<compile_context>
chip_gen: v5e
topology: v5e:2x2
jax: 0.10.0
libtpu: 0.0.40
codegen_flags: <defaults>
</compile_context>

<pallas_src>
import jax
import jax.numpy as jnp
from jax import lax
from jax.experimental import pallas as pl
from jax.experimental.pallas import tpu as pltpu

DIM = 512            # channels (matches the PyTorch module constant)
KSIZE = 5
PAD = 2
RES_SCALE = 0.3


def _conv1d_k5(h, w_ref, b_ref, masks):
    """Cross-correlation, kernel 5, zero padding 2, applied per sample.

    h:      (M, Cin) bf16 — whole samples of length L stacked along M.
    w_ref:  (KSIZE, Cin, Cout) bf16 ref.   b_ref: (1, Cout) f32 ref.
    masks:  {d: (M, 1) bool}, True where row r+d stays inside row r's sample.

        y[r] = b + sum_k W[k] . h[r + k - PAD]      (zero outside each sample)

    Realized as 5 unshifted (M, Cin) @ (Cin, Cout) MXU matmuls whose results are
    rotated along the sublane axis (XLU) and edge-masked.
    """
    m = h.shape[0]
    acc = None
    for k in range(KSIZE):
        part = jnp.dot(h, w_ref[k], preferred_element_type=jnp.float32)   # (M, Cout) f32
        d = k - PAD                                  # source-row offset of this tap
        if d != 0:
            part = pltpu.roll(part, shift=(-d) % m, axis=0)   # part'[r] = part[r + d]
            part = jnp.where(masks[d], part, 0.0)             # zero-padding at edges
        acc = part if acc is None else acc + part             # first tap seeds acc
    return acc + b_ref[...].astype(jnp.float32)               # bias folded into final add


def resblock_kernel(x_ref, w1_ref, b1_ref, w2_ref, b2_ref, o_ref):
    x = x_ref[...]                                            # (nb, C, L) f32, NCL layout
    nb, c, seg_len = x.shape
    m = nb * seg_len

    # NCL -> rows inside VMEM (XLU transpose; HBM traffic stays in NCL layout).
    x_rows = jnp.transpose(x, (0, 2, 1)).reshape(m, c)        # (M, C) f32

    # local position of each row inside its sample (samples are contiguous L-row blocks)
    pos = lax.broadcasted_iota(jnp.int32, (m, 1), 0) % seg_len
    masks = {d: jnp.logical_and(pos + d >= 0, pos + d < seg_len)
             for d in range(-PAD, PAD + 1) if d != 0}

    h1 = jnp.maximum(x_rows, 0.0).astype(jnp.bfloat16)        # ReLU -> bf16 MXU operand
    y1 = _conv1d_k5(h1, w1_ref, b1_ref, masks)                # Conv1d #1 (f32 accum)
    h2 = jnp.maximum(y1, 0.0).astype(jnp.bfloat16)            # ReLU
    y2 = _conv1d_k5(h2, w2_ref, b2_ref, masks)                # Conv1d #2

    # rows -> NCL for the conv branch only; residual add stays in f32 NCL layout.
    y2_ncl = jnp.transpose(y2.reshape(nb, seg_len, c), (0, 2, 1))
    o_ref[...] = (x + RES_SCALE * y2_ncl).astype(o_ref.dtype)


def _tpu_tuning():
    """(max_rows_per_tile, vmem_limit_bytes), chosen per TPU generation."""
    try:
        vmem_bytes = pltpu.get_tpu_info().vmem_capacity_bytes
    except Exception:                       # no TPU info available: assume small-VMEM chip
        vmem_bytes = 64 * 1024 * 1024
    if vmem_bytes >= 96 * 1024 * 1024:      # v5e / v6e: 128 MiB VMEM
        return 2048, 96 * 1024 * 1024
    return 1024, 50 * 1024 * 1024           # v7x: 64 MiB VMEM


def _samples_per_step(n, seg_len, max_rows):
    """Whole samples per grid step.

    Fills the MXU M axis while (a) bounding the per-step VMEM tile, (b) keeping at
    least 2 grid steps when n >= 2 so both v7x TensorCores get work, and (c)
    preferring sublane-aligned (rows % 8 == 0) tiles for cheap rolls/reshapes.
    The batch is padded to a multiple of the result, so n need not divide evenly.
    """
    # TODO(synk): a single sample whose L alone exceeds the row budget still lands in
    # one oversized tile; that case needs an L-axis grid dimension with a 2*PAD halo.
    cap = max(1, min(max_rows // max(seg_len, 1), n))
    if n >= 2:
        cap = min(cap, -(-n // 2))          # ceil(n/2): guarantees >= 2 grid steps
    for nb in range(cap, 0, -1):
        if (nb * seg_len) % 8 == 0:
            return nb
    return cap


def _invariant_spec(shape):
    """Grid-invariant operand (weights/bias): constant index_map, single-buffered."""
    index_map = lambda i: (0,) * len(shape)
    try:
        return pl.BlockSpec(shape, index_map, pipeline_mode=pl.Buffered(1))
    except (TypeError, AttributeError):     # jax version without pipeline_mode/Buffered
        return pl.BlockSpec(shape, index_map)


def resblock_forward(x_ncl, w1, b1, w2, b2):
    """x_ncl: (N, C, L) float (PyTorch layout). w*: (Cout, Cin, K). b*: (Cout,)."""
    n, c, seg_len = x_ncl.shape
    assert c == DIM

    max_rows, vmem_limit = _tpu_tuning()
    nb = _samples_per_step(n, seg_len, max_rows)
    n_pad = -(-n // nb) * nb                       # pad batch so nb always divides it

    x = x_ncl.astype(jnp.float32)
    if n_pad != n:
        x = jnp.pad(x, ((0, n_pad - n), (0, 0), (0, 0)))

    # weights to (K, Cin, Cout) bf16 (full-rate MXU, half the VMEM); biases (1, Cout) f32.
    w1_t = jnp.transpose(w1, (2, 1, 0)).astype(jnp.bfloat16)
    w2_t = jnp.transpose(w2, (2, 1, 0)).astype(jnp.bfloat16)
    b1_r = b1.reshape(1, c).astype(jnp.float32)
    b2_r = b2.reshape(1, c).astype(jnp.float32)

    out = pl.pallas_call(
        resblock_kernel,
        out_shape=jax.ShapeDtypeStruct((n_pad, c, seg_len), jnp.float32),
        grid_spec=pltpu.PrefetchScalarGridSpec(
            num_scalar_prefetch=0,
            grid=(n_pad // nb,),
            in_specs=[
                pl.BlockSpec((nb, c, seg_len), lambda i: (i, 0, 0)),   # x (NCL block)
                _invariant_spec((KSIZE, c, c)),                        # w1 (grid-invariant)
                _invariant_spec((1, c)),                               # b1
                _invariant_spec((KSIZE, c, c)),                        # w2 (grid-invariant)
                _invariant_spec((1, c)),                               # b2
            ],
            out_specs=pl.BlockSpec((nb, c, seg_len), lambda i: (i, 0, 0)),
        ),
        compiler_params=pltpu.CompilerParams(
            dimension_semantics=("parallel",),      # batch tiles are independent (2 TCs on v7x)
            vmem_limit_bytes=vmem_limit,            # generation-aware (96 MiB v5e/v6e, 50 MiB v7x)
        ),
        input_output_aliases={0: 0},                # output reuses the (padded) x buffer
    )(x, w1_t, b1_r, w2_t, b2_r)

    return out[:n] if n_pad != n else out


def _reference_forward(x_ncl, w1, b1, w2, b2):
    """Pure-JAX f32 reference matching torch semantics (NCL conv, padding=2)."""
    dn = lax.conv_dimension_numbers(x_ncl.shape, w1.shape, ("NCH", "OIH", "NCH"))

    def conv(h, w, b):
        y = lax.conv_general_dilated(h, w, window_strides=(1,),
                                     padding=[(PAD, PAD)], dimension_numbers=dn)
        return y + b.reshape(1, -1, 1)

    h = jnp.maximum(x_ncl, 0.0)
    y = conv(h, w1, b1)
    y = jnp.maximum(y, 0.0)
    y = conv(y, w2, b2)
    return x_ncl + RES_SCALE * y


if __name__ == "__main__":
    n, c, seg_len = 2, DIM, 16
    key = jax.random.PRNGKey(0)
    kx, kw1, kb1, kw2, kb2 = jax.random.split(key, 5)

    # deterministic param init (PyTorch-style uniform bound 1/sqrt(Cin*K))
    bound = 1.0 / (c * KSIZE) ** 0.5
    x = jax.random.normal(kx, (n, c, seg_len), dtype=jnp.float32)
    w1 = jax.random.uniform(kw1, (c, c, KSIZE), jnp.float32, -bound, bound)
    b1 = jax.random.uniform(kb1, (c,), jnp.float32, -bound, bound)
    w2 = jax.random.uniform(kw2, (c, c, KSIZE), jnp.float32, -bound, bound)
    b2 = jax.random.uniform(kb2, (c,), jnp.float32, -bound, bound)

    out = jax.block_until_ready(jax.jit(resblock_forward)(x, w1, b1, w2, b2))
    ref = jax.block_until_ready(_reference_forward(x, w1, b1, w2, b2))

    assert out.shape == (n, c, seg_len)
    # bf16 MXU operands with f32 accumulation vs an f32 reference: allow ~2^-9-scale
    # relative error on the conv path (scaled by the 0.3 residual factor).
    max_abs = float(jnp.max(jnp.abs(out - ref)))
    rel_l2 = float(jnp.linalg.norm(out - ref) / jnp.linalg.norm(ref))
    assert max_abs < 5e-2 and rel_l2 < 1e-2, (max_abs, rel_l2)

    print("KERNEL_OK")
</pallas_src>

<mosaic_0001>
module attributes {stable_mosaic.version = 11 : i64} {
  func.func @resblock_kernel(%arg0: i32, %arg1: memref<1x512x16xf32, #tpu.memory_space<vmem>>, %arg2: memref<5x512x512xbf16, #tpu.memory_space<vmem>>, %arg3: memref<1x512xf32, #tpu.memory_space<vmem>>, %arg4: memref<5x512x512xbf16, #tpu.memory_space<vmem>>, %arg5: memref<1x512xf32, #tpu.memory_space<vmem>>, %arg6: memref<1x512x16xf32, #tpu.memory_space<vmem>>) attributes {dimension_semantics = [#tpu.dimension_semantics<parallel>], iteration_bounds = array<i64: 2>, scalar_prefetch = 0 : i64, scratch_operands = 0 : i64, tpu.core_type = #tpu.core_type<tc>, window_params = [{transform_indices = @transform_0, window_bounds = array<i64: 1, 512, 16>}, {pipeline_mode = #tpu.pipeline_mode<synchronous>, transform_indices = @transform_1, window_bounds = array<i64: 5, 512, 512>}, {pipeline_mode = #tpu.pipeline_mode<synchronous>, transform_indices = @transform_2, window_bounds = array<i64: 1, 512>}, {pipeline_mode = #tpu.pipeline_mode<synchronous>, transform_indices = @transform_3, window_bounds = array<i64: 5, 512, 512>}, {pipeline_mode = #tpu.pipeline_mode<synchronous>, transform_indices = @transform_4, window_bounds = array<i64: 1, 512>}, {transform_indices = @transform_5, window_bounds = array<i64: 1, 512, 16>}]} {
    %c0 = arith.constant 0 : index
    %c0_0 = arith.constant 0 : index
    %c0_1 = arith.constant 0 : index
    %0 = vector.load %arg1[%c0, %c0_0, %c0_1] : memref<1x512x16xf32, #tpu.memory_space<vmem>>, vector<1x512x16xf32>
    %1 = tpu.transpose %0, [0, 2, 1] : vector<1x512x16xf32> -> vector<1x16x512xf32>
    %2 = vector.shape_cast %1 : vector<1x16x512xf32> to vector<16x512xf32>
    %3 = tpu.iota {dimensions = array<i32: 0>} : vector<16x1xi32>
    %c16_i32 = arith.constant 16 : i32
    %c0_i32 = arith.constant 0 : i32
    %4 = arith.cmpi eq, %c16_i32, %c0_i32 : i32
    %c1_i32 = arith.constant 1 : i32
    %5 = arith.select %4, %c1_i32, %c16_i32 : i32
    %6 = vector.broadcast %5 : i32 to vector<16x1xi32>
    %7 = arith.remsi %3, %6 : vector<16x1xi32>
    %c0_i32_2 = arith.constant 0 : i32
    %8 = vector.broadcast %c0_i32_2 : i32 to vector<16x1xi32>
    %9 = arith.cmpi ne, %7, %8 : vector<16x1xi32>
    %c0_i32_3 = arith.constant 0 : i32
    %10 = vector.broadcast %c0_i32_3 : i32 to vector<16x1xi32>
    %11 = arith.cmpi slt, %7, %10 : vector<16x1xi32>
    %c0_i32_4 = arith.constant 0 : i32
    %12 = arith.cmpi slt, %5, %c0_i32_4 : i32
    %13 = vector.broadcast %12 : i1 to vector<16x1xi1>
    %14 = vector.broadcast %13 : vector<16x1xi1> to vector<16x1xi1>
    %15 = arith.xori %11, %14 : vector<16x1xi1>
    %16 = arith.andi %15, %9 : vector<16x1xi1>
    %17 = vector.broadcast %5 : i32 to vector<16x1xi32>
    %18 = arith.addi %7, %17 : vector<16x1xi32>
    %19 = arith.select %16, %18, %7 : vector<16x1xi1>, vector<16x1xi32>
    %c-2_i32 = arith.constant -2 : i32
    %20 = vector.broadcast %c-2_i32 : i32 to vector<16x1xi32>
    %21 = arith.addi %19, %20 : vector<16x1xi32>
    %c0_i32_5 = arith.constant 0 : i32
    %22 = vector.broadcast %c0_i32_5 : i32 to vector<16x1xi32>
    %23 = arith.cmpi sge, %21, %22 : vector<16x1xi32>
    %c-2_i32_6 = arith.constant -2 : i32
    %24 = vector.broadcast %c-2_i32_6 : i32 to vector<16x1xi32>
    %25 = arith.addi %19, %24 : vector<16x1xi32>
    %c16_i32_7 = arith.constant 16 : i32
    %26 = vector.broadcast %c16_i32_7 : i32 to vector<16x1xi32>
    %27 = arith.cmpi slt, %25, %26 : vector<16x1xi32>
    %28 = arith.andi %23, %27 : vector<16x1xi1>
    %c-1_i32 = arith.constant -1 : i32
    %29 = vector.broadcast %c-1_i32 : i32 to vector<16x1xi32>
    %30 = arith.addi %19, %29 : vector<16x1xi32>
    %c0_i32_8 = arith.constant 0 : i32
    %31 = vector.broadcast %c0_i32_8 : i32 to vector<16x1xi32>
    %32 = arith.cmpi sge, %30, %31 : vector<16x1xi32>
    %c-1_i32_9 = arith.constant -1 : i32
    %33 = vector.broadcast %c-1_i32_9 : i32 to vector<16x1xi32>
    %34 = arith.addi %19, %33 : vector<16x1xi32>
    %c16_i32_10 = arith.constant 16 : i32
    %35 = vector.broadcast %c16_i32_10 : i32 to vector<16x1xi32>
    %36 = arith.cmpi slt, %34, %35 : vector<16x1xi32>
    %37 = arith.andi %32, %36 : vector<16x1xi1>
    %c1_i32_11 = arith.constant 1 : i32
    %38 = vector.broadcast %c1_i32_11 : i32 to vector<16x1xi32>
    %39 = arith.addi %19, %38 : vector<16x1xi32>
    %c0_i32_12 = arith.constant 0 : i32
    %40 = vector.broadcast %c0_i32_12 : i32 to vector<16x1xi32>
    %41 = arith.cmpi sge, %39, %40 : vector<16x1xi32>
    %c1_i32_13 = arith.constant 1 : i32
    %42 = vector.broadcast %c1_i32_13 : i32 to vector<16x1xi32>
    %43 = arith.addi %19, %42 : vector<16x1xi32>
    %c16_i32_14 = arith.constant 16 : i32
    %44 = vector.broadcast %c16_i32_14 : i32 to vector<16x1xi32>
    %45 = arith.cmpi slt, %43, %44 : vector<16x1xi32>
    %46 = arith.andi %41, %45 : vector<16x1xi1>
    %c2_i32 = arith.constant 2 : i32
    %47 = vector.broadcast %c2_i32 : i32 to vector<16x1xi32>
    %48 = arith.addi %19, %47 : vector<16x1xi32>
    %c0_i32_15 = arith.constant 0 : i32
    %49 = vector.broadcast %c0_i32_15 : i32 to vector<16x1xi32>
    %50 = arith.cmpi sge, %48, %49 : vector<16x1xi32>
    %c2_i32_16 = arith.constant 2 : i32
    %51 = vector.broadcast %c2_i32_16 : i32 to vector<16x1xi32>
    %52 = arith.addi %19, %51 : vector<16x1xi32>
    %c16_i32_17 = arith.constant 16 : i32
    %53 = vector.broadcast %c16_i32_17 : i32 to vector<16x1xi32>
    %54 = arith.cmpi slt, %52, %53 : vector<16x1xi32>
    %55 = arith.andi %50, %54 : vector<16x1xi1>
    %cst = arith.constant 0.000000e+00 : f32
    %56 = vector.broadcast %cst : f32 to vector<16x512xf32>
    %57 = arith.maximumf %2, %56 : vector<16x512xf32>
    %58 = arith.truncf %57 : vector<16x512xf32> to vector<16x512xbf16>
    %c0_18 = arith.constant 0 : index
    %c0_19 = arith.constant 0 : index
    %c0_20 = arith.constant 0 : index
    %59 = vector.load %arg2[%c0_18, %c0_19, %c0_20] : memref<5x512x512xbf16, #tpu.memory_space<vmem>>, vector<1x512x512xbf16>
    %60 = vector.shape_cast %59 : vector<1x512x512xbf16> to vector<512x512xbf16>
    %cst_21 = arith.constant dense<0.000000e+00> : vector<16x512xf32>
    %61 = tpu.matmul %58, %60, %cst_21 {dimension_numbers = #tpu.dot_dimension_numbers<[1], [0], [0], [1], [0, 0, 1, 1], [], []>} : vector<16x512xbf16>, vector<512x512xbf16>, vector<16x512xf32> -> vector<16x512xf32>
    %c2_i32_22 = arith.constant 2 : i32
    %62 = tpu.dynamic_rotate %61 by %c2_i32_22 dim 0 : vector<16x512xf32>, i32 -> vector<16x512xf32>
    %cst_23 = arith.constant 0.000000e+00 : f32
    %63 = vector.shape_cast %28 : vector<16x1xi1> to vector<16x1xi1>
    %64 = vector.broadcast %63 : vector<16x1xi1> to vector<16x512xi1>
    %65 = vector.broadcast %cst_23 : f32 to vector<16x512xf32>
    %66 = arith.select %64, %62, %65 : vector<16x512xi1>, vector<16x512xf32>
    %c1 = arith.constant 1 : index
    %c0_24 = arith.constant 0 : index
    %c0_25 = arith.constant 0 : index
    %67 = vector.load %arg2[%c1, %c0_24, %c0_25] : memref<5x512x512xbf16, #tpu.memory_space<vmem>>, vector<1x512x512xbf16>
    %68 = vector.shape_cast %67 : vector<1x512x512xbf16> to vector<512x512xbf16>
    %cst_26 = arith.constant dense<0.000000e+00> : vector<16x512xf32>
    %69 = tpu.matmul %58, %68, %cst_26 {dimension_numbers = #tpu.dot_dimension_numbers<[1], [0], [0], [1], [0, 0, 1, 1], [], []>} : vector<16x512xbf16>, vector<512x512xbf16>, vector<16x512xf32> -> vector<16x512xf32>
    %c1_i32_27 = arith.constant 1 : i32
    %70 = tpu.dynamic_rotate %69 by %c1_i32_27 dim 0 : vector<16x512xf32>, i32 -> vector<16x512xf32>
    %cst_28 = arith.constant 0.000000e+00 : f32
    %71 = vector.shape_cast %37 : vector<16x1xi1> to vector<16x1xi1>
    %72 = vector.broadcast %71 : vector<16x1xi1> to vector<16x512xi1>
    %73 = vector.broadcast %cst_28 : f32 to vector<16x512xf32>
    %74 = arith.select %72, %70, %73 : vector<16x512xi1>, vector<16x512xf32>
    %75 = arith.addf %66, %74 : vector<16x512xf32>
    %c2 = arith.constant 2 : index
    %c0_29 = arith.constant 0 : index
    %c0_30 = arith.constant 0 : index
    %76 = vector.load %arg2[%c2, %c0_29, %c0_30] : memref<5x512x512xbf16, #tpu.memory_space<vmem>>, vector<1x512x512xbf16>
    %77 = vector.shape_cast %76 : vector<1x512x512xbf16> to vector<512x512xbf16>
    %cst_31 = arith.constant dense<0.000000e+00> : vector<16x512xf32>
    %78 = tpu.matmul %58, %77, %cst_31 {dimension_numbers = #tpu.dot_dimension_numbers<[1], [0], [0], [1], [0, 0, 1, 1], [], []>} : vector<16x512xbf16>, vector<512x512xbf16>, vector<16x512xf32> -> vector<16x512xf32>
    %79 = arith.addf %75, %78 : vector<16x512xf32>
    %c3 = arith.constant 3 : index
    %c0_32 = arith.constant 0 : index
    %c0_33 = arith.constant 0 : index
    %80 = vector.load %arg2[%c3, %c0_32, %c0_33] : memref<5x512x512xbf16, #tpu.memory_space<vmem>>, vector<1x512x512xbf16>
    %81 = vector.shape_cast %80 : vector<1x512x512xbf16> to vector<512x512xbf16>
    %cst_34 = arith.constant dense<0.000000e+00> : vector<16x512xf32>
    %82 = tpu.matmul %58, %81, %cst_34 {dimension_numbers = #tpu.dot_dimension_numbers<[1], [0], [0], [1], [0, 0, 1, 1], [], []>} : vector<16x512xbf16>, vector<512x512xbf16>, vector<16x512xf32> -> vector<16x512xf32>
    %c15_i32 = arith.constant 15 : i32
    %83 = tpu.dynamic_rotate %82 by %c15_i32 dim 0 : vector<16x512xf32>, i32 -> vector<16x512xf32>
    %cst_35 = arith.constant 0.000000e+00 : f32
    %84 = vector.shape_cast %46 : vector<16x1xi1> to vector<16x1xi1>
    %85 = vector.broadcast %84 : vector<16x1xi1> to vector<16x512xi1>
    %86 = vector.broadcast %cst_35 : f32 to vector<16x512xf32>
    %87 = arith.select %85, %83, %86 : vector<16x512xi1>, vector<16x512xf32>
    %88 = arith.addf %79, %87 : vector<16x512xf32>
    %c4 = arith.constant 4 : index
    %c0_36 = arith.constant 0 : index
    %c0_37 = arith.constant 0 : index
    %89 = vector.load %arg2[%c4, %c0_36, %c0_37] : memref<5x512x512xbf16, #tpu.memory_space<vmem>>, vector<1x512x512xbf16>
    %90 = vector.shape_cast %89 : vector<1x512x512xbf16> to vector<512x512xbf16>
    %cst_38 = arith.constant dense<0.000000e+00> : vector<16x512xf32>
    %91 = tpu.matmul %58, %90, %cst_38 {dimension_numbers = #tpu.dot_dimension_numbers<[1], [0], [0], [1], [0, 0, 1, 1], [], []>} : vector<16x512xbf16>, vector<512x512xbf16>, vector<16x512xf32> -> vector<16x512xf32>
    %c14_i32 = arith.constant 14 : i32
    %92 = tpu.dynamic_rotate %91 by %c14_i32 dim 0 : vector<16x512xf32>, i32 -> vector<16x512xf32>
    %cst_39 = arith.constant 0.000000e+00 : f32
    %93 = vector.shape_cast %55 : vector<16x1xi1> to vector<16x1xi1>
    %94 = vector.broadcast %93 : vector<16x1xi1> to vector<16x512xi1>
    %95 = vector.broadcast %cst_39 : f32 to vector<16x512xf32>
    %96 = arith.select %94, %92, %95 : vector<16x512xi1>, vector<16x512xf32>
    %97 = arith.addf %88, %96 : vector<16x512xf32>
    %c0_40 = arith.constant 0 : index
    %c0_41 = arith.constant 0 : index
    %98 = vector.load %arg3[%c0_40, %c0_41] : memref<1x512xf32, #tpu.memory_space<vmem>>, vector<1x512xf32>
    %99 = vector.broadcast %98 : vector<1x512xf32> to vector<16x512xf32>
    %100 = arith.addf %97, %99 : vector<16x512xf32>
    %cst_42 = arith.constant 0.000000e+00 : f32
    %101 = vector.broadcast %cst_42 : f32 to vector<16x512xf32>
    %102 = arith.maximumf %100, %101 : vector<16x512xf32>
    %103 = arith.truncf %102 : vector<16x512xf32> to vector<16x512xbf16>
    %c0_43 = arith.constant 0 : index
    %c0_44 = arith.constant 0 : index
    %c0_45 = arith.constant 0 : index
    %104 = vector.load %arg4[%c0_43, %c0_44, %c0_45] : memref<5x512x512xbf16, #tpu.memory_space<vmem>>, vector<1x512x512xbf16>
    %105 = vector.shape_cast %104 : vector<1x512x512xbf16> to vector<512x512xbf16>
    %cst_46 = arith.constant dense<0.000000e+00> : vector<16x512xf32>
    %106 = tpu.matmul %103, %105, %cst_46 {dimension_numbers = #tpu.dot_dimension_numbers<[1], [0], [0], [1], [0, 0, 1, 1], [], []>} : vector<16x512xbf16>, vector<512x512xbf16>, vector<16x512xf32> -> vector<16x512xf32>
    %c2_i32_47 = arith.constant 2 : i32
    %107 = tpu.dynamic_rotate %106 by %c2_i32_47 dim 0 : vector<16x512xf32>, i32 -> vector<16x512xf32>
    %cst_48 = arith.constant 0.000000e+00 : f32
    %108 = vector.shape_cast %28 : vector<16x1xi1> to vector<16x1xi1>
    %109 = vector.broadcast %108 : vector<16x1xi1> to vector<16x512xi1>
    %110 = vector.broadcast %cst_48 : f32 to vector<16x512xf32>
    %111 = arith.select %109, %107, %110 : vector<16x512xi1>, vector<16x512xf32>
    %c1_49 = arith.constant 1 : index
    %c0_50 = arith.constant 0 : index
    %c0_51 = arith.constant 0 : index
    %112 = vector.load %arg4[%c1_49, %c0_50, %c0_51] : memref<5x512x512xbf16, #tpu.memory_space<vmem>>, vector<1x512x512xbf16>
    %113 = vector.shape_cast %112 : vector<1x512x512xbf16> to vector<512x512xbf16>
    %cst_52 = arith.constant dense<0.000000e+00> : vector<16x512xf32>
    %114 = tpu.matmul %103, %113, %cst_52 {dimension_numbers = #tpu.dot_dimension_numbers<[1], [0], [0], [1], [0, 0, 1, 1], [], []>} : vector<16x512xbf16>, vector<512x512xbf16>, vector<16x512xf32> -> vector<16x512xf32>
    %c1_i32_53 = arith.constant 1 : i32
    %115 = tpu.dynamic_rotate %114 by %c1_i32_53 dim 0 : vector<16x512xf32>, i32 -> vector<16x512xf32>
    %cst_54 = arith.constant 0.000000e+00 : f32
    %116 = vector.shape_cast %37 : vector<16x1xi1> to vector<16x1xi1>
    %117 = vector.broadcast %116 : vector<16x1xi1> to vector<16x512xi1>
    %118 = vector.broadcast %cst_54 : f32 to vector<16x512xf32>
    %119 = arith.select %117, %115, %118 : vector<16x512xi1>, vector<16x512xf32>
    %120 = arith.addf %111, %119 : vector<16x512xf32>
    %c2_55 = arith.constant 2 : index
    %c0_56 = arith.constant 0 : index
    %c0_57 = arith.constant 0 : index
    %121 = vector.load %arg4[%c2_55, %c0_56, %c0_57] : memref<5x512x512xbf16, #tpu.memory_space<vmem>>, vector<1x512x512xbf16>
    %122 = vector.shape_cast %121 : vector<1x512x512xbf16> to vector<512x512xbf16>
    %cst_58 = arith.constant dense<0.000000e+00> : vector<16x512xf32>
    %123 = tpu.matmul %103, %122, %cst_58 {dimension_numbers = #tpu.dot_dimension_numbers<[1], [0], [0], [1], [0, 0, 1, 1], [], []>} : vector<16x512xbf16>, vector<512x512xbf16>, vector<16x512xf32> -> vector<16x512xf32>
    %124 = arith.addf %120, %123 : vector<16x512xf32>
    %c3_59 = arith.constant 3 : index
    %c0_60 = arith.constant 0 : index
    %c0_61 = arith.constant 0 : index
    %125 = vector.load %arg4[%c3_59, %c0_60, %c0_61] : memref<5x512x512xbf16, #tpu.memory_space<vmem>>, vector<1x512x512xbf16>
    %126 = vector.shape_cast %125 : vector<1x512x512xbf16> to vector<512x512xbf16>
    %cst_62 = arith.constant dense<0.000000e+00> : vector<16x512xf32>
    %127 = tpu.matmul %103, %126, %cst_62 {dimension_numbers = #tpu.dot_dimension_numbers<[1], [0], [0], [1], [0, 0, 1, 1], [], []>} : vector<16x512xbf16>, vector<512x512xbf16>, vector<16x512xf32> -> vector<16x512xf32>
    %c15_i32_63 = arith.constant 15 : i32
    %128 = tpu.dynamic_rotate %127 by %c15_i32_63 dim 0 : vector<16x512xf32>, i32 -> vector<16x512xf32>
    %cst_64 = arith.constant 0.000000e+00 : f32
    %129 = vector.shape_cast %46 : vector<16x1xi1> to vector<16x1xi1>
    %130 = vector.broadcast %129 : vector<16x1xi1> to vector<16x512xi1>
    %131 = vector.broadcast %cst_64 : f32 to vector<16x512xf32>
    %132 = arith.select %130, %128, %131 : vector<16x512xi1>, vector<16x512xf32>
    %133 = arith.addf %124, %132 : vector<16x512xf32>
    %c4_65 = arith.constant 4 : index
    %c0_66 = arith.constant 0 : index
    %c0_67 = arith.constant 0 : index
    %134 = vector.load %arg4[%c4_65, %c0_66, %c0_67] : memref<5x512x512xbf16, #tpu.memory_space<vmem>>, vector<1x512x512xbf16>
    %135 = vector.shape_cast %134 : vector<1x512x512xbf16> to vector<512x512xbf16>
    %cst_68 = arith.constant dense<0.000000e+00> : vector<16x512xf32>
    %136 = tpu.matmul %103, %135, %cst_68 {dimension_numbers = #tpu.dot_dimension_numbers<[1], [0], [0], [1], [0, 0, 1, 1], [], []>} : vector<16x512xbf16>, vector<512x512xbf16>, vector<16x512xf32> -> vector<16x512xf32>
    %c14_i32_69 = arith.constant 14 : i32
    %137 = tpu.dynamic_rotate %136 by %c14_i32_69 dim 0 : vector<16x512xf32>, i32 -> vector<16x512xf32>
    %cst_70 = arith.constant 0.000000e+00 : f32
    %138 = vector.shape_cast %55 : vector<16x1xi1> to vector<16x1xi1>
    %139 = vector.broadcast %138 : vector<16x1xi1> to vector<16x512xi1>
    %140 = vector.broadcast %cst_70 : f32 to vector<16x512xf32>
    %141 = arith.select %139, %137, %140 : vector<16x512xi1>, vector<16x512xf32>
    %142 = arith.addf %133, %141 : vector<16x512xf32>
    %c0_71 = arith.constant 0 : index
    %c0_72 = arith.constant 0 : index
    %143 = vector.load %arg5[%c0_71, %c0_72] : memref<1x512xf32, #tpu.memory_space<vmem>>, vector<1x512xf32>
    %144 = vector.broadcast %143 : vector<1x512xf32> to vector<16x512xf32>
    %145 = arith.addf %142, %144 : vector<16x512xf32>
    %146 = vector.shape_cast %145 : vector<16x512xf32> to vector<1x16x512xf32>
    %147 = tpu.transpose %146, [0, 2, 1] : vector<1x16x512xf32> -> vector<1x512x16xf32>
    %cst_73 = arith.constant 3.000000e-01 : f32
    %148 = vector.broadcast %cst_73 : f32 to vector<1x512x16xf32>
    %149 = arith.mulf %148, %147 : vector<1x512x16xf32>
    %150 = arith.addf %0, %149 : vector<1x512x16xf32>
    %c0_74 = arith.constant 0 : index
    %c0_75 = arith.constant 0 : index
    %c0_76 = arith.constant 0 : index
    %151 = vector.load %arg6[%c0_74, %c0_75, %c0_76] : memref<1x512x16xf32, #tpu.memory_space<vmem>>, vector<1x512x16xf32>
    tpu.vector_store %arg6[%c0_74, %c0_75, %c0_76], %150 {strides = array<i32>} : memref<1x512x16xf32, #tpu.memory_space<vmem>>, vector<1x512x16xf32>,
    return
  }
  func.func @transform_0(%arg0: i32) -> (i32, i32, i32) {
    %c0_i32 = arith.constant 0 : i32
    %c0_i32_0 = arith.constant 0 : i32
    %c0_i32_1 = arith.constant 0 : i32
    return %arg0, %c0_i32, %c0_i32_0 : i32, i32, i32
  }
  func.func @transform_1(%arg0: i32) -> (i32, i32, i32) {
    %c0_i32 = arith.constant 0 : i32
    %c0_i32_0 = arith.constant 0 : i32
    %c0_i32_1 = arith.constant 0 : i32
    %c0_i32_2 = arith.constant 0 : i32
    return %c0_i32, %c0_i32_0, %c0_i32_1 : i32, i32, i32
  }
  func.func @transform_2(%arg0: i32) -> (i32, i32) {
    %c0_i32 = arith.constant 0 : i32
    %c0_i32_0 = arith.constant 0 : i32
    %c0_i32_1 = arith.constant 0 : i32
    return %c0_i32, %c0_i32_0 : i32, i32
  }
  func.func @transform_3(%arg0: i32) -> (i32, i32, i32) {
    %c0_i32 = arith.constant 0 : i32
    %c0_i32_0 = arith.constant 0 : i32
    %c0_i32_1 = arith.constant 0 : i32
    %c0_i32_2 = arith.constant 0 : i32
    return %c0_i32, %c0_i32_0, %c0_i32_1 : i32, i32, i32
  }
  func.func @transform_4(%arg0: i32) -> (i32, i32) {
    %c0_i32 = arith.constant 0 : i32
    %c0_i32_0 = arith.constant 0 : i32
    %c0_i32_1 = arith.constant 0 : i32
    return %c0_i32, %c0_i32_0 : i32, i32
  }
  func.func @transform_5(%arg0: i32) -> (i32, i32, i32) {
    %c0_i32 = arith.constant 0 : i32
    %c0_i32_0 = arith.constant 0 : i32
    %c0_i32_1 = arith.constant 0 : i32
    return %arg0, %c0_i32, %c0_i32_0 : i32, i32, i32
  }
}

</mosaic_0001>

<bundles_post_ra>
// kernel: resblock_forward.1
= control target key start
LH: loop header
LB: loop body
LE: loop exit
PB: predicated region body
PF: predicated region fallthrough
CT: control target
= control target key end

     0   :  { %s18685_s18 = smov 0   ;;  %s27769_s0 = inlined_call_operand.vmem [shape: f32[2,512,16], index: 0, kind: input, shape index: {}, may-alias: {0,5}]   ;;  %s27770_s1 = inlined_call_operand.vmem [shape: bf16[5,512,512], index: 1, kind: input, shape index: {}]   ;;  %s27771_s2 = inlined_call_operand.vmem [shape: f32[1,512], index: 2, kind: input, shape index: {}]   ;;  %s27772_s3 = inlined_call_operand.vmem [shape: bf16[5,512,512], index: 3, kind: input, shape index: {}]   ;;  %s27773_s4 = inlined_call_operand.vmem [shape: f32[1,512], index: 4, kind: input, shape index: {}]   ;;  %s27774_s5 = inlined_call_operand.vmem [shape: f32[2,512,16], index: 5, kind: output, shape index: {}, may-alias: {0,5}]  }
   0x1 LB: > { %s11116_s19 = sadd.s32 4294967295, %s18653_s18   ;;  %p11120_p0 = scmp.ge.s32.totalorder %s18653_s18, 1  ;;  %s18653_s18 = sphi %s18685_s18, %s15_s18  }
   0x2   : > { %p187_p1 = scmp.lt.s32.totalorder %s18653_s18, 3 }
   0x4   : > { %p188_p2 = pnand %p11120_p0, %p187_p1 }
   0x6   : > { %191 = sbr.rel (%p188_p2) target bundleno = 1967 (0x7af), region = 40 }
   0xb   : > { %p215_p3 = scmp.lt.s32.totalorder %s11116_s19, 1  ;;  %vm10996_vm8 = vcmask 130048  }
   0xd   : > { %s27956_s19 = smov (!%p215_p3, %s11116_s19), 1 }
   0xe   : > { %s17271_s20 = sshll.u32 %s27956_s19, 9 }
   0xf   : > { %s18701_s23 = scalar_lea.vmem %s27769_s0, %s17271_s20  ;;  %s27572_s26 = scalar_lea.vmem %s27774_s5, %s17271_s20 }
  0x10   : > { %v18704_v0 = vld [vmem:[%s18701_s23 + $0x100] sm:$0xff]  ;;  %v18717_v6 = vld [vmem:[%s18701_s23 + $0x108] sm:$0xff]  ;;  %v18733_v12 = vld [vmem:[%s18701_s23 + $0x110] sm:$0xff] }
  0x11   : > { %27833 = vst [vmem:[#allocation2_spill] sm:$0xff] %v18704_v0  ;;  %v18707_v1 = vld [vmem:[%s18701_s23 + $0x180] sm:$0xff]  ;;  %v18720_v7 = vld [vmem:[%s18701_s23 + $0x188] sm:$0xff]  ;;  %v18736_v13 = vld [vmem:[%s18701_s23 + $0x190] sm:$0xff] }
  0x12   : > { %27834 = vst [vmem:[#allocation3_spill] sm:$0xff] %v18707_v1  ;;  %v225_v2 = vld [vmem:[%s18701_s23] sm:$0xff]  ;;  %v18562_v3 = vpack.i.bf16 %v18707_v1, %v18704_v0  ;;  %v18723_v8 = vld [vmem:[%s18701_s23 + $0x8] sm:$0xff]  ;;  %v18564_v10 = vpack.i.bf16 %v18720_v7, %v18717_v6  ;;  %v18739_v14 = vld [vmem:[%s18701_s23 + $0x10] sm:$0xff]  ;;  %v18566_v16 = vpack.i.bf16 %v18736_v13, %v18733_v12 }
  0x13   : > { %v18713_v4 = vld [vmem:[%s18701_s23 + $0x80] sm:$0xff]  ;;  %27836 = vst [vmem:[#allocation5_spill] sm:$0xff] %v18717_v6  ;;  %v18726_v9 = vld [vmem:[%s18701_s23 + $0x88] sm:$0xff]  ;;  %v18742_v15 = vld [vmem:[%s18701_s23 + $0x90] sm:$0xff] }
  0x14   : > { %27835 = vst [vmem:[#allocation4_spill] sm:$0xff] %v18713_v4  ;;  %v18604_v5 = vpack.i.bf16 %v18713_v4, %v225_v2  ;;  %18563 = vxpose.xlu0.b32.start [1/16] (narrow) %v18562_v3, 16  ;;  %v18606_v11 = vpack.i.bf16 %v18726_v9, %v18723_v8  ;;  %v18608_v17 = vpack.i.bf16 %v18742_v15, %v18739_v14  ;;  %v18749_v18 = vld [vmem:[%s18701_s23 + $0x118] sm:$0xff]  ;;  %v18765_v24 = vld [vmem:[%s18701_s23 + $0x120] sm:$0xff]  ;;  %v18781_v30 = vld [vmem:[%s18701_s23 + $0x128] sm:$0xff] }
  0x15   : > { %27837 = vst [vmem:[#allocation6_spill] sm:$0xff] %v18720_v7  ;;  %v18752_v19 = vld [vmem:[%s18701_s23 + $0x198] sm:$0xff]  ;;  %v18768_v25 = vld [vmem:[%s18701_s23 + $0x1a0] sm:$0xff]  ;;  %v18784_v31 = vld [vmem:[%s18701_s23 + $0x1a8] sm:$0xff] }
  0x16   : > { %18605 = vxpose.xlu1.b32.start [1/16] (narrow) %v18604_v5, 16  ;;  %27838 = vst [vmem:[#allocation7_spill] sm:$0xff] %v18726_v9  ;;  %v18755_v20 = vld [vmem:[%s18701_s23 + $0x18] sm:$0xff]  ;;  %v18568_v22 = vpack.i.bf16 %v18752_v19, %v18749_v18  ;;  %v18771_v26 = vld [vmem:[%s18701_s23 + $0x20] sm:$0xff]  ;;  %v18570_v28 = vpack.i.bf16 %v18768_v25, %v18765_v24  ;;  %v18787_v32 = vld [vmem:[%s18701_s23 + $0x28] sm:$0xff]  ;;  %v18572_v34 = vpack.i.bf16 %v18784_v31, %v18781_v30 }
  0x17   : > { %27839 = vst [vmem:[#allocation8_spill] sm:$0xff] %v18733_v12  ;;  %v18758_v21 = vld [vmem:[%s18701_s23 + $0x98] sm:$0xff]  ;;  %v18774_v27 = vld [vmem:[%s18701_s23 + $0xa0] sm:$0xff]  ;;  %v18790_v33 = vld [vmem:[%s18701_s23 + $0xa8] sm:$0xff] }
  0x18   : > { %27840 = vst [vmem:[#allocation9_spill] sm:$0xff] %v18736_v13  ;;  %v18610_v23 = vpack.i.bf16 %v18758_v21, %v18755_v20  ;;  %v18612_v29 = vpack.i.bf16 %v18774_v27, %v18771_v26  ;;  %v18614_v35 = vpack.i.bf16 %v18790_v33, %v18787_v32  ;;  %v18797_v36 = vld [vmem:[%s18701_s23 + $0x130] sm:$0xff]  ;;  %v18813_v42 = vld [vmem:[%s18701_s23 + $0x138] sm:$0xff]  ;;  %v18829_v48 = vld [vmem:[%s18701_s23 + $0x140] sm:$0xff] }
  0x19   : > { %27841 = vst [vmem:[#allocation10_spill] sm:$0xff] %v18742_v15  ;;  %v18800_v37 = vld [vmem:[%s18701_s23 + $0x1b0] sm:$0xff]  ;;  %v18816_v43 = vld [vmem:[%s18701_s23 + $0x1b8] sm:$0xff]  ;;  %v18832_v49 = vld [vmem:[%s18701_s23 + $0x1c0] sm:$0xff] }
  0x1a   : > { %27842 = vst [vmem:[#allocation11_spill] sm:$0xff] %v18749_v18  ;;  %v18803_v38 = vld [vmem:[%s18701_s23 + $0x30] sm:$0xff]  ;;  %v18574_v40 = vpack.i.bf16 %v18800_v37, %v18797_v36  ;;  %v18819_v44 = vld [vmem:[%s18701_s23 + $0x38] sm:$0xff]  ;;  %v18576_v46 = vpack.i.bf16 %v18816_v43, %v18813_v42  ;;  %v18835_v50 = vld [vmem:[%s18701_s23 + $0x40] sm:$0xff]  ;;  %v18578_v52 = vpack.i.bf16 %v18832_v49, %v18829_v48 }
  0x1b   : > { %27843 = vst [vmem:[#allocation12_spill] sm:$0xff] %v18752_v19  ;;  %v18806_v39 = vld [vmem:[%s18701_s23 + $0xb0] sm:$0xff]  ;;  %v18822_v45 = vld [vmem:[%s18701_s23 + $0xb8] sm:$0xff]  ;;  %v18838_v51 = vld [vmem:[%s18701_s23 + $0xc0] sm:$0xff] }
  0x1c   : > { %18565 = vxpose.xlu0.b32.cont [2/16] (narrow) %v18564_v10, 16  ;;  %27844 = vst [vmem:[#allocation13_spill] sm:$0xff] %v18758_v21  ;;  %v18616_v41 = vpack.i.bf16 %v18806_v39, %v18803_v38  ;;  %v18618_v47 = vpack.i.bf16 %v18822_v45, %v18819_v44  ;;  %v18620_v53 = vpack.i.bf16 %v18838_v51, %v18835_v50  ;;  %v18845_v54 = vld [vmem:[%s18701_s23 + $0x148] sm:$0xff]  ;;  %v18861_v60 = vld [vmem:[%s18701_s23 + $0x150] sm:$0xff]  ;;  %v18877_v5 = vld [vmem:[%s18701_s23 + $0x158] sm:$0xff] }
  0x1d   : > { %27845 = vst [vmem:[#allocation14_spill] sm:$0xff] %v18765_v24  ;;  %v18848_v55 = vld [vmem:[%s18701_s23 + $0x1c8] sm:$0xff]  ;;  %v18864_v61 = vld [vmem:[%s18701_s23 + $0x1d0] sm:$0xff]  ;;  %v18880_v10 = vld [vmem:[%s18701_s23 + $0x1d8] sm:$0xff] }
  0x1e   : > { %18607 = vxpose.xlu1.b32.cont [2/16] (narrow) %v18606_v11, 16  ;;  %27846 = vst [vmem:[#allocation15_spill] sm:$0xff] %v18768_v25  ;;  %v18851_v56 = vld [vmem:[%s18701_s23 + $0x48] sm:$0xff]  ;;  %v18580_v58 = vpack.i.bf16 %v18848_v55, %v18845_v54  ;;  %v18867_v62 = vld [vmem:[%s18701_s23 + $0x50] sm:$0xff]  ;;  %v18582_v2 = vpack.i.bf16 %v18864_v61, %v18861_v60  ;;  %v18883_v11 = vld [vmem:[%s18701_s23 + $0x58] sm:$0xff] }
  0x1f   : > { %27847 = vst [vmem:[#allocation16_spill] sm:$0xff] %v18774_v27  ;;  %v18854_v57 = vld [vmem:[%s18701_s23 + $0xc8] sm:$0xff]  ;;  %v18870_v63 = vld [vmem:[%s18701_s23 + $0xd0] sm:$0xff]  ;;  %v12631_v4 = vld [vmem:[%s27770_s1 + $0x9c0] sm:$0xf] }
  0x20   : > { %27848 = vst [vmem:[#allocation17_spill] sm:$0xff] %v18781_v30  ;;  %v18622_v59 = vpack.i.bf16 %v18854_v57, %v18851_v56  ;;  %v18624_v3 = vpack.i.bf16 %v18870_v63, %v18867_v62  ;;  %v17526_v21 = vld [vmem:[%s27770_s1 + $0x7ec] sm:$0xf]  ;;  %v17585_v13 = vld [vmem:[%s27770_s1 + $0x9c4] sm:$0xf] }
  0x21   : > { %27849 = vst [vmem:[#allocation18_spill] sm:$0xff] %v18784_v31  ;;  %v17556_v1 = vld [vmem:[%s27770_s1 + $0x8d4] sm:$0xf0]  ;;  %v17821_v0 = vld [vmem:[%s27770_s1 + $0x1124] sm:$0xf] }
  0x22   : > { %27850 = vst [vmem:[#allocation19_spill] sm:$0xff] %v18790_v33 }
  0x23   : > { %27851 = vst [vmem:[#allocation20_spill] sm:$0xff] %v18797_v36  ;;  %v11873_v36 = vld [vmem:[%s27770_s1 + $0x4d8] sm:$0xf0] }
  0x24   : > { %18567 = vxpose.xlu0.b32.cont [3/16] (narrow) %v18566_v16, 16  ;;  %27852 = vst [vmem:[#allocation21_spill] sm:$0xff] %v18800_v37  ;;  %v18886_v16 = vld [vmem:[%s18701_s23 + $0xd8] sm:$0xff] }
  0x25   : > { %27853 = vst [vmem:[#allocation22_spill] sm:$0xff] %v18803_v38 }
  0x26   : > { %18609 = vxpose.xlu1.b32.cont [3/16] (narrow) %v18608_v17, 16  ;;  %27854 = vst [vmem:[#allocation23_spill] sm:$0xff] %v18806_v39  ;;  %v18584_v17 = vpack.i.bf16 %v18880_v10, %v18877_v5 }
  0x27   : > { %27855 = vst [vmem:[#allocation24_spill] sm:$0xff] %v18813_v42  ;;  %v12273_v42 = vld [vmem:[%s27770_s1 + $0x7f8] sm:$0xf0] }
  0x28   : > { %27856 = vst [vmem:[#allocation25_spill] sm:$0xff] %v18816_v43  ;;  %v12145_v43 = vld [vmem:[%s27770_s1 + $0x6f8] sm:$0xf0]  ;;  %v12276_v9 = vor.u32 %v17526_v21, %v12273_v42  ;;  %v17522_v42 = vld [vmem:[%s27770_s1 + $0x7cc] sm:$0xf] }
  0x29   : > { %27857 = vst [vmem:[#allocation26_spill] sm:$0xff] %v18819_v44  ;;  %v12129_v21 = vld [vmem:[%s27770_s1 + $0x6d8] sm:$0xf0] }
  0x2a   : > { %27858 = vst [vmem:[#allocation27_spill] sm:$0xff] %v18822_v45  ;;  %v11383_v45 = vld [vmem:[%s27770_s1 + $0x200] sm:$0xf] }
  0x2b   : > { %27859 = vst [vmem:[#allocation28_spill] sm:$0xff] %v18829_v48  ;;  %v17330_v48 = vld [vmem:[%s27770_s1 + $0x1cc] sm:$0xf] }
  0x2c   : > { %18569 = vxpose.xlu0.b32.cont [4/16] (narrow) %v18568_v22, 16  ;;  %27860 = vst [vmem:[#allocation29_spill] sm:$0xff] %v18832_v49  ;;  %v18626_v22 = vpack.i.bf16 %v18886_v16, %v18883_v11 }
  0x2d   : > { %27861 = vst [vmem:[#allocation30_spill] sm:$0xff] %v18835_v50  ;;  %v17912_v50 = vld [vmem:[%s27770_s1 + $0x13f4] sm:$0xf0] }
  0x2e   : > { %18611 = vxpose.xlu1.b32.cont [4/16] (narrow) %v18610_v23, 16  ;;  %27862 = vst [vmem:[#allocation31_spill] sm:$0xff] %v18838_v51  ;;  %v18893_v23 = vld [vmem:[%s18701_s23 + $0x160] sm:$0xff] }
  0x2f   : > { %27863 = vst [vmem:[#allocation32_spill] sm:$0xff] %v18845_v54 }
  0x30   : > { %27864 = vst [vmem:[#allocation33_spill] sm:$0xff] %v18848_v55 }
  0x31   : > { %27865 = vst [vmem:[#allocation34_spill] sm:$0xff] %v18851_v56 }
  0x32   : > { %27866 = vst [vmem:[#allocation35_spill] sm:$0xff] %v18854_v57  ;;  %v18990_v57 = vld [vmem:[%s18701_s23 + $0x68] sm:$0xff] }
  0x33   : > { %27867 = vst [vmem:[#allocation36_spill] sm:$0xff] %v18861_v60 }
  0x34   : > { %18571 = vxpose.xlu0.b32.cont [5/16] (narrow) %v18570_v28, 16  ;;  %27868 = vst [vmem:[#allocation37_spill] sm:$0xff] %v18864_v61  ;;  %v18896_v28 = vld [vmem:[%s18701_s23 + $0x1e0] sm:$0xff] }
  0x35   : > { %27869 = vst [vmem:[#allocation38_spill] sm:$0xff] %v18867_v62 }
  0x36   : > { %18613 = vxpose.xlu1.b32.cont [5/16] (narrow) %v18612_v29, 16  ;;  %27870 = vst [vmem:[#allocation39_spill] sm:$0xff] %v18870_v63  ;;  %v11239_v29 = vld [vmem:[%s27770_s1 + $0xe0] sm:$0xf] }
  0x37   : > { %27871 = vst [vmem:[#allocation40_spill] sm:$0xff] %v18877_v5  ;;  %v19130_v5 = vld [vmem:[%s18701_s23 + $0x78] sm:$0xff] }
  0x38   : > { %27872 = vst [vmem:[#allocation41_spill] sm:$0xff] %v18880_v10  ;;  %v17279_v10 = vld [vmem:[%s27770_s1 + $0x2c] sm:$0xf0] }
  0x39   : > { %27873 = vst [vmem:[#allocation42_spill] sm:$0xff] %v18883_v11 }
  0x3a   : > { %27874 = vst [vmem:[#allocation43_spill] sm:$0xff] %v18886_v16  ;;  %v11335_v16 = vld [vmem:[%s27770_s1 + $0x1a0] sm:$0xf] }
  0x3b   : > { %27875 = vst [vmem:[#allocation44_spill] sm:$0xff] %v18893_v23 }
  0x3c   : > { %18573 = vxpose.xlu0.b32.cont [6/16] (narrow) %v18572_v34, 16  ;;  %27876 = vst [vmem:[#allocation45_spill] sm:$0xff] %v18896_v28  ;;  %v17303_v34 = vld [vmem:[%s27770_s1 + $0xec] sm:$0xf0] }
  0x3d   : > { %27881 = vst [vmem:[#allocation50_spill] sm:$0xff] %v18990_v57 }
  0x3e   : > { %18615 = vxpose.xlu1.b32.cont [6/16] (narrow) %v18614_v35, 16  ;;  %v11367_v35 = vld [vmem:[%s27770_s1 + $0x1e0] sm:$0xf]  ;;  %27889 = vst [vmem:[#allocation58_spill] sm:$0xff] %v19130_v5 }
  0x44   : > { %18575 = vxpose.xlu0.b32.cont [7/16] (narrow) %v18574_v40, 16  ;;  %v18908_v40 = vld [vmem:[%s18701_s23 + $0x60] sm:$0xff] }
  0x45   : > { %27877 = vst [vmem:[#allocation46_spill] sm:$0xff] %v18908_v40 }
  0x46   : > { %18617 = vxpose.xlu1.b32.cont [7/16] (narrow) %v18616_v41, 16  ;;  %v11240_v41 = vor.u32 %v17303_v34, %v11239_v29 }
  0x48   : > { %1256 = vmatpush.bf16.msra.mxu0 %v11240_v41  ;;  %v17331_v41 = vld [vmem:[%s27770_s1 + $0x1cc] sm:$0xf0] }
  0x4c   : > { %18577 = vxpose.xlu0.b32.cont [8/16] (narrow) %v18576_v46, 16  ;;  %v17335_v46 = vld [vmem:[%s27770_s1 + $0x1ec] sm:$0xf0] }
  0x4e   : > { %18619 = vxpose.xlu1.b32.cont [8/16] (narrow) %v18618_v47, 16  ;;  %v11495_v47 = vld [vmem:[%s27770_s1 + $0x2e0] sm:$0xf] }
  0x54   : > { %18579 = vxpose.xlu0.b32.cont [9/16] (narrow) %v18578_v52, 16  ;;  %v18917_v52 = vld [vmem:[%s18701_s23 + $0xe0] sm:$0xff] }
  0x55   : > { %27878 = vst [vmem:[#allocation47_spill] sm:$0xff] %v18917_v52 }
  0x56   : > { %18621 = vxpose.xlu1.b32.cont [9/16] (narrow) %v18620_v53, 16  ;;  %v11368_v53 = vor.u32 %v17335_v46, %v11367_v35  ;;  %v11351_v35 = vld [vmem:[%s27770_s1 + $0x1c0] sm:$0xf] }
  0x57   : > { %v11479_v46 = vld [vmem:[%s27770_s1 + $0x2c0] sm:$0xf] }
  0x58   : > { %1270 = vmatpush.bf16.msra.mxu1 %v11368_v53  ;;  %v17363_v53 = vld [vmem:[%s27770_s1 + $0x2cc] sm:$0xf0] }
  0x5c   : > { %18581 = vxpose.xlu0.b32.cont [10/16] (narrow) %v18580_v58, 16  ;;  %v17367_v58 = vld [vmem:[%s27770_s1 + $0x2ec] sm:$0xf0] }
  0x5e   : > { %18623 = vxpose.xlu1.b32.cont [10/16] (narrow) %v18622_v59, 16  ;;  %v11623_v59 = vld [vmem:[%s27770_s1 + $0x3e0] sm:$0xf] }
  0x64   : > { %18583 = vxpose.xlu0.b32.cont [11/16] (narrow) %v18582_v2, 16  ;;  %v11496_v2 = vor.u32 %v17367_v58, %v11495_v47  ;;  %v18586_v47 = vpack.i.bf16 %v18896_v28, %v18893_v23  ;;  %v11352_v58 = vor.u32 %v17331_v41, %v11351_v35  ;;  %v11207_v35 = vld [vmem:[%s27770_s1 + $0xa0] sm:$0xf]  ;;  %v17295_v41 = vld [vmem:[%s27770_s1 + $0xac] sm:$0xf0] }
  0x65   : > { %v11208_v63 = vor.u32 %v17295_v41, %v11207_v35  ;;  %v11591_v35 = vld [vmem:[%s27770_s1 + $0x3a0] sm:$0xf]  ;;  %v17391_v41 = vld [vmem:[%s27770_s1 + $0x3ac] sm:$0xf0] }
  0x66   : > { %18625 = vxpose.xlu1.b32.cont [11/16] (narrow) %v18624_v3, 16  ;;  %v17399_v3 = vld [vmem:[%s27770_s1 + $0x3ec] sm:$0xf0]  ;;  %1284 = vmatpush.bf16.msra.mxu2 %v11496_v2  ;;  %v11480_v2 = vor.u32 %v17363_v53, %v11479_v46  ;;  %v11463_v46 = vld [vmem:[%s27770_s1 + $0x2a0] sm:$0xf]  ;;  %v11592_v51 = vor.u32 %v17391_v41, %v11591_v35 }
  0x67   : > { %v11624_v29 = vor.u32 %v17399_v3, %v11623_v59  ;;  %v11607_v59 = vld [vmem:[%s27770_s1 + $0x3c0] sm:$0xf]  ;;  %v17395_v3 = vld [vmem:[%s27770_s1 + $0x3cc] sm:$0xf0]  ;;  %1271 = vmatpush.bf16.msra.mxu1 %v11352_v58 }
  0x68   : > { %v17359_v53 = vld [vmem:[%s27770_s1 + $0x2ac] sm:$0xf0]  ;;  %v11319_v58 = vld [vmem:[%s27770_s1 + $0x180] sm:$0xf] }
  0x69   : > { %1298 = vmatpush.bf16.msra.mxu3 %v11624_v29  ;;  %v17327_v29 = vld [vmem:[%s27770_s1 + $0x1ac] sm:$0xf0]  ;;  %v11464_v28 = vor.u32 %v17359_v53, %v11463_v46  ;;  %v11175_v41 = vld [vmem:[%s27770_s1 + $0x60] sm:$0xf] }
  0x6a   : > { %1285 = vmatpush.bf16.msra.mxu2 %v11480_v2  ;;  %v11447_v2 = vld [vmem:[%s27770_s1 + $0x280] sm:$0xf]  ;;  %v17355_v53 = vld [vmem:[%s27770_s1 + $0x28c] sm:$0xf0] }
  0x6b   : > { %v11303_v23 = vld [vmem:[%s27770_s1 + $0x160] sm:$0xf] }
  0x6c   : > { %18585 = vxpose.xlu0.b32.cont [12/16] (narrow) %v18584_v17, 16  ;;  %v11223_v17 = vld [vmem:[%s27770_s1 + $0xc0] sm:$0xf] }
  0x6e   : > { %18627 = vxpose.xlu1.b32.cont [12/16] (narrow) %v18626_v22, 16  ;;  %v17299_v22 = vld [vmem:[%s27770_s1 + $0xcc] sm:$0xf0]  ;;  %1286 = vmatpush.bf16.msra.mxu2 %v11464_v28 }
  0x6f   : > { %v11224_v34 = vor.u32 %v17299_v22, %v11223_v17  ;;  %v18628_v17 = vpack.i.bf16 %v18917_v52, %v18908_v40  ;;  %v11608_v22 = vor.u32 %v17395_v3, %v11607_v59  ;;  %v18975_v59 = vld [vmem:[%s18701_s23 + $0x168] sm:$0xff]  ;;  %v11191_v52 = vld [vmem:[%s27770_s1 + $0x80] sm:$0xf]  ;;  %v17351_v28 = vld [vmem:[%s27770_s1 + $0x26c] sm:$0xf0] }
  0x70   : > { %27879 = vst [vmem:[#allocation48_spill] sm:$0xff] %v18975_v59  ;;  %v18978_v3 = vld [vmem:[%s18701_s23 + $0x1e8] sm:$0xff]  ;;  %v17841_v40 = vld [vmem:[%s27770_s1 + $0x11c4] sm:$0xf] }
  0x71   : > { %1257 = vmatpush.bf16.msra.mxu0 %v11224_v34  ;;  %27880 = vst [vmem:[#allocation49_spill] sm:$0xff] %v18978_v3  ;;  %v11336_v34 = vor.u32 %v17327_v29, %v11335_v16  ;;  %v17291_v16 = vld [vmem:[%s27770_s1 + $0x8c] sm:$0xf0]  ;;  %v18999_v29 = vld [vmem:[%s18701_s23 + $0xe8] sm:$0xff]  ;;  %1299 = vmatpush.bf16.msra.mxu3 %v11608_v22 }
  0x72   : > { %27882 = vst [vmem:[#allocation51_spill] sm:$0xff] %v18999_v29  ;;  %v11192_v46 = vor.u32 %v17291_v16, %v11191_v52  ;;  %v17387_v22 = vld [vmem:[%s27770_s1 + $0x38c] sm:$0xf0]  ;;  %v18588_v52 = vpack.i.bf16 %v18978_v3, %v18975_v59  ;;  %v11448_v16 = vor.u32 %v17355_v53, %v11447_v2  ;;  %v11431_v3 = vld [vmem:[%s27770_s1 + $0x260] sm:$0xf] }
  0x73   : > { %1272 = vmatpush.bf16.msra.mxu1 %v11336_v34  ;;  %v17319_v34 = vld [vmem:[%s27770_s1 + $0x16c] sm:$0xf0]  ;;  %v11559_v53 = vld [vmem:[%s27770_s1 + $0x360] sm:$0xf] }
  0x74   : > { %18587 = vxpose.xlu0.b32.cont [13/16] (narrow) %v18586_v47, 16  ;;  %v17323_v47 = vld [vmem:[%s27770_s1 + $0x18c] sm:$0xf0]  ;;  %1287 = vmatpush.bf16.msra.mxu2 %v11448_v16  ;;  %v11287_v59 = vld [vmem:[%s27770_s1 + $0x140] sm:$0xf] }
  0x75   : > { %1258 = vmatpush.bf16.msra.mxu0 %v11208_v63  ;;  %v11320_v35 = vor.u32 %v17323_v47, %v11319_v58  ;;  %v17287_v63 = vld [vmem:[%s27770_s1 + $0x6c] sm:$0xf0]  ;;  %v18630_v58 = vpack.i.bf16 %v18999_v29, %v18990_v57  ;;  %1300 = vmatpush.bf16.msra.mxu3 %v11592_v51  ;;  %v11159_v29 = vld [vmem:[%s27770_s1 + $0x40] sm:$0xf]  ;;  %v17656_v57 = vld [vmem:[%s27770_s1 + $0xbf4] sm:$0xf0] }
  0x76   : > { %18629 = vxpose.xlu1.b32.cont [13/16] (narrow) %v18628_v17, 16  ;;  %v11575_v17 = vld [vmem:[%s27770_s1 + $0x380] sm:$0xf]  ;;  %v11176_v2 = vor.u32 %v17287_v63, %v11175_v41  ;;  %v17383_v51 = vld [vmem:[%s27770_s1 + $0x36c] sm:$0xf0]  ;;  %v11432_v63 = vor.u32 %v17351_v28, %v11431_v3 }
  0x77   : > { %v11576_v47 = vor.u32 %v17387_v22, %v11575_v17  ;;  %v19045_v17 = vld [vmem:[%s18701_s23 + $0x170] sm:$0xff]  ;;  %1273 = vmatpush.bf16.msra.mxu1 %v11320_v35  ;;  %v11304_v22 = vor.u32 %v17319_v34, %v11303_v23  ;;  %v11560_v34 = vor.u32 %v17383_v51, %v11559_v53  ;;  %v11143_v51 = vld [vmem:[%s27770_s1 + $0x20] sm:$0xf] }
  0x78   : > { %27883 = vst [vmem:[#allocation52_spill] sm:$0xff] %v19045_v17  ;;  %v19054_v41 = vld [vmem:[%s18701_s23 + $0x1f0] sm:$0xff]  ;;  %1288 = vmatpush.bf16.msra.mxu2 %v11432_v63 }
  0x79   : > { %1259 = vmatpush.bf16.msra.mxu0 %v11192_v46  ;;  %v17283_v46 = vld [vmem:[%s27770_s1 + $0x4c] sm:$0xf0]  ;;  %27884 = vst [vmem:[#allocation53_spill] sm:$0xff] %v19054_v41  ;;  %1301 = vmatpush.bf16.msra.mxu3 %v11576_v47 }
  0x7a   : > { %v17315_v23 = vld [vmem:[%s27770_s1 + $0x14c] sm:$0xf0]  ;;  %v11160_v28 = vor.u32 %v17283_v46, %v11159_v29  ;;  %v18590_v29 = vpack.i.bf16 %v19054_v41, %v19045_v17  ;;  %v11399_v41 = vld [vmem:[%s27770_s1 + $0x220] sm:$0xf]  ;;  %v19118_v17 = vld [vmem:[%s18701_s23 + $0x1f8] sm:$0xff] }
  0x7b   : > { %v19063_v35 = vld [vmem:[%s18701_s23 + $0x70] sm:$0xff]  ;;  %1274 = vmatpush.bf16.msra.mxu1 %v11304_v22  ;;  %v11288_v53 = vor.u32 %v17315_v23, %v11287_v59  ;;  %v11271_v22 = vld [vmem:[%s27770_s1 + $0x120] sm:$0xf]  ;;  %27888 = vst [vmem:[#allocation57_spill] sm:$0xff] %v19118_v17 }
  0x7c   : > { %18589 = vxpose.xlu0.b32.cont [14/16] (narrow) %v18588_v52, 16  ;;  %27885 = vst [vmem:[#allocation54_spill] sm:$0xff] %v19063_v35  ;;  %v11415_v52 = vld [vmem:[%s27770_s1 + $0x240] sm:$0xf]  ;;  %v17347_v3 = vld [vmem:[%s27770_s1 + $0x24c] sm:$0xf0] }
  0x7d   : > { %v19072_v16 = vld [vmem:[%s18701_s23 + $0xf0] sm:$0xff]  ;;  %1260 = vmatpush.bf16.msra.mxu0 %v11176_v2  ;;  %v11416_v2 = vor.u32 %v17347_v3, %v11415_v52  ;;  %1302 = vmatpush.bf16.msra.mxu3 %v11560_v34  ;;  %v11527_v52 = vld [vmem:[%s27770_s1 + $0x320] sm:$0xf]  ;;  %v11144_v3 = vor.u32 %v17279_v10, %v11143_v51 }
  0x7e   : > { %18631 = vxpose.xlu1.b32.cont [14/16] (narrow) %v18630_v58, 16  ;;  %27886 = vst [vmem:[#allocation55_spill] sm:$0xff] %v19072_v16  ;;  %v11543_v58 = vld [vmem:[%s27770_s1 + $0x340] sm:$0xf]  ;;  %v17379_v47 = vld [vmem:[%s27770_s1 + $0x34c] sm:$0xf0]  ;;  %v18632_v46 = vpack.i.bf16 %v19072_v16, %v19063_v35 }
  0x7f   : > { %v17311_v59 = vld [vmem:[%s27770_s1 + $0x12c] sm:$0xf0]  ;;  %v11544_v23 = vor.u32 %v17379_v47, %v11543_v58  ;;  %v11127_v58 = vld [vmem:[%s27770_s1] sm:$0xf]  ;;  %v19115_v16 = vld [vmem:[%s18701_s23 + $0x178] sm:$0xff]  ;;  %1275 = vmatpush.bf16.msra.mxu1 %v11288_v53  ;;  %1289 = vmatpush.bf16.msra.mxu2 %v11416_v2 }
  0x80   : > { %v17343_v63 = vld [vmem:[%s27770_s1 + $0x22c] sm:$0xf0]  ;;  %27887 = vst [vmem:[#allocation56_spill] sm:$0xff] %v19115_v16  ;;  %v11255_v10 = vld [vmem:[%s27770_s1 + $0x100] sm:$0xf]  ;;  %v18592_v60 = vpack.i.bf16 %v19118_v17, %v19115_v16 }
  0x81   : > { %1261 = vmatpush.bf16.msra.mxu0 %v11160_v28  ;;  %v17375_v34 = vld [vmem:[%s27770_s1 + $0x32c] sm:$0xf0]  ;;  %v11272_v28 = vor.u32 %v17311_v59, %v11271_v22  ;;  %v11400_v61 = vor.u32 %v17343_v63, %v11399_v41  ;;  %v17301_v53 = vld [vmem:[%s27770_s1 + $0xe4] sm:$0xf]  ;;  %v11241_v22 = vld [vmem:[%s27770_s1 + $0xf0] sm:$0xf0]  ;;  %1303 = vmatpush.bf16.msra.mxu3 %v11544_v23 }
  0x82   : > { %v17275_v47 = vld [vmem:[%s27770_s1 + $0xc] sm:$0xf0]  ;;  %v19139_v59 = vld [vmem:[%s18701_s23 + $0xf8] sm:$0xff]  ;;  %v11528_v39 = vor.u32 %v17375_v34, %v11527_v52  ;;  %v11511_v41 = vld [vmem:[%s27770_s1 + $0x300] sm:$0xf]  ;;  %v11244_v34 = vor.u32 %v17301_v53, %v11241_v22 }
  0x83   : > { %v17307_v51 = vld [vmem:[%s27770_s1 + $0x10c] sm:$0xf0]  ;;  %27890 = vst [vmem:[#allocation59_spill] sm:$0xff] %v19139_v59  ;;  %v11128_v2 = vor.u32 %v17275_v47, %v11127_v58  ;;  %v11369_v23 = vld [vmem:[%s27770_s1 + $0x1f0] sm:$0xf0]  ;;  %1276 = vmatpush.bf16.msra.mxu1 %v11272_v28  ;;  %1290 = vmatpush.bf16.msra.mxu2 %v11400_v61  ;;  %v18634_v53 = vpack.i.bf16 %v19139_v59, %v19130_v5 }
  0x84   : > { %18591 = vxpose.xlu0.b32.cont [15/16] (narrow) %v18590_v29, 16  ;;  %v17339_v29 = vld [vmem:[%s27770_s1 + $0x20c] sm:$0xf0]  ;;  %v11256_v52 = vor.u32 %v17307_v51, %v11255_v10  ;;  %v11497_v58 = vld [vmem:[%s27770_s1 + $0x2f0] sm:$0xf0] }
  0x85   : > { %1262 = vmatpush.bf16.msra.mxu0 %v11144_v3  ;;  %v17371_v63 = vld [vmem:[%s27770_s1 + $0x30c] sm:$0xf0]  ;;  %v17365_v3 = vld [vmem:[%s27770_s1 + $0x2e4] sm:$0xf]  ;;  %v11384_v55 = vor.u32 %v17339_v29, %v11383_v45  ;;  %v11625_v28 = vld [vmem:[%s27770_s1 + $0x3f0] sm:$0xf0]  ;;  %1304 = vmatpush.bf16.msra.mxu3 %v11528_v39 }
  0x86   : > { %18633 = vxpose.xlu1.b32.cont [15/16] (narrow) %v18632_v46, 16  ;;  %v17333_v46 = vld [vmem:[%s27770_s1 + $0x1e4] sm:$0xf]  ;;  %v11225_v51 = vld [vmem:[%s27770_s1 + $0xd0] sm:$0xf0]  ;;  %v11512_v22 = vor.u32 %v17371_v63, %v11511_v41  ;;  %v11500_v45 = vor.u32 %v17365_v3, %v11497_v58 }
  0x87   : > { %v17397_v47 = vld [vmem:[%s27770_s1 + $0x3e4] sm:$0xf]  ;;  %v11372_v61 = vor.u32 %v17333_v46, %v11369_v23  ;;  %v11353_v17 = vld [vmem:[%s27770_s1 + $0x1d0] sm:$0xf0]  ;;  %1277 = vmatpush.bf16.msra.mxu1 %v11256_v52  ;;  %1291 = vmatpush.bf16.msra.mxu2 %v11384_v55 }
  0x88   : > { %v17297_v10 = vld [vmem:[%s27770_s1 + $0xc4] sm:$0xf]  ;;  %v11628_v59 = vor.u32 %v17397_v47, %v11625_v28  ;;  %v11481_v41 = vld [vmem:[%s27770_s1 + $0x2d0] sm:$0xf0] }
  0x89   : > { %1263 = vmatpush.bf16.msra.mxu0 %v11128_v2  ;;  %v17329_v29 = vld [vmem:[%s27770_s1 + $0x1c4] sm:$0xf]  ;;  %v11228_v39 = vor.u32 %v17297_v10, %v11225_v51  ;;  %v11609_v63 = vld [vmem:[%s27770_s1 + $0x3d0] sm:$0xf0]  ;;  %1305 = vmatpush.bf16.msra.mxu3 %v11512_v22 }
  0x8a   : > { %v17361_v16 = vld [vmem:[%s27770_s1 + $0x2c4] sm:$0xf]  ;;  %v11209_v23 = vld [vmem:[%s27770_s1 + $0xb0] sm:$0xf0]  ;;  %v11356_v52 = vor.u32 %v17329_v29, %v11353_v17 }
  0x8b   : > { %v17393_v2 = vld [vmem:[%s27770_s1 + $0x3c4] sm:$0xf]  ;;  %1326 = vmatpush.bf16.msrb.mxu1 %v11372_v61  ;;  %1340 = vmatpush.bf16.msrb.mxu2 %v11500_v45  ;;  %v11337_v55 = vld [vmem:[%s27770_s1 + $0x1b0] sm:$0xf0] }
  0x8c   : > { %18593 = vxpose.xlu0.b32.end [16/16] (narrow) %v18592_v60, 16  ;;  %v17293_v46 = vld [vmem:[%s27770_s1 + $0xa4] sm:$0xf]  ;;  %v11612_v60 = vor.u32 %v17393_v2, %v11609_v63  ;;  %v11465_v17 = vld [vmem:[%s27770_s1 + $0x2b0] sm:$0xf0] }
  0x8d   : > { %1312 = vmatpush.bf16.msrb.mxu0 %v11244_v34  ;;  %v11484_v34 = vor.u32 %v17361_v16, %v11481_v41  ;;  %v17325_v3 = vld [vmem:[%s27770_s1 + $0x1a4] sm:$0xf]  ;;  %1354 = vmatpush.bf16.msrb.mxu3 %v11628_v59  ;;  %v11212_v58 = vor.u32 %v17293_v46, %v11209_v23  ;;  %v11593_v28 = vld [vmem:[%s27770_s1 + $0x3b0] sm:$0xf0] }
  0x8e   : > { %18635 = vxpose.xlu1.b32.end [16/16] (narrow) %v18634_v53, 16  ;;  %v17357_v47 = vld [vmem:[%s27770_s1 + $0x2a4] sm:$0xf]  ;;  %v11193_v10 = vld [vmem:[%s27770_s1 + $0x90] sm:$0xf0]  ;;  %v11340_v51 = vor.u32 %v17325_v3, %v11337_v55 }
  0x8f   : > { %v17389_v16 = vld [vmem:[%s27770_s1 + $0x3a4] sm:$0xf]  ;;  %1327 = vmatpush.bf16.msrb.mxu1 %v11356_v52  ;;  %1341 = vmatpush.bf16.msrb.mxu2 %v11484_v34  ;;  %v11468_v53 = vor.u32 %v17357_v47, %v11465_v17  ;;  %v11321_v29 = vld [vmem:[%s27770_s1 + $0x190] sm:$0xf0] }
  0x90   : > { %v17289_v59 = vld [vmem:[%s27770_s1 + $0x84] sm:$0xf]  ;;  %v11596_v61 = vor.u32 %v17389_v16, %v11593_v28  ;;  %v11449_v41 = vld [vmem:[%s27770_s1 + $0x290] sm:$0xf0] }
  0x91   : > { %1313 = vmatpush.bf16.msrb.mxu0 %v11228_v39  ;;  %v17321_v22 = vld [vmem:[%s27770_s1 + $0x184] sm:$0xf]  ;;  %1355 = vmatpush.bf16.msrb.mxu3 %v11612_v60  ;;  %v11196_v45 = vor.u32 %v17289_v59, %v11193_v10  ;;  %v11577_v63 = vld [vmem:[%s27770_s1 + $0x390] sm:$0xf0] }
  0x92   : > { %v17353_v39 = vld [vmem:[%s27770_s1 + $0x284] sm:$0xf]  ;;  %v11324_v46 = vor.u32 %v17321_v22, %v11321_v29  ;;  %v11177_v3 = vld [vmem:[%s27770_s1 + $0x70] sm:$0xf0] }
  0x93   : > { %v17385_v2 = vld [vmem:[%s27770_s1 + $0x384] sm:$0xf]  ;;  %1328 = vmatpush.bf16.msrb.mxu1 %v11340_v51  ;;  %1342 = vmatpush.bf16.msrb.mxu2 %v11468_v53  ;;  %v11452_v23 = vor.u32 %v17353_v39, %v11449_v41  ;;  %v11433_v17 = vld [vmem:[%s27770_s1 + $0x270] sm:$0xf0] }
  0x94   : > { %v11580_v52 = vor.u32 %v17385_v2, %v11577_v63  ;;  %v17285_v34 = vld [vmem:[%s27770_s1 + $0x64] sm:$0xf]  ;;  %v11561_v10 = vld [vmem:[%s27770_s1 + $0x370] sm:$0xf0] }
  0x95   : > { %1314 = vmatpush.bf16.msrb.mxu0 %v11212_v58  ;;  %1356 = vmatpush.bf16.msrb.mxu3 %v11596_v61  ;;  %v17317_v55 = vld [vmem:[%s27770_s1 + $0x164] sm:$0xf]  ;;  %v11180_v60 = vor.u32 %v17285_v34, %v11177_v3  ;;  %v11305_v58 = vld [vmem:[%s27770_s1 + $0x170] sm:$0xf0] }
  0x96   : > { %v17349_v47 = vld [vmem:[%s27770_s1 + $0x264] sm:$0xf]  ;;  %v11308_v16 = vor.u32 %v17317_v55, %v11305_v58  ;;  %v11161_v22 = vld [vmem:[%s27770_s1 + $0x50] sm:$0xf0] }
  0x97   : > { %1329 = vmatpush.bf16.msrb.mxu1 %v11324_v46  ;;  %1343 = vmatpush.bf16.msrb.mxu2 %v11452_v23  ;;  %v11436_v28 = vor.u32 %v17349_v47, %v11433_v17  ;;  %v17381_v59 = vld [vmem:[%s27770_s1 + $0x364] sm:$0xf]  ;;  %v11289_v29 = vld [vmem:[%s27770_s1 + $0x150] sm:$0xf0] }
  0x98   : > { %v11564_v51 = vor.u32 %v17381_v59, %v11561_v10  ;;  %v17281_v53 = vld [vmem:[%s27770_s1 + $0x44] sm:$0xf]  ;;  %v11417_v41 = vld [vmem:[%s27770_s1 + $0x250] sm:$0xf0] }
  0x99   : > { %1315 = vmatpush.bf16.msrb.mxu0 %v11196_v45  ;;  %1357 = vmatpush.bf16.msrb.mxu3 %v11580_v52  ;;  %v17313_v61 = vld [vmem:[%s27770_s1 + $0x144] sm:$0xf]  ;;  %v11164_v45 = vor.u32 %v17281_v53, %v11161_v22  ;;  %v11545_v23 = vld [vmem:[%s27770_s1 + $0x350] sm:$0xf0] }
  0x9a   : > { %v17345_v39 = vld [vmem:[%s27770_s1 + $0x244] sm:$0xf]  ;;  %v11292_v2 = vor.u32 %v17313_v61, %v11289_v29  ;;  %v11145_v3 = vld [vmem:[%s27770_s1 + $0x30] sm:$0xf0] }
  0x9b   : > { %1330 = vmatpush.bf16.msrb.mxu1 %v11308_v16  ;;  %1344 = vmatpush.bf16.msrb.mxu2 %v11436_v28  ;;  %v11420_v63 = vor.u32 %v17345_v39, %v11417_v41  ;;  %v17377_v46 = vld [vmem:[%s27770_s1 + $0x344] sm:$0xf]  ;;  %v11273_v58 = vld [vmem:[%s27770_s1 + $0x130] sm:$0xf0] }
  0x9c   : > { %v11548_v52 = vor.u32 %v17377_v46, %v11545_v23  ;;  %v17277_v34 = vld [vmem:[%s27770_s1 + $0x24] sm:$0xf]  ;;  %v11401_v17 = vld [vmem:[%s27770_s1 + $0x230] sm:$0xf0] }
  0x9d   : > { %1316 = vmatpush.bf16.msrb.mxu0 %v11180_v60  ;;  %1358 = vmatpush.bf16.msrb.mxu3 %v11564_v51  ;;  %v17309_v55 = vld [vmem:[%s27770_s1 + $0x124] sm:$0xf]  ;;  %v11148_v60 = vor.u32 %v17277_v34, %v11145_v3  ;;  %v11529_v10 = vld [vmem:[%s27770_s1 + $0x330] sm:$0xf0] }
  0x9e   : > { %v17341_v47 = vld [vmem:[%s27770_s1 + $0x224] sm:$0xf]  ;;  %v11276_v16 = vor.u32 %v17309_v55, %v11273_v58  ;;  %v11129_v22 = vld [vmem:[%s27770_s1 + $0x10] sm:$0xf0] }
  0x9f   : > { %1331 = vmatpush.bf16.msrb.mxu1 %v11292_v2  ;;  %1345 = vmatpush.bf16.msrb.mxu2 %v11420_v63  ;;  %v11404_v28 = vor.u32 %v17341_v47, %v11401_v17  ;;  %v17373_v59 = vld [vmem:[%s27770_s1 + $0x324] sm:$0xf]  ;;  %v11257_v29 = vld [vmem:[%s27770_s1 + $0x110] sm:$0xf0] }
  0xa0   : > { %v11532_v51 = vor.u32 %v17373_v59, %v11529_v10  ;;  %v17273_v53 = vld [vmem:[%s27770_s1 + $0x4] sm:$0xf]  ;;  %v11385_v41 = vld [vmem:[%s27770_s1 + $0x210] sm:$0xf0] }
  0xa1   : > { %1317 = vmatpush.bf16.msrb.mxu0 %v11164_v45  ;;  %1359 = vmatpush.bf16.msrb.mxu3 %v11548_v52  ;;  %v17305_v61 = vld [vmem:[%s27770_s1 + $0x104] sm:$0xf]  ;;  %v11132_v45 = vor.u32 %v17273_v53, %v11129_v22  ;;  %v11513_v23 = vld [vmem:[%s27770_s1 + $0x310] sm:$0xf0]  ;;  %v11375_v53 = vld [vmem:[%s27770_s1 + $0x1e8] sm:$0xf] }
  0xa2   : > { %v17337_v39 = vld [vmem:[%s27770_s1 + $0x204] sm:$0xf]  ;;  %v11260_v2 = vor.u32 %v17305_v61, %v11257_v29  ;;  %v17336_v22 = vld [vmem:[%s27770_s1 + $0x1f4] sm:$0xf0]  ;;  %v11503_v29 = vld [vmem:[%s27770_s1 + $0x2e8] sm:$0xf] }
  0xa3   : > { %1332 = vmatpush.bf16.msrb.mxu1 %v11276_v16  ;;  %1346 = vmatpush.bf16.msrb.mxu2 %v11404_v28  ;;  %v11388_v63 = vor.u32 %v17337_v39, %v11385_v41  ;;  %v17369_v46 = vld [vmem:[%s27770_s1 + $0x304] sm:$0xf]  ;;  %v11247_v16 = vld [vmem:[%s27770_s1 + $0xe8] sm:$0xf]  ;;  %v17368_v39 = vld [vmem:[%s27770_s1 + $0x2f4] sm:$0xf0]  ;;  %v11376_v27 = vor.u32 %v17336_v22, %v11375_v53 }
  0xa4   : > { %v11516_v52 = vor.u32 %v17369_v46, %v11513_v23  ;;  %v11631_v41 = vld [vmem:[%s27770_s1 + $0x3e8] sm:$0xf]  ;;  %v17364_v53 = vld [vmem:[%s27770_s1 + $0x2d4] sm:$0xf0] }
  0xa5   : > { %1318 = vmatpush.bf16.msrb.mxu0 %v11148_v60  ;;  %1360 = vmatpush.bf16.msrb.mxu3 %v11532_v51  ;;  %v17304_v51 = vld [vmem:[%s27770_s1 + $0xf4] sm:$0xf0]  ;;  %v11615_v22 = vld [vmem:[%s27770_s1 + $0x3c8] sm:$0xf] }
  0xa6   : > { %v11248_v49 = vor.u32 %v17304_v51, %v11247_v16  ;;  %v17332_v16 = vld [vmem:[%s27770_s1 + $0x1d4] sm:$0xf0]  ;;  %v11487_v51 = vld [vmem:[%s27770_s1 + $0x2c8] sm:$0xf] }
  0xa7   : > { %1333 = vmatpush.bf16.msrb.mxu1 %v11260_v2  ;;  %1347 = vmatpush.bf16.msrb.mxu2 %v11388_v63 }
  0xa9   : > { %1319 = vmatpush.bf16.msrb.mxu0 %v11132_v45  ;;  %1361 = vmatpush.bf16.msrb.mxu3 %v11516_v52  ;;  %v17400_v52 = vld [vmem:[%s27770_s1 + $0x3f4] sm:$0xf0] }
  0xb8   : > { %v18594_v34 = vpop.trf.xlu0 }
  0xb9   : > { %v18598_v55 = vunpack.i.h.bf16 %v18594_v34  ;;  %v18595_v60 = vunpack.i.l.bf16 %v18594_v34 }
  0xba   : > { %v18636_v3 = vpop.trf.xlu1 }
  0xbb   : > { %v18640_v58 = vunpack.i.h.bf16 %v18636_v3  ;;  %v18637_v47 = vunpack.i.l.bf16 %v18636_v3  ;;  %v479_v2 = vmax.f32 %v18598_v55, 0.0  ;;  %v478_v63 = vmax.f32 %v18595_v60, 0.0  ;;  %v11231_v55 = vld [vmem:[%s27770_s1 + $0xc8] sm:$0xf]  ;;  %v17300_v60 = vld [vmem:[%s27770_s1 + $0xd4] sm:$0xf0] }
  0xbd   : > { %v477_v34 = vmax.f32 %v18640_v58, 0.0  ;;  %v476_v3 = vmax.f32 %v18637_v47, 0.0  ;;  %v11504_v47 = vor.u32 %v17368_v39, %v11503_v29  ;;  %v11232_v29 = vor.u32 %v17300_v60, %v11231_v55  ;;  %v11199_v55 = vld [vmem:[%s27770_s1 + $0x88] sm:$0xf]  ;;  %v17292_v60 = vld [vmem:[%s27770_s1 + $0x94] sm:$0xf0] }
  0xc0   : > { %v18599_v17 = vpop.trf.xlu0 }
  0xc1   : > { %v18603_v28 = vunpack.i.h.bf16 %v18599_v17  ;;  %v18600_v59 = vunpack.i.l.bf16 %v18599_v17 }
  0xc2   : > { %v18641_v10 = vpop.trf.xlu1 }
  0xc3   : > { %v18645_v61 = vunpack.i.h.bf16 %v18641_v10  ;;  %v18642_v45 = vunpack.i.l.bf16 %v18641_v10  ;;  %v483_v46 = vmax.f32 %v18603_v28, 0.0  ;;  %v482_v23 = vmax.f32 %v18600_v59, 0.0 }
  0xc4   : > { %v11632_v59 = vor.u32 %v17400_v52, %v11631_v41  ;;  %v11215_v41 = vld [vmem:[%s27770_s1 + $0xa8] sm:$0xf]  ;;  %v17360_v52 = vld [vmem:[%s27770_s1 + $0x2b4] sm:$0xf0] }
  0xc5   : > { %v481_v17 = vmax.f32 %v18645_v61, 0.0  ;;  %v480_v10 = vmax.f32 %v18642_v45, 0.0  ;;  %v19364_v33 = vpack.c.bf16 %v482_v23, %v478_v63  ;;  %v19366_v54 = vpack.c.bf16 %v483_v46, %v479_v2  ;;  %v11359_v61 = vld [vmem:[%s27770_s1 + $0x1c8] sm:$0xf]  ;;  %v17396_v45 = vld [vmem:[%s27770_s1 + $0x3d4] sm:$0xf0] }
  0xc6   : > { %v11360_v39 = vor.u32 %v17332_v16, %v11359_v61  ;;  %v17296_v2 = vld [vmem:[%s27770_s1 + $0xb4] sm:$0xf0]  ;;  %v11488_v63 = vor.u32 %v17364_v53, %v11487_v51  ;;  %v11616_v46 = vor.u32 %v17396_v45, %v11615_v22  ;;  %v11343_v23 = vld [vmem:[%s27770_s1 + $0x1a8] sm:$0xf] }
  0xc7   : > { %v19374_v28 = vpack.c.bf16 %v480_v10, %v476_v3  ;;  %v19376_v58 = vpack.c.bf16 %v481_v17, %v477_v34  ;;  %1292 = vmatmul.bf16.vlgmr.msra.gmra.mxu2 %v19364_v33  ;;  %1306 = vmatmul.bf16.vlgmr.msra.gmra.mxu3 %v19366_v54  ;;  %v11599_v34 = vld [vmem:[%s27770_s1 + $0x3a8] sm:$0xf]  ;;  %v17392_v3 = vld [vmem:[%s27770_s1 + $0x3b4] sm:$0xf0]  ;;  %v11216_v17 = vor.u32 %v17296_v2, %v11215_v41 }
  0xc8   : > { %1396 = vmatpush.bf16.msra.mxu2 %v11504_v47  ;;  %1410 = vmatpush.bf16.msra.mxu3 %v11632_v59  ;;  %v11600_v59 = vor.u32 %v17392_v3, %v11599_v34  ;;  %v11327_v61 = vld [vmem:[%s27770_s1 + $0x188] sm:$0xf]  ;;  %v17324_v16 = vld [vmem:[%s27770_s1 + $0x194] sm:$0xf0] }
  0xc9   : > { %1264 = vmatmul.bf16.vlgmr.msra.gmra.mxu0 %v19374_v28  ;;  %1278 = vmatmul.bf16.vlgmr.msra.gmra.mxu1 %v19376_v58  ;;  %v11455_v51 = vld [vmem:[%s27770_s1 + $0x288] sm:$0xf]  ;;  %v17356_v53 = vld [vmem:[%s27770_s1 + $0x294] sm:$0xf0] }
  0xca   : > { %1368 = vmatpush.bf16.msra.mxu0 %v11248_v49  ;;  %1382 = vmatpush.bf16.msra.mxu1 %v11376_v27  ;;  %v17328_v27 = vld [vmem:[%s27770_s1 + $0x1b4] sm:$0xf0]  ;;  %v11471_v49 = vld [vmem:[%s27770_s1 + $0x2a8] sm:$0xf] }
  0xcb   : > { %v11344_v10 = vor.u32 %v17328_v27, %v11343_v23  ;;  %v11472_v47 = vor.u32 %v17360_v52, %v11471_v49  ;;  %v11583_v22 = vld [vmem:[%s27770_s1 + $0x388] sm:$0xf]  ;;  %v17388_v45 = vld [vmem:[%s27770_s1 + $0x394] sm:$0xf0] }
  0xcc   : > { %1397 = vmatpush.bf16.msra.mxu2 %v11488_v63  ;;  %1411 = vmatpush.bf16.msra.mxu3 %v11616_v46  ;;  %v11183_v41 = vld [vmem:[%s27770_s1 + $0x68] sm:$0xf]  ;;  %v17288_v2 = vld [vmem:[%s27770_s1 + $0x74] sm:$0xf0]  ;;  %v11456_v63 = vor.u32 %v17356_v53, %v11455_v51  ;;  %v11584_v46 = vor.u32 %v17388_v45, %v11583_v22 }
  0xcd   : > { %v11311_v23 = vld [vmem:[%s27770_s1 + $0x168] sm:$0xf]  ;;  %v17320_v27 = vld [vmem:[%s27770_s1 + $0x174] sm:$0xf0] }
  0xce   : > { %1369 = vmatpush.bf16.msra.mxu0 %v11232_v29  ;;  %1383 = vmatpush.bf16.msra.mxu1 %v11360_v39  ;;  %v11200_v29 = vor.u32 %v17292_v60, %v11199_v55  ;;  %v11328_v39 = vor.u32 %v17324_v16, %v11327_v61  ;;  %v11439_v49 = vld [vmem:[%s27770_s1 + $0x268] sm:$0xf]  ;;  %v17352_v52 = vld [vmem:[%s27770_s1 + $0x274] sm:$0xf0] }
  0xcf   : > { %v11567_v34 = vld [vmem:[%s27770_s1 + $0x368] sm:$0xf]  ;;  %v17384_v3 = vld [vmem:[%s27770_s1 + $0x374] sm:$0xf0] }
  0xd0   : > { %1398 = vmatpush.bf16.msra.mxu2 %v11472_v47  ;;  %1412 = vmatpush.bf16.msra.mxu3 %v11600_v59  ;;  %v11167_v55 = vld [vmem:[%s27770_s1 + $0x48] sm:$0xf]  ;;  %v17284_v60 = vld [vmem:[%s27770_s1 + $0x54] sm:$0xf0]  ;;  %v11440_v47 = vor.u32 %v17352_v52, %v11439_v49  ;;  %v11568_v59 = vor.u32 %v17384_v3, %v11567_v34 }
  0xd1   : > { %v11295_v61 = vld [vmem:[%s27770_s1 + $0x148] sm:$0xf]  ;;  %v17316_v16 = vld [vmem:[%s27770_s1 + $0x154] sm:$0xf0] }
  0xd2   : > { %1370 = vmatpush.bf16.msra.mxu0 %v11216_v17  ;;  %1384 = vmatpush.bf16.msra.mxu1 %v11344_v10  ;;  %v11184_v17 = vor.u32 %v17288_v2, %v11183_v41  ;;  %v11312_v10 = vor.u32 %v17320_v27, %v11311_v23  ;;  %v11423_v51 = vld [vmem:[%s27770_s1 + $0x248] sm:$0xf]  ;;  %v17348_v53 = vld [vmem:[%s27770_s1 + $0x254] sm:$0xf0] }
  0xd3   : > { %v11551_v22 = vld [vmem:[%s27770_s1 + $0x348] sm:$0xf]  ;;  %v17380_v45 = vld [vmem:[%s27770_s1 + $0x354] sm:$0xf0] }
  0xd4   : > { %1399 = vmatpush.bf16.msra.mxu2 %v11456_v63  ;;  %1413 = vmatpush.bf16.msra.mxu3 %v11584_v46  ;;  %v11151_v41 = vld [vmem:[%s27770_s1 + $0x28] sm:$0xf]  ;;  %v17280_v2 = vld [vmem:[%s27770_s1 + $0x34] sm:$0xf0]  ;;  %v11424_v63 = vor.u32 %v17348_v53, %v11423_v51  ;;  %v11552_v46 = vor.u32 %v17380_v45, %v11551_v22 }
  0xd5   : > { %v11279_v23 = vld [vmem:[%s27770_s1 + $0x128] sm:$0xf]  ;;  %v17312_v27 = vld [vmem:[%s27770_s1 + $0x134] sm:$0xf0] }
  0xd6   : > { %1371 = vmatpush.bf16.msra.mxu0 %v11200_v29  ;;  %1385 = vmatpush.bf16.msra.mxu1 %v11328_v39  ;;  %v11168_v29 = vor.u32 %v17284_v60, %v11167_v55  ;;  %v11296_v39 = vor.u32 %v17316_v16, %v11295_v61  ;;  %v11407_v49 = vld [vmem:[%s27770_s1 + $0x228] sm:$0xf]  ;;  %v17344_v52 = vld [vmem:[%s27770_s1 + $0x234] sm:$0xf0]  ;;  %v11280_v55 = vor.u32 %v17312_v27, %v11279_v23  ;;  %v11505_v27 = vld [vmem:[%s27770_s1 + $0x2f8] sm:$0xf0] }
  0xd7   : > { %1348 = vmatmul.bf16.vlgmr.msrb.gmra.mxu2 %v19364_v33  ;;  %1362 = vmatmul.bf16.vlgmr.msrb.gmra.mxu3 %v19366_v54  ;;  %v11535_v34 = vld [vmem:[%s27770_s1 + $0x328] sm:$0xf]  ;;  %v17376_v3 = vld [vmem:[%s27770_s1 + $0x334] sm:$0xf0]  ;;  %v11408_v61 = vor.u32 %v17344_v52, %v11407_v49  ;;  %v17398_v49 = vld [vmem:[%s27770_s1 + $0x3ec] sm:$0xf] }
  0xd8   : > { %1400 = vmatpush.bf16.msra.mxu2 %v11440_v47  ;;  %1414 = vmatpush.bf16.msra.mxu3 %v11568_v59  ;;  %v17276_v60 = vld [vmem:[%s27770_s1 + $0x14] sm:$0xf0]  ;;  %v11263_v47 = vld [vmem:[%s27770_s1 + $0x108] sm:$0xf]  ;;  %v11536_v16 = vor.u32 %v17376_v3, %v11535_v34  ;;  %v11633_v52 = vld [vmem:[%s27770_s1 + $0x3f8] sm:$0xf0] }
  0xd9   : > { %1320 = vmatmul.bf16.vlgmr.msrb.gmra.mxu0 %v19374_v28  ;;  %1334 = vmatmul.bf16.vlgmr.msrb.gmra.mxu1 %v19376_v58  ;;  %v17308_v59 = vld [vmem:[%s27770_s1 + $0x114] sm:$0xf0]  ;;  %v11391_v51 = vld [vmem:[%s27770_s1 + $0x208] sm:$0xf] }
  0xda   : > { %1372 = vmatpush.bf16.msra.mxu0 %v11184_v17  ;;  %1386 = vmatpush.bf16.msra.mxu1 %v11312_v10  ;;  %v11135_v17 = vld [vmem:[%s27770_s1 + $0x8] sm:$0xf]  ;;  %v11152_v10 = vor.u32 %v17280_v2, %v11151_v41  ;;  %v17340_v53 = vld [vmem:[%s27770_s1 + $0x214] sm:$0xf0]  ;;  %v17334_v41 = vld [vmem:[%s27770_s1 + $0x1ec] sm:$0xf]  ;;  %v11264_v23 = vor.u32 %v17308_v59, %v11263_v47  ;;  %v11636_v59 = vor.u32 %v17398_v49, %v11633_v52 }
  0xdb   : > { %v11519_v22 = vld [vmem:[%s27770_s1 + $0x308] sm:$0xf]  ;;  %v17372_v45 = vld [vmem:[%s27770_s1 + $0x314] sm:$0xf0]  ;;  %v11377_v2 = vld [vmem:[%s27770_s1 + $0x1f8] sm:$0xf0]  ;;  %v11392_v34 = vor.u32 %v17340_v53, %v11391_v51 }
  0xdc   : > { %1401 = vmatpush.bf16.msra.mxu2 %v11424_v63  ;;  %1415 = vmatpush.bf16.msra.mxu3 %v11552_v46  ;;  %v17366_v63 = vld [vmem:[%s27770_s1 + $0x2ec] sm:$0xf]  ;;  %v11136_v46 = vor.u32 %v17276_v60, %v11135_v17  ;;  %v11520_v3 = vor.u32 %v17372_v45, %v11519_v22  ;;  %v11233_v60 = vld [vmem:[%s27770_s1 + $0xd8] sm:$0xf0] }
  0xdd   : > { %v17298_v17 = vld [vmem:[%s27770_s1 + $0xcc] sm:$0xf]  ;;  %v11508_v47 = vor.u32 %v17366_v63, %v11505_v27  ;;  %v11489_v51 = vld [vmem:[%s27770_s1 + $0x2d8] sm:$0xf0] }
  0xde   : > { %1373 = vmatpush.bf16.msra.mxu0 %v11168_v29  ;;  %1387 = vmatpush.bf16.msra.mxu1 %v11296_v39  ;;  %v17302_v29 = vld [vmem:[%s27770_s1 + $0xec] sm:$0xf]  ;;  %v11249_v39 = vld [vmem:[%s27770_s1 + $0xf8] sm:$0xf0]  ;;  %v11236_v45 = vor.u32 %v17298_v17, %v11233_v60 }
  0xdf   : > { %v17394_v53 = vld [vmem:[%s27770_s1 + $0x3cc] sm:$0xf]  ;;  %v11617_v22 = vld [vmem:[%s27770_s1 + $0x3d8] sm:$0xf0] }
  0xe0   : > { %1402 = vmatpush.bf16.msra.mxu2 %v11408_v61  ;;  %1416 = vmatpush.bf16.msra.mxu3 %v11536_v16  ;;  %v11361_v61 = vld [vmem:[%s27770_s1 + $0x1d8] sm:$0xf0]  ;;  %v17362_v16 = vld [vmem:[%s27770_s1 + $0x2cc] sm:$0xf]  ;;  %v11620_v63 = vor.u32 %v17394_v53, %v11617_v22 }
  0xe1   : > { %v11473_v27 = vld [vmem:[%s27770_s1 + $0x2b8] sm:$0xf0]  ;;  %v17390_v49 = vld [vmem:[%s27770_s1 + $0x3ac] sm:$0xf] }
  0xe2   : > { %1374 = vmatpush.bf16.msra.mxu0 %v11152_v10  ;;  %1388 = vmatpush.bf16.msra.mxu1 %v11280_v55  ;;  %v11252_v10 = vor.u32 %v17302_v29, %v11249_v39  ;;  %v11380_v55 = vor.u32 %v17334_v41, %v11377_v2  ;;  %v11364_v29 = vor.u32 %v17330_v48, %v11361_v61  ;;  %v17294_v39 = vld [vmem:[%s27770_s1 + $0xac] sm:$0xf]  ;;  %v11217_v41 = vld [vmem:[%s27770_s1 + $0xb8] sm:$0xf0] }
  0xe3   : > { %v11492_v2 = vor.u32 %v17362_v16, %v11489_v51  ;;  %v11345_v48 = vld [vmem:[%s27770_s1 + $0x1b8] sm:$0xf0]  ;;  %v17354_v61 = vld [vmem:[%s27770_s1 + $0x28c] sm:$0xf] }
  0xe4   : > { %1403 = vmatpush.bf16.msra.mxu2 %v11392_v34  ;;  %1417 = vmatpush.bf16.msra.mxu3 %v11520_v3  ;;  %v11601_v52 = vld [vmem:[%s27770_s1 + $0x3b8] sm:$0xf0]  ;;  %v11220_v34 = vor.u32 %v17294_v39, %v11217_v41  ;;  %v17386_v51 = vld [vmem:[%s27770_s1 + $0x38c] sm:$0xf] }
  0xe5   : > { %v11604_v60 = vor.u32 %v17390_v49, %v11601_v52  ;;  %v11457_v16 = vld [vmem:[%s27770_s1 + $0x298] sm:$0xf0] }
  0xe6   : > { %1375 = vmatpush.bf16.msra.mxu0 %v11136_v46  ;;  %1389 = vmatpush.bf16.msra.mxu1 %v11264_v23  ;;  %v17326_v46 = vld [vmem:[%s27770_s1 + $0x1ac] sm:$0xf]  ;;  %v11585_v53 = vld [vmem:[%s27770_s1 + $0x398] sm:$0xf0]  ;;  %v11460_v41 = vor.u32 %v17354_v61, %v11457_v16 }
  0xe7   : > { %v17358_v23 = vld [vmem:[%s27770_s1 + $0x2ac] sm:$0xf]  ;;  %1404 = vmatmul.bf16.vlgmr.msra.gmra.mxu2 %v19364_v33  ;;  %1418 = vmatmul.bf16.vlgmr.msra.gmra.mxu3 %v19366_v54  ;;  %v11348_v3 = vor.u32 %v17326_v46, %v11345_v48  ;;  %v11185_v39 = vld [vmem:[%s27770_s1 + $0x78] sm:$0xf0] }
  0xe8   : > { %1452 = vmatpush.bf16.msrb.mxu2 %v11508_v47  ;;  %1466 = vmatpush.bf16.msrb.mxu3 %v11636_v59  ;;  %v11476_v17 = vor.u32 %v17358_v23, %v11473_v27  ;;  %v17322_v47 = vld [vmem:[%s27770_s1 + $0x18c] sm:$0xf]  ;;  %v11329_v59 = vld [vmem:[%s27770_s1 + $0x198] sm:$0xf0] }
  0xe9   : > { %1376 = vmatmul.bf16.vlgmr.msra.gmra.mxu0 %v19374_v28  ;;  %1390 = vmatmul.bf16.vlgmr.msra.gmra.mxu1 %v19376_v58  ;;  %v11313_v46 = vld [vmem:[%s27770_s1 + $0x178] sm:$0xf0]  ;;  %v17350_v48 = vld [vmem:[%s27770_s1 + $0x26c] sm:$0xf] }
  0xea   : > { %1424 = vmatpush.bf16.msrb.mxu0 %v11252_v10  ;;  %1438 = vmatpush.bf16.msrb.mxu1 %v11380_v55  ;;  %v17290_v10 = vld [vmem:[%s27770_s1 + $0x8c] sm:$0xf]  ;;  %v11201_v55 = vld [vmem:[%s27770_s1 + $0x98] sm:$0xf0] }
  0xeb   : > { %v11204_v22 = vor.u32 %v17290_v10, %v11201_v55  ;;  %v11441_v23 = vld [vmem:[%s27770_s1 + $0x278] sm:$0xf0]  ;;  %v17382_v27 = vld [vmem:[%s27770_s1 + $0x36c] sm:$0xf] }
  0xec   : > { %1453 = vmatpush.bf16.msrb.mxu2 %v11492_v2  ;;  %1467 = vmatpush.bf16.msrb.mxu3 %v11620_v63  ;;  %v11588_v2 = vor.u32 %v17386_v51, %v11585_v53  ;;  %v17318_v63 = vld [vmem:[%s27770_s1 + $0x16c] sm:$0xf]  ;;  %v11569_v49 = vld [vmem:[%s27770_s1 + $0x378] sm:$0xf0]  ;;  %v11444_v55 = vor.u32 %v17350_v48, %v11441_v23 }
  0xed   : > { %v11169_v10 = vld [vmem:[%s27770_s1 + $0x58] sm:$0xf0]  ;;  %v17378_v16 = vld [vmem:[%s27770_s1 + $0x34c] sm:$0xf] }
  0xee   : > { %1425 = vmatpush.bf16.msrb.mxu0 %v11236_v45  ;;  %1439 = vmatpush.bf16.msrb.mxu1 %v11364_v29  ;;  %v11332_v45 = vor.u32 %v17322_v47, %v11329_v59  ;;  %v17286_v29 = vld [vmem:[%s27770_s1 + $0x6c] sm:$0xf]  ;;  %v11297_v47 = vld [vmem:[%s27770_s1 + $0x158] sm:$0xf0] }
  0xef   : > { %v11188_v52 = vor.u32 %v17286_v29, %v11185_v39  ;;  %v17346_v59 = vld [vmem:[%s27770_s1 + $0x24c] sm:$0xf]  ;;  %v11425_v61 = vld [vmem:[%s27770_s1 + $0x258] sm:$0xf0] }
  0xf0   : > { %1454 = vmatpush.bf16.msrb.mxu2 %v11476_v17  ;;  %1468 = vmatpush.bf16.msrb.mxu3 %v11604_v60  ;;  %v11572_v17 = vor.u32 %v17382_v27, %v11569_v49  ;;  %v17314_v60 = vld [vmem:[%s27770_s1 + $0x14c] sm:$0xf]  ;;  %v11553_v51 = vld [vmem:[%s27770_s1 + $0x358] sm:$0xf0]  ;;  %v11428_v39 = vor.u32 %v17346_v59, %v11425_v61 }
  0xf1   : > { %v11153_v29 = vld [vmem:[%s27770_s1 + $0x38] sm:$0xf0]  ;;  %v17374_v23 = vld [vmem:[%s27770_s1 + $0x32c] sm:$0xf] }
  0xf2   : > { %1426 = vmatpush.bf16.msrb.mxu0 %v11220_v34  ;;  %1440 = vmatpush.bf16.msrb.mxu1 %v11348_v3  ;;  %v11316_v34 = vor.u32 %v17318_v63, %v11313_v46  ;;  %v17282_v3 = vld [vmem:[%s27770_s1 + $0x4c] sm:$0xf]  ;;  %v11281_v63 = vld [vmem:[%s27770_s1 + $0x138] sm:$0xf0] }
  0xf3   : > { %v11172_v53 = vor.u32 %v17282_v3, %v11169_v10  ;;  %v17342_v46 = vld [vmem:[%s27770_s1 + $0x22c] sm:$0xf]  ;;  %v11409_v48 = vld [vmem:[%s27770_s1 + $0x238] sm:$0xf0] }
  0xf4   : > { %1455 = vmatpush.bf16.msrb.mxu2 %v11460_v41  ;;  %1469 = vmatpush.bf16.msrb.mxu3 %v11588_v2  ;;  %v11556_v41 = vor.u32 %v17378_v16, %v11553_v51  ;;  %v17310_v2 = vld [vmem:[%s27770_s1 + $0x12c] sm:$0xf]  ;;  %v11537_v27 = vld [vmem:[%s27770_s1 + $0x338] sm:$0xf0]  ;;  %v11879_v51 = vld [vmem:[%s27770_s1 + $0x4e0] sm:$0xf] }
  0xf5   : > { %v17274_v49 = vld [vmem:[%s27770_s1 + $0xc] sm:$0xf]  ;;  %v11137_v3 = vld [vmem:[%s27770_s1 + $0x18] sm:$0xf0] }
  0xf6   : > { %1427 = vmatpush.bf16.msrb.mxu0 %v11204_v22  ;;  %1441 = vmatpush.bf16.msrb.mxu1 %v11332_v45  ;;  %v11300_v22 = vor.u32 %v17314_v60, %v11297_v47  ;;  %v17278_v45 = vld [vmem:[%s27770_s1 + $0x2c] sm:$0xf]  ;;  %v11540_v60 = vor.u32 %v17374_v23, %v11537_v27  ;;  %v11393_v59 = vld [vmem:[%s27770_s1 + $0x218] sm:$0xf0] }
  0xf7   : > { %v17306_v10 = vld [vmem:[%s27770_s1 + $0x10c] sm:$0xf]  ;;  %v11521_v16 = vld [vmem:[%s27770_s1 + $0x318] sm:$0xf0] }
  0xf8   : > { %1456 = vmatpush.bf16.msrb.mxu2 %v11444_v55  ;;  %1470 = vmatpush.bf16.msrb.mxu3 %v11572_v17  ;;  %v11265_v55 = vld [vmem:[%s27770_s1 + $0x118] sm:$0xf0]  ;;  %v11412_v17 = vor.u32 %v17342_v46, %v11409_v48  ;;  %v17338_v47 = vld [vmem:[%s27770_s1 + $0x20c] sm:$0xf]  ;;  %v17527_v46 = vld [vmem:[%s27770_s1 + $0x7ec] sm:$0xf0] }
  0xf9   : > { %v17370_v61 = vld [vmem:[%s27770_s1 + $0x30c] sm:$0xf]  ;;  %v11396_v48 = vor.u32 %v17338_v47, %v11393_v59  ;;  %v17491_v47 = vld [vmem:[%s27770_s1 + $0x6cc] sm:$0xf0]  ;;  %v12247_v59 = vld [vmem:[%s27770_s1 + $0x7c0] sm:$0xf] }
  0xfa   : > { %1428 = vmatpush.bf16.msrb.mxu0 %v11188_v52  ;;  %1442 = vmatpush.bf16.msrb.mxu1 %v11316_v34  ;;  %v11156_v52 = vor.u32 %v17278_v45, %v11153_v29  ;;  %v11284_v34 = vor.u32 %v17310_v2, %v11281_v63  ;;  %v17463_v45 = vld [vmem:[%s27770_s1 + $0x5ec] sm:$0xf0]  ;;  %v12135_v29 = vld [vmem:[%s27770_s1 + $0x6e0] sm:$0xf]  ;;  %v11524_v23 = vor.u32 %v17370_v61, %v11521_v16 }
  0xfb   : > { %v17495_v2 = vld [vmem:[%s27770_s1 + $0x6ec] sm:$0xf0]  ;;  %v12263_v63 = vld [vmem:[%s27770_s1 + $0x7e0] sm:$0xf] }
  0xfc   : > { %1457 = vmatpush.bf16.msrb.mxu2 %v11428_v39  ;;  %1471 = vmatpush.bf16.msrb.mxu3 %v11556_v41  ;;  %v11140_v39 = vor.u32 %v17274_v49, %v11137_v3  ;;  %v11268_v41 = vor.u32 %v17306_v10, %v11265_v55  ;;  %v11863_v49 = vld [vmem:[%s27770_s1 + $0x4c0] sm:$0xf]  ;;  %v12136_v3 = vor.u32 %v17495_v2, %v12135_v29  ;;  %v17523_v61 = vld [vmem:[%s27770_s1 + $0x7cc] sm:$0xf0] }
  0xfd   : > { %v12264_v10 = vor.u32 %v17527_v46, %v12263_v63  ;;  %v11991_v55 = vld [vmem:[%s27770_s1 + $0x5c0] sm:$0xf]  ;;  %v12248_v29 = vor.u32 %v17523_v61, %v12247_v59  ;;  %v17487_v63 = vld [vmem:[%s27770_s1 + $0x6ac] sm:$0xf0] }
  0xfe   : > { %1429 = vmatpush.bf16.msrb.mxu0 %v11172_v53  ;;  %1443 = vmatpush.bf16.msrb.mxu1 %v11300_v22  ;;  %v17431_v53 = vld [vmem:[%s27770_s1 + $0x4ec] sm:$0xf0]  ;;  %v12007_v22 = vld [vmem:[%s27770_s1 + $0x5e0] sm:$0xf] }
  0xff   : > { %v11880_v27 = vor.u32 %v17431_v53, %v11879_v51  ;;  %v11847_v53 = vld [vmem:[%s27770_s1 + $0x4a0] sm:$0xf]  ;;  %v17515_v59 = vld [vmem:[%s27770_s1 + $0x78c] sm:$0xf0] }
 0x100   : > { %1458 = vmatpush.bf16.msrb.mxu2 %v11412_v17  ;;  %1472 = vmatpush.bf16.msrb.mxu3 %v11540_v60  ;;  %v17459_v17 = vld [vmem:[%s27770_s1 + $0x5cc] sm:$0xf0]  ;;  %v12119_v60 = vld [vmem:[%s27770_s1 + $0x6c0] sm:$0xf] }
 0x101   : > { %v11992_v51 = vor.u32 %v17459_v17, %v11991_v55  ;;  %v12103_v2 = vld [vmem:[%s27770_s1 + $0x6a0] sm:$0xf]  ;;  %v17451_v55 = vld [vmem:[%s27770_s1 + $0x58c] sm:$0xf0] }
 0x102   : > { %1430 = vmatpush.bf16.msrb.mxu0 %v11156_v52  ;;  %1444 = vmatpush.bf16.msrb.mxu1 %v11284_v34  ;;  %v12008_v52 = vor.u32 %v17463_v45, %v12007_v22  ;;  %v17427_v34 = vld [vmem:[%s27770_s1 + $0x4cc] sm:$0xf0]  ;;  %v12120_v45 = vor.u32 %v17491_v47, %v12119_v60  ;;  %v12231_v46 = vld [vmem:[%s27770_s1 + $0x7a0] sm:$0xf] }
 0x103   : > { %v11864_v16 = vor.u32 %v17427_v34, %v11863_v49  ;;  %v17423_v22 = vld [vmem:[%s27770_s1 + $0x4ac] sm:$0xf0]  ;;  %v12104_v34 = vor.u32 %v17487_v63, %v12103_v2  ;;  %v12087_v17 = vld [vmem:[%s27770_s1 + $0x680] sm:$0xf] }
 0x104   : > { %1459 = vmatpush.bf16.msrb.mxu2 %v11396_v48  ;;  %1473 = vmatpush.bf16.msrb.mxu3 %v11524_v23  ;;  %v17519_v48 = vld [vmem:[%s27770_s1 + $0x7ac] sm:$0xf0]  ;;  %v11848_v23 = vor.u32 %v17423_v22, %v11847_v53  ;;  %v12215_v47 = vld [vmem:[%s27770_s1 + $0x780] sm:$0xf] }
 0x105   : > { %v17419_v49 = vld [vmem:[%s27770_s1 + $0x48c] sm:$0xf0]  ;;  %v12199_v63 = vld [vmem:[%s27770_s1 + $0x760] sm:$0xf] }
 0x106   : > { %1431 = vmatpush.bf16.msrb.mxu0 %v11140_v39  ;;  %1445 = vmatpush.bf16.msrb.mxu1 %v11268_v41  ;;  %v11975_v39 = vld [vmem:[%s27770_s1 + $0x5a0] sm:$0xf]  ;;  %v17455_v41 = vld [vmem:[%s27770_s1 + $0x5ac] sm:$0xf0] }
 0x107   : > { %1460 = vmatmul.bf16.vlgmr.msrb.gmra.mxu2 %v19364_v33  ;;  %1474 = vmatmul.bf16.vlgmr.msrb.gmra.mxu3 %v19366_v54  ;;  %v17483_v60 = vld [vmem:[%s27770_s1 + $0x68c] sm:$0xf0] }
 0x108   : > { %2306 = vmatpush.bf16.msra.mxu2 %v12136_v3  ;;  %2320 = vmatpush.bf16.msra.mxu3 %v12264_v10  ;;  %v12232_v3 = vor.u32 %v17519_v48, %v12231_v46  ;;  %v11959_v10 = vld [vmem:[%s27770_s1 + $0x580] sm:$0xf]  ;;  %v17415_v53 = vld [vmem:[%s27770_s1 + $0x46c] sm:$0xf0]  ;;  %v12088_v22 = vor.u32 %v17483_v60, %v12087_v17 }
 0x109   : > { %1432 = vmatmul.bf16.vlgmr.msrb.gmra.mxu0 %v19374_v28  ;;  %1446 = vmatmul.bf16.vlgmr.msrb.gmra.mxu1 %v19376_v58  ;;  %v17479_v2 = vld [vmem:[%s27770_s1 + $0x66c] sm:$0xf0]  ;;  %v12183_v60 = vld [vmem:[%s27770_s1 + $0x740] sm:$0xf] }
 0x10a   : > { %2278 = vmatpush.bf16.msra.mxu0 %v11880_v27  ;;  %2292 = vmatpush.bf16.msra.mxu1 %v12008_v52  ;;  %v11976_v27 = vor.u32 %v17455_v41, %v11975_v39  ;;  %v11831_v52 = vld [vmem:[%s27770_s1 + $0x480] sm:$0xf]  ;;  %v17447_v39 = vld [vmem:[%s27770_s1 + $0x56c] sm:$0xf0] }
 0x10b   : > { %v11832_v61 = vor.u32 %v17419_v49, %v11831_v52  ;;  %v12071_v41 = vld [vmem:[%s27770_s1 + $0x660] sm:$0xf]  ;;  %v17511_v46 = vld [vmem:[%s27770_s1 + $0x76c] sm:$0xf0] }
 0x10c   : > { %2307 = vmatpush.bf16.msra.mxu2 %v12120_v45  ;;  %2321 = vmatpush.bf16.msra.mxu3 %v12248_v29  ;;  %v12216_v45 = vor.u32 %v17515_v59, %v12215_v47  ;;  %v11943_v29 = vld [vmem:[%s27770_s1 + $0x560] sm:$0xf]  ;;  %v17411_v52 = vld [vmem:[%s27770_s1 + $0x44c] sm:$0xf0]  ;;  %v12072_v49 = vor.u32 %v17479_v2, %v12071_v41 }
 0x10d   : > { %v17475_v17 = vld [vmem:[%s27770_s1 + $0x64c] sm:$0xf0]  ;;  %v12167_v2 = vld [vmem:[%s27770_s1 + $0x720] sm:$0xf] }
 0x10e   : > { %2279 = vmatpush.bf16.msra.mxu0 %v11864_v16  ;;  %2293 = vmatpush.bf16.msra.mxu1 %v11992_v51  ;;  %v11960_v16 = vor.u32 %v17451_v55, %v11959_v10  ;;  %v11815_v51 = vld [vmem:[%s27770_s1 + $0x460] sm:$0xf]  ;;  %v17443_v10 = vld [vmem:[%s27770_s1 + $0x54c] sm:$0xf0] }
 0x10f   : > { %v11816_v48 = vor.u32 %v17415_v53, %v11815_v51  ;;  %v12055_v55 = vld [vmem:[%s27770_s1 + $0x640] sm:$0xf]  ;;  %v17507_v47 = vld [vmem:[%s27770_s1 + $0x74c] sm:$0xf0] }
 0x110   : > { %2308 = vmatpush.bf16.msra.mxu2 %v12104_v34  ;;  %2322 = vmatpush.bf16.msra.mxu3 %v12232_v3  ;;  %v12200_v34 = vor.u32 %v17511_v46, %v12199_v63  ;;  %v11927_v3 = vld [vmem:[%s27770_s1 + $0x540] sm:$0xf]  ;;  %v17407_v51 = vld [vmem:[%s27770_s1 + $0x42c] sm:$0xf0]  ;;  %v12056_v53 = vor.u32 %v17475_v17, %v12055_v55 }
 0x111   : > { %v17471_v41 = vld [vmem:[%s27770_s1 + $0x62c] sm:$0xf0]  ;;  %v11767_v46 = vld [vmem:[%s27770_s1 + $0x400] sm:$0xf] }
 0x112   : > { %2280 = vmatpush.bf16.msra.mxu0 %v11848_v23  ;;  %2294 = vmatpush.bf16.msra.mxu1 %v11976_v27  ;;  %v11944_v23 = vor.u32 %v17447_v39, %v11943_v29  ;;  %v11799_v27 = vld [vmem:[%s27770_s1 + $0x440] sm:$0xf]  ;;  %v17439_v29 = vld [vmem:[%s27770_s1 + $0x52c] sm:$0xf0] }
 0x113   : > { %v11800_v59 = vor.u32 %v17411_v52, %v11799_v27  ;;  %v12039_v39 = vld [vmem:[%s27770_s1 + $0x620] sm:$0xf]  ;;  %v17503_v63 = vld [vmem:[%s27770_s1 + $0x72c] sm:$0xf0] }
 0x114   : > { %2309 = vmatpush.bf16.msra.mxu2 %v12088_v22  ;;  %2323 = vmatpush.bf16.msra.mxu3 %v12216_v45  ;;  %v12184_v22 = vor.u32 %v17507_v47, %v12183_v60  ;;  %v11911_v45 = vld [vmem:[%s27770_s1 + $0x520] sm:$0xf]  ;;  %v17403_v27 = vld [vmem:[%s27770_s1 + $0x40c] sm:$0xf0]  ;;  %v17429_v47 = vld [vmem:[%s27770_s1 + $0x4e4] sm:$0xf] }
 0x115   : > { %v11895_v52 = vld [vmem:[%s27770_s1 + $0x500] sm:$0xf]  ;;  %v17467_v55 = vld [vmem:[%s27770_s1 + $0x60c] sm:$0xf0] }
 0x116   : > { %2281 = vmatpush.bf16.msra.mxu0 %v11832_v61  ;;  %2295 = vmatpush.bf16.msra.mxu1 %v11960_v16  ;;  %v11928_v61 = vor.u32 %v17443_v10, %v11927_v3  ;;  %v11783_v16 = vld [vmem:[%s27770_s1 + $0x420] sm:$0xf]  ;;  %v12168_v3 = vor.u32 %v17503_v63, %v12167_v2  ;;  %v17499_v60 = vld [vmem:[%s27770_s1 + $0x70c] sm:$0xf0] }
 0x117   : > { %v12023_v10 = vld [vmem:[%s27770_s1 + $0x600] sm:$0xf] }
 0x118   : > { %2310 = vmatpush.bf16.msra.mxu2 %v12072_v49  ;;  %2324 = vmatpush.bf16.msra.mxu3 %v12200_v34  ;;  %v17435_v49 = vld [vmem:[%s27770_s1 + $0x50c] sm:$0xf0]  ;;  %v12040_v34 = vor.u32 %v17471_v41, %v12039_v39  ;;  %v12151_v17 = vld [vmem:[%s27770_s1 + $0x700] sm:$0xf]  ;;  %v12265_v39 = vld [vmem:[%s27770_s1 + $0x7f0] sm:$0xf0]  ;;  %v12024_v41 = vor.u32 %v17467_v55, %v12023_v10 }
 0x119   : > { %v12152_v2 = vor.u32 %v17499_v60, %v12151_v17  ;;  %v12121_v10 = vld [vmem:[%s27770_s1 + $0x6d0] sm:$0xf0]  ;;  %v17521_v55 = vld [vmem:[%s27770_s1 + $0x7c4] sm:$0xf] }
 0x11a   : > { %2282 = vmatpush.bf16.msra.mxu0 %v11816_v48  ;;  %2296 = vmatpush.bf16.msra.mxu1 %v11944_v23  ;;  %v11784_v48 = vor.u32 %v17407_v51, %v11783_v16  ;;  %v11912_v23 = vor.u32 %v17439_v29, %v11911_v45  ;;  %v12009_v16 = vld [vmem:[%s27770_s1 + $0x5f0] sm:$0xf0]  ;;  %v17493_v51 = vld [vmem:[%s27770_s1 + $0x6e4] sm:$0xf] }
 0x11b   : > { %v12137_v45 = vld [vmem:[%s27770_s1 + $0x6f0] sm:$0xf0]  ;;  %v17525_v29 = vld [vmem:[%s27770_s1 + $0x7e4] sm:$0xf] }
 0x11c   : > { %2311 = vmatpush.bf16.msra.mxu2 %v12056_v53  ;;  %2325 = vmatpush.bf16.msra.mxu3 %v12184_v22  ;;  %v11768_v53 = vor.u32 %v17403_v27, %v11767_v46  ;;  %v11896_v22 = vor.u32 %v17435_v49, %v11895_v52  ;;  %v17425_v46 = vld [vmem:[%s27770_s1 + $0x4c4] sm:$0xf]  ;;  %v12140_v27 = vor.u32 %v17493_v51, %v12137_v45  ;;  %v12249_v17 = vld [vmem:[%s27770_s1 + $0x7d0] sm:$0xf0] }
 0x11d   : > { %v12268_v52 = vor.u32 %v17525_v29, %v12265_v39  ;;  %v17457_v49 = vld [vmem:[%s27770_s1 + $0x5c4] sm:$0xf]  ;;  %v12252_v51 = vor.u32 %v17521_v55, %v12249_v17  ;;  %v12105_v29 = vld [vmem:[%s27770_s1 + $0x6b0] sm:$0xf0] }
 0x11e   : > { %2283 = vmatpush.bf16.msra.mxu0 %v11800_v59  ;;  %2297 = vmatpush.bf16.msra.mxu1 %v11928_v61  ;;  %v11881_v59 = vld [vmem:[%s27770_s1 + $0x4f0] sm:$0xf0]  ;;  %v17461_v61 = vld [vmem:[%s27770_s1 + $0x5e4] sm:$0xf] }
 0x11f   : > { %v11884_v63 = vor.u32 %v17429_v47, %v11881_v59  ;;  %v17421_v59 = vld [vmem:[%s27770_s1 + $0x4a4] sm:$0xf]  ;;  %v12217_v55 = vld [vmem:[%s27770_s1 + $0x790] sm:$0xf0] }
 0x120   : > { %2312 = vmatpush.bf16.msra.mxu2 %v12040_v34  ;;  %2326 = vmatpush.bf16.msra.mxu3 %v12168_v3  ;;  %v11993_v34 = vld [vmem:[%s27770_s1 + $0x5d0] sm:$0xf0]  ;;  %v17489_v3 = vld [vmem:[%s27770_s1 + $0x6c4] sm:$0xf] }
 0x121   : > { %v11996_v47 = vor.u32 %v17457_v49, %v11993_v34  ;;  %v17485_v45 = vld [vmem:[%s27770_s1 + $0x6a4] sm:$0xf]  ;;  %v11961_v49 = vld [vmem:[%s27770_s1 + $0x590] sm:$0xf0] }
 0x122   : > { %2284 = vmatpush.bf16.msra.mxu0 %v11784_v48  ;;  %2298 = vmatpush.bf16.msra.mxu1 %v11912_v23  ;;  %v12012_v48 = vor.u32 %v17461_v61, %v12009_v16  ;;  %v11865_v23 = vld [vmem:[%s27770_s1 + $0x4d0] sm:$0xf0]  ;;  %v12124_v16 = vor.u32 %v17489_v3, %v12121_v10  ;;  %v17517_v39 = vld [vmem:[%s27770_s1 + $0x7a4] sm:$0xf] }
 0x123   : > { %v11868_v60 = vor.u32 %v17425_v46, %v11865_v23  ;;  %v11849_v61 = vld [vmem:[%s27770_s1 + $0x4b0] sm:$0xf0]  ;;  %v12108_v23 = vor.u32 %v17485_v45, %v12105_v29  ;;  %v17481_v34 = vld [vmem:[%s27770_s1 + $0x684] sm:$0xf] }
 0x124   : > { %2313 = vmatpush.bf16.msra.mxu2 %v12024_v41  ;;  %2327 = vmatpush.bf16.msra.mxu3 %v12152_v2  ;;  %v12233_v41 = vld [vmem:[%s27770_s1 + $0x7b0] sm:$0xf0]  ;;  %v11852_v2 = vor.u32 %v17421_v59, %v11849_v61  ;;  %v17513_v10 = vld [vmem:[%s27770_s1 + $0x784] sm:$0xf] }
 0x125   : > { %v11833_v46 = vld [vmem:[%s27770_s1 + $0x490] sm:$0xf0]  ;;  %v17509_v29 = vld [vmem:[%s27770_s1 + $0x764] sm:$0xf] }
 0x126   : > { %2285 = vmatpush.bf16.msra.mxu0 %v11768_v53  ;;  %2299 = vmatpush.bf16.msra.mxu1 %v11896_v22  ;;  %v17453_v53 = vld [vmem:[%s27770_s1 + $0x5a4] sm:$0xf]  ;;  %v11977_v22 = vld [vmem:[%s27770_s1 + $0x5b0] sm:$0xf0] }
 0x127   : > { %2314 = vmatmul.bf16.vlgmr.msra.gmra.mxu2 %v19364_v33  ;;  %2328 = vmatmul.bf16.vlgmr.msra.gmra.mxu3 %v19366_v54  ;;  %v12089_v3 = vld [vmem:[%s27770_s1 + $0x690] sm:$0xf0] }
 0x128   : > { %2362 = vmatpush.bf16.msrb.mxu2 %v12140_v27  ;;  %2376 = vmatpush.bf16.msrb.mxu3 %v12268_v52  ;;  %v12236_v27 = vor.u32 %v17517_v39, %v12233_v41  ;;  %v17449_v52 = vld [vmem:[%s27770_s1 + $0x584] sm:$0xf]  ;;  %v11817_v59 = vld [vmem:[%s27770_s1 + $0x470] sm:$0xf0]  ;;  %v12092_v61 = vor.u32 %v17481_v34, %v12089_v3 }
 0x129   : > { %2286 = vmatmul.bf16.vlgmr.msra.gmra.mxu0 %v19374_v28  ;;  %2300 = vmatmul.bf16.vlgmr.msra.gmra.mxu1 %v19376_v58  ;;  %v12073_v45 = vld [vmem:[%s27770_s1 + $0x670] sm:$0xf0]  ;;  %v17505_v3 = vld [vmem:[%s27770_s1 + $0x744] sm:$0xf] }
 0x12a   : > { %2334 = vmatpush.bf16.msrb.mxu0 %v11884_v63  ;;  %2348 = vmatpush.bf16.msrb.mxu1 %v12012_v48  ;;  %v11980_v63 = vor.u32 %v17453_v53, %v11977_v22  ;;  %v17417_v48 = vld [vmem:[%s27770_s1 + $0x484] sm:$0xf]  ;;  %v11945_v53 = vld [vmem:[%s27770_s1 + $0x570] sm:$0xf0] }
 0x12b   : > { %v11836_v17 = vor.u32 %v17417_v48, %v11833_v46  ;;  %v17477_v22 = vld [vmem:[%s27770_s1 + $0x664] sm:$0xf]  ;;  %v12201_v39 = vld [vmem:[%s27770_s1 + $0x770] sm:$0xf0] }
 0x12c   : > { %2363 = vmatpush.bf16.msrb.mxu2 %v12124_v16  ;;  %2377 = vmatpush.bf16.msrb.mxu3 %v12252_v51  ;;  %v12220_v16 = vor.u32 %v17513_v10, %v12217_v55  ;;  %v17445_v51 = vld [vmem:[%s27770_s1 + $0x564] sm:$0xf]  ;;  %v11801_v48 = vld [vmem:[%s27770_s1 + $0x450] sm:$0xf0]  ;;  %v12076_v46 = vor.u32 %v17477_v22, %v12073_v45 }
 0x12d   : > { %v12057_v34 = vld [vmem:[%s27770_s1 + $0x650] sm:$0xf0]  ;;  %v17501_v45 = vld [vmem:[%s27770_s1 + $0x724] sm:$0xf] }
 0x12e   : > { %2335 = vmatpush.bf16.msrb.mxu0 %v11868_v60  ;;  %2349 = vmatpush.bf16.msrb.mxu1 %v11996_v47  ;;  %v11964_v60 = vor.u32 %v17449_v52, %v11961_v49  ;;  %v17413_v47 = vld [vmem:[%s27770_s1 + $0x464] sm:$0xf]  ;;  %v11929_v52 = vld [vmem:[%s27770_s1 + $0x550] sm:$0xf0] }
 0x12f   : > { %v11820_v41 = vor.u32 %v17413_v47, %v11817_v59  ;;  %v17473_v49 = vld [vmem:[%s27770_s1 + $0x644] sm:$0xf]  ;;  %v12185_v10 = vld [vmem:[%s27770_s1 + $0x750] sm:$0xf0] }
 0x130   : > { %2364 = vmatpush.bf16.msrb.mxu2 %v12108_v23  ;;  %2378 = vmatpush.bf16.msrb.mxu3 %v12236_v27  ;;  %v12204_v23 = vor.u32 %v17509_v29, %v12201_v39  ;;  %v17441_v27 = vld [vmem:[%s27770_s1 + $0x544] sm:$0xf]  ;;  %v11785_v47 = vld [vmem:[%s27770_s1 + $0x430] sm:$0xf0]  ;;  %v12060_v59 = vor.u32 %v17473_v49, %v12057_v34 }
 0x131   : > { %v12041_v22 = vld [vmem:[%s27770_s1 + $0x630] sm:$0xf0]  ;;  %v17401_v39 = vld [vmem:[%s27770_s1 + $0x404] sm:$0xf] }
 0x132   : > { %2336 = vmatpush.bf16.msrb.mxu0 %v11852_v2  ;;  %2350 = vmatpush.bf16.msrb.mxu1 %v11980_v63  ;;  %v11948_v2 = vor.u32 %v17445_v51, %v11945_v53  ;;  %v17409_v63 = vld [vmem:[%s27770_s1 + $0x444] sm:$0xf]  ;;  %v11913_v51 = vld [vmem:[%s27770_s1 + $0x530] sm:$0xf0] }
 0x133   : > { %v11804_v55 = vor.u32 %v17409_v63, %v11801_v48  ;;  %v17469_v53 = vld [vmem:[%s27770_s1 + $0x624] sm:$0xf]  ;;  %v12169_v29 = vld [vmem:[%s27770_s1 + $0x730] sm:$0xf0] }
 0x134   : > { %2365 = vmatpush.bf16.msrb.mxu2 %v12092_v61  ;;  %2379 = vmatpush.bf16.msrb.mxu3 %v12220_v16  ;;  %v12188_v61 = vor.u32 %v17505_v3, %v12185_v10  ;;  %v17437_v16 = vld [vmem:[%s27770_s1 + $0x524] sm:$0xf]  ;;  %v11769_v63 = vld [vmem:[%s27770_s1 + $0x410] sm:$0xf0]  ;;  %v11887_v10 = vld [vmem:[%s27770_s1 + $0x4e8] sm:$0xf] }
 0x135   : > { %v17433_v48 = vld [vmem:[%s27770_s1 + $0x504] sm:$0xf]  ;;  %v12025_v49 = vld [vmem:[%s27770_s1 + $0x610] sm:$0xf0] }
 0x136   : > { %2337 = vmatpush.bf16.msrb.mxu0 %v11836_v17  ;;  %2351 = vmatpush.bf16.msrb.mxu1 %v11964_v60  ;;  %v11932_v17 = vor.u32 %v17441_v27, %v11929_v52  ;;  %v17405_v60 = vld [vmem:[%s27770_s1 + $0x424] sm:$0xf]  ;;  %v12172_v27 = vor.u32 %v17501_v45, %v12169_v29  ;;  %v12153_v3 = vld [vmem:[%s27770_s1 + $0x710] sm:$0xf0] }
 0x137   : > { %v17465_v52 = vld [vmem:[%s27770_s1 + $0x604] sm:$0xf] }
 0x138   : > { %2366 = vmatpush.bf16.msrb.mxu2 %v12076_v46  ;;  %2380 = vmatpush.bf16.msrb.mxu3 %v12204_v23  ;;  %v11897_v46 = vld [vmem:[%s27770_s1 + $0x510] sm:$0xf0]  ;;  %v12044_v23 = vor.u32 %v17469_v53, %v12041_v22  ;;  %v17497_v34 = vld [vmem:[%s27770_s1 + $0x704] sm:$0xf]  ;;  %v17528_v53 = vld [vmem:[%s27770_s1 + $0x7f4] sm:$0xf0]  ;;  %v12028_v22 = vor.u32 %v17465_v52, %v12025_v49 }
 0x139   : > { %v12156_v45 = vor.u32 %v17497_v34, %v12153_v3  ;;  %v17492_v52 = vld [vmem:[%s27770_s1 + $0x6d4] sm:$0xf0]  ;;  %v12255_v49 = vld [vmem:[%s27770_s1 + $0x7c8] sm:$0xf] }
 0x13a   : > { %2338 = vmatpush.bf16.msrb.mxu0 %v11820_v41  ;;  %2352 = vmatpush.bf16.msrb.mxu1 %v11948_v2  ;;  %v11788_v41 = vor.u32 %v17405_v60, %v11785_v47  ;;  %v11916_v2 = vor.u32 %v17437_v16, %v11913_v51  ;;  %v17464_v60 = vld [vmem:[%s27770_s1 + $0x5f4] sm:$0xf0]  ;;  %v12143_v47 = vld [vmem:[%s27770_s1 + $0x6e8] sm:$0xf] }
 0x13b   : > { %v17496_v16 = vld [vmem:[%s27770_s1 + $0x6f4] sm:$0xf0]  ;;  %v12271_v51 = vld [vmem:[%s27770_s1 + $0x7e8] sm:$0xf] }
 0x13c   : > { %2367 = vmatpush.bf16.msrb.mxu2 %v12060_v59  ;;  %2381 = vmatpush.bf16.msrb.mxu3 %v12188_v61  ;;  %v11772_v59 = vor.u32 %v17401_v39, %v11769_v63  ;;  %v11900_v61 = vor.u32 %v17433_v48, %v11897_v46  ;;  %v11871_v39 = vld [vmem:[%s27770_s1 + $0x4c8] sm:$0xf]  ;;  %v12144_v63 = vor.u32 %v17496_v16, %v12143_v47  ;;  %v17524_v34 = vld [vmem:[%s27770_s1 + $0x7d4] sm:$0xf0] }
 0x13d   : > { %v12272_v48 = vor.u32 %v17528_v53, %v12271_v51  ;;  %v11999_v46 = vld [vmem:[%s27770_s1 + $0x5c8] sm:$0xf]  ;;  %v12256_v47 = vor.u32 %v17524_v34, %v12255_v49  ;;  %v17488_v51 = vld [vmem:[%s27770_s1 + $0x6b4] sm:$0xf0] }
 0x13e   : > { %2339 = vmatpush.bf16.msrb.mxu0 %v11804_v55  ;;  %2353 = vmatpush.bf16.msrb.mxu1 %v11932_v17  ;;  %v17432_v55 = vld [vmem:[%s27770_s1 + $0x4f4] sm:$0xf0]  ;;  %v12015_v17 = vld [vmem:[%s27770_s1 + $0x5e8] sm:$0xf] }
 0x13f   : > { %v11888_v29 = vor.u32 %v17432_v55, %v11887_v10  ;;  %v11855_v55 = vld [vmem:[%s27770_s1 + $0x4a8] sm:$0xf]  ;;  %v17484_v34 = vld [vmem:[%s27770_s1 + $0x694] sm:$0xf0] }
 0x140   : > { %2368 = vmatpush.bf16.msrb.mxu2 %v12044_v23  ;;  %2382 = vmatpush.bf16.msrb.mxu3 %v12172_v27  ;;  %v17460_v23 = vld [vmem:[%s27770_s1 + $0x5d4] sm:$0xf0]  ;;  %v12127_v27 = vld [vmem:[%s27770_s1 + $0x6c8] sm:$0xf] }
 0x141   : > { %v12000_v10 = vor.u32 %v17460_v23, %v11999_v46  ;;  %v12111_v16 = vld [vmem:[%s27770_s1 + $0x6a8] sm:$0xf] }
 0x142   : > { %2340 = vmatpush.bf16.msrb.mxu0 %v11788_v41  ;;  %2354 = vmatpush.bf16.msrb.mxu1 %v11916_v2  ;;  %v12016_v41 = vor.u32 %v17464_v60, %v12015_v17  ;;  %v17428_v2 = vld [vmem:[%s27770_s1 + $0x4d4] sm:$0xf0]  ;;  %v12128_v60 = vor.u32 %v17492_v52, %v12127_v27  ;;  %v12239_v53 = vld [vmem:[%s27770_s1 + $0x7a8] sm:$0xf] }
 0x143   : > { %v11872_v3 = vor.u32 %v17428_v2, %v11871_v39  ;;  %v17424_v17 = vld [vmem:[%s27770_s1 + $0x4b4] sm:$0xf0]  ;;  %v11839_v2 = vld [vmem:[%s27770_s1 + $0x488] sm:$0xf] }
 0x144   : > { %2369 = vmatpush.bf16.msrb.mxu2 %v12028_v22  ;;  %2383 = vmatpush.bf16.msrb.mxu3 %v12156_v45  ;;  %v17520_v22 = vld [vmem:[%s27770_s1 + $0x7b4] sm:$0xf0]  ;;  %v11856_v45 = vor.u32 %v17424_v17, %v11855_v55  ;;  %v11967_v27 = vld [vmem:[%s27770_s1 + $0x588] sm:$0xf] }
 0x145   : > { %v12240_v46 = vor.u32 %v17520_v22, %v12239_v53  ;;  %v17452_v52 = vld [vmem:[%s27770_s1 + $0x594] sm:$0xf0]  ;;  %v12095_v49 = vld [vmem:[%s27770_s1 + $0x688] sm:$0xf] }
 0x146   : > { %2341 = vmatpush.bf16.msrb.mxu0 %v11772_v59  ;;  %2355 = vmatpush.bf16.msrb.mxu1 %v11900_v61  ;;  %v11983_v59 = vld [vmem:[%s27770_s1 + $0x5a8] sm:$0xf]  ;;  %v17456_v61 = vld [vmem:[%s27770_s1 + $0x5b4] sm:$0xf0]  ;;  %v1279_v39 = vpop.f32.mrf.mxu1  ;;  %v11968_v17 = vor.u32 %v17452_v52, %v11967_v27 }
 0x147   : > { %2370 = vmatmul.bf16.vlgmr.msrb.gmra.mxu2 %v19364_v33  ;;  %2384 = vmatmul.bf16.vlgmr.msrb.gmra.mxu3 %v19366_v54  ;;  %v11951_v53 = vld [vmem:[%s27770_s1 + $0x568] sm:$0xf]  ;;  %v17448_v22 = vld [vmem:[%s27770_s1 + $0x574] sm:$0xf0] }
 0x148   : > { %2418 = vmatpush.bf16.msra.mxu2 %v12144_v63  ;;  %2432 = vmatpush.bf16.msra.mxu3 %v12272_v48  ;;  %v17420_v63 = vld [vmem:[%s27770_s1 + $0x494] sm:$0xf0]  ;;  %v12112_v48 = vor.u32 %v17488_v51, %v12111_v16  ;;  %v11807_v52 = vld [vmem:[%s27770_s1 + $0x448] sm:$0xf] }
 0x149   : > { %2342 = vmatmul.bf16.vlgmr.msrb.gmra.mxu0 %v19374_v28  ;;  %2356 = vmatmul.bf16.vlgmr.msrb.gmra.mxu1 %v19376_v58  ;;  %v11840_v55 = vor.u32 %v17420_v63, %v11839_v2  ;;  %v17512_v2 = vld [vmem:[%s27770_s1 + $0x774] sm:$0xf0] }
 0x14a   : > { %2390 = vmatpush.bf16.msra.mxu0 %v11888_v29  ;;  %2404 = vmatpush.bf16.msra.mxu1 %v12016_v41  ;;  %v11984_v29 = vor.u32 %v17456_v61, %v11983_v59  ;;  %v1265_v41 = vpop.f32.mrf.mxu0  ;;  %v12096_v59 = vor.u32 %v17484_v34, %v12095_v49  ;;  %v1293_v16 = vpop.f32.mrf.mxu2  ;;  %v17412_v49 = vld [vmem:[%s27770_s1 + $0x454] sm:$0xf0] }
 0x14b   : > { %v1280_v23 = vadd.f32 %v1279_v39, %v1265_v41  ;;  %v1307_v51 = vpop.f32.mrf.mxu3  ;;  %v17480_v41 = vld [vmem:[%s27770_s1 + $0x674] sm:$0xf0]  ;;  %v12207_v39 = vld [vmem:[%s27770_s1 + $0x768] sm:$0xf] }
 0x14c   : > { %2419 = vmatpush.bf16.msra.mxu2 %v12128_v60  ;;  %2433 = vmatpush.bf16.msra.mxu3 %v12256_v47  ;;  %v11823_v60 = vld [vmem:[%s27770_s1 + $0x468] sm:$0xf]  ;;  %v17416_v47 = vld [vmem:[%s27770_s1 + $0x474] sm:$0xf0] }
 0x14e   : > { %2391 = vmatpush.bf16.msra.mxu0 %v11872_v3  ;;  %2405 = vmatpush.bf16.msra.mxu1 %v12000_v10  ;;  %v12223_v3 = vld [vmem:[%s27770_s1 + $0x788] sm:$0xf]  ;;  %v17516_v10 = vld [vmem:[%s27770_s1 + $0x794] sm:$0xf0] }
 0x14f   : > { %v12224_v61 = vor.u32 %v17516_v10, %v12223_v3  ;;  %v12208_v3 = vor.u32 %v17512_v2, %v12207_v39  ;;  %v11935_v10 = vld [vmem:[%s27770_s1 + $0x548] sm:$0xf]  ;;  %v17440_v2 = vld [vmem:[%s27770_s1 + $0x534] sm:$0xf0] }
 0x150   : > { %2420 = vmatpush.bf16.msra.mxu2 %v12112_v48  ;;  %2434 = vmatpush.bf16.msra.mxu3 %v12240_v46  ;;  %v11824_v48 = vor.u32 %v17416_v47, %v11823_v60  ;;  %v11952_v46 = vor.u32 %v17448_v22, %v11951_v53  ;;  %v17476_v60 = vld [vmem:[%s27770_s1 + $0x654] sm:$0xf0]  ;;  %v12191_v47 = vld [vmem:[%s27770_s1 + $0x748] sm:$0xf] }
 0x151   : > { %v17408_v53 = vld [vmem:[%s27770_s1 + $0x434] sm:$0xf0]  ;;  %v11919_v39 = vld [vmem:[%s27770_s1 + $0x528] sm:$0xf] }
 0x152   : > { %2392 = vmatpush.bf16.msra.mxu0 %v11856_v45  ;;  %2406 = vmatpush.bf16.msra.mxu1 %v11984_v29  ;;  %v12079_v45 = vld [vmem:[%s27770_s1 + $0x668] sm:$0xf]  ;;  %v1294_v29 = vadd.f32 %v1293_v16, %v1280_v23  ;;  %v20262_v27 = vpop.f32.mrf.mxu0  ;;  %v20264_v23 = vpop.f32.mrf.mxu1 }
 0x153   : > { %v12080_v34 = vor.u32 %v17480_v41, %v12079_v45  ;;  %v20298_v41 = vpop.f32.mrf.mxu3 }
 0x154   : > { %v20260_v63 = vadd.f32 %v1307_v51, %v1294_v29  ;;  %2421 = vmatpush.bf16.msra.mxu2 %v12096_v59  ;;  %2435 = vmatpush.bf16.msra.mxu3 %v12224_v61  ;;  %v17508_v59 = vld [vmem:[%s27770_s1 + $0x754] sm:$0xf0]  ;;  %v11808_v61 = vor.u32 %v17412_v49, %v11807_v52  ;;  %v11791_v51 = vld [vmem:[%s27770_s1 + $0x428] sm:$0xf]  ;;  %v20296_v29 = vpop.f32.mrf.mxu2 }
 0x155   : > { %v12192_v45 = vor.u32 %v17508_v59, %v12191_v47  ;;  %v12175_v52 = vld [vmem:[%s27770_s1 + $0x728] sm:$0xf]  ;;  %v17504_v49 = vld [vmem:[%s27770_s1 + $0x734] sm:$0xf0] }
 0x156   : > { %2393 = vmatpush.bf16.msra.mxu0 %v11840_v55  ;;  %2407 = vmatpush.bf16.msra.mxu1 %v11968_v17  ;;  %v17444_v55 = vld [vmem:[%s27770_s1 + $0x554] sm:$0xf0]  ;;  %v12063_v17 = vld [vmem:[%s27770_s1 + $0x648] sm:$0xf] }
 0x157   : > { %v11936_v16 = vor.u32 %v17444_v55, %v11935_v10  ;;  %v12064_v22 = vor.u32 %v17476_v60, %v12063_v17  ;;  %v11920_v10 = vor.u32 %v17440_v2, %v11919_v39  ;;  %v17404_v60 = vld [vmem:[%s27770_s1 + $0x414] sm:$0xf0]  ;;  %v11903_v47 = vld [vmem:[%s27770_s1 + $0x508] sm:$0xf] }
 0x158   : > { %2422 = vmatpush.bf16.msra.mxu2 %v12080_v34  ;;  %2436 = vmatpush.bf16.msra.mxu3 %v12208_v3  ;;  %v11775_v34 = vld [vmem:[%s27770_s1 + $0x408] sm:$0xf]  ;;  %v11792_v3 = vor.u32 %v17408_v53, %v11791_v51  ;;  %v17436_v59 = vld [vmem:[%s27770_s1 + $0x514] sm:$0xf0] }
 0x159   : > { %v12031_v53 = vld [vmem:[%s27770_s1 + $0x608] sm:$0xf]  ;;  %v17468_v39 = vld [vmem:[%s27770_s1 + $0x614] sm:$0xf0] }
 0x15a   : > { %2394 = vmatpush.bf16.msra.mxu0 %v11824_v48  ;;  %2408 = vmatpush.bf16.msra.mxu1 %v11952_v46  ;;  %v12047_v48 = vld [vmem:[%s27770_s1 + $0x628] sm:$0xf]  ;;  %v17472_v46 = vld [vmem:[%s27770_s1 + $0x634] sm:$0xf0]  ;;  %v1321_v55 = vpop.f32.mrf.mxu0  ;;  %v1335_v17 = vpop.f32.mrf.mxu1  ;;  %v12032_v37 = vor.u32 %v17468_v39, %v12031_v53 }
 0x15b   : > { %v1336_v51 = vadd.f32 %v1335_v17, %v1321_v55  ;;  %v12159_v2 = vld [vmem:[%s27770_s1 + $0x708] sm:$0xf]  ;;  %v11776_v55 = vor.u32 %v17404_v60, %v11775_v34  ;;  %v11904_v17 = vor.u32 %v17436_v59, %v11903_v47  ;;  %v1363_v47 = vpop.f32.mrf.mxu3  ;;  %v17426_v59 = vld [vmem:[%s27770_s1 + $0x4cc] sm:$0xf] }
 0x15c   : > { %2423 = vmatpush.bf16.msra.mxu2 %v12064_v22  ;;  %2437 = vmatpush.bf16.msra.mxu3 %v12192_v45  ;;  %v17500_v22 = vld [vmem:[%s27770_s1 + $0x714] sm:$0xf0]  ;;  %v17430_v45 = vld [vmem:[%s27770_s1 + $0x4ec] sm:$0xf] }
 0x15d   : > { %v12160_v15 = vor.u32 %v17500_v22, %v12159_v2  ;;  %v12257_v2 = vld [vmem:[%s27770_s1 + $0x7d8] sm:$0xf0]  ;;  %v11876_v22 = vor.u32 %v17426_v59, %v11873_v36 }
 0x15e   : > { %2395 = vmatpush.bf16.msra.mxu0 %v11808_v61  ;;  %2409 = vmatpush.bf16.msra.mxu1 %v11936_v16  ;;  %v12048_v61 = vor.u32 %v17472_v46, %v12047_v48  ;;  %v12176_v16 = vor.u32 %v17504_v49, %v12175_v52  ;;  %v11889_v48 = vld [vmem:[%s27770_s1 + $0x4f8] sm:$0xf0]  ;;  %v17462_v46 = vld [vmem:[%s27770_s1 + $0x5ec] sm:$0xf] }
 0x15f   : > { %v12017_v52 = vld [vmem:[%s27770_s1 + $0x5f8] sm:$0xf0]  ;;  %v17494_v49 = vld [vmem:[%s27770_s1 + $0x6ec] sm:$0xf] }
 0x160   : > { %2424 = vmatpush.bf16.msra.mxu2 %v12048_v61  ;;  %2438 = vmatpush.bf16.msra.mxu3 %v12176_v16  ;;  %v12020_v34 = vor.u32 %v17462_v46, %v12017_v52  ;;  %v12148_v31 = vor.u32 %v17494_v49, %v12145_v43  ;;  %v17458_v61 = vld [vmem:[%s27770_s1 + $0x5cc] sm:$0xf]  ;;  %v12001_v16 = vld [vmem:[%s27770_s1 + $0x5d8] sm:$0xf0]  ;;  %v12260_v49 = vor.u32 %v17522_v42, %v12257_v2 }
 0x161   : > { %v11857_v46 = vld [vmem:[%s27770_s1 + $0x4b8] sm:$0xf0]  ;;  %v17514_v2 = vld [vmem:[%s27770_s1 + $0x78c] sm:$0xf] }
 0x162   : > { %2396 = vmatpush.bf16.msra.mxu0 %v11792_v3  ;;  %2410 = vmatpush.bf16.msra.mxu1 %v11920_v10  ;;  %v1349_v3 = vpop.f32.mrf.mxu2  ;;  %v11892_v10 = vor.u32 %v17430_v45, %v11889_v48  ;;  %v20383_v39 = vpop.f32.mrf.mxu0  ;;  %v12004_v45 = vor.u32 %v17458_v61, %v12001_v16  ;;  %v17422_v48 = vld [vmem:[%s27770_s1 + $0x4ac] sm:$0xf]  ;;  %v11985_v36 = vld [vmem:[%s27770_s1 + $0x5b8] sm:$0xf0] }
 0x163   : > { %v1350_v60 = vadd.f32 %v1349_v3, %v1336_v51  ;;  %v17490_v51 = vld [vmem:[%s27770_s1 + $0x6cc] sm:$0xf]  ;;  %v20385_v43 = vpop.f32.mrf.mxu1  ;;  %v11969_v16 = vld [vmem:[%s27770_s1 + $0x598] sm:$0xf0] }
 0x164   : > { %2425 = vmatpush.bf16.msra.mxu2 %v12032_v37  ;;  %2439 = vmatpush.bf16.msra.mxu3 %v12160_v15  ;;  %v12132_v52 = vor.u32 %v17490_v51, %v12129_v21  ;;  %v17454_v15 = vld [vmem:[%s27770_s1 + $0x5ac] sm:$0xf]  ;;  %v20441_v21 = vpop.f32.mrf.mxu3  ;;  %v12097_v42 = vld [vmem:[%s27770_s1 + $0x698] sm:$0xf0] }
 0x165   : > { %v20381_v53 = vadd.f32 %v1363_v47, %v1350_v60  ;;  %v17486_v37 = vld [vmem:[%s27770_s1 + $0x6ac] sm:$0xf]  ;;  %v11988_v3 = vor.u32 %v17454_v15, %v11985_v36  ;;  %v11841_v60 = vld [vmem:[%s27770_s1 + $0x498] sm:$0xf0] }
 0x166   : > { %2397 = vmatpush.bf16.msra.mxu0 %v11776_v55  ;;  %2411 = vmatpush.bf16.msra.mxu1 %v11904_v17  ;;  %v12241_v55 = vld [vmem:[%s27770_s1 + $0x7b8] sm:$0xf0]  ;;  %v11860_v17 = vor.u32 %v17422_v48, %v11857_v46  ;;  %v17450_v61 = vld [vmem:[%s27770_s1 + $0x58c] sm:$0xf] }
 0x167   : > { %2426 = vmatmul.bf16.vlgmr.msra.gmra.mxu2 %v19364_v33  ;;  %2440 = vmatmul.bf16.vlgmr.msra.gmra.mxu3 %v19366_v54  ;;  %v17482_v51 = vld [vmem:[%s27770_s1 + $0x68c] sm:$0xf]  ;;  %v11825_v36 = vld [vmem:[%s27770_s1 + $0x478] sm:$0xf0] }
 0x168   : > { %2474 = vmatpush.bf16.msrb.mxu2 %v12148_v31  ;;  %2488 = vmatpush.bf16.msrb.mxu3 %v12276_v9  ;;  %v12113_v9 = vld [vmem:[%s27770_s1 + $0x6b8] sm:$0xf0]  ;;  %v17518_v31 = vld [vmem:[%s27770_s1 + $0x7ac] sm:$0xf] }
 0x169   : > { %2398 = vmatmul.bf16.vlgmr.msra.gmra.mxu0 %v19374_v28  ;;  %2412 = vmatmul.bf16.vlgmr.msra.gmra.mxu1 %v19376_v58  ;;  %v12116_v47 = vor.u32 %v17486_v37, %v12113_v9  ;;  %v12244_v59 = vor.u32 %v17518_v31, %v12241_v55  ;;  %v17414_v15 = vld [vmem:[%s27770_s1 + $0x46c] sm:$0xf]  ;;  %v12100_v37 = vor.u32 %v17482_v51, %v12097_v42  ;;  %v11953_v55 = vld [vmem:[%s27770_s1 + $0x578] sm:$0xf0] }
 0x16a   : > { %2446 = vmatpush.bf16.msrb.mxu0 %v11892_v10  ;;  %2460 = vmatpush.bf16.msrb.mxu1 %v12020_v34  ;;  %v20424_v10 = vpop.f32.mrf.mxu2  ;;  %v17418_v34 = vld [vmem:[%s27770_s1 + $0x48c] sm:$0xf] }
 0x16b   : > { %v1391_v48 = vpop.f32.mrf.mxu1  ;;  %v17446_v31 = vld [vmem:[%s27770_s1 + $0x56c] sm:$0xf] }
 0x16c   : > { %2475 = vmatpush.bf16.msrb.mxu2 %v12132_v52  ;;  %2489 = vmatpush.bf16.msrb.mxu3 %v12260_v49  ;;  %v11844_v52 = vor.u32 %v17418_v34, %v11841_v60  ;;  %v11972_v49 = vor.u32 %v17450_v61, %v11969_v16  ;;  %v17510_v34 = vld [vmem:[%s27770_s1 + $0x76c] sm:$0xf]  ;;  %v12209_v60 = vld [vmem:[%s27770_s1 + $0x778] sm:$0xf0] }
 0x16d   : > { %v17410_v61 = vld [vmem:[%s27770_s1 + $0x44c] sm:$0xf]  ;;  %v11809_v16 = vld [vmem:[%s27770_s1 + $0x458] sm:$0xf0]  ;;  %v12212_v42 = vor.u32 %v17510_v34, %v12209_v60 }
 0x16e   : > { %2447 = vmatpush.bf16.msrb.mxu0 %v11876_v22  ;;  %2461 = vmatpush.bf16.msrb.mxu1 %v12004_v45  ;;  %v12225_v22 = vld [vmem:[%s27770_s1 + $0x798] sm:$0xf0]  ;;  %v1377_v45 = vpop.f32.mrf.mxu0 }
 0x16f   : > { %v1392_v46 = vadd.f32 %v1391_v48, %v1377_v45  ;;  %v12228_v9 = vor.u32 %v17514_v2, %v12225_v22  ;;  %v17442_v2 = vld [vmem:[%s27770_s1 + $0x54c] sm:$0xf]  ;;  %v11937_v22 = vld [vmem:[%s27770_s1 + $0x558] sm:$0xf0] }
 0x170   : > { %2476 = vmatpush.bf16.msrb.mxu2 %v12116_v47  ;;  %2490 = vmatpush.bf16.msrb.mxu3 %v12244_v59  ;;  %v11828_v47 = vor.u32 %v17414_v15, %v11825_v36  ;;  %v11956_v59 = vor.u32 %v17446_v31, %v11953_v55  ;;  %v17474_v45 = vld [vmem:[%s27770_s1 + $0x64c] sm:$0xf]  ;;  %v12193_v15 = vld [vmem:[%s27770_s1 + $0x758] sm:$0xf0]  ;;  %v11940_v31 = vor.u32 %v17442_v2, %v11937_v22 }
 0x171   : > { %v17406_v55 = vld [vmem:[%s27770_s1 + $0x42c] sm:$0xf] }
 0x172   : > { %2448 = vmatpush.bf16.msrb.mxu0 %v11860_v17  ;;  %2462 = vmatpush.bf16.msrb.mxu1 %v11988_v3  ;;  %v17478_v17 = vld [vmem:[%s27770_s1 + $0x66c] sm:$0xf]  ;;  %v12081_v3 = vld [vmem:[%s27770_s1 + $0x678] sm:$0xf0]  ;;  %v1405_v48 = vpop.f32.mrf.mxu2 }
 0x173   : > { %v12084_v51 = vor.u32 %v17478_v17, %v12081_v3  ;;  %v1406_v36 = vadd.f32 %v1405_v48, %v1392_v46  ;;  %v11793_v17 = vld [vmem:[%s27770_s1 + $0x438] sm:$0xf0]  ;;  %v17438_v46 = vld [vmem:[%s27770_s1 + $0x52c] sm:$0xf] }
 0x174   : > { %2477 = vmatpush.bf16.msrb.mxu2 %v12100_v37  ;;  %2491 = vmatpush.bf16.msrb.mxu3 %v12228_v9  ;;  %v1419_v37 = vpop.f32.mrf.mxu3  ;;  %v11812_v9 = vor.u32 %v17410_v61, %v11809_v16  ;;  %v12049_v61 = vld [vmem:[%s27770_s1 + $0x638] sm:$0xf0]  ;;  %v17502_v16 = vld [vmem:[%s27770_s1 + $0x72c] sm:$0xf]  ;;  %v11796_v2 = vor.u32 %v17406_v55, %v11793_v17  ;;  %v12519_v55 = vld [vmem:[%s27770_s1 + $0x8e0] sm:$0xf] }
 0x175   : > { %v20506_v3 = vadd.f32 %v1419_v37, %v1406_v36  ;;  %v17434_v48 = vld [vmem:[%s27770_s1 + $0x50c] sm:$0xf]  ;;  %v12033_v37 = vld [vmem:[%s27770_s1 + $0x618] sm:$0xf0]  ;;  %v17559_v17 = vld [vmem:[%s27770_s1 + $0x8ec] sm:$0xf0] }
 0x176   : > { %2449 = vmatpush.bf16.msrb.mxu0 %v11844_v52  ;;  %2463 = vmatpush.bf16.msrb.mxu1 %v11972_v49  ;;  %v12065_v52 = vld [vmem:[%s27770_s1 + $0x658] sm:$0xf0]  ;;  %v17506_v49 = vld [vmem:[%s27770_s1 + $0x74c] sm:$0xf] }
 0x177   : > { %v12068_v34 = vor.u32 %v17474_v45, %v12065_v52  ;;  %v12196_v60 = vor.u32 %v17506_v49, %v12193_v15  ;;  %v11777_v45 = vld [vmem:[%s27770_s1 + $0x418] sm:$0xf0]  ;;  %v17466_v36 = vld [vmem:[%s27770_s1 + $0x60c] sm:$0xf] }
 0x178   : > { %2478 = vmatpush.bf16.msrb.mxu2 %v12084_v51  ;;  %2492 = vmatpush.bf16.msrb.mxu3 %v12212_v42  ;;  %v12177_v51 = vld [vmem:[%s27770_s1 + $0x738] sm:$0xf0]  ;;  %v17402_v42 = vld [vmem:[%s27770_s1 + $0x40c] sm:$0xf]  ;;  %v12036_v30 = vor.u32 %v17466_v36, %v12033_v37  ;;  %v17619_v36 = vld [vmem:[%s27770_s1 + $0xacc] sm:$0xf0] }
 0x179   : > { %v11905_v52 = vld [vmem:[%s27770_s1 + $0x518] sm:$0xf0]  ;;  %v12180_v15 = vor.u32 %v17502_v16, %v12177_v51  ;;  %v12903_v16 = vld [vmem:[%s27770_s1 + $0xbe0] sm:$0xf]  ;;  %v17655_v51 = vld [vmem:[%s27770_s1 + $0xbec] sm:$0xf0] }
 0x17a   : > { %2450 = vmatpush.bf16.msrb.mxu0 %v11828_v47  ;;  %2464 = vmatpush.bf16.msrb.mxu1 %v11956_v59  ;;  %v11921_v47 = vld [vmem:[%s27770_s1 + $0x538] sm:$0xf0]  ;;  %v17470_v59 = vld [vmem:[%s27770_s1 + $0x62c] sm:$0xf]  ;;  %v12887_v37 = vld [vmem:[%s27770_s1 + $0xbc0] sm:$0xf] }
 0x17b   : > { %v11924_v22 = vor.u32 %v17438_v46, %v11921_v47  ;;  %v12052_v49 = vor.u32 %v17470_v59, %v12049_v61  ;;  %v12775_v46 = vld [vmem:[%s27770_s1 + $0xae0] sm:$0xf]  ;;  %v11780_v47 = vor.u32 %v17402_v42, %v11777_v45  ;;  %v11908_v59 = vor.u32 %v17434_v48, %v11905_v52  ;;  %v17623_v61 = vld [vmem:[%s27770_s1 + $0xaec] sm:$0xf0] }
 0x17c   : > { %2479 = vmatpush.bf16.msrb.mxu2 %v12068_v34  ;;  %2493 = vmatpush.bf16.msrb.mxu3 %v12196_v60  ;;  %v12647_v34 = vld [vmem:[%s27770_s1 + $0x9e0] sm:$0xf]  ;;  %v17591_v60 = vld [vmem:[%s27770_s1 + $0x9ec] sm:$0xf0]  ;;  %v12776_v48 = vor.u32 %v17623_v61, %v12775_v46  ;;  %v12904_v52 = vor.u32 %v17655_v51, %v12903_v16 }
 0x17d   : > { %v12503_v42 = vld [vmem:[%s27770_s1 + $0x8c0] sm:$0xf]  ;;  %v17555_v45 = vld [vmem:[%s27770_s1 + $0x8cc] sm:$0xf0] }
 0x17e   : > { %2451 = vmatpush.bf16.msrb.mxu0 %v11812_v9  ;;  %2465 = vmatpush.bf16.msrb.mxu1 %v11940_v31  ;;  %v17498_v9 = vld [vmem:[%s27770_s1 + $0x70c] sm:$0xf]  ;;  %v12161_v31 = vld [vmem:[%s27770_s1 + $0x718] sm:$0xf0]  ;;  %v17551_v46 = vld [vmem:[%s27770_s1 + $0x8ac] sm:$0xf0] }
 0x17f   : > { %v12164_v25 = vor.u32 %v17498_v9, %v12161_v31  ;;  %v17651_v9 = vld [vmem:[%s27770_s1 + $0xbcc] sm:$0xf0]  ;;  %v20598_v31 = vpop.f32.mrf.mxu0  ;;  %v12871_v16 = vld [vmem:[%s27770_s1 + $0xba0] sm:$0xf] }
 0x180   : > { %2480 = vmatpush.bf16.msrb.mxu2 %v12052_v49  ;;  %2494 = vmatpush.bf16.msrb.mxu3 %v12180_v15  ;;  %v17587_v49 = vld [vmem:[%s27770_s1 + $0x9cc] sm:$0xf0]  ;;  %v12759_v15 = vld [vmem:[%s27770_s1 + $0xac0] sm:$0xf] }
 0x181   : > { %v17615_v61 = vld [vmem:[%s27770_s1 + $0xaac] sm:$0xf0] }
 0x182   : > { %2452 = vmatpush.bf16.msrb.mxu0 %v11796_v2  ;;  %2466 = vmatpush.bf16.msrb.mxu1 %v11924_v22  ;;  %v12520_v2 = vor.u32 %v17559_v17, %v12519_v55  ;;  %v12648_v22 = vor.u32 %v17591_v60, %v12647_v34  ;;  %v20600_v55 = vpop.f32.mrf.mxu1  ;;  %v12504_v17 = vor.u32 %v17555_v45, %v12503_v42  ;;  %v12487_v60 = vld [vmem:[%s27770_s1 + $0x8a0] sm:$0xf]  ;;  %v17647_v51 = vld [vmem:[%s27770_s1 + $0xbac] sm:$0xf0] }
 0x183   : > { %v12632_v34 = vor.u32 %v17587_v49, %v12631_v4  ;;  %v17583_v4 = vld [vmem:[%s27770_s1 + $0x9ac] sm:$0xf0]  ;;  %v12471_v42 = vld [vmem:[%s27770_s1 + $0x880] sm:$0xf] }
 0x184   : > { %2481 = vmatpush.bf16.msrb.mxu2 %v12036_v30  ;;  %2495 = vmatpush.bf16.msrb.mxu3 %v12164_v25  ;;  %v12615_v25 = vld [vmem:[%s27770_s1 + $0x9a0] sm:$0xf]  ;;  %v17547_v45 = vld [vmem:[%s27770_s1 + $0x88c] sm:$0xf0] }
 0x185   : > { %v12743_v30 = vld [vmem:[%s27770_s1 + $0xaa0] sm:$0xf] }
 0x186   : > { %2453 = vmatpush.bf16.msrb.mxu0 %v11780_v47  ;;  %2467 = vmatpush.bf16.msrb.mxu1 %v11908_v59  ;;  %v12760_v47 = vor.u32 %v17619_v36, %v12759_v15  ;;  %v12888_v59 = vor.u32 %v17651_v9, %v12887_v37  ;;  %v12599_v49 = vld [vmem:[%s27770_s1 + $0x980] sm:$0xf]  ;;  %v17579_v15 = vld [vmem:[%s27770_s1 + $0x98c] sm:$0xf0]  ;;  %v20645_v37 = vpop.f32.mrf.mxu2 }
 0x187   : > { %2482 = vmatmul.bf16.vlgmr.msrb.gmra.mxu2 %v19364_v33  ;;  %2496 = vmatmul.bf16.vlgmr.msrb.gmra.mxu3 %v19366_v54  ;;  %v12727_v36 = vld [vmem:[%s27770_s1 + $0xa80] sm:$0xf]  ;;  %v17611_v9 = vld [vmem:[%s27770_s1 + $0xa8c] sm:$0xf0] }
 0x188   : > { %3336 = vmatpush.bf16.msra.mxu2 %v12776_v48  ;;  %3350 = vmatpush.bf16.msra.mxu3 %v12904_v52  ;;  %v12744_v48 = vor.u32 %v17615_v61, %v12743_v30  ;;  %v12872_v52 = vor.u32 %v17647_v51, %v12871_v16  ;;  %v12455_v30 = vld [vmem:[%s27770_s1 + $0x860] sm:$0xf]  ;;  %v17543_v61 = vld [vmem:[%s27770_s1 + $0x86c] sm:$0xf0]  ;;  %v12728_v16 = vor.u32 %v17611_v9, %v12727_v36 }
 0x189   : > { %2454 = vmatmul.bf16.vlgmr.msrb.gmra.mxu0 %v19374_v28  ;;  %2468 = vmatmul.bf16.vlgmr.msrb.gmra.mxu1 %v19376_v58  ;;  %v12439_v36 = vld [vmem:[%s27770_s1 + $0x840] sm:$0xf]  ;;  %v17539_v9 = vld [vmem:[%s27770_s1 + $0x84c] sm:$0xf0] }
 0x18a   : > { %3308 = vmatpush.bf16.msra.mxu0 %v12520_v2  ;;  %3322 = vmatpush.bf16.msra.mxu1 %v12648_v22  ;;  %v12488_v2 = vor.u32 %v17551_v46, %v12487_v60  ;;  %v12616_v22 = vor.u32 %v17583_v4, %v12615_v25  ;;  %v1433_v60 = vpop.f32.mrf.mxu0  ;;  %v1447_v46 = vpop.f32.mrf.mxu1  ;;  %v12472_v25 = vor.u32 %v17547_v45, %v12471_v42  ;;  %v12711_v42 = vld [vmem:[%s27770_s1 + $0xa60] sm:$0xf]  ;;  %v17607_v45 = vld [vmem:[%s27770_s1 + $0xa6c] sm:$0xf0] }
 0x18b   : > { %v12600_v4 = vor.u32 %v17579_v15, %v12599_v49  ;;  %v12456_v49 = vor.u32 %v17543_v61, %v12455_v30  ;;  %v17603_v30 = vld [vmem:[%s27770_s1 + $0xa4c] sm:$0xf0]  ;;  %v12823_v61 = vld [vmem:[%s27770_s1 + $0xb40] sm:$0xf] }
 0x18c   : > { %3337 = vmatpush.bf16.msra.mxu2 %v12760_v47  ;;  %3351 = vmatpush.bf16.msra.mxu3 %v12888_v59  ;;  %v20656_v47 = vpop.f32.mrf.mxu3  ;;  %v1448_v59 = vadd.f32 %v1447_v46, %v1433_v60  ;;  %v12567_v60 = vld [vmem:[%s27770_s1 + $0x940] sm:$0xf]  ;;  %v17571_v46 = vld [vmem:[%s27770_s1 + $0x94c] sm:$0xf0] }
 0x18e   : > { %3309 = vmatpush.bf16.msra.mxu0 %v12504_v17  ;;  %3323 = vmatpush.bf16.msra.mxu1 %v12632_v34  ;;  %v12855_v17 = vld [vmem:[%s27770_s1 + $0xb80] sm:$0xf]  ;;  %v17643_v34 = vld [vmem:[%s27770_s1 + $0xb8c] sm:$0xf0] }
 0x18f   : > { %v12856_v51 = vor.u32 %v17643_v34, %v12855_v17  ;;  %v12712_v17 = vor.u32 %v17607_v45, %v12711_v42  ;;  %v12568_v42 = vor.u32 %v17571_v46, %v12567_v60  ;;  %v12423_v45 = vld [vmem:[%s27770_s1 + $0x820] sm:$0xf] }
 0x190   : > { %3338 = vmatpush.bf16.msra.mxu2 %v12744_v48  ;;  %3352 = vmatpush.bf16.msra.mxu3 %v12872_v52  ;;  %v12839_v48 = vld [vmem:[%s27770_s1 + $0xb60] sm:$0xf]  ;;  %v17639_v52 = vld [vmem:[%s27770_s1 + $0xb6c] sm:$0xf0] }
 0x191   : > { %v12840_v34 = vor.u32 %v17639_v52, %v12839_v48  ;;  %v17535_v48 = vld [vmem:[%s27770_s1 + $0x82c] sm:$0xf0] }
 0x192   : > { %3310 = vmatpush.bf16.msra.mxu0 %v12488_v2  ;;  %3324 = vmatpush.bf16.msra.mxu1 %v12616_v22  ;;  %v12583_v2 = vld [vmem:[%s27770_s1 + $0x960] sm:$0xf]  ;;  %v17575_v22 = vld [vmem:[%s27770_s1 + $0x96c] sm:$0xf0]  ;;  %v12424_v60 = vor.u32 %v17535_v48, %v12423_v45  ;;  %v17589_v45 = vld [vmem:[%s27770_s1 + $0x9e4] sm:$0xf] }
 0x193   : > { %v12584_v15 = vor.u32 %v17575_v22, %v12583_v2  ;;  %v12440_v22 = vor.u32 %v17539_v9, %v12439_v36  ;;  %v17599_v36 = vld [vmem:[%s27770_s1 + $0xa2c] sm:$0xf0]  ;;  %v12807_v9 = vld [vmem:[%s27770_s1 + $0xb20] sm:$0xf]  ;;  %v12649_v48 = vld [vmem:[%s27770_s1 + $0x9f0] sm:$0xf0] }
 0x194   : > { %3339 = vmatpush.bf16.msra.mxu2 %v12728_v16  ;;  %3353 = vmatpush.bf16.msra.mxu3 %v12856_v51  ;;  %v17635_v16 = vld [vmem:[%s27770_s1 + $0xb4c] sm:$0xf0]  ;;  %v1475_v2 = vpop.f32.mrf.mxu3 }
 0x195   : > { %v12824_v19 = vor.u32 %v17635_v16, %v12823_v61 }
 0x196   : > { %3311 = vmatpush.bf16.msra.mxu0 %v12472_v25  ;;  %3325 = vmatpush.bf16.msra.mxu1 %v12600_v4  ;;  %v12695_v25 = vld [vmem:[%s27770_s1 + $0xa40] sm:$0xf]  ;;  %v1461_v4 = vpop.f32.mrf.mxu2 }
 0x197   : > { %v1462_v51 = vadd.f32 %v1461_v4, %v1448_v59  ;;  %v12696_v24 = vor.u32 %v17603_v30, %v12695_v25  ;;  %v12551_v59 = vld [vmem:[%s27770_s1 + $0x920] sm:$0xf]  ;;  %v17531_v25 = vld [vmem:[%s27770_s1 + $0x80c] sm:$0xf0] }
 0x198   : > { %3340 = vmatpush.bf16.msra.mxu2 %v12712_v17  ;;  %3354 = vmatpush.bf16.msra.mxu3 %v12840_v34  ;;  %v17631_v17 = vld [vmem:[%s27770_s1 + $0xb2c] sm:$0xf0]  ;;  %v12407_v34 = vld [vmem:[%s27770_s1 + $0x800] sm:$0xf] }
 0x199   : > { %v20712_v52 = vadd.f32 %v1475_v2, %v1462_v51  ;;  %v12535_v4 = vld [vmem:[%s27770_s1 + $0x900] sm:$0xf]  ;;  %v17563_v30 = vld [vmem:[%s27770_s1 + $0x90c] sm:$0xf0]  ;;  %v12808_v16 = vor.u32 %v17631_v17, %v12807_v9  ;;  %v17653_v9 = vld [vmem:[%s27770_s1 + $0xbe4] sm:$0xf] }
 0x19a   : > { %3312 = vmatpush.bf16.msra.mxu0 %v12456_v49  ;;  %3326 = vmatpush.bf16.msra.mxu1 %v12584_v15  ;;  %v17567_v49 = vld [vmem:[%s27770_s1 + $0x92c] sm:$0xf0]  ;;  %v12679_v15 = vld [vmem:[%s27770_s1 + $0xa20] sm:$0xf]  ;;  %v12905_v17 = vld [vmem:[%s27770_s1 + $0xbf0] sm:$0xf0] }
 0x19b   : > { %v12552_v46 = vor.u32 %v17567_v49, %v12551_v59  ;;  %v12680_v61 = vor.u32 %v17599_v36, %v12679_v15  ;;  %v12663_v51 = vld [vmem:[%s27770_s1 + $0xa00] sm:$0xf]  ;;  %v17595_v2 = vld [vmem:[%s27770_s1 + $0xa0c] sm:$0xf0]  ;;  %v17621_v59 = vld [vmem:[%s27770_s1 + $0xae4] sm:$0xf]  ;;  %v12408_v49 = vor.u32 %v17531_v25, %v12407_v34  ;;  %v12536_v15 = vor.u32 %v17563_v30, %v12535_v4 }
 0x19c   : > { %3341 = vmatpush.bf16.msra.mxu2 %v12696_v24  ;;  %3355 = vmatpush.bf16.msra.mxu3 %v12824_v19  ;;  %v17557_v19 = vld [vmem:[%s27770_s1 + $0x8e4] sm:$0xf]  ;;  %v12521_v24 = vld [vmem:[%s27770_s1 + $0x8f0] sm:$0xf0]  ;;  %v12664_v5 = vor.u32 %v17595_v2, %v12663_v51  ;;  %v12908_v30 = vor.u32 %v17653_v9, %v12905_v17 }
 0x19d   : > { %v12777_v36 = vld [vmem:[%s27770_s1 + $0xaf0] sm:$0xf0]  ;;  %v17553_v34 = vld [vmem:[%s27770_s1 + $0x8c4] sm:$0xf] }
 0x19e   : > { %3313 = vmatpush.bf16.msra.mxu0 %v12440_v22  ;;  %3327 = vmatpush.bf16.msra.mxu1 %v12568_v42  ;;  %v12791_v22 = vld [vmem:[%s27770_s1 + $0xb00] sm:$0xf]  ;;  %v17627_v42 = vld [vmem:[%s27770_s1 + $0xb0c] sm:$0xf0]  ;;  %v12505_v25 = vld [vmem:[%s27770_s1 + $0x8d0] sm:$0xf0]  ;;  %v12780_v4 = vor.u32 %v17621_v59, %v12777_v36 }
 0x19f   : > { %v12792_v18 = vor.u32 %v17627_v42, %v12791_v22  ;;  %v12761_v51 = vld [vmem:[%s27770_s1 + $0xad0] sm:$0xf0]  ;;  %v17649_v2 = vld [vmem:[%s27770_s1 + $0xbc4] sm:$0xf]  ;;  %v20804_v42 = vpop.f32.mrf.mxu0 }
 0x1a0   : > { %3342 = vmatpush.bf16.msra.mxu2 %v12680_v61  ;;  %3356 = vmatpush.bf16.msra.mxu3 %v12808_v16  ;;  %v12633_v61 = vld [vmem:[%s27770_s1 + $0x9d0] sm:$0xf0]  ;;  %v17617_v16 = vld [vmem:[%s27770_s1 + $0xac4] sm:$0xf] }
 0x1a1   : > { %v12889_v22 = vld [vmem:[%s27770_s1 + $0xbd0] sm:$0xf0]  ;;  %v17645_v9 = vld [vmem:[%s27770_s1 + $0xba4] sm:$0xf] }
 0x1a2   : > { %3314 = vmatpush.bf16.msra.mxu0 %v12424_v60  ;;  %3328 = vmatpush.bf16.msra.mxu1 %v12552_v46  ;;  %v12524_v60 = vor.u32 %v17557_v19, %v12521_v24  ;;  %v12652_v46 = vor.u32 %v17589_v45, %v12649_v48  ;;  %v20806_v19 = vpop.f32.mrf.mxu1  ;;  %v12508_v24 = vor.u32 %v17553_v34, %v12505_v25  ;;  %v17549_v48 = vld [vmem:[%s27770_s1 + $0x8a4] sm:$0xf]  ;;  %v12489_v59 = vld [vmem:[%s27770_s1 + $0x8b0] sm:$0xf0] }
 0x1a3   : > { %v12636_v45 = vor.u32 %v17585_v13, %v12633_v61  ;;  %v12617_v13 = vld [vmem:[%s27770_s1 + $0x9b0] sm:$0xf0]  ;;  %v17545_v34 = vld [vmem:[%s27770_s1 + $0x884] sm:$0xf] }
 0x1a4   : > { %3343 = vmatpush.bf16.msra.mxu2 %v12664_v5  ;;  %3357 = vmatpush.bf16.msra.mxu3 %v12792_v18  ;;  %v17581_v18 = vld [vmem:[%s27770_s1 + $0x9a4] sm:$0xf]  ;;  %v12745_v36 = vld [vmem:[%s27770_s1 + $0xab0] sm:$0xf0] }
 0x1a5   : > { %v17613_v5 = vld [vmem:[%s27770_s1 + $0xaa4] sm:$0xf]  ;;  %v12873_v17 = vld [vmem:[%s27770_s1 + $0xbb0] sm:$0xf0] }
 0x1a6   : > { %3315 = vmatpush.bf16.msra.mxu0 %v12408_v49  ;;  %3329 = vmatpush.bf16.msra.mxu1 %v12536_v15  ;;  %v12764_v49 = vor.u32 %v17617_v16, %v12761_v51  ;;  %v12892_v15 = vor.u32 %v17649_v2, %v12889_v22  ;;  %v12473_v25 = vld [vmem:[%s27770_s1 + $0x890] sm:$0xf0]  ;;  %v17577_v61 = vld [vmem:[%s27770_s1 + $0x984] sm:$0xf]  ;;  %v20851_v2 = vpop.f32.mrf.mxu2  ;;  %v20853_v22 = vpop.f32.mrf.mxu3 }
 0x1a7   : > { %3344 = vmatmul.bf16.vlgmr.msra.gmra.mxu2 %v19364_v33  ;;  %3358 = vmatmul.bf16.vlgmr.msra.gmra.mxu3 %v19366_v54  ;;  %v12601_v16 = vld [vmem:[%s27770_s1 + $0x990] sm:$0xf0]  ;;  %v17609_v51 = vld [vmem:[%s27770_s1 + $0xa84] sm:$0xf] }
 0x1a8   : > { %3392 = vmatpush.bf16.msrb.mxu2 %v12780_v4  ;;  %3406 = vmatpush.bf16.msrb.mxu3 %v12908_v30  ;;  %v12748_v4 = vor.u32 %v17613_v5, %v12745_v36  ;;  %v12876_v30 = vor.u32 %v17645_v9, %v12873_v17  ;;  %v12604_v5 = vor.u32 %v17577_v61, %v12601_v16  ;;  %v17541_v36 = vld [vmem:[%s27770_s1 + $0x864] sm:$0xf]  ;;  %v12457_v9 = vld [vmem:[%s27770_s1 + $0x870] sm:$0xf0] }
 0x1a9   : > { %3316 = vmatmul.bf16.vlgmr.msra.gmra.mxu0 %v19374_v28  ;;  %3330 = vmatmul.bf16.vlgmr.msra.gmra.mxu1 %v19376_v58  ;;  %v1282_v17 = vadd.f32 %v20264_v23, %v20262_v27  ;;  %v12713_v27 = vld [vmem:[%s27770_s1 + $0xa70] sm:$0xf0]  ;;  %v17637_v23 = vld [vmem:[%s27770_s1 + $0xb64] sm:$0xf]  ;;  %v12460_v61 = vor.u32 %v17541_v36, %v12457_v9 }
 0x1aa   : > { %3364 = vmatpush.bf16.msrb.mxu0 %v12524_v60  ;;  %3378 = vmatpush.bf16.msrb.mxu1 %v12652_v46  ;;  %v12492_v60 = vor.u32 %v17549_v48, %v12489_v59  ;;  %v12620_v46 = vor.u32 %v17581_v18, %v12617_v13  ;;  %v12857_v48 = vld [vmem:[%s27770_s1 + $0xb90] sm:$0xf0]  ;;  %v2287_v59 = vpop.f32.mrf.mxu0  ;;  %v12476_v13 = vor.u32 %v17545_v34, %v12473_v25  ;;  %v17605_v34 = vld [vmem:[%s27770_s1 + $0xa64] sm:$0xf] }
 0x1ab   : > { %v12841_v25 = vld [vmem:[%s27770_s1 + $0xb70] sm:$0xf0] }
 0x1ac   : > { %3393 = vmatpush.bf16.msrb.mxu2 %v12764_v49  ;;  %3407 = vmatpush.bf16.msrb.mxu3 %v12892_v15  ;;  %v2301_v49 = vpop.f32.mrf.mxu1  ;;  %v417_v15 = vlaneseq }
 0x1ad   : > { %v2302_v18 = vadd.f32 %v2301_v49, %v2287_v59  ;;  %v12569_v59 = vld [vmem:[%s27770_s1 + $0x950] sm:$0xf0]  ;;  %v17601_v49 = vld [vmem:[%s27770_s1 + $0xa44] sm:$0xf] }
 0x1ae   : > { %3365 = vmatpush.bf16.msrb.mxu0 %v12508_v24  ;;  %3379 = vmatpush.bf16.msrb.mxu1 %v12636_v45  ;;  %v12729_v24 = vld [vmem:[%s27770_s1 + $0xa90] sm:$0xf0]  ;;  %v17641_v45 = vld [vmem:[%s27770_s1 + $0xb84] sm:$0xf] }
 0x1af   : > { %v12732_v35 = vor.u32 %v17609_v51, %v12729_v24  ;;  %v12860_v12 = vor.u32 %v17641_v45, %v12857_v48  ;;  %v17537_v51 = vld [vmem:[%s27770_s1 + $0x844] sm:$0xf]  ;;  %v12441_v24 = vld [vmem:[%s27770_s1 + $0x850] sm:$0xf0]  ;;  %v12716_v45 = vor.u32 %v17605_v34, %v12713_v27  ;;  %v12844_v48 = vor.u32 %v17637_v23, %v12841_v25 }
 0x1b0   : > { %3394 = vmatpush.bf16.msrb.mxu2 %v12748_v4  ;;  %3408 = vmatpush.bf16.msrb.mxu3 %v12876_v30  ;;  %v1296_v4 = vadd.f32 %v20296_v29, %v1282_v17  ;;  %v20891_v30 = vshrl.u32 %v417_v15, 7  ;;  %v17569_v29 = vld [vmem:[%s27770_s1 + $0x944] sm:$0xf]  ;;  %v2315_v15 = vpop.f32.mrf.mxu2  ;;  %v12425_v27 = vld [vmem:[%s27770_s1 + $0x830] sm:$0xf0] }
 0x1b1   : > { %v2316_v9 = vadd.f32 %v2315_v15, %v2302_v18  ;;  %v17533_v34 = vld [vmem:[%s27770_s1 + $0x824] sm:$0xf] }
 0x1b2   : > { %3366 = vmatpush.bf16.msrb.mxu0 %v12492_v60  ;;  %3380 = vmatpush.bf16.msrb.mxu1 %v12620_v46  ;;  %v17573_v60 = vld [vmem:[%s27770_s1 + $0x964] sm:$0xf]  ;;  %v12585_v46 = vld [vmem:[%s27770_s1 + $0x970] sm:$0xf0]  ;;  %v20918_v36 = vadd.f32 %v20298_v41, %v1296_v4  ;;  %v424_v17 = vand.u32 15, %v20891_v30  ;;  %vm1488_vm0 = vcmp.lt.s32.totalorder %v20891_v30, 2 }
 0x1b3   : > { %v12588_v16 = vor.u32 %v17573_v60, %v12585_v46  ;;  %v12444_v60 = vor.u32 %v17537_v51, %v12441_v24  ;;  %v12572_v46 = vor.u32 %v17569_v29, %v12569_v59  ;;  %v17565_v25 = vld [vmem:[%s27770_s1 + $0x924] sm:$0xf]  ;;  %v12553_v4 = vld [vmem:[%s27770_s1 + $0x930] sm:$0xf0]  ;;  %vm2510_vm2 = vcmp.lt.s32.totalorder %v20891_v30, 1 }
 0x1b4   : > { %3395 = vmatpush.bf16.msrb.mxu2 %v12732_v35  ;;  %3409 = vmatpush.bf16.msrb.mxu3 %v12860_v12  ;;  %v12697_v12 = vld [vmem:[%s27770_s1 + $0xa50] sm:$0xf0]  ;;  %v17633_v35 = vld [vmem:[%s27770_s1 + $0xb44] sm:$0xf]  ;;  %v2303_v51 = vpop.f32.mrf.mxu1  ;;  %v20952_v15 = vadd.s32 4294967294, %v424_v17  ;;  %vm4541_vm4 = vcmp.lt.s32.totalorder %v20891_v30, 7 }
 0x1b5   : > { %v12700_v41 = vor.u32 %v17601_v49, %v12697_v12  ;;  %v12681_v24 = vld [vmem:[%s27770_s1 + $0xa30] sm:$0xf0]  ;;  %v17529_v49 = vld [vmem:[%s27770_s1 + $0x804] sm:$0xf]  ;;  %v12556_v12 = vor.u32 %v17565_v25, %v12553_v4  ;;  %v17560_v4 = vld [vmem:[%s27770_s1 + $0x8f4] sm:$0xf0] }
 0x1b6   : > { %3367 = vmatpush.bf16.msrb.mxu0 %v12476_v13  ;;  %3381 = vmatpush.bf16.msrb.mxu1 %v12604_v5  ;;  %v2329_v13 = vpop.f32.mrf.mxu3  ;;  %v12825_v5 = vld [vmem:[%s27770_s1 + $0xb50] sm:$0xf0]  ;;  %vm446_vm1 = vcmp.ge.s32.totalorder %v20952_v15, 0  ;;  %vm5571_vm6 = vcmp.lt.s32.totalorder %v20891_v30, 6 }
 0x1b7   : > { %v20927_v23 = vadd.f32 %v2329_v13, %v2316_v9  ;;  %v12828_v18 = vor.u32 %v17633_v35, %v12825_v5  ;;  %v12428_v13 = vor.u32 %v17533_v34, %v12425_v27  ;;  %v12409_v35 = vld [vmem:[%s27770_s1 + $0x810] sm:$0xf0]  ;;  %v17561_v5 = vld [vmem:[%s27770_s1 + $0x904] sm:$0xf] }
 0x1b8   : > { %3396 = vmatpush.bf16.msrb.mxu2 %v12716_v45  ;;  %3410 = vmatpush.bf16.msrb.mxu3 %v12844_v48  ;;  %v17629_v45 = vld [vmem:[%s27770_s1 + $0xb24] sm:$0xf]  ;;  %v12809_v48 = vld [vmem:[%s27770_s1 + $0xb30] sm:$0xf0]  ;;  %v2317_v25 = vpop.f32.mrf.mxu2 }
 0x1b9   : > { %v12537_v9 = vld [vmem:[%s27770_s1 + $0x910] sm:$0xf0]  ;;  %v17625_v27 = vld [vmem:[%s27770_s1 + $0xb04] sm:$0xf] }
 0x1ba   : > { %3368 = vmatpush.bf16.msrb.mxu0 %v12460_v61  ;;  %3382 = vmatpush.bf16.msrb.mxu1 %v12588_v16  ;;  %v17597_v61 = vld [vmem:[%s27770_s1 + $0xa24] sm:$0xf]  ;;  %v2289_v16 = vpop.f32.mrf.mxu0  ;;  %v12665_v34 = vld [vmem:[%s27770_s1 + $0xa10] sm:$0xf0]  ;;  %v12540_v7 = vor.u32 %v17561_v5, %v12537_v9 }
 0x1bb   : > { %v2304_v59 = vadd.f32 %v2303_v51, %v2289_v16  ;;  %v12684_v29 = vor.u32 %v17597_v61, %v12681_v24  ;;  %v12655_v16 = vld [vmem:[%s27770_s1 + $0x9e8] sm:$0xf]  ;;  %v17592_v51 = vld [vmem:[%s27770_s1 + $0x9f4] sm:$0xf0] }
 0x1bc   : > { %3397 = vmatpush.bf16.msrb.mxu2 %v12700_v41  ;;  %3411 = vmatpush.bf16.msrb.mxu3 %v12828_v18  ;;  %v12793_v41 = vld [vmem:[%s27770_s1 + $0xb10] sm:$0xf0]  ;;  %v12527_v18 = vld [vmem:[%s27770_s1 + $0x8e8] sm:$0xf]  ;;  %v12656_v9 = vor.u32 %v17592_v51, %v12655_v16 }
 0x1bd   : > { %v2318_v61 = vadd.f32 %v2317_v25, %v2304_v59  ;;  %v12783_v24 = vld [vmem:[%s27770_s1 + $0xae8] sm:$0xf]  ;;  %v17624_v59 = vld [vmem:[%s27770_s1 + $0xaf4] sm:$0xf0]  ;;  %v12528_v5 = vor.u32 %v17560_v4, %v12527_v18 }
 0x1be   : > { %3369 = vmatpush.bf16.msrb.mxu0 %v12444_v60  ;;  %3383 = vmatpush.bf16.msrb.mxu1 %v12572_v46  ;;  %v12812_v60 = vor.u32 %v17629_v45, %v12809_v48  ;;  %v17593_v46 = vld [vmem:[%s27770_s1 + $0xa04] sm:$0xf]  ;;  %v2331_v45 = vpop.f32.mrf.mxu3  ;;  %v12412_v48 = vor.u32 %v17529_v49, %v12409_v35  ;;  %v12911_v25 = vld [vmem:[%s27770_s1 + $0xbe8] sm:$0xf]  ;;  %v21003_v35 = vadd.s32 4294967295, %v424_v17 }
 0x1bf   : > { %v2332_v6 = vadd.f32 %v2331_v45, %v2318_v61  ;;  %v12511_v49 = vld [vmem:[%s27770_s1 + $0x8c8] sm:$0xf]  ;;  %v12912_v17 = vor.u32 %v17656_v57, %v12911_v25  ;;  %v17620_v18 = vld [vmem:[%s27770_s1 + $0xad4] sm:$0xf0] }
 0x1c0   : > { %3398 = vmatpush.bf16.msrb.mxu2 %v12684_v29  ;;  %3412 = vmatpush.bf16.msrb.mxu3 %v12812_v60  ;;  %v12639_v29 = vld [vmem:[%s27770_s1 + $0x9c8] sm:$0xf]  ;;  %v2502_v60 = vrot.slane %v20927_v23, 7  ;;  %v17652_v57 = vld [vmem:[%s27770_s1 + $0xbd4] sm:$0xf0]  ;;  %vm454_vm3 = vcmp.ge.s32.totalorder %v21003_v35, 0  ;;  %v12512_v45 = vor.u32 %v17556_v1, %v12511_v49 }
 0x1c1   : > { %v27891_v23 = vrot.slane %v20260_v63, 6  ;;  %v17552_v25 = vld [vmem:[%s27770_s1 + $0x8b4] sm:$0xf0]  ;;  %v12751_v49 = vld [vmem:[%s27770_s1 + $0xaa8] sm:$0xf] }
 0x1c2   : > { %3370 = vmatpush.bf16.msrb.mxu0 %v12428_v13  ;;  %3384 = vmatpush.bf16.msrb.mxu1 %v12556_v12  ;;  %v12668_v13 = vor.u32 %v17593_v46, %v12665_v34  ;;  %v12796_v12 = vor.u32 %v17625_v27, %v12793_v41  ;;  %v2506_v46 = vrot.slane %v2332_v6, 7  ;;  %v12784_v34 = vor.u32 %v17624_v59, %v12783_v24  ;;  %v17588_v27 = vld [vmem:[%s27770_s1 + $0x9d4] sm:$0xf0]  ;;  %v12767_v41 = vld [vmem:[%s27770_s1 + $0xac8] sm:$0xf] }
 0x1c3   : > { %v12895_v6 = vld [vmem:[%s27770_s1 + $0xbc8] sm:$0xf]  ;;  %v27894_v51 = vmov %v27891_v23 }
 0x1c4   : > { %3399 = vmatpush.bf16.msrb.mxu2 %v12668_v13  ;;  %3413 = vmatpush.bf16.msrb.mxu3 %v12796_v12  ;;  %v2515_v61 = vsel %vm2510_vm2, %v2506_v46, %v2502_v60  ;;  %v12495_v59 = vld [vmem:[%s27770_s1 + $0x8a8] sm:$0xf]  ;;  %v2511_v63 = vsel %vm2510_vm2, %v2502_v60, %v2506_v46  ;;  %v12768_v13 = vor.u32 %v17620_v18, %v12767_v41  ;;  %v17584_v12 = vld [vmem:[%s27770_s1 + $0x9b4] sm:$0xf0] }
 0x1c5   : > { %v12896_v1 = vor.u32 %v17652_v57, %v12895_v6  ;;  %v17648_v60 = vld [vmem:[%s27770_s1 + $0xbb4] sm:$0xf0]  ;;  %v12479_v18 = vld [vmem:[%s27770_s1 + $0x888] sm:$0xf] }
 0x1c6   : > { %3371 = vmatpush.bf16.msrb.mxu0 %v12412_v48  ;;  %3385 = vmatpush.bf16.msrb.mxu1 %v12540_v7  ;;  %v27892_v7 = vrot.slane %v20918_v36, 6  ;;  %v12640_v48 = vor.u32 %v17588_v27, %v12639_v29  ;;  %v12623_v36 = vld [vmem:[%s27770_s1 + $0x9a8] sm:$0xf]  ;;  %v12496_v27 = vor.u32 %v17552_v25, %v12495_v59  ;;  %v17548_v6 = vld [vmem:[%s27770_s1 + $0x894] sm:$0xf0] }
 0x1c7   : > { %v12879_v29 = vld [vmem:[%s27770_s1 + $0xba8] sm:$0xf]  ;;  %3400 = vmatmul.bf16.vlgmr.msrb.gmra.mxu2 %v19364_v33  ;;  %3414 = vmatmul.bf16.vlgmr.msrb.gmra.mxu3 %v19366_v54  ;;  %v12624_v41 = vor.u32 %v17584_v12, %v12623_v36  ;;  %v12480_v25 = vor.u32 %v17548_v6, %v12479_v18  ;;  %v17540_v6 = vld [vmem:[%s27770_s1 + $0x854] sm:$0xf0] }
 0x1c8   : > { %v1493_v4 = vsel %vm1488_vm0, %v27892_v7, %v27891_v23  ;;  %v27893_v16 = vmov %v27892_v7  ;;  %3448 = vmatpush.bf16.msra.mxu2 %v12784_v34  ;;  %3462 = vmatpush.bf16.msra.mxu3 %v12912_v17  ;;  %v2523_v34 = vsel %vm454_vm3, %v2515_v61, 0.0  ;;  %v12880_v23 = vor.u32 %v17648_v60, %v12879_v29  ;;  %v12607_v7 = vld [vmem:[%s27770_s1 + $0x988] sm:$0xf]  ;;  %v17608_v60 = vld [vmem:[%s27770_s1 + $0xa74] sm:$0xf0] }
 0x1c9   : > { %v1489_v24 = vsel %vm1488_vm0, %v27894_v51, %v27893_v16  ;;  %3372 = vmatmul.bf16.vlgmr.msrb.gmra.mxu0 %v19374_v28  ;;  %3386 = vmatmul.bf16.vlgmr.msrb.gmra.mxu1 %v19376_v58  ;;  %v1501_v46 = vsel %vm446_vm1, %v1493_v4, 0.0  ;;  %v17580_v4 = vld [vmem:[%s27770_s1 + $0x994] sm:$0xf0]  ;;  %v12735_v61 = vld [vmem:[%s27770_s1 + $0xa88] sm:$0xf] }
 0x1ca   : > { %3420 = vmatpush.bf16.msra.mxu0 %v12528_v5  ;;  %3434 = vmatpush.bf16.msra.mxu1 %v12656_v9  ;;  %v17616_v5 = vld [vmem:[%s27770_s1 + $0xab4] sm:$0xf0]  ;;  %v21064_v9 = vadd.f32 %v2511_v63, %v1489_v24  ;;  %v21080_v17 = vadd.f32 %v2523_v34, %v1501_v46  ;;  %v12863_v51 = vld [vmem:[%s27770_s1 + $0xb88] sm:$0xf]  ;;  %v12608_v36 = vor.u32 %v17580_v4, %v12607_v7 }
 0x1cb   : > { %v12752_v57 = vor.u32 %v17616_v5, %v12751_v49  ;;  %v17612_v16 = vld [vmem:[%s27770_s1 + $0xa94] sm:$0xf0]  ;;  %v12463_v63 = vld [vmem:[%s27770_s1 + $0x868] sm:$0xf] }
 0x1cc   : > { %3449 = vmatpush.bf16.msra.mxu2 %v12768_v13  ;;  %3463 = vmatpush.bf16.msra.mxu3 %v12896_v1  ;;  %v17644_v24 = vld [vmem:[%s27770_s1 + $0xb94] sm:$0xf0]  ;;  %v12736_v1 = vor.u32 %v17612_v16, %v12735_v61  ;;  %v12591_v49 = vld [vmem:[%s27770_s1 + $0x968] sm:$0xf]  ;;  %v1338_v16 = vadd.f32 %v20385_v43, %v20383_v39 }
 0x1cd   : > { %v17544_v13 = vld [vmem:[%s27770_s1 + $0x874] sm:$0xf0]  ;;  %v12864_v12 = vor.u32 %v17644_v24, %v12863_v51  ;;  %v12719_v29 = vld [vmem:[%s27770_s1 + $0xa68] sm:$0xf]  ;;  %v2371_v51 = vpop.f32.mrf.mxu2  ;;  %v2385_v24 = vpop.f32.mrf.mxu3 }
 0x1ce   : > { %3421 = vmatpush.bf16.msra.mxu0 %v12512_v45  ;;  %3435 = vmatpush.bf16.msra.mxu1 %v12640_v48  ;;  %v2343_v45 = vpop.f32.mrf.mxu0  ;;  %v2357_v48 = vpop.f32.mrf.mxu1  ;;  %v17576_v5 = vld [vmem:[%s27770_s1 + $0x974] sm:$0xf0]  ;;  %v12847_v46 = vld [vmem:[%s27770_s1 + $0xb68] sm:$0xf] }
 0x1cf   : > { %v2358_v59 = vadd.f32 %v2357_v48, %v2343_v45  ;;  %v17640_v34 = vld [vmem:[%s27770_s1 + $0xb74] sm:$0xf0]  ;;  %v12447_v18 = vld [vmem:[%s27770_s1 + $0x848] sm:$0xf] }
 0x1d0   : > { %3450 = vmatpush.bf16.msra.mxu2 %v12752_v57  ;;  %3464 = vmatpush.bf16.msra.mxu3 %v12880_v23  ;;  %v12720_v57 = vor.u32 %v17608_v60, %v12719_v29  ;;  %v12848_v23 = vor.u32 %v17640_v34, %v12847_v46  ;;  %v12575_v7 = vld [vmem:[%s27770_s1 + $0x948] sm:$0xf]  ;;  %v17572_v4 = vld [vmem:[%s27770_s1 + $0x954] sm:$0xf0]  ;;  %v12448_v39 = vor.u32 %v17540_v6, %v12447_v18  ;;  %v1481_v18 = vrot.slane %v20381_v53, 6 }
 0x1d1   : > { %v12703_v61 = vld [vmem:[%s27770_s1 + $0xa48] sm:$0xf]  ;;  %v17604_v45 = vld [vmem:[%s27770_s1 + $0xa54] sm:$0xf0]  ;;  %v12576_v43 = vor.u32 %v17572_v4, %v12575_v7 }
 0x1d2   : > { %3422 = vmatpush.bf16.msra.mxu0 %v12496_v27  ;;  %3436 = vmatpush.bf16.msra.mxu1 %v12624_v41  ;;  %v12464_v27 = vor.u32 %v17544_v13, %v12463_v63  ;;  %v12592_v41 = vor.u32 %v17576_v5, %v12591_v49  ;;  %v12831_v48 = vld [vmem:[%s27770_s1 + $0xb48] sm:$0xf]  ;;  %v1352_v63 = vadd.f32 %v20424_v10, %v1338_v16  ;;  %v17568_v5 = vld [vmem:[%s27770_s1 + $0x934] sm:$0xf0] }
 0x1d3   : > { %v12431_v13 = vld [vmem:[%s27770_s1 + $0x828] sm:$0xf]  ;;  %v12704_v49 = vor.u32 %v17604_v45, %v12703_v61  ;;  %v17600_v34 = vld [vmem:[%s27770_s1 + $0xa34] sm:$0xf0] }
 0x1d4   : > { %3451 = vmatpush.bf16.msra.mxu2 %v12736_v1  ;;  %3465 = vmatpush.bf16.msra.mxu3 %v12864_v12  ;;  %v17536_v1 = vld [vmem:[%s27770_s1 + $0x834] sm:$0xf0]  ;;  %v12559_v10 = vld [vmem:[%s27770_s1 + $0x928] sm:$0xf] }
 0x1d5   : > { %v12687_v29 = vld [vmem:[%s27770_s1 + $0xa28] sm:$0xf]  ;;  %v12560_v7 = vor.u32 %v17568_v5, %v12559_v10  ;;  %v17532_v4 = vld [vmem:[%s27770_s1 + $0x814] sm:$0xf0] }
 0x1d6   : > { %3423 = vmatpush.bf16.msra.mxu0 %v12480_v25  ;;  %3437 = vmatpush.bf16.msra.mxu1 %v12608_v36  ;;  %v17636_v25 = vld [vmem:[%s27770_s1 + $0xb54] sm:$0xf0]  ;;  %v2372_v36 = vadd.f32 %v2371_v51, %v2358_v59  ;;  %v2345_v60 = vpop.f32.mrf.mxu0  ;;  %v2359_v46 = vpop.f32.mrf.mxu1  ;;  %v12415_v6 = vld [vmem:[%s27770_s1 + $0x808] sm:$0xf] }
 0x1d7   : > { %v12832_v59 = vor.u32 %v17636_v25, %v12831_v48  ;;  %v12543_v61 = vld [vmem:[%s27770_s1 + $0x908] sm:$0xf]  ;;  %v17564_v53 = vld [vmem:[%s27770_s1 + $0x914] sm:$0xf0]  ;;  %v2360_v16 = vadd.f32 %v2359_v46, %v2345_v60  ;;  %v2373_v25 = vpop.f32.mrf.mxu2  ;;  %v12416_v10 = vor.u32 %v17532_v4, %v12415_v6  ;;  %v17654_v60 = vld [vmem:[%s27770_s1 + $0xbec] sm:$0xf] }
 0x1d8   : > { %3452 = vmatpush.bf16.msra.mxu2 %v12720_v57  ;;  %3466 = vmatpush.bf16.msra.mxu3 %v12848_v23  ;;  %v21163_v12 = vadd.f32 %v2385_v24, %v2372_v36  ;;  %v1366_v57 = vadd.f32 %v20441_v21, %v1352_v63  ;;  %v12432_v23 = vor.u32 %v17536_v1, %v12431_v13  ;;  %v12671_v24 = vld [vmem:[%s27770_s1 + $0xa08] sm:$0xf]  ;;  %v17596_v45 = vld [vmem:[%s27770_s1 + $0xa14] sm:$0xf0]  ;;  %v17558_v63 = vld [vmem:[%s27770_s1 + $0x8ec] sm:$0xf] }
 0x1d9   : > { %v12688_v21 = vor.u32 %v17600_v34, %v12687_v29  ;;  %v12799_v48 = vld [vmem:[%s27770_s1 + $0xb08] sm:$0xf]  ;;  %v17628_v36 = vld [vmem:[%s27770_s1 + $0xb14] sm:$0xf0]  ;;  %v17590_v13 = vld [vmem:[%s27770_s1 + $0x9ec] sm:$0xf]  ;;  %v12544_v5 = vor.u32 %v17564_v53, %v12543_v61 }
 0x1da   : > { %3424 = vmatpush.bf16.msra.mxu0 %v12464_v27  ;;  %3438 = vmatpush.bf16.msra.mxu1 %v12592_v41  ;;  %v12815_v27 = vld [vmem:[%s27770_s1 + $0xb28] sm:$0xf]  ;;  %v17632_v41 = vld [vmem:[%s27770_s1 + $0xb34] sm:$0xf0]  ;;  %v12657_v1 = vld [vmem:[%s27770_s1 + $0x9f8] sm:$0xf0] }
 0x1db   : > { %v12816_v51 = vor.u32 %v17632_v41, %v12815_v27  ;;  %v12785_v29 = vld [vmem:[%s27770_s1 + $0xaf8] sm:$0xf0]  ;;  %v1485_v34 = vrot.slane %v1366_v57, 6  ;;  %v12672_v41 = vor.u32 %v17596_v45, %v12671_v24  ;;  %v17554_v4 = vld [vmem:[%s27770_s1 + $0x8cc] sm:$0xf]  ;;  %v2503_v57 = vrot.slane %v21163_v12, 7 }
 0x1dc   : > { %3453 = vmatpush.bf16.msra.mxu2 %v12704_v49  ;;  %3467 = vmatpush.bf16.msra.mxu3 %v12832_v59  ;;  %v17622_v49 = vld [vmem:[%s27770_s1 + $0xaec] sm:$0xf]  ;;  %v2387_v59 = vpop.f32.mrf.mxu3  ;;  %v12913_v46 = vld [vmem:[%s27770_s1 + $0xbf8] sm:$0xf0]  ;;  %v16463_v35 = vld [vmem:[%s27772_s3 + $0xea8] sm:$0xf] }
 0x1dd   : > { %v12513_v61 = vld [vmem:[%s27770_s1 + $0x8d8] sm:$0xf0]  ;;  %v17586_v53 = vld [vmem:[%s27770_s1 + $0x9cc] sm:$0xf] }
 0x1de   : > { %3425 = vmatpush.bf16.msra.mxu0 %v12448_v39  ;;  %3439 = vmatpush.bf16.msra.mxu1 %v12576_v43  ;;  %v12529_v39 = vld [vmem:[%s27770_s1 + $0x8f8] sm:$0xf0]  ;;  %v2374_v43 = vadd.f32 %v2373_v25, %v2360_v16  ;;  %v17618_v45 = vld [vmem:[%s27770_s1 + $0xacc] sm:$0xf] }
 0x1df   : > { %v12532_v6 = vor.u32 %v17558_v63, %v12529_v39  ;;  %v12641_v24 = vld [vmem:[%s27770_s1 + $0x9d8] sm:$0xf0]  ;;  %v17650_v12 = vld [vmem:[%s27770_s1 + $0xbcc] sm:$0xf]  ;;  %v1490_v39 = vsel %vm1488_vm0, %v1481_v18, %v1485_v34 }
 0x1e0   : > { %3454 = vmatpush.bf16.msra.mxu2 %v12688_v21  ;;  %3468 = vmatpush.bf16.msra.mxu3 %v12816_v51  ;;  %v2388_v27 = vadd.f32 %v2387_v59, %v2374_v43  ;;  %v12788_v21 = vor.u32 %v17622_v49, %v12785_v29  ;;  %v12916_v51 = vor.u32 %v17654_v60, %v12913_v46  ;;  %v12897_v25 = vld [vmem:[%s27770_s1 + $0xbd8] sm:$0xf0]  ;;  %v17582_v59 = vld [vmem:[%s27770_s1 + $0x9ac] sm:$0xf] }
 0x1e1   : > { %v12516_v43 = vor.u32 %v17554_v4, %v12513_v61  ;;  %v12497_v49 = vld [vmem:[%s27770_s1 + $0x8b8] sm:$0xf0]  ;;  %v17614_v60 = vld [vmem:[%s27770_s1 + $0xaac] sm:$0xf] }
 0x1e2   : > { %3426 = vmatpush.bf16.msra.mxu0 %v12432_v23  ;;  %3440 = vmatpush.bf16.msra.mxu1 %v12560_v7  ;;  %v12800_v23 = vor.u32 %v17628_v36, %v12799_v48  ;;  %v12660_v7 = vor.u32 %v17590_v13, %v12657_v1  ;;  %v2507_v16 = vrot.slane %v2388_v27, 7  ;;  %v12769_v48 = vld [vmem:[%s27770_s1 + $0xad8] sm:$0xf0]  ;;  %v1494_v36 = vsel %vm1488_vm0, %v1485_v34, %v1481_v18  ;;  %v17550_v1 = vld [vmem:[%s27770_s1 + $0x8ac] sm:$0xf] }
 0x1e3   : > { %v12644_v13 = vor.u32 %v17586_v53, %v12641_v24  ;;  %v12772_v18 = vor.u32 %v17618_v45, %v12769_v48  ;;  %v12625_v29 = vld [vmem:[%s27770_s1 + $0x9b8] sm:$0xf0]  ;;  %v17646_v27 = vld [vmem:[%s27770_s1 + $0xbac] sm:$0xf]  ;;  %v12500_v4 = vor.u32 %v17550_v1, %v12497_v49 }
 0x1e4   : > { %3455 = vmatpush.bf16.msra.mxu2 %v12672_v41  ;;  %3469 = vmatpush.bf16.msra.mxu3 %v12800_v23  ;;  %v2516_v63 = vsel %vm2510_vm2, %v2507_v16, %v2503_v57  ;;  %v12753_v46 = vld [vmem:[%s27770_s1 + $0xab8] sm:$0xf0]  ;;  %v1502_v23 = vsel %vm446_vm1, %v1494_v36, 0.0  ;;  %v12628_v61 = vor.u32 %v17582_v59, %v12625_v29  ;;  %v17546_v53 = vld [vmem:[%s27770_s1 + $0x88c] sm:$0xf] }
 0x1e5   : > { %v12881_v41 = vld [vmem:[%s27770_s1 + $0xbb8] sm:$0xf0]  ;;  %v17610_v45 = vld [vmem:[%s27770_s1 + $0xa8c] sm:$0xf] }
 0x1e6   : > { %3427 = vmatpush.bf16.msra.mxu0 %v12416_v10  ;;  %3441 = vmatpush.bf16.msra.mxu1 %v12544_v5  ;;  %v2512_v10 = vsel %vm2510_vm2, %v2503_v57, %v2507_v16  ;;  %v12900_v5 = vor.u32 %v17650_v12, %v12897_v25  ;;  %v12481_v57 = vld [vmem:[%s27770_s1 + $0x898] sm:$0xf0]  ;;  %v12756_v16 = vor.u32 %v17614_v60, %v12753_v46  ;;  %v17642_v12 = vld [vmem:[%s27770_s1 + $0xb8c] sm:$0xf]  ;;  %v2399_v36 = vpop.f32.mrf.mxu0 }
 0x1e7   : > { %v21284_v34 = vadd.f32 %v2512_v10, %v1490_v39  ;;  %3456 = vmatmul.bf16.vlgmr.msra.gmra.mxu2 %v19364_v33  ;;  %3470 = vmatmul.bf16.vlgmr.msra.gmra.mxu3 %v19366_v54  ;;  %v12609_v24 = vld [vmem:[%s27770_s1 + $0x998] sm:$0xf0]  ;;  %v17542_v1 = vld [vmem:[%s27770_s1 + $0x86c] sm:$0xf] }
 0x1e8   : > { %3504 = vmatpush.bf16.msrb.mxu2 %v12788_v21  ;;  %3518 = vmatpush.bf16.msrb.mxu3 %v12916_v51  ;;  %v12884_v21 = vor.u32 %v17646_v27, %v12881_v41  ;;  %v17578_v51 = vld [vmem:[%s27770_s1 + $0x98c] sm:$0xf]  ;;  %v12737_v48 = vld [vmem:[%s27770_s1 + $0xa98] sm:$0xf0] }
 0x1e9   : > { %3428 = vmatmul.bf16.vlgmr.msra.gmra.mxu0 %v19374_v28  ;;  %3442 = vmatmul.bf16.vlgmr.msra.gmra.mxu1 %v19376_v58  ;;  %v12865_v25 = vld [vmem:[%s27770_s1 + $0xb98] sm:$0xf0]  ;;  %v12740_v59 = vor.u32 %v17610_v45, %v12737_v48  ;;  %v17606_v29 = vld [vmem:[%s27770_s1 + $0xa6c] sm:$0xf] }
 0x1ea   : > { %3476 = vmatpush.bf16.msrb.mxu0 %v12532_v6  ;;  %3490 = vmatpush.bf16.msrb.mxu1 %v12660_v7  ;;  %v2524_v6 = vsel %vm454_vm3, %v2516_v63, 0.0  ;;  %v2413_v63 = vpop.f32.mrf.mxu1  ;;  %v12465_v49 = vld [vmem:[%s27770_s1 + $0x878] sm:$0xf0]  ;;  %v12868_v10 = vor.u32 %v17642_v12, %v12865_v25  ;;  %v17638_v46 = vld [vmem:[%s27770_s1 + $0xb6c] sm:$0xf]  ;;  %v2441_v45 = vpop.f32.mrf.mxu3 }
 0x1eb   : > { %v21300_v7 = vadd.f32 %v2524_v6, %v1502_v23  ;;  %v2414_v39 = vadd.f32 %v2413_v63, %v2399_v36  ;;  %v12721_v60 = vld [vmem:[%s27770_s1 + $0xa78] sm:$0xf0]  ;;  %v12468_v41 = vor.u32 %v17542_v1, %v12465_v49  ;;  %v17538_v6 = vld [vmem:[%s27770_s1 + $0x84c] sm:$0xf] }
 0x1ec   : > { %3505 = vmatpush.bf16.msrb.mxu2 %v12772_v18  ;;  %3519 = vmatpush.bf16.msrb.mxu3 %v12900_v5  ;;  %v17574_v18 = vld [vmem:[%s27770_s1 + $0x96c] sm:$0xf]  ;;  %v12593_v5 = vld [vmem:[%s27770_s1 + $0x978] sm:$0xf0] }
 0x1ed   : > { %v12849_v27 = vld [vmem:[%s27770_s1 + $0xb78] sm:$0xf0]  ;;  %v12596_v23 = vor.u32 %v17574_v18, %v12593_v5  ;;  %v17634_v12 = vld [vmem:[%s27770_s1 + $0xb4c] sm:$0xf] }
 0x1ee   : > { %3477 = vmatpush.bf16.msrb.mxu0 %v12516_v43  ;;  %3491 = vmatpush.bf16.msrb.mxu1 %v12644_v13  ;;  %v12484_v43 = vor.u32 %v17546_v53, %v12481_v57  ;;  %v12612_v13 = vor.u32 %v17578_v51, %v12609_v24  ;;  %v12852_v53 = vor.u32 %v17638_v46, %v12849_v27  ;;  %v17570_v57 = vld [vmem:[%s27770_s1 + $0x94c] sm:$0xf]  ;;  %v2427_v24 = vpop.f32.mrf.mxu2  ;;  %v12705_v48 = vld [vmem:[%s27770_s1 + $0xa58] sm:$0xf0]  ;;  %v2401_v18 = vpop.f32.mrf.mxu0  ;;  %v1482_v27 = vrot.slane %v20506_v3, 6 }
 0x1ef   : > { %v1394_v51 = vadd.f32 %v20600_v55, %v20598_v31  ;;  %v12833_v25 = vld [vmem:[%s27770_s1 + $0xb58] sm:$0xf0]  ;;  %v2428_v36 = vadd.f32 %v2427_v24, %v2414_v39  ;;  %v17626_v24 = vld [vmem:[%s27770_s1 + $0xb0c] sm:$0xf] }
 0x1f0   : > { %3506 = vmatpush.bf16.msrb.mxu2 %v12756_v16  ;;  %3520 = vmatpush.bf16.msrb.mxu3 %v12884_v21  ;;  %v12577_v16 = vld [vmem:[%s27770_s1 + $0x958] sm:$0xf0]  ;;  %v17602_v21 = vld [vmem:[%s27770_s1 + $0xa4c] sm:$0xf]  ;;  %v12836_v39 = vor.u32 %v17634_v12, %v12833_v25  ;;  %v13159_v12 = vld [vmem:[%s27770_s1 + $0xce0] sm:$0xf] }
 0x1f1   : > { %v1408_v63 = vadd.f32 %v20645_v37, %v1394_v51  ;;  %v12580_v55 = vor.u32 %v17570_v57, %v12577_v16  ;;  %v21383_v1 = vadd.f32 %v2441_v45, %v2428_v36  ;;  %v12708_v49 = vor.u32 %v17602_v21, %v12705_v48  ;;  %v17566_v37 = vld [vmem:[%s27770_s1 + $0x92c] sm:$0xf]  ;;  %v12817_v46 = vld [vmem:[%s27770_s1 + $0xb38] sm:$0xf0]  ;;  %v17687_v25 = vld [vmem:[%s27770_s1 + $0xcec] sm:$0xf0] }
 0x1f2   : > { %3478 = vmatpush.bf16.msrb.mxu0 %v12500_v4  ;;  %3492 = vmatpush.bf16.msrb.mxu1 %v12628_v61  ;;  %v12449_v4 = vld [vmem:[%s27770_s1 + $0x858] sm:$0xf0]  ;;  %v12724_v61 = vor.u32 %v17606_v29, %v12721_v60  ;;  %v2415_v5 = vpop.f32.mrf.mxu1  ;;  %v17630_v60 = vld [vmem:[%s27770_s1 + $0xb2c] sm:$0xf] }
 0x1f3   : > { %v12452_v31 = vor.u32 %v17538_v6, %v12449_v4  ;;  %v12689_v29 = vld [vmem:[%s27770_s1 + $0xa38] sm:$0xf0]  ;;  %v2416_v57 = vadd.f32 %v2415_v5, %v2401_v18  ;;  %v12820_v16 = vor.u32 %v17630_v60, %v12817_v46  ;;  %v17594_v21 = vld [vmem:[%s27770_s1 + $0xa0c] sm:$0xf]  ;;  %v13160_v60 = vor.u32 %v17687_v25, %v13159_v12  ;;  %v13127_v25 = vld [vmem:[%s27770_s1 + $0xca0] sm:$0xf] }
 0x1f4   : > { %3507 = vmatpush.bf16.msrb.mxu2 %v12740_v59  ;;  %3521 = vmatpush.bf16.msrb.mxu3 %v12868_v10  ;;  %v12561_v59 = vld [vmem:[%s27770_s1 + $0x938] sm:$0xf0]  ;;  %v17598_v10 = vld [vmem:[%s27770_s1 + $0xa2c] sm:$0xf] }
 0x1f5   : > { %v12564_v4 = vor.u32 %v17566_v37, %v12561_v59  ;;  %v12545_v3 = vld [vmem:[%s27770_s1 + $0x918] sm:$0xf0]  ;;  %v13543_v37 = vld [vmem:[%s27770_s1 + $0xfe0] sm:$0xf]  ;;  %v17783_v59 = vld [vmem:[%s27770_s1 + $0xfec] sm:$0xf0] }
 0x1f6   : > { %3479 = vmatpush.bf16.msrb.mxu0 %v12484_v43  ;;  %3493 = vmatpush.bf16.msrb.mxu1 %v12612_v13  ;;  %v17534_v43 = vld [vmem:[%s27770_s1 + $0x82c] sm:$0xf]  ;;  %v12433_v13 = vld [vmem:[%s27770_s1 + $0x838] sm:$0xf0]  ;;  %v2429_v45 = vpop.f32.mrf.mxu2 }
 0x1f7   : > { %v12436_v6 = vor.u32 %v17534_v43, %v12433_v13  ;;  %v12673_v51 = vld [vmem:[%s27770_s1 + $0xa18] sm:$0xf0]  ;;  %v2430_v36 = vadd.f32 %v2429_v45, %v2416_v57  ;;  %v2443_v43 = vpop.f32.mrf.mxu3  ;;  %v17715_v57 = vld [vmem:[%s27770_s1 + $0xdcc] sm:$0xf0] }
 0x1f8   : > { %3508 = vmatpush.bf16.msrb.mxu2 %v12724_v61  ;;  %3522 = vmatpush.bf16.msrb.mxu3 %v12852_v53  ;;  %v12417_v61 = vld [vmem:[%s27770_s1 + $0x818] sm:$0xf0]  ;;  %v17562_v53 = vld [vmem:[%s27770_s1 + $0x90c] sm:$0xf]  ;;  %v12676_v5 = vor.u32 %v17594_v21, %v12673_v51  ;;  %v17779_v21 = vld [vmem:[%s27770_s1 + $0xfcc] sm:$0xf0] }
 0x1f9   : > { %v12801_v48 = vld [vmem:[%s27770_s1 + $0xb18] sm:$0xf0]  ;;  %v2444_v18 = vadd.f32 %v2443_v43, %v2430_v36  ;;  %v17679_v36 = vld [vmem:[%s27770_s1 + $0xcac] sm:$0xf0] }
 0x1fa   : > { %3480 = vmatpush.bf16.msrb.mxu0 %v12468_v41  ;;  %3494 = vmatpush.bf16.msrb.mxu1 %v12596_v23  ;;  %v17530_v41 = vld [vmem:[%s27770_s1 + $0x80c] sm:$0xf]  ;;  %v1422_v23 = vadd.f32 %v20656_v47, %v1408_v63  ;;  %v12692_v47 = vor.u32 %v17598_v10, %v12689_v29  ;;  %v13287_v63 = vld [vmem:[%s27770_s1 + $0xde0] sm:$0xf]  ;;  %v12804_v29 = vor.u32 %v17626_v24, %v12801_v48  ;;  %v17711_v43 = vld [vmem:[%s27770_s1 + $0xdac] sm:$0xf0] }
 0x1fb   : > { %v12420_v13 = vor.u32 %v17530_v41, %v12417_v61  ;;  %v13143_v41 = vld [vmem:[%s27770_s1 + $0xcc0] sm:$0xf]  ;;  %v2508_v61 = vrot.slane %v2444_v18, 7 }
 0x1fc   : > { %3509 = vmatpush.bf16.msrb.mxu2 %v12708_v49  ;;  %3523 = vmatpush.bf16.msrb.mxu3 %v12836_v39  ;;  %v12548_v49 = vor.u32 %v17562_v53, %v12545_v3  ;;  %v17751_v39 = vld [vmem:[%s27770_s1 + $0xeec] sm:$0xf0]  ;;  %v1486_v10 = vrot.slane %v1422_v23, 6  ;;  %v2504_v23 = vrot.slane %v21383_v1, 7  ;;  %v13544_v3 = vor.u32 %v17783_v59, %v13543_v37  ;;  %v13527_v1 = vld [vmem:[%s27770_s1 + $0xfc0] sm:$0xf] }
 0x1fd   : > { %v13511_v37 = vld [vmem:[%s27770_s1 + $0xfa0] sm:$0xf]  ;;  %v17775_v59 = vld [vmem:[%s27770_s1 + $0xfac] sm:$0xf0] }
 0x1fe   : > { %3481 = vmatpush.bf16.msrb.mxu0 %v12452_v31  ;;  %3495 = vmatpush.bf16.msrb.mxu1 %v12580_v55  ;;  %v17719_v31 = vld [vmem:[%s27770_s1 + $0xdec] sm:$0xf0]  ;;  %v13415_v55 = vld [vmem:[%s27770_s1 + $0xee0] sm:$0xf]  ;;  %v1495_v51 = vsel %vm1488_vm0, %v1486_v10, %v1482_v27  ;;  %v2517_v24 = vsel %vm2510_vm2, %v2508_v61, %v2504_v23  ;;  %v1491_v45 = vsel %vm1488_vm0, %v1482_v27, %v1486_v10 }
 0x1ff   : > { %v13288_v46 = vor.u32 %v17719_v31, %v13287_v63  ;;  %v13416_v53 = vor.u32 %v17751_v39, %v13415_v55  ;;  %v13255_v63 = vld [vmem:[%s27770_s1 + $0xda0] sm:$0xf]  ;;  %v2513_v31 = vsel %vm2510_vm2, %v2504_v23, %v2508_v61  ;;  %v13528_v55 = vor.u32 %v17779_v21, %v13527_v1  ;;  %v17707_v61 = vld [vmem:[%s27770_s1 + $0xd8c] sm:$0xf0] }
 0x200   : > { %3510 = vmatpush.bf16.msrb.mxu2 %v12692_v47  ;;  %3524 = vmatpush.bf16.msrb.mxu3 %v12820_v16  ;;  %v13399_v47 = vld [vmem:[%s27770_s1 + $0xec0] sm:$0xf]  ;;  %v17747_v16 = vld [vmem:[%s27770_s1 + $0xecc] sm:$0xf0]  ;;  %v21504_v39 = vadd.f32 %v2513_v31, %v1491_v45  ;;  %v1503_v10 = vsel %vm446_vm1, %v1495_v51, 0.0  ;;  %v2525_v18 = vsel %vm454_vm3, %v2517_v24, 0.0 }
 0x201   : > { %v13400_v27 = vor.u32 %v17747_v16, %v13399_v47  ;;  %v13239_v23 = vld [vmem:[%s27770_s1 + $0xd80] sm:$0xf]  ;;  %v17771_v47 = vld [vmem:[%s27770_s1 + $0xf8c] sm:$0xf0] }
 0x202   : > { %3482 = vmatpush.bf16.msrb.mxu0 %v12436_v6  ;;  %3496 = vmatpush.bf16.msrb.mxu1 %v12564_v4  ;;  %v17683_v6 = vld [vmem:[%s27770_s1 + $0xccc] sm:$0xf0]  ;;  %v13271_v4 = vld [vmem:[%s27770_s1 + $0xdc0] sm:$0xf]  ;;  %v13240_v24 = vor.u32 %v17707_v61, %v13239_v23 }
 0x203   : > { %v13144_v48 = vor.u32 %v17683_v6, %v13143_v41  ;;  %v13272_v12 = vor.u32 %v17715_v57, %v13271_v4  ;;  %v17675_v41 = vld [vmem:[%s27770_s1 + $0xc8c] sm:$0xf0]  ;;  %v13512_v4 = vor.u32 %v17775_v59, %v13511_v37  ;;  %v13495_v57 = vld [vmem:[%s27770_s1 + $0xf80] sm:$0xf] }
 0x204   : > { %3511 = vmatpush.bf16.msrb.mxu2 %v12676_v5  ;;  %3525 = vmatpush.bf16.msrb.mxu3 %v12804_v29  ;;  %v21520_v5 = vadd.f32 %v2525_v18, %v1503_v10  ;;  %v13128_v29 = vor.u32 %v17679_v36, %v13127_v25  ;;  %v13095_v45 = vld [vmem:[%s27770_s1 + $0xc60] sm:$0xf]  ;;  %v13496_v25 = vor.u32 %v17771_v47, %v13495_v57  ;;  %v17667_v59 = vld [vmem:[%s27770_s1 + $0xc4c] sm:$0xf0] }
 0x205   : > { %v13223_v36 = vld [vmem:[%s27770_s1 + $0xd60] sm:$0xf]  ;;  %v17731_v23 = vld [vmem:[%s27770_s1 + $0xe4c] sm:$0xf0] }
 0x206   : > { %3483 = vmatpush.bf16.msrb.mxu0 %v12420_v13  ;;  %3497 = vmatpush.bf16.msrb.mxu1 %v12548_v49  ;;  %v13383_v13 = vld [vmem:[%s27770_s1 + $0xea0] sm:$0xf]  ;;  %v17743_v49 = vld [vmem:[%s27770_s1 + $0xeac] sm:$0xf0]  ;;  %v2455_v16 = vpop.f32.mrf.mxu0  ;;  %v2469_v1 = vpop.f32.mrf.mxu1 }
 0x207   : > { %3512 = vmatmul.bf16.vlgmr.msrb.gmra.mxu2 %v19364_v33  ;;  %3526 = vmatmul.bf16.vlgmr.msrb.gmra.mxu3 %v19366_v54  ;;  %v13384_v6 = vor.u32 %v17743_v49, %v13383_v13  ;;  %v2470_v21 = vadd.f32 %v2469_v1, %v2455_v16  ;;  %v13351_v31 = vld [vmem:[%s27770_s1 + $0xe60] sm:$0xf]  ;;  %v17663_v16 = vld [vmem:[%s27770_s1 + $0xc2c] sm:$0xf0] }
 0x208   : > { %4337 = vmatpush.bf16.msra.mxu2 %v13416_v53  ;;  %4351 = vmatpush.bf16.msra.mxu3 %v13544_v3  ;;  %v13367_v53 = vld [vmem:[%s27770_s1 + $0xe80] sm:$0xf]  ;;  %v17739_v3 = vld [vmem:[%s27770_s1 + $0xe8c] sm:$0xf0] }
 0x209   : > { %3484 = vmatmul.bf16.vlgmr.msrb.gmra.mxu0 %v19374_v28  ;;  %3498 = vmatmul.bf16.vlgmr.msrb.gmra.mxu1 %v19376_v58  ;;  %v13079_v37 = vld [vmem:[%s27770_s1 + $0xc40] sm:$0xf] }
 0x20a   : > { %4309 = vmatpush.bf16.msra.mxu0 %v13160_v60  ;;  %4323 = vmatpush.bf16.msra.mxu1 %v13288_v46  ;;  %v13256_v60 = vor.u32 %v17711_v43, %v13255_v63  ;;  %v13111_v46 = vld [vmem:[%s27770_s1 + $0xc80] sm:$0xf]  ;;  %v17703_v63 = vld [vmem:[%s27770_s1 + $0xd6c] sm:$0xf0] }
 0x20b   : > { %v13112_v51 = vor.u32 %v17675_v41, %v13111_v46  ;;  %v17767_v43 = vld [vmem:[%s27770_s1 + $0xf6c] sm:$0xf0]  ;;  %v13224_v49 = vor.u32 %v17703_v63, %v13223_v36  ;;  %v13335_v46 = vld [vmem:[%s27770_s1 + $0xe40] sm:$0xf]  ;;  %v1450_v41 = vadd.f32 %v20806_v19, %v20804_v42  ;;  %v13080_v42 = vor.u32 %v17667_v59, %v13079_v37 }
 0x20c   : > { %4338 = vmatpush.bf16.msra.mxu2 %v13400_v27  ;;  %4352 = vmatpush.bf16.msra.mxu3 %v13528_v55  ;;  %v17735_v27 = vld [vmem:[%s27770_s1 + $0xe6c] sm:$0xf0]  ;;  %v13479_v55 = vld [vmem:[%s27770_s1 + $0xf60] sm:$0xf] }
 0x20d   : > { %v13352_v10 = vor.u32 %v17735_v27, %v13351_v31  ;;  %v13480_v18 = vor.u32 %v17767_v43, %v13479_v55  ;;  %v13463_v61 = vld [vmem:[%s27770_s1 + $0xf40] sm:$0xf]  ;;  %v1464_v57 = vadd.f32 %v20851_v2, %v1450_v41  ;;  %v17759_v63 = vld [vmem:[%s27770_s1 + $0xf2c] sm:$0xf0]  ;;  %v1483_v31 = vrot.slane %v20712_v52, 6 }
 0x20e   : > { %4310 = vmatpush.bf16.msra.mxu0 %v13144_v48  ;;  %4324 = vmatpush.bf16.msra.mxu1 %v13272_v12  ;;  %v17671_v48 = vld [vmem:[%s27770_s1 + $0xc6c] sm:$0xf0]  ;;  %v13368_v12 = vor.u32 %v17739_v3, %v13367_v53  ;;  %v13063_v47 = vld [vmem:[%s27770_s1 + $0xc20] sm:$0xf] }
 0x20f   : > { %v13096_v13 = vor.u32 %v17671_v48, %v13095_v45  ;;  %v17763_v53 = vld [vmem:[%s27770_s1 + $0xf4c] sm:$0xf0]  ;;  %v13191_v2 = vld [vmem:[%s27770_s1 + $0xd20] sm:$0xf]  ;;  %v2457_v48 = vpop.f32.mrf.mxu0  ;;  %v1478_v55 = vadd.f32 %v20853_v22, %v1464_v57  ;;  %v13064_v43 = vor.u32 %v17663_v16, %v13063_v47  ;;  %v13417_v47 = vld [vmem:[%s27770_s1 + $0xef0] sm:$0xf0] }
 0x210   : > { %4339 = vmatpush.bf16.msra.mxu2 %v13384_v6  ;;  %4353 = vmatpush.bf16.msra.mxu3 %v13512_v4  ;;  %v2483_v6 = vpop.f32.mrf.mxu2  ;;  %v2497_v4 = vpop.f32.mrf.mxu3  ;;  %v13319_v45 = vld [vmem:[%s27770_s1 + $0xe20] sm:$0xf]  ;;  %v17691_v52 = vld [vmem:[%s27770_s1 + $0xd0c] sm:$0xf0]  ;;  %v17781_v16 = vld [vmem:[%s27770_s1 + $0xfe4] sm:$0xf] }
 0x211   : > { %v2484_v3 = vadd.f32 %v2483_v6, %v2470_v21  ;;  %v13464_v21 = vor.u32 %v17763_v53, %v13463_v61  ;;  %v13447_v36 = vld [vmem:[%s27770_s1 + $0xf20] sm:$0xf]  ;;  %v17755_v41 = vld [vmem:[%s27770_s1 + $0xf0c] sm:$0xf0]  ;;  %v17685_v6 = vld [vmem:[%s27770_s1 + $0xce4] sm:$0xf] }
 0x212   : > { %4311 = vmatpush.bf16.msra.mxu0 %v13128_v29  ;;  %4325 = vmatpush.bf16.msra.mxu1 %v13256_v60  ;;  %v13207_v29 = vld [vmem:[%s27770_s1 + $0xd40] sm:$0xf]  ;;  %v17699_v60 = vld [vmem:[%s27770_s1 + $0xd4c] sm:$0xf0]  ;;  %v17717_v61 = vld [vmem:[%s27770_s1 + $0xde4] sm:$0xf] }
 0x213   : > { %v13208_v19 = vor.u32 %v17699_v60, %v13207_v29  ;;  %v21603_v1 = vadd.f32 %v2497_v4, %v2484_v3  ;;  %v13047_v27 = vld [vmem:[%s27770_s1 + $0xc00] sm:$0xf]  ;;  %v17723_v29 = vld [vmem:[%s27770_s1 + $0xe0c] sm:$0xf0]  ;;  %v13161_v4 = vld [vmem:[%s27770_s1 + $0xcf0] sm:$0xf0] }
 0x214   : > { %4340 = vmatpush.bf16.msra.mxu2 %v13368_v12  ;;  %4354 = vmatpush.bf16.msra.mxu3 %v13496_v25  ;;  %v2471_v12 = vpop.f32.mrf.mxu1  ;;  %v17727_v25 = vld [vmem:[%s27770_s1 + $0xe2c] sm:$0xf0]  ;;  %v13175_v37 = vld [vmem:[%s27770_s1 + $0xd00] sm:$0xf]  ;;  %v13289_v53 = vld [vmem:[%s27770_s1 + $0xdf0] sm:$0xf0] }
 0x215   : > { %v2472_v59 = vadd.f32 %v2471_v12, %v2457_v48  ;;  %v13320_v22 = vor.u32 %v17727_v25, %v13319_v45  ;;  %v13431_v60 = vld [vmem:[%s27770_s1 + $0xf00] sm:$0xf]  ;;  %v17749_v3 = vld [vmem:[%s27770_s1 + $0xee4] sm:$0xf]  ;;  %v13164_v48 = vor.u32 %v17685_v6, %v13161_v4  ;;  %v13292_v12 = vor.u32 %v17717_v61, %v13289_v53  ;;  %v13257_v61 = vld [vmem:[%s27770_s1 + $0xdb0] sm:$0xf0] }
 0x216   : > { %4312 = vmatpush.bf16.msra.mxu0 %v13112_v51  ;;  %4326 = vmatpush.bf16.msra.mxu1 %v13240_v24  ;;  %v13336_v51 = vor.u32 %v17731_v23, %v13335_v46  ;;  %v17695_v24 = vld [vmem:[%s27770_s1 + $0xd2c] sm:$0xf0]  ;;  %v13432_v45 = vor.u32 %v17755_v41, %v13431_v60  ;;  %v17681_v25 = vld [vmem:[%s27770_s1 + $0xcc4] sm:$0xf]  ;;  %v13129_v41 = vld [vmem:[%s27770_s1 + $0xcb0] sm:$0xf0] }
 0x217   : > { %v17709_v6 = vld [vmem:[%s27770_s1 + $0xda4] sm:$0xf] }
 0x218   : > { %4341 = vmatpush.bf16.msra.mxu2 %v13352_v10  ;;  %4355 = vmatpush.bf16.msra.mxu3 %v13480_v18  ;;  %v13448_v10 = vor.u32 %v17759_v63, %v13447_v36  ;;  %v13303_v18 = vld [vmem:[%s27770_s1 + $0xe00] sm:$0xf]  ;;  %v2485_v46 = vpop.f32.mrf.mxu2  ;;  %v2499_v57 = vpop.f32.mrf.mxu3  ;;  %v13145_v36 = vld [vmem:[%s27770_s1 + $0xcd0] sm:$0xf0]  ;;  %v17713_v63 = vld [vmem:[%s27770_s1 + $0xdc4] sm:$0xf] }
 0x219   : > { %v2486_v23 = vadd.f32 %v2485_v46, %v2472_v59  ;;  %v13529_v59 = vld [vmem:[%s27770_s1 + $0xfd0] sm:$0xf0]  ;;  %v17677_v46 = vld [vmem:[%s27770_s1 + $0xca4] sm:$0xf] }
 0x21a   : > { %4313 = vmatpush.bf16.msra.mxu0 %v13096_v13  ;;  %4327 = vmatpush.bf16.msra.mxu1 %v13224_v49  ;;  %v13192_v13 = vor.u32 %v17695_v24, %v13191_v2  ;;  %v17659_v49 = vld [vmem:[%s27770_s1 + $0xc0c] sm:$0xf0]  ;;  %v13304_v24 = vor.u32 %v17723_v29, %v13303_v18  ;;  %v13148_v29 = vor.u32 %v17681_v25, %v13145_v36  ;;  %v17741_v53 = vld [vmem:[%s27770_s1 + $0xea4] sm:$0xf]  ;;  %v13241_v36 = vld [vmem:[%s27770_s1 + $0xd90] sm:$0xf0] }
 0x21b   : > { %v2500_v2 = vadd.f32 %v2499_v57, %v2486_v23  ;;  %v17705_v25 = vld [vmem:[%s27770_s1 + $0xd84] sm:$0xf] }
 0x21c   : > { %4342 = vmatpush.bf16.msra.mxu2 %v13336_v51  ;;  %4356 = vmatpush.bf16.msra.mxu3 %v13464_v21  ;;  %v13545_v51 = vld [vmem:[%s27770_s1 + $0xff0] sm:$0xf0]  ;;  %v1487_v21 = vrot.slane %v1478_v55, 6 }
 0x21d   : > { %v2509_v55 = vrot.slane %v2500_v2, 7  ;;  %v13260_v2 = vor.u32 %v17709_v6, %v13257_v61  ;;  %v17765_v6 = vld [vmem:[%s27770_s1 + $0xf64] sm:$0xf] }
 0x21e   : > { %4314 = vmatpush.bf16.msra.mxu0 %v13080_v42  ;;  %4328 = vmatpush.bf16.msra.mxu1 %v13208_v19  ;;  %v13048_v42 = vor.u32 %v17659_v49, %v13047_v27  ;;  %v13176_v19 = vor.u32 %v17691_v52, %v13175_v37  ;;  %v2505_v27 = vrot.slane %v21603_v1, 7  ;;  %v13273_v49 = vld [vmem:[%s27770_s1 + $0xdd0] sm:$0xf0]  ;;  %v17745_v37 = vld [vmem:[%s27770_s1 + $0xec4] sm:$0xf]  ;;  %v1492_v18 = vsel %vm1488_vm0, %v1483_v31, %v1487_v21 }
 0x21f   : > { %v13401_v52 = vld [vmem:[%s27770_s1 + $0xed0] sm:$0xf0]  ;;  %v17777_v1 = vld [vmem:[%s27770_s1 + $0xfc4] sm:$0xf]  ;;  %v13276_v60 = vor.u32 %v17713_v63, %v13273_v49 }
 0x220   : > { %4343 = vmatpush.bf16.msra.mxu2 %v13320_v22  ;;  %4357 = vmatpush.bf16.msra.mxu3 %v13448_v10  ;;  %v1496_v22 = vsel %vm1488_vm0, %v1487_v21, %v1483_v31  ;;  %v2518_v10 = vsel %vm2510_vm2, %v2509_v55, %v2505_v27  ;;  %v2514_v4 = vsel %vm2510_vm2, %v2505_v27, %v2509_v55  ;;  %v17737_v63 = vld [vmem:[%s27770_s1 + $0xe84] sm:$0xf]  ;;  %v13369_v27 = vld [vmem:[%s27770_s1 + $0xe90] sm:$0xf0] }
 0x221   : > { %v13404_v31 = vor.u32 %v17745_v37, %v13401_v52  ;;  %v13532_v23 = vor.u32 %v17777_v1, %v13529_v59  ;;  %v21724_v57 = vadd.f32 %v2514_v4, %v1492_v18  ;;  %v13132_v21 = vor.u32 %v17677_v46, %v13129_v41  ;;  %v17769_v55 = vld [vmem:[%s27770_s1 + $0xf84] sm:$0xf]  ;;  %v13353_v41 = vld [vmem:[%s27770_s1 + $0xe70] sm:$0xf0] }
 0x222   : > { %4315 = vmatpush.bf16.msra.mxu0 %v13064_v43  ;;  %4329 = vmatpush.bf16.msra.mxu1 %v13192_v13  ;;  %v13420_v43 = vor.u32 %v17749_v3, %v13417_v47  ;;  %v13548_v13 = vor.u32 %v17781_v16, %v13545_v51  ;;  %v13385_v3 = vld [vmem:[%s27770_s1 + $0xeb0] sm:$0xf0]  ;;  %v1504_v47 = vsel %vm446_vm1, %v1496_v22, 0.0  ;;  %v2526_v16 = vsel %vm454_vm3, %v2518_v10, 0.0  ;;  %v17669_v59 = vld [vmem:[%s27770_s1 + $0xc64] sm:$0xf] }
 0x223   : > { %v21740_v51 = vadd.f32 %v2526_v16, %v1504_v47  ;;  %v13244_v1 = vor.u32 %v17705_v25, %v13241_v36  ;;  %v13097_v22 = vld [vmem:[%s27770_s1 + $0xc70] sm:$0xf0]  ;;  %v13372_v10 = vor.u32 %v17737_v63, %v13369_v27  ;;  %v17733_v46 = vld [vmem:[%s27770_s1 + $0xe64] sm:$0xf] }
 0x224   : > { %4344 = vmatpush.bf16.msra.mxu2 %v13304_v24  ;;  %4358 = vmatpush.bf16.msra.mxu3 %v13432_v45  ;;  %v17673_v24 = vld [vmem:[%s27770_s1 + $0xc84] sm:$0xf]  ;;  %v13113_v45 = vld [vmem:[%s27770_s1 + $0xc90] sm:$0xf0] }
 0x225   : > { %v13116_v52 = vor.u32 %v17673_v24, %v13113_v45  ;;  %v13481_v4 = vld [vmem:[%s27770_s1 + $0xf70] sm:$0xf0]  ;;  %v17665_v61 = vld [vmem:[%s27770_s1 + $0xc44] sm:$0xf] }
 0x226   : > { %4316 = vmatpush.bf16.msra.mxu0 %v13048_v42  ;;  %4330 = vmatpush.bf16.msra.mxu1 %v13176_v19  ;;  %v17773_v42 = vld [vmem:[%s27770_s1 + $0xfa4] sm:$0xf]  ;;  %v13513_v19 = vld [vmem:[%s27770_s1 + $0xfb0] sm:$0xf0]  ;;  %v3331_v49 = vpop.f32.mrf.mxu1 }
 0x227   : > { %4345 = vmatmul.bf16.vlgmr.msra.gmra.mxu2 %v19364_v33  ;;  %4359 = vmatmul.bf16.vlgmr.msra.gmra.mxu3 %v19366_v54  ;;  %v13209_v47 = vld [vmem:[%s27770_s1 + $0xd50] sm:$0xf0]  ;;  %v17729_v16 = vld [vmem:[%s27770_s1 + $0xe44] sm:$0xf] }
 0x228   : > { %4393 = vmatpush.bf16.msrb.mxu2 %v13420_v43  ;;  %4407 = vmatpush.bf16.msrb.mxu3 %v13548_v13  ;;  %v13497_v43 = vld [vmem:[%s27770_s1 + $0xf90] sm:$0xf0]  ;;  %v3317_v13 = vpop.f32.mrf.mxu0  ;;  %v17761_v24 = vld [vmem:[%s27770_s1 + $0xf44] sm:$0xf] }
 0x229   : > { %4317 = vmatmul.bf16.vlgmr.msra.gmra.mxu0 %v19374_v28  ;;  %4331 = vmatmul.bf16.vlgmr.msra.gmra.mxu1 %v19376_v58  ;;  %v3332_v37 = vadd.f32 %v3331_v49, %v3317_v13  ;;  %v13500_v18 = vor.u32 %v17769_v55, %v13497_v43  ;;  %v13465_v45 = vld [vmem:[%s27770_s1 + $0xf50] sm:$0xf0]  ;;  %v17661_v63 = vld [vmem:[%s27770_s1 + $0xc24] sm:$0xf] }
 0x22a   : > { %4365 = vmatpush.bf16.msrb.mxu0 %v13164_v48  ;;  %4379 = vmatpush.bf16.msrb.mxu1 %v13292_v12  ;;  %v13388_v48 = vor.u32 %v17741_v53, %v13385_v3  ;;  %v13516_v12 = vor.u32 %v17773_v42, %v13513_v19  ;;  %v13081_v53 = vld [vmem:[%s27770_s1 + $0xc50] sm:$0xf0]  ;;  %v13356_v3 = vor.u32 %v17733_v46, %v13353_v41  ;;  %v17697_v19 = vld [vmem:[%s27770_s1 + $0xd44] sm:$0xf] }
 0x22b   : > { %v13484_v42 = vor.u32 %v17765_v6, %v13481_v4  ;;  %v13084_v25 = vor.u32 %v17665_v61, %v13081_v53  ;;  %v13212_v36 = vor.u32 %v17697_v19, %v13209_v47  ;;  %v13065_v27 = vld [vmem:[%s27770_s1 + $0xc30] sm:$0xf0]  ;;  %v13468_v13 = vor.u32 %v17761_v24, %v13465_v45  ;;  %v17693_v49 = vld [vmem:[%s27770_s1 + $0xd24] sm:$0xf]  ;;  %v13295_v19 = vld [vmem:[%s27770_s1 + $0xde8] sm:$0xf] }
 0x22c   : > { %4394 = vmatpush.bf16.msrb.mxu2 %v13404_v31  ;;  %4408 = vmatpush.bf16.msrb.mxu3 %v13532_v23  ;;  %v13100_v31 = vor.u32 %v17669_v59, %v13097_v22  ;;  %v17757_v59 = vld [vmem:[%s27770_s1 + $0xf24] sm:$0xf]  ;;  %v13449_v22 = vld [vmem:[%s27770_s1 + $0xf30] sm:$0xf0]  ;;  %v17720_v47 = vld [vmem:[%s27770_s1 + $0xdf4] sm:$0xf0] }
 0x22d   : > { %v13049_v46 = vld [vmem:[%s27770_s1 + $0xc10] sm:$0xf0]  ;;  %v17689_v41 = vld [vmem:[%s27770_s1 + $0xd04] sm:$0xf]  ;;  %v13452_v4 = vor.u32 %v17757_v59, %v13449_v22  ;;  %v17752_v24 = vld [vmem:[%s27770_s1 + $0xef4] sm:$0xf0] }
 0x22e   : > { %4366 = vmatpush.bf16.msrb.mxu0 %v13148_v29  ;;  %4380 = vmatpush.bf16.msrb.mxu1 %v13276_v60  ;;  %v17701_v29 = vld [vmem:[%s27770_s1 + $0xd64] sm:$0xf]  ;;  %v13225_v60 = vld [vmem:[%s27770_s1 + $0xd70] sm:$0xf0]  ;;  %v13551_v45 = vld [vmem:[%s27770_s1 + $0xfe8] sm:$0xf] }
 0x22f   : > { %v13228_v23 = vor.u32 %v17701_v29, %v13225_v60  ;;  %v13068_v29 = vor.u32 %v17661_v63, %v13065_v27  ;;  %v17753_v61 = vld [vmem:[%s27770_s1 + $0xf04] sm:$0xf]  ;;  %v13433_v53 = vld [vmem:[%s27770_s1 + $0xf10] sm:$0xf0]  ;;  %v13296_v63 = vor.u32 %v17720_v47, %v13295_v19  ;;  %v13151_v27 = vld [vmem:[%s27770_s1 + $0xcc8] sm:$0xf] }
 0x230   : > { %4395 = vmatpush.bf16.msrb.mxu2 %v13388_v48  ;;  %4409 = vmatpush.bf16.msrb.mxu3 %v13516_v12  ;;  %v3359_v12 = vpop.f32.mrf.mxu3  ;;  %v13535_v59 = vld [vmem:[%s27770_s1 + $0xfc8] sm:$0xf]  ;;  %v17780_v22 = vld [vmem:[%s27770_s1 + $0xfd4] sm:$0xf0] }
 0x232   : > { %4367 = vmatpush.bf16.msrb.mxu0 %v13132_v21  ;;  %4381 = vmatpush.bf16.msrb.mxu1 %v13260_v2  ;;  %v3345_v21 = vpop.f32.mrf.mxu2  ;;  %v13337_v2 = vld [vmem:[%s27770_s1 + $0xe50] sm:$0xf0] }
 0x233   : > { %v3346_v48 = vadd.f32 %v3345_v21, %v3332_v37  ;;  %v13340_v43 = vor.u32 %v17729_v16, %v13337_v2  ;;  %v13193_v37 = vld [vmem:[%s27770_s1 + $0xd30] sm:$0xf0]  ;;  %v13423_v16 = vld [vmem:[%s27770_s1 + $0xee8] sm:$0xf] }
 0x234   : > { %4396 = vmatpush.bf16.msrb.mxu2 %v13372_v10  ;;  %4410 = vmatpush.bf16.msrb.mxu3 %v13500_v18  ;;  %v17657_v18 = vld [vmem:[%s27770_s1 + $0xc04] sm:$0xf]  ;;  %v13196_v60 = vor.u32 %v17693_v49, %v13193_v37  ;;  %v13279_v49 = vld [vmem:[%s27770_s1 + $0xdc8] sm:$0xf]  ;;  %v17716_v37 = vld [vmem:[%s27770_s1 + $0xdd4] sm:$0xf0] }
 0x235   : > { %v3360_v55 = vadd.f32 %v3359_v12, %v3346_v48  ;;  %v13052_v21 = vor.u32 %v17657_v18, %v13049_v46  ;;  %v17784_v48 = vld [vmem:[%s27770_s1 + $0xff4] sm:$0xf0]  ;;  %v21913_v18 = vpop.f32.mrf.mxu0  ;;  %v13280_v46 = vor.u32 %v17716_v37, %v13279_v49 }
 0x236   : > { %4368 = vmatpush.bf16.msrb.mxu0 %v13116_v52  ;;  %4382 = vmatpush.bf16.msrb.mxu1 %v13244_v1  ;;  %v17725_v52 = vld [vmem:[%s27770_s1 + $0xe24] sm:$0xf]  ;;  %v13321_v1 = vld [vmem:[%s27770_s1 + $0xe30] sm:$0xf0] }
 0x237   : > { %v21839_v10 = vadd.f32 %v3360_v55, %v21080_v17  ;;  %v13177_v17 = vld [vmem:[%s27770_s1 + $0xd10] sm:$0xf0]  ;;  %v13324_v6 = vor.u32 %v17725_v52, %v13321_v1  ;;  %v17684_v55 = vld [vmem:[%s27770_s1 + $0xcd4] sm:$0xf0]  ;;  %v13407_v52 = vld [vmem:[%s27770_s1 + $0xec8] sm:$0xf] }
 0x238   : > { %4397 = vmatpush.bf16.msrb.mxu2 %v13356_v3  ;;  %4411 = vmatpush.bf16.msrb.mxu3 %v13484_v42  ;;  %v13167_v3 = vld [vmem:[%s27770_s1 + $0xce8] sm:$0xf]  ;;  %v17688_v42 = vld [vmem:[%s27770_s1 + $0xcf4] sm:$0xf0]  ;;  %v13180_v2 = vor.u32 %v17689_v41, %v13177_v17 }
 0x239   : > { %v17748_v1 = vld [vmem:[%s27770_s1 + $0xed4] sm:$0xf0]  ;;  %v13135_v41 = vld [vmem:[%s27770_s1 + $0xca8] sm:$0xf] }
 0x23a   : > { %4369 = vmatpush.bf16.msrb.mxu0 %v13100_v31  ;;  %4383 = vmatpush.bf16.msrb.mxu1 %v13228_v23  ;;  %v17721_v31 = vld [vmem:[%s27770_s1 + $0xe04] sm:$0xf]  ;;  %v13305_v23 = vld [vmem:[%s27770_s1 + $0xe10] sm:$0xf0]  ;;  %v17680_v17 = vld [vmem:[%s27770_s1 + $0xcb4] sm:$0xf0] }
 0x23b   : > { %v13308_v12 = vor.u32 %v17721_v31, %v13305_v23  ;;  %v13263_v31 = vld [vmem:[%s27770_s1 + $0xda8] sm:$0xf]  ;;  %v17712_v23 = vld [vmem:[%s27770_s1 + $0xdb4] sm:$0xf0]  ;;  %v13136_v19 = vor.u32 %v17680_v17, %v13135_v41 }
 0x23c   : > { %4398 = vmatpush.bf16.msrb.mxu2 %v13340_v43  ;;  %4412 = vmatpush.bf16.msrb.mxu3 %v13468_v13  ;;  %v13424_v43 = vor.u32 %v17752_v24, %v13423_v16  ;;  %v13552_v13 = vor.u32 %v17784_v48, %v13551_v45  ;;  %v13264_v47 = vor.u32 %v17712_v23, %v13263_v31  ;;  %v13119_v16 = vld [vmem:[%s27770_s1 + $0xc88] sm:$0xf]  ;;  %v17708_v48 = vld [vmem:[%s27770_s1 + $0xd94] sm:$0xf0] }
 0x23d   : > { %v13247_v45 = vld [vmem:[%s27770_s1 + $0xd88] sm:$0xf]  ;;  %v17704_v41 = vld [vmem:[%s27770_s1 + $0xd74] sm:$0xf0] }
 0x23e   : > { %4370 = vmatpush.bf16.msrb.mxu0 %v13084_v25  ;;  %4384 = vmatpush.bf16.msrb.mxu1 %v13212_v36  ;;  %v13436_v25 = vor.u32 %v17753_v61, %v13433_v53  ;;  %v13168_v36 = vor.u32 %v17688_v42, %v13167_v3  ;;  %v13391_v61 = vld [vmem:[%s27770_s1 + $0xea8] sm:$0xf]  ;;  %v17744_v53 = vld [vmem:[%s27770_s1 + $0xeb4] sm:$0xf0] }
 0x23f   : > { %v13519_v3 = vld [vmem:[%s27770_s1 + $0xfa8] sm:$0xf]  ;;  %v17776_v42 = vld [vmem:[%s27770_s1 + $0xfb4] sm:$0xf0] }
 0x240   : > { %4399 = vmatpush.bf16.msrb.mxu2 %v13324_v6  ;;  %4413 = vmatpush.bf16.msrb.mxu3 %v13452_v4  ;;  %v13408_v6 = vor.u32 %v17748_v1, %v13407_v52  ;;  %v13536_v4 = vor.u32 %v17780_v22, %v13535_v59  ;;  %v13520_v24 = vor.u32 %v17776_v42, %v13519_v3  ;;  %v13103_v1 = vld [vmem:[%s27770_s1 + $0xc68] sm:$0xf]  ;;  %v17672_v59 = vld [vmem:[%s27770_s1 + $0xc74] sm:$0xf0] }
 0x241   : > { %v13248_v52 = vor.u32 %v17708_v48, %v13247_v45  ;;  %v13359_v17 = vld [vmem:[%s27770_s1 + $0xe68] sm:$0xf]  ;;  %v17768_v31 = vld [vmem:[%s27770_s1 + $0xf74] sm:$0xf0]  ;;  %v13104_v23 = vor.u32 %v17672_v59, %v13103_v1 }
 0x242   : > { %4371 = vmatpush.bf16.msrb.mxu0 %v13068_v29  ;;  %4385 = vmatpush.bf16.msrb.mxu1 %v13196_v60  ;;  %v21915_v29 = vpop.f32.mrf.mxu1  ;;  %v13152_v60 = vor.u32 %v17684_v55, %v13151_v27  ;;  %v17772_v27 = vld [vmem:[%s27770_s1 + $0xf94] sm:$0xf0]  ;;  %v13471_v45 = vld [vmem:[%s27770_s1 + $0xf48] sm:$0xf] }
 0x243   : > { %v17668_v3 = vld [vmem:[%s27770_s1 + $0xc54] sm:$0xf0] }
 0x244   : > { %4400 = vmatpush.bf16.msrb.mxu2 %v13308_v12  ;;  %4414 = vmatpush.bf16.msrb.mxu3 %v13436_v25  ;;  %v13375_v12 = vld [vmem:[%s27770_s1 + $0xe88] sm:$0xf]  ;;  %v21960_v25 = vpop.f32.mrf.mxu2  ;;  %v17764_v48 = vld [vmem:[%s27770_s1 + $0xf54] sm:$0xf0] }
 0x245   : > { %v13472_v1 = vor.u32 %v17764_v48, %v13471_v45  ;;  %v17696_v59 = vld [vmem:[%s27770_s1 + $0xd34] sm:$0xf0]  ;;  %v13297_v45 = vld [vmem:[%s27770_s1 + $0xdf8] sm:$0xf0]  ;;  %v17750_v48 = vld [vmem:[%s27770_s1 + $0xeec] sm:$0xf] }
 0x246   : > { %4372 = vmatpush.bf16.msrb.mxu0 %v13052_v21  ;;  %4386 = vmatpush.bf16.msrb.mxu1 %v13180_v2  ;;  %v17676_v21 = vld [vmem:[%s27770_s1 + $0xc94] sm:$0xf0]  ;;  %v13392_v2 = vor.u32 %v17744_v53, %v13391_v61  ;;  %v3373_v55 = vpop.f32.mrf.mxu0  ;;  %v13087_v53 = vld [vmem:[%s27770_s1 + $0xc48] sm:$0xf] }
 0x247   : > { %4401 = vmatmul.bf16.vlgmr.msrb.gmra.mxu2 %v19364_v33  ;;  %4415 = vmatmul.bf16.vlgmr.msrb.gmra.mxu3 %v19366_v54  ;;  %v13120_v37 = vor.u32 %v17676_v21, %v13119_v16  ;;  %v17700_v16 = vld [vmem:[%s27770_s1 + $0xd54] sm:$0xf0]  ;;  %v13343_v21 = vld [vmem:[%s27770_s1 + $0xe48] sm:$0xf] }
 0x248   : > { %4449 = vmatpush.bf16.msra.mxu2 %v13424_v43  ;;  %4463 = vmatpush.bf16.msra.mxu3 %v13552_v13  ;;  %v21971_v13 = vpop.f32.mrf.mxu3 }
 0x249   : > { %4373 = vmatmul.bf16.vlgmr.msrb.gmra.mxu0 %v19374_v28  ;;  %4387 = vmatmul.bf16.vlgmr.msrb.gmra.mxu1 %v19376_v58 }
 0x24a   : > { %4421 = vmatpush.bf16.msra.mxu0 %v13168_v36  ;;  %4435 = vmatpush.bf16.msra.mxu1 %v13296_v63  ;;  %v17740_v36 = vld [vmem:[%s27770_s1 + $0xe94] sm:$0xf0]  ;;  %v13503_v63 = vld [vmem:[%s27770_s1 + $0xf88] sm:$0xf]  ;;  %v3387_v43 = vpop.f32.mrf.mxu1 }
 0x24b   : > { %v3388_v49 = vadd.f32 %v3387_v43, %v3373_v55  ;;  %v13376_v22 = vor.u32 %v17740_v36, %v13375_v12  ;;  %v13071_v55 = vld [vmem:[%s27770_s1 + $0xc28] sm:$0xf]  ;;  %v17664_v43 = vld [vmem:[%s27770_s1 + $0xc34] sm:$0xf0] }
 0x24c   : > { %4450 = vmatpush.bf16.msra.mxu2 %v13408_v6  ;;  %4464 = vmatpush.bf16.msra.mxu3 %v13536_v4  ;;  %v17736_v6 = vld [vmem:[%s27770_s1 + $0xe74] sm:$0xf0]  ;;  %v13487_v4 = vld [vmem:[%s27770_s1 + $0xf68] sm:$0xf] }
 0x24d   : > { %v13360_v42 = vor.u32 %v17736_v6, %v13359_v17  ;;  %v13055_v6 = vld [vmem:[%s27770_s1 + $0xc08] sm:$0xf] }
 0x24e   : > { %4422 = vmatpush.bf16.msra.mxu0 %v13152_v60  ;;  %4436 = vmatpush.bf16.msra.mxu1 %v13280_v46  ;;  %v13504_v60 = vor.u32 %v17772_v27, %v13503_v63  ;;  %v13231_v46 = vld [vmem:[%s27770_s1 + $0xd68] sm:$0xf]  ;;  %v13088_v63 = vor.u32 %v17668_v3, %v13087_v53 }
 0x24f   : > { %v13232_v61 = vor.u32 %v17704_v41, %v13231_v46  ;;  %v13455_v46 = vld [vmem:[%s27770_s1 + $0xf28] sm:$0xf]  ;;  %v17760_v41 = vld [vmem:[%s27770_s1 + $0xf34] sm:$0xf0] }
 0x250   : > { %4451 = vmatpush.bf16.msra.mxu2 %v13392_v2  ;;  %4465 = vmatpush.bf16.msra.mxu3 %v13520_v24  ;;  %v3401_v2 = vpop.f32.mrf.mxu2  ;;  %v17732_v24 = vld [vmem:[%s27770_s1 + $0xe54] sm:$0xf0]  ;;  %v3415_v36 = vpop.f32.mrf.mxu3  ;;  %v13456_v3 = vor.u32 %v17760_v41, %v13455_v46  ;;  %v17714_v46 = vld [vmem:[%s27770_s1 + $0xdcc] sm:$0xf]  ;;  %v13281_v41 = vld [vmem:[%s27770_s1 + $0xdd8] sm:$0xf0] }
 0x251   : > { %v3402_v12 = vadd.f32 %v3401_v2, %v3388_v49  ;;  %v13199_v49 = vld [vmem:[%s27770_s1 + $0xd28] sm:$0xf]  ;;  %v13169_v2 = vld [vmem:[%s27770_s1 + $0xcf8] sm:$0xf0] }
 0x252   : > { %4423 = vmatpush.bf16.msra.mxu0 %v13136_v19  ;;  %4437 = vmatpush.bf16.msra.mxu1 %v13264_v47  ;;  %v13488_v19 = vor.u32 %v17768_v31, %v13487_v4  ;;  %v13215_v47 = vld [vmem:[%s27770_s1 + $0xd48] sm:$0xf]  ;;  %v13072_v4 = vor.u32 %v17664_v43, %v13071_v55  ;;  %v13200_v31 = vor.u32 %v17696_v59, %v13199_v49  ;;  %v13553_v55 = vld [vmem:[%s27770_s1 + $0xff8] sm:$0xf0]  ;;  %v17682_v49 = vld [vmem:[%s27770_s1 + $0xccc] sm:$0xf] }
 0x253   : > { %v13216_v27 = vor.u32 %v17700_v16, %v13215_v47  ;;  %v13439_v47 = vld [vmem:[%s27770_s1 + $0xf08] sm:$0xf]  ;;  %v17756_v16 = vld [vmem:[%s27770_s1 + $0xf14] sm:$0xf0]  ;;  %v13153_v59 = vld [vmem:[%s27770_s1 + $0xcd8] sm:$0xf0] }
 0x254   : > { %4452 = vmatpush.bf16.msra.mxu2 %v13376_v22  ;;  %4466 = vmatpush.bf16.msra.mxu3 %v13504_v60  ;;  %v13327_v22 = vld [vmem:[%s27770_s1 + $0xe28] sm:$0xf]  ;;  %v17728_v60 = vld [vmem:[%s27770_s1 + $0xe34] sm:$0xf0] }
 0x255   : > { %v13328_v53 = vor.u32 %v17728_v60, %v13327_v22 }
 0x256   : > { %4424 = vmatpush.bf16.msra.mxu0 %v13120_v37  ;;  %4438 = vmatpush.bf16.msra.mxu1 %v13248_v52  ;;  %v3416_v37 = vadd.f32 %v3415_v36, %v3402_v12  ;;  %v13344_v52 = vor.u32 %v17732_v24, %v13343_v21  ;;  %v17686_v21 = vld [vmem:[%s27770_s1 + $0xcec] sm:$0xf] }
 0x257   : > { %v17718_v24 = vld [vmem:[%s27770_s1 + $0xdec] sm:$0xf] }
 0x258   : > { %4453 = vmatpush.bf16.msra.mxu2 %v13360_v42  ;;  %4467 = vmatpush.bf16.msra.mxu3 %v13488_v19  ;;  %v22046_v17 = vadd.f32 %v3416_v37, %v21300_v7  ;;  %v17692_v7 = vld [vmem:[%s27770_s1 + $0xd14] sm:$0xf0]  ;;  %v13311_v42 = vld [vmem:[%s27770_s1 + $0xe08] sm:$0xf]  ;;  %v13440_v37 = vor.u32 %v17756_v16, %v13439_v47 }
 0x259   : > { %v17724_v19 = vld [vmem:[%s27770_s1 + $0xe14] sm:$0xf0] }
 0x25a   : > { %4425 = vmatpush.bf16.msra.mxu0 %v13104_v23  ;;  %4439 = vmatpush.bf16.msra.mxu1 %v13232_v61  ;;  %v17660_v23 = vld [vmem:[%s27770_s1 + $0xc14] sm:$0xf0]  ;;  %v13183_v61 = vld [vmem:[%s27770_s1 + $0xd08] sm:$0xf]  ;;  %v13312_v43 = vor.u32 %v17724_v19, %v13311_v42  ;;  %v17678_v42 = vld [vmem:[%s27770_s1 + $0xcac] sm:$0xf] }
 0x25b   : > { %v13056_v12 = vor.u32 %v17660_v23, %v13055_v6  ;;  %v13184_v36 = vor.u32 %v17692_v7, %v13183_v61  ;;  %v17746_v6 = vld [vmem:[%s27770_s1 + $0xecc] sm:$0xf]  ;;  %v13537_v23 = vld [vmem:[%s27770_s1 + $0xfd8] sm:$0xf0]  ;;  %v22120_v61 = vpop.f32.mrf.mxu0  ;;  %v22122_v7 = vpop.f32.mrf.mxu1 }
 0x25c   : > { %4454 = vmatpush.bf16.msra.mxu2 %v13344_v52  ;;  %4468 = vmatpush.bf16.msra.mxu3 %v13472_v1  ;;  %v13172_v52 = vor.u32 %v17686_v21, %v13169_v2  ;;  %v13300_v1 = vor.u32 %v17718_v24, %v13297_v45  ;;  %v13137_v19 = vld [vmem:[%s27770_s1 + $0xcb8] sm:$0xf0]  ;;  %v17710_v21 = vld [vmem:[%s27770_s1 + $0xdac] sm:$0xf] }
 0x25d   : > { %v13265_v2 = vld [vmem:[%s27770_s1 + $0xdb8] sm:$0xf0]  ;;  %v17742_v24 = vld [vmem:[%s27770_s1 + $0xeac] sm:$0xf] }
 0x25e   : > { %4426 = vmatpush.bf16.msra.mxu0 %v13088_v63  ;;  %4440 = vmatpush.bf16.msra.mxu1 %v13216_v27  ;;  %v13425_v63 = vld [vmem:[%s27770_s1 + $0xef8] sm:$0xf0]  ;;  %v17782_v27 = vld [vmem:[%s27770_s1 + $0xfec] sm:$0xf] }
 0x25f   : > { %v13428_v22 = vor.u32 %v17750_v48, %v13425_v63  ;;  %v13556_v60 = vor.u32 %v17782_v27, %v13553_v55  ;;  %v13393_v45 = vld [vmem:[%s27770_s1 + $0xeb8] sm:$0xf0]  ;;  %v17774_v48 = vld [vmem:[%s27770_s1 + $0xfac] sm:$0xf]  ;;  %v13268_v63 = vor.u32 %v17710_v21, %v13265_v2 }
 0x260   : > { %4455 = vmatpush.bf16.msra.mxu2 %v13328_v53  ;;  %4469 = vmatpush.bf16.msra.mxu3 %v13456_v3  ;;  %v13156_v53 = vor.u32 %v17682_v49, %v13153_v59  ;;  %v13284_v3 = vor.u32 %v17714_v46, %v13281_v41  ;;  %v17674_v27 = vld [vmem:[%s27770_s1 + $0xc8c] sm:$0xf]  ;;  %v13121_v55 = vld [vmem:[%s27770_s1 + $0xc98] sm:$0xf0]  ;;  %v22167_v59 = vpop.f32.mrf.mxu2 }
 0x261   : > { %v17738_v49 = vld [vmem:[%s27770_s1 + $0xe8c] sm:$0xf]  ;;  %v13505_v46 = vld [vmem:[%s27770_s1 + $0xf98] sm:$0xf0] }
 0x262   : > { %4427 = vmatpush.bf16.msra.mxu0 %v13072_v4  ;;  %4441 = vmatpush.bf16.msra.mxu1 %v13200_v31  ;;  %v13409_v4 = vld [vmem:[%s27770_s1 + $0xed8] sm:$0xf0]  ;;  %v17778_v31 = vld [vmem:[%s27770_s1 + $0xfcc] sm:$0xf] }
 0x263   : > { %v13412_v47 = vor.u32 %v17746_v6, %v13409_v4  ;;  %v13540_v16 = vor.u32 %v17778_v31, %v13537_v23  ;;  %v22178_v4 = vpop.f32.mrf.mxu3  ;;  %v13124_v23 = vor.u32 %v17674_v27, %v13121_v55  ;;  %v13233_v21 = vld [vmem:[%s27770_s1 + $0xd78] sm:$0xf0]  ;;  %v17734_v2 = vld [vmem:[%s27770_s1 + $0xe6c] sm:$0xf] }
 0x264   : > { %4456 = vmatpush.bf16.msra.mxu2 %v13312_v43  ;;  %4470 = vmatpush.bf16.msra.mxu3 %v13440_v37  ;;  %v13396_v43 = vor.u32 %v17742_v24, %v13393_v45  ;;  %v13361_v24 = vld [vmem:[%s27770_s1 + $0xe78] sm:$0xf0]  ;;  %v17766_v45 = vld [vmem:[%s27770_s1 + $0xf6c] sm:$0xf] }
 0x265   : > { %v13089_v27 = vld [vmem:[%s27770_s1 + $0xc58] sm:$0xf0]  ;;  %v13364_v55 = vor.u32 %v17734_v2, %v13361_v24  ;;  %v17726_v2 = vld [vmem:[%s27770_s1 + $0xe2c] sm:$0xf] }
 0x266   : > { %4428 = vmatpush.bf16.msra.mxu0 %v13056_v12  ;;  %4442 = vmatpush.bf16.msra.mxu1 %v13184_v36  ;;  %v13521_v12 = vld [vmem:[%s27770_s1 + $0xfb8] sm:$0xf0]  ;;  %v13140_v36 = vor.u32 %v17678_v42, %v13137_v19  ;;  %v3429_v41 = vpop.f32.mrf.mxu0  ;;  %v3443_v6 = vpop.f32.mrf.mxu1 }
 0x267   : > { %4457 = vmatmul.bf16.vlgmr.msra.gmra.mxu2 %v19364_v33  ;;  %4471 = vmatmul.bf16.vlgmr.msra.gmra.mxu3 %v19366_v54  ;;  %v13524_v37 = vor.u32 %v17774_v48, %v13521_v12  ;;  %v3444_v31 = vadd.f32 %v3443_v6, %v3429_v41  ;;  %v13105_v42 = vld [vmem:[%s27770_s1 + $0xc78] sm:$0xf0] }
 0x268   : > { %4505 = vmatpush.bf16.msrb.mxu2 %v13428_v22  ;;  %4519 = vmatpush.bf16.msrb.mxu3 %v13556_v60  ;;  %v13377_v22 = vld [vmem:[%s27770_s1 + $0xe98] sm:$0xf0]  ;;  %v17770_v60 = vld [vmem:[%s27770_s1 + $0xf8c] sm:$0xf] }
 0x269   : > { %4429 = vmatmul.bf16.vlgmr.msra.gmra.mxu0 %v19374_v28  ;;  %4443 = vmatmul.bf16.vlgmr.msra.gmra.mxu1 %v19376_v58  ;;  %v13380_v19 = vor.u32 %v17738_v49, %v13377_v22  ;;  %v13489_v48 = vld [vmem:[%s27770_s1 + $0xf78] sm:$0xf0] }
 0x26a   : > { %4477 = vmatpush.bf16.msrb.mxu0 %v13172_v52  ;;  %4491 = vmatpush.bf16.msrb.mxu1 %v13300_v1  ;;  %v17706_v52 = vld [vmem:[%s27770_s1 + $0xd8c] sm:$0xf]  ;;  %v13249_v1 = vld [vmem:[%s27770_s1 + $0xd98] sm:$0xf0]  ;;  %v3457_v49 = vpop.f32.mrf.mxu2 }
 0x26b   : > { %v13345_v22 = vld [vmem:[%s27770_s1 + $0xe58] sm:$0xf0]  ;;  %v3458_v41 = vadd.f32 %v3457_v49, %v3444_v31  ;;  %v3471_v6 = vpop.f32.mrf.mxu3  ;;  %v17694_v31 = vld [vmem:[%s27770_s1 + $0xd2c] sm:$0xf] }
 0x26c   : > { %4506 = vmatpush.bf16.msrb.mxu2 %v13412_v47  ;;  %4520 = vmatpush.bf16.msrb.mxu3 %v13540_v16  ;;  %v13508_v47 = vor.u32 %v17770_v60, %v13505_v46  ;;  %v17702_v16 = vld [vmem:[%s27770_s1 + $0xd6c] sm:$0xf]  ;;  %v13473_v46 = vld [vmem:[%s27770_s1 + $0xf58] sm:$0xf0] }
 0x26d   : > { %v17762_v60 = vld [vmem:[%s27770_s1 + $0xf4c] sm:$0xf]  ;;  %v13329_v24 = vld [vmem:[%s27770_s1 + $0xe38] sm:$0xf0] }
 0x26e   : > { %4478 = vmatpush.bf16.msrb.mxu0 %v13156_v53  ;;  %4492 = vmatpush.bf16.msrb.mxu1 %v13284_v3  ;;  %v13252_v53 = vor.u32 %v17706_v52, %v13249_v1  ;;  %v17670_v3 = vld [vmem:[%s27770_s1 + $0xc6c] sm:$0xf]  ;;  %v13217_v52 = vld [vmem:[%s27770_s1 + $0xd58] sm:$0xf0] }
 0x26f   : > { %v13108_v12 = vor.u32 %v17670_v3, %v13105_v42  ;;  %v17730_v1 = vld [vmem:[%s27770_s1 + $0xe4c] sm:$0xf]  ;;  %v13073_v42 = vld [vmem:[%s27770_s1 + $0xc38] sm:$0xf0] }
 0x270   : > { %4507 = vmatpush.bf16.msrb.mxu2 %v13396_v43  ;;  %4521 = vmatpush.bf16.msrb.mxu3 %v13524_v37  ;;  %v13492_v43 = vor.u32 %v17766_v45, %v13489_v48  ;;  %v17698_v37 = vld [vmem:[%s27770_s1 + $0xd4c] sm:$0xf]  ;;  %v13457_v48 = vld [vmem:[%s27770_s1 + $0xf38] sm:$0xf0] }
 0x271   : > { %v17662_v3 = vld [vmem:[%s27770_s1 + $0xc2c] sm:$0xf]  ;;  %v13313_v49 = vld [vmem:[%s27770_s1 + $0xe18] sm:$0xf0] }
 0x272   : > { %4479 = vmatpush.bf16.msrb.mxu0 %v13140_v36  ;;  %4493 = vmatpush.bf16.msrb.mxu1 %v13268_v63  ;;  %v13236_v36 = vor.u32 %v17702_v16, %v13233_v21  ;;  %v17666_v63 = vld [vmem:[%s27770_s1 + $0xc4c] sm:$0xf]  ;;  %v13476_v16 = vor.u32 %v17762_v60, %v13473_v46  ;;  %v13201_v21 = vld [vmem:[%s27770_s1 + $0xd38] sm:$0xf0]  ;;  %v13799_v46 = vld [vmem:[%s27770_s1 + $0x10e0] sm:$0xf] }
 0x273   : > { %v17758_v45 = vld [vmem:[%s27770_s1 + $0xf2c] sm:$0xf]  ;;  %v13441_v60 = vld [vmem:[%s27770_s1 + $0xf18] sm:$0xf0] }
 0x274   : > { %4508 = vmatpush.bf16.msrb.mxu2 %v13380_v19  ;;  %4522 = vmatpush.bf16.msrb.mxu3 %v13508_v47  ;;  %v3472_v19 = vadd.f32 %v3471_v6, %v3458_v41  ;;  %v13348_v47 = vor.u32 %v17730_v1, %v13345_v22  ;;  %v17722_v1 = vld [vmem:[%s27770_s1 + $0xe0c] sm:$0xf]  ;;  %v17815_v41 = vld [vmem:[%s27770_s1 + $0x10ec] sm:$0xf0]  ;;  %v13927_v6 = vld [vmem:[%s27770_s1 + $0x11e0] sm:$0xf] }
 0x275   : > { %v17754_v22 = vld [vmem:[%s27770_s1 + $0xf0c] sm:$0xf] }
 0x276   : > { %4480 = vmatpush.bf16.msrb.mxu0 %v13124_v23  ;;  %4494 = vmatpush.bf16.msrb.mxu1 %v13252_v53  ;;  %v13092_v23 = vor.u32 %v17666_v63, %v13089_v27  ;;  %v13220_v53 = vor.u32 %v17698_v37, %v13217_v52  ;;  %v13076_v63 = vor.u32 %v17662_v3, %v13073_v42 }
 0x277   : > { %v13204_v27 = vor.u32 %v17694_v31, %v13201_v21  ;;  %v13332_v37 = vor.u32 %v17726_v2, %v13329_v24  ;;  %v13460_v52 = vor.u32 %v17758_v45, %v13457_v48  ;;  %v13316_v31 = vor.u32 %v17722_v1, %v13313_v49  ;;  %v13783_v45 = vld [vmem:[%s27770_s1 + $0x10c0] sm:$0xf]  ;;  %v17811_v48 = vld [vmem:[%s27770_s1 + $0x10cc] sm:$0xf0]  ;;  %v22327_v1 = vpop.f32.mrf.mxu0  ;;  %v22329_v49 = vpop.f32.mrf.mxu1 }
 0x278   : > { %4509 = vmatpush.bf16.msrb.mxu2 %v13364_v55  ;;  %4523 = vmatpush.bf16.msrb.mxu3 %v13492_v43  ;;  %v13057_v55 = vld [vmem:[%s27770_s1 + $0xc18] sm:$0xf0]  ;;  %v17690_v43 = vld [vmem:[%s27770_s1 + $0xd0c] sm:$0xf]  ;;  %v13444_v21 = vor.u32 %v17754_v22, %v13441_v60  ;;  %v13800_v2 = vor.u32 %v17815_v41, %v13799_v46  ;;  %v13784_v22 = vor.u32 %v17811_v48, %v13783_v45  ;;  %v13767_v46 = vld [vmem:[%s27770_s1 + $0x10a0] sm:$0xf] }
 0x279   : > { %v17807_v41 = vld [vmem:[%s27770_s1 + $0x10ac] sm:$0xf0] }
 0x27a   : > { %4481 = vmatpush.bf16.msrb.mxu0 %v13108_v12  ;;  %4495 = vmatpush.bf16.msrb.mxu1 %v13236_v36  ;;  %v22253_v12 = vadd.f32 %v3472_v19, %v21520_v5  ;;  %v17658_v36 = vld [vmem:[%s27770_s1 + $0xc0c] sm:$0xf]  ;;  %v13185_v5 = vld [vmem:[%s27770_s1 + $0xd18] sm:$0xf0]  ;;  %v17879_v19 = vld [vmem:[%s27770_s1 + $0x12ec] sm:$0xf0] }
 0x27b   : > { %v13060_v3 = vor.u32 %v17658_v36, %v13057_v55  ;;  %v13188_v42 = vor.u32 %v17690_v43, %v13185_v5  ;;  %v17843_v55 = vld [vmem:[%s27770_s1 + $0x11cc] sm:$0xf0]  ;;  %v14039_v43 = vld [vmem:[%s27770_s1 + $0x12c0] sm:$0xf] }
 0x27c   : > { %4510 = vmatpush.bf16.msrb.mxu2 %v13348_v47  ;;  %4524 = vmatpush.bf16.msrb.mxu3 %v13476_v16  ;;  %v14183_v47 = vld [vmem:[%s27770_s1 + $0x13e0] sm:$0xf]  ;;  %v17911_v16 = vld [vmem:[%s27770_s1 + $0x13ec] sm:$0xf0] }
 0x27d   : > { %v17875_v5 = vld [vmem:[%s27770_s1 + $0x12cc] sm:$0xf0] }
 0x27e   : > { %4482 = vmatpush.bf16.msrb.mxu0 %v13092_v23  ;;  %4496 = vmatpush.bf16.msrb.mxu1 %v13220_v53  ;;  %v17847_v23 = vld [vmem:[%s27770_s1 + $0x11ec] sm:$0xf0]  ;;  %v14055_v53 = vld [vmem:[%s27770_s1 + $0x12e0] sm:$0xf] }
 0x27f   : > { %v13928_v24 = vor.u32 %v17847_v23, %v13927_v6  ;;  %v14056_v36 = vor.u32 %v17879_v19, %v14055_v53  ;;  %v14040_v6 = vor.u32 %v17875_v5, %v14039_v43  ;;  %v13895_v53 = vld [vmem:[%s27770_s1 + $0x11a0] sm:$0xf]  ;;  %v17871_v19 = vld [vmem:[%s27770_s1 + $0x12ac] sm:$0xf0] }
 0x280   : > { %4511 = vmatpush.bf16.msrb.mxu2 %v13332_v37  ;;  %4525 = vmatpush.bf16.msrb.mxu3 %v13460_v52  ;;  %v14167_v37 = vld [vmem:[%s27770_s1 + $0x13c0] sm:$0xf]  ;;  %v17907_v52 = vld [vmem:[%s27770_s1 + $0x13cc] sm:$0xf0] }
 0x281   : > { %v14168_v23 = vor.u32 %v17907_v52, %v14167_v37  ;;  %v17867_v43 = vld [vmem:[%s27770_s1 + $0x128c] sm:$0xf0]  ;;  %v14135_v5 = vld [vmem:[%s27770_s1 + $0x1380] sm:$0xf] }
 0x282   : > { %4483 = vmatpush.bf16.msrb.mxu0 %v13076_v63  ;;  %4497 = vmatpush.bf16.msrb.mxu1 %v13204_v27  ;;  %v14184_v63 = vor.u32 %v17911_v16, %v14183_v47  ;;  %v13911_v27 = vld [vmem:[%s27770_s1 + $0x11c0] sm:$0xf]  ;;  %v17903_v16 = vld [vmem:[%s27770_s1 + $0x13ac] sm:$0xf0] }
 0x283   : > { %v13912_v60 = vor.u32 %v17843_v55, %v13911_v27  ;;  %v14151_v47 = vld [vmem:[%s27770_s1 + $0x13a0] sm:$0xf]  ;;  %v22374_v55 = vpop.f32.mrf.mxu2  ;;  %v17899_v37 = vld [vmem:[%s27770_s1 + $0x138c] sm:$0xf0] }
 0x284   : > { %4512 = vmatpush.bf16.msrb.mxu2 %v13316_v31  ;;  %4526 = vmatpush.bf16.msrb.mxu3 %v13444_v21  ;;  %v13768_v31 = vor.u32 %v17807_v41, %v13767_v46  ;;  %v14152_v48 = vor.u32 %v17903_v16, %v14151_v47  ;;  %v14007_v27 = vld [vmem:[%s27770_s1 + $0x1280] sm:$0xf]  ;;  %v17831_v47 = vld [vmem:[%s27770_s1 + $0x116c] sm:$0xf0] }
 0x285   : > { %v13991_v16 = vld [vmem:[%s27770_s1 + $0x1260] sm:$0xf] }
 0x286   : > { %4484 = vmatpush.bf16.msrb.mxu0 %v13060_v3  ;;  %4498 = vmatpush.bf16.msrb.mxu1 %v13188_v42  ;;  %v17839_v3 = vld [vmem:[%s27770_s1 + $0x11ac] sm:$0xf0]  ;;  %v14023_v42 = vld [vmem:[%s27770_s1 + $0x12a0] sm:$0xf]  ;;  %v3485_v52 = vpop.f32.mrf.mxu0 }
 0x287   : > { %4513 = vmatmul.bf16.vlgmr.msrb.gmra.mxu2 %v19364_v33  ;;  %4527 = vmatmul.bf16.vlgmr.msrb.gmra.mxu3 %v19366_v54  ;;  %v13896_v21 = vor.u32 %v17839_v3, %v13895_v53  ;;  %v14024_v45 = vor.u32 %v17871_v19, %v14023_v42  ;;  %v17799_v53 = vld [vmem:[%s27770_s1 + $0x106c] sm:$0xf0]  ;;  %v14008_v3 = vor.u32 %v17867_v43, %v14007_v27  ;;  %v13863_v19 = vld [vmem:[%s27770_s1 + $0x1160] sm:$0xf] }
 0x288   : > { %5367 = vmatpush.bf16.msra.mxu2 %v14056_v36  ;;  %5381 = vmatpush.bf16.msra.mxu3 %v14184_v63  ;;  %v13879_v36 = vld [vmem:[%s27770_s1 + $0x1180] sm:$0xf]  ;;  %v17835_v63 = vld [vmem:[%s27770_s1 + $0x118c] sm:$0xf0]  ;;  %v14136_v42 = vor.u32 %v17899_v37, %v14135_v5 }
 0x289   : > { %4485 = vmatmul.bf16.vlgmr.msrb.gmra.mxu0 %v19374_v28  ;;  %4499 = vmatmul.bf16.vlgmr.msrb.gmra.mxu1 %v19376_v58  ;;  %v13847_v43 = vld [vmem:[%s27770_s1 + $0x1140] sm:$0xf]  ;;  %v17827_v5 = vld [vmem:[%s27770_s1 + $0x114c] sm:$0xf0] }
 0x28a   : > { %5339 = vmatpush.bf16.msra.mxu0 %v13800_v2  ;;  %5353 = vmatpush.bf16.msra.mxu1 %v13928_v24  ;;  %v13751_v2 = vld [vmem:[%s27770_s1 + $0x1080] sm:$0xf]  ;;  %v17803_v24 = vld [vmem:[%s27770_s1 + $0x108c] sm:$0xf0] }
 0x28b   : > { %v13752_v41 = vor.u32 %v17803_v24, %v13751_v2  ;;  %v17895_v2 = vld [vmem:[%s27770_s1 + $0x136c] sm:$0xf0]  ;;  %v13975_v37 = vld [vmem:[%s27770_s1 + $0x1240] sm:$0xf] }
 0x28c   : > { %5368 = vmatpush.bf16.msra.mxu2 %v14040_v6  ;;  %5382 = vmatpush.bf16.msra.mxu3 %v14168_v23  ;;  %v13880_v6 = vor.u32 %v17835_v63, %v13879_v36  ;;  %v13735_v23 = vld [vmem:[%s27770_s1 + $0x1060] sm:$0xf]  ;;  %v17795_v36 = vld [vmem:[%s27770_s1 + $0x104c] sm:$0xf0] }
 0x28d   : > { %v13736_v24 = vor.u32 %v17799_v53, %v13735_v23 }
 0x28e   : > { %5340 = vmatpush.bf16.msra.mxu0 %v13784_v22  ;;  %5354 = vmatpush.bf16.msra.mxu1 %v13912_v60  ;;  %v3499_v22 = vpop.f32.mrf.mxu1  ;;  %v22385_v60 = vpop.f32.mrf.mxu3 }
 0x28f   : > { %v3500_v46 = vadd.f32 %v3499_v22, %v3485_v52  ;;  %v3513_v52 = vpop.f32.mrf.mxu2  ;;  %v17859_v22 = vld [vmem:[%s27770_s1 + $0x124c] sm:$0xf0] }
 0x290   : > { %5369 = vmatpush.bf16.msra.mxu2 %v14024_v45  ;;  %5383 = vmatpush.bf16.msra.mxu3 %v14152_v48  ;;  %v13864_v45 = vor.u32 %v17831_v47, %v13863_v19  ;;  %v13719_v48 = vld [vmem:[%s27770_s1 + $0x1040] sm:$0xf]  ;;  %v17791_v47 = vld [vmem:[%s27770_s1 + $0x102c] sm:$0xf0] }
 0x291   : > { %v3514_v23 = vadd.f32 %v3513_v52, %v3500_v46  ;;  %v13703_v19 = vld [vmem:[%s27770_s1 + $0x1020] sm:$0xf] }
 0x292   : > { %5341 = vmatpush.bf16.msra.mxu0 %v13768_v31  ;;  %5355 = vmatpush.bf16.msra.mxu1 %v13896_v21  ;;  %v17863_v31 = vld [vmem:[%s27770_s1 + $0x126c] sm:$0xf0]  ;;  %v14119_v21 = vld [vmem:[%s27770_s1 + $0x1360] sm:$0xf] }
 0x293   : > { %v13992_v63 = vor.u32 %v17863_v31, %v13991_v16  ;;  %v14120_v27 = vor.u32 %v17895_v2, %v14119_v21  ;;  %v13976_v31 = vor.u32 %v17859_v22, %v13975_v37  ;;  %v13831_v46 = vld [vmem:[%s27770_s1 + $0x1120] sm:$0xf]  ;;  %v17823_v2 = vld [vmem:[%s27770_s1 + $0x112c] sm:$0xf0] }
 0x294   : > { %5370 = vmatpush.bf16.msra.mxu2 %v14008_v3  ;;  %5384 = vmatpush.bf16.msra.mxu3 %v14136_v42  ;;  %v13720_v3 = vor.u32 %v17795_v36, %v13719_v48  ;;  %v13848_v42 = vor.u32 %v17827_v5, %v13847_v43  ;;  %v14087_v48 = vld [vmem:[%s27770_s1 + $0x1320] sm:$0xf]  ;;  %v17887_v36 = vld [vmem:[%s27770_s1 + $0x132c] sm:$0xf0]  ;;  %v13704_v43 = vor.u32 %v17791_v47, %v13703_v19  ;;  %v13801_v19 = vld [vmem:[%s27770_s1 + $0x10f0] sm:$0xf0] }
 0x295   : > { %v13832_v5 = vor.u32 %v17823_v2, %v13831_v46  ;;  %v17787_v37 = vld [vmem:[%s27770_s1 + $0x100c] sm:$0xf0]  ;;  %v13815_v52 = vld [vmem:[%s27770_s1 + $0x1100] sm:$0xf]  ;;  %v17845_v47 = vld [vmem:[%s27770_s1 + $0x11e4] sm:$0xf] }
 0x296   : > { %5342 = vmatpush.bf16.msra.mxu0 %v13752_v41  ;;  %5356 = vmatpush.bf16.msra.mxu1 %v13880_v6  ;;  %v14103_v41 = vld [vmem:[%s27770_s1 + $0x1340] sm:$0xf]  ;;  %v17891_v6 = vld [vmem:[%s27770_s1 + $0x134c] sm:$0xf0]  ;;  %v3527_v53 = vpop.f32.mrf.mxu3  ;;  %v14057_v2 = vld [vmem:[%s27770_s1 + $0x12f0] sm:$0xf0] }
 0x297   : > { %v3528_v16 = vadd.f32 %v3527_v53, %v3514_v23  ;;  %v14104_v21 = vor.u32 %v17891_v6, %v14103_v41  ;;  %v14088_v41 = vor.u32 %v17887_v36, %v14087_v48  ;;  %v13943_v6 = vld [vmem:[%s27770_s1 + $0x1200] sm:$0xf]  ;;  %v17851_v23 = vld [vmem:[%s27770_s1 + $0x120c] sm:$0xf0] }
 0x298   : > { %5371 = vmatpush.bf16.msra.mxu2 %v13992_v63  ;;  %5385 = vmatpush.bf16.msra.mxu3 %v14120_v27  ;;  %v13687_v27 = vld [vmem:[%s27770_s1 + $0x1000] sm:$0xf]  ;;  %v13944_v48 = vor.u32 %v17851_v23, %v13943_v6  ;;  %v14041_v6 = vld [vmem:[%s27770_s1 + $0x12d0] sm:$0xf0]  ;;  %v17905_v23 = vld [vmem:[%s27770_s1 + $0x13c4] sm:$0xf] }
 0x299   : > { %v22460_v63 = vadd.f32 %v3528_v16, %v21740_v51  ;;  %v17819_v51 = vld [vmem:[%s27770_s1 + $0x110c] sm:$0xf0]  ;;  %v14071_v53 = vld [vmem:[%s27770_s1 + $0x1300] sm:$0xf]  ;;  %v13929_v16 = vld [vmem:[%s27770_s1 + $0x11f0] sm:$0xf0] }
 0x29a   : > { %5343 = vmatpush.bf16.msra.mxu0 %v13736_v24  ;;  %5357 = vmatpush.bf16.msra.mxu1 %v13864_v45  ;;  %v13959_v24 = vld [vmem:[%s27770_s1 + $0x1220] sm:$0xf]  ;;  %v17855_v45 = vld [vmem:[%s27770_s1 + $0x122c] sm:$0xf0]  ;;  %v13816_v46 = vor.u32 %v17819_v51, %v13815_v52 }
 0x29b   : > { %v13960_v22 = vor.u32 %v17855_v45, %v13959_v24  ;;  %v17909_v24 = vld [vmem:[%s27770_s1 + $0x13e4] sm:$0xf]  ;;  %v14185_v45 = vld [vmem:[%s27770_s1 + $0x13f0] sm:$0xf0] }
 0x29c   : > { %5372 = vmatpush.bf16.msra.mxu2 %v13976_v31  ;;  %5386 = vmatpush.bf16.msra.mxu3 %v14104_v21  ;;  %v17877_v31 = vld [vmem:[%s27770_s1 + $0x12e4] sm:$0xf]  ;;  %v13688_v21 = vor.u32 %v17787_v37, %v13687_v27  ;;  %v13785_v37 = vld [vmem:[%s27770_s1 + $0x10d0] sm:$0xf0]  ;;  %v14188_v51 = vor.u32 %v17909_v24, %v14185_v45 }
 0x29d   : > { %v17809_v27 = vld [vmem:[%s27770_s1 + $0x10c4] sm:$0xf]  ;;  %v14060_v52 = vor.u32 %v17877_v31, %v14057_v2  ;;  %v13769_v31 = vld [vmem:[%s27770_s1 + $0x10b0] sm:$0xf0] }
 0x29e   : > { %5344 = vmatpush.bf16.msra.mxu0 %v13720_v3  ;;  %5358 = vmatpush.bf16.msra.mxu1 %v13848_v42  ;;  %v17883_v3 = vld [vmem:[%s27770_s1 + $0x130c] sm:$0xf0]  ;;  %v17813_v42 = vld [vmem:[%s27770_s1 + $0x10e4] sm:$0xf]  ;;  %v14025_v45 = vld [vmem:[%s27770_s1 + $0x12b0] sm:$0xf0] }
 0x29f   : > { %v14072_v36 = vor.u32 %v17883_v3, %v14071_v53  ;;  %v14169_v53 = vld [vmem:[%s27770_s1 + $0x13d0] sm:$0xf0]  ;;  %v22534_v3 = vpop.f32.mrf.mxu0  ;;  %v17837_v2 = vld [vmem:[%s27770_s1 + $0x11a4] sm:$0xf] }
 0x2a0   : > { %5373 = vmatpush.bf16.msra.mxu2 %v13960_v22  ;;  %5387 = vmatpush.bf16.msra.mxu3 %v14088_v41  ;;  %v13913_v22 = vld [vmem:[%s27770_s1 + $0x11d0] sm:$0xf0]  ;;  %v17873_v41 = vld [vmem:[%s27770_s1 + $0x12c4] sm:$0xf] }
 0x2a1   : > { %v17869_v24 = vld [vmem:[%s27770_s1 + $0x12a4] sm:$0xf] }
 0x2a2   : > { %5345 = vmatpush.bf16.msra.mxu0 %v13704_v43  ;;  %5359 = vmatpush.bf16.msra.mxu1 %v13832_v5  ;;  %v13804_v43 = vor.u32 %v17813_v42, %v13801_v19  ;;  %v13932_v5 = vor.u32 %v17845_v47, %v13929_v16  ;;  %v22536_v42 = vpop.f32.mrf.mxu1  ;;  %v13788_v19 = vor.u32 %v17809_v27, %v13785_v37  ;;  %v17805_v16 = vld [vmem:[%s27770_s1 + $0x10a4] sm:$0xf]  ;;  %v13753_v37 = vld [vmem:[%s27770_s1 + $0x1090] sm:$0xf0] }
 0x2a3   : > { %v13916_v47 = vor.u32 %v17841_v40, %v13913_v22  ;;  %v13897_v40 = vld [vmem:[%s27770_s1 + $0x11b0] sm:$0xf0]  ;;  %v17801_v27 = vld [vmem:[%s27770_s1 + $0x1084] sm:$0xf] }
 0x2a4   : > { %5374 = vmatpush.bf16.msra.mxu2 %v13944_v48  ;;  %5388 = vmatpush.bf16.msra.mxu3 %v14072_v36  ;;  %v17901_v48 = vld [vmem:[%s27770_s1 + $0x13a4] sm:$0xf]  ;;  %v14153_v36 = vld [vmem:[%s27770_s1 + $0x13b0] sm:$0xf0] }
 0x2a5   : > { %v17833_v22 = vld [vmem:[%s27770_s1 + $0x1184] sm:$0xf] }
 0x2a6   : > { %5346 = vmatpush.bf16.msra.mxu0 %v13688_v21  ;;  %5360 = vmatpush.bf16.msra.mxu1 %v13816_v46  ;;  %v14044_v21 = vor.u32 %v17873_v41, %v14041_v6  ;;  %v14172_v46 = vor.u32 %v17905_v23, %v14169_v53  ;;  %v13881_v41 = vld [vmem:[%s27770_s1 + $0x1190] sm:$0xf0]  ;;  %v17865_v6 = vld [vmem:[%s27770_s1 + $0x1284] sm:$0xf]  ;;  %v22581_v23 = vpop.f32.mrf.mxu2  ;;  %v22583_v53 = vpop.f32.mrf.mxu3 }
 0x2a7   : > { %5375 = vmatmul.bf16.vlgmr.msra.gmra.mxu2 %v19364_v33  ;;  %5389 = vmatmul.bf16.vlgmr.msra.gmra.mxu3 %v19366_v54 }
 0x2a8   : > { %5423 = vmatpush.bf16.msrb.mxu2 %v14060_v52  ;;  %5437 = vmatpush.bf16.msrb.mxu3 %v14188_v51  ;;  %v14028_v52 = vor.u32 %v17869_v24, %v14025_v45  ;;  %v14156_v51 = vor.u32 %v17901_v48, %v14153_v36  ;;  %v17797_v24 = vld [vmem:[%s27770_s1 + $0x1064] sm:$0xf]  ;;  %v13737_v45 = vld [vmem:[%s27770_s1 + $0x1070] sm:$0xf0] }
 0x2a9   : > { %5347 = vmatmul.bf16.vlgmr.msra.gmra.mxu0 %v19374_v28  ;;  %5361 = vmatmul.bf16.vlgmr.msra.gmra.mxu1 %v19376_v58 }
 0x2aa   : > { %5395 = vmatpush.bf16.msrb.mxu0 %v13804_v43  ;;  %5409 = vmatpush.bf16.msrb.mxu1 %v13932_v5  ;;  %v13772_v43 = vor.u32 %v17805_v16, %v13769_v31  ;;  %v13900_v5 = vor.u32 %v17837_v2, %v13897_v40  ;;  %v14137_v16 = vld [vmem:[%s27770_s1 + $0x1390] sm:$0xf0]  ;;  %v4318_v31 = vpop.f32.mrf.mxu0  ;;  %v13756_v2 = vor.u32 %v17801_v27, %v13753_v37  ;;  %v17861_v27 = vld [vmem:[%s27770_s1 + $0x1264] sm:$0xf] }
 0x2ab   : > { %v13884_v40 = vor.u32 %v17833_v22, %v13881_v41  ;;  %v13993_v37 = vld [vmem:[%s27770_s1 + $0x1270] sm:$0xf0]  ;;  %v13740_v22 = vor.u32 %v17797_v24, %v13737_v45 }
 0x2ac   : > { %5424 = vmatpush.bf16.msrb.mxu2 %v14044_v21  ;;  %5438 = vmatpush.bf16.msrb.mxu3 %v14172_v46  ;;  %v4332_v21 = vpop.f32.mrf.mxu1 }
 0x2ad   : > { %v4333_v46 = vadd.f32 %v4332_v21, %v4318_v31  ;;  %v13849_v21 = vld [vmem:[%s27770_s1 + $0x1150] sm:$0xf0] }
 0x2ae   : > { %5396 = vmatpush.bf16.msrb.mxu0 %v13788_v19  ;;  %5410 = vmatpush.bf16.msrb.mxu1 %v13916_v47  ;;  %v14009_v19 = vld [vmem:[%s27770_s1 + $0x1290] sm:$0xf0]  ;;  %v17897_v47 = vld [vmem:[%s27770_s1 + $0x1384] sm:$0xf]  ;;  %v4346_v24 = vpop.f32.mrf.mxu2  ;;  %v4360_v45 = vpop.f32.mrf.mxu3 }
 0x2af   : > { %v14012_v48 = vor.u32 %v17865_v6, %v14009_v19  ;;  %v14140_v36 = vor.u32 %v17897_v47, %v14137_v16  ;;  %v17793_v6 = vld [vmem:[%s27770_s1 + $0x1044] sm:$0xf]  ;;  %v13721_v19 = vld [vmem:[%s27770_s1 + $0x1050] sm:$0xf0]  ;;  %v13996_v16 = vor.u32 %v17861_v27, %v13993_v37 }
 0x2b0   : > { %5425 = vmatpush.bf16.msrb.mxu2 %v14028_v52  ;;  %5439 = vmatpush.bf16.msrb.mxu3 %v14156_v51  ;;  %v17893_v52 = vld [vmem:[%s27770_s1 + $0x1364] sm:$0xf]  ;;  %v14121_v51 = vld [vmem:[%s27770_s1 + $0x1370] sm:$0xf0]  ;;  %v13724_v27 = vor.u32 %v17793_v6, %v13721_v19 }
 0x2b1   : > { %v17825_v47 = vld [vmem:[%s27770_s1 + $0x1144] sm:$0xf]  ;;  %v14124_v31 = vor.u32 %v17893_v52, %v14121_v51  ;;  %v13705_v51 = vld [vmem:[%s27770_s1 + $0x1030] sm:$0xf0] }
 0x2b2   : > { %5397 = vmatpush.bf16.msrb.mxu0 %v13772_v43  ;;  %5411 = vmatpush.bf16.msrb.mxu1 %v13900_v5  ;;  %v17829_v43 = vld [vmem:[%s27770_s1 + $0x1164] sm:$0xf]  ;;  %v13865_v5 = vld [vmem:[%s27770_s1 + $0x1170] sm:$0xf0]  ;;  %v13852_v37 = vor.u32 %v17825_v47, %v13849_v21  ;;  %v3334_v47 = vadd.f32 %v21915_v29, %v21913_v18  ;;  %v4320_v21 = vpop.f32.mrf.mxu0 }
 0x2b3   : > { %v13868_v41 = vor.u32 %v17829_v43, %v13865_v5  ;;  %v14105_v43 = vld [vmem:[%s27770_s1 + $0x1350] sm:$0xf0]  ;;  %v4347_v5 = vadd.f32 %v4346_v24, %v4333_v46  ;;  %v17789_v52 = vld [vmem:[%s27770_s1 + $0x1024] sm:$0xf] }
 0x2b4   : > { %5426 = vmatpush.bf16.msrb.mxu2 %v14012_v48  ;;  %5440 = vmatpush.bf16.msrb.mxu3 %v14140_v36  ;;  %v13977_v48 = vld [vmem:[%s27770_s1 + $0x1250] sm:$0xf0]  ;;  %v17889_v36 = vld [vmem:[%s27770_s1 + $0x1344] sm:$0xf] }
 0x2b5   : > { %v22654_v11 = vadd.f32 %v4360_v45, %v4347_v5  ;;  %v17853_v6 = vld [vmem:[%s27770_s1 + $0x1224] sm:$0xf]  ;;  %v14089_v24 = vld [vmem:[%s27770_s1 + $0x1330] sm:$0xf0]  ;;  %v3348_v45 = vadd.f32 %v21960_v25, %v3334_v47 }
 0x2b6   : > { %5398 = vmatpush.bf16.msrb.mxu0 %v13756_v2  ;;  %5412 = vmatpush.bf16.msrb.mxu1 %v13884_v40  ;;  %v17857_v2 = vld [vmem:[%s27770_s1 + $0x1244] sm:$0xf]  ;;  %v22634_v40 = vadd.s32 8, %v20891_v30  ;;  %v13689_v29 = vld [vmem:[%s27770_s1 + $0x1010] sm:$0xf0] }
 0x2b7   : > { %v13980_v46 = vor.u32 %v17857_v2, %v13977_v48  ;;  %v17885_v2 = vld [vmem:[%s27770_s1 + $0x1324] sm:$0xf]  ;;  %v13708_v48 = vor.u32 %v17789_v52, %v13705_v51  ;;  %v13817_v5 = vld [vmem:[%s27770_s1 + $0x1110] sm:$0xf0] }
 0x2b8   : > { %5427 = vmatpush.bf16.msrb.mxu2 %v13996_v16  ;;  %5441 = vmatpush.bf16.msrb.mxu3 %v14124_v31  ;;  %v4334_v16 = vpop.f32.mrf.mxu1  ;;  %v13961_v31 = vld [vmem:[%s27770_s1 + $0x1230] sm:$0xf0]  ;;  %v17785_v18 = vld [vmem:[%s27770_s1 + $0x1004] sm:$0xf] }
 0x2b9   : > { %v17849_v19 = vld [vmem:[%s27770_s1 + $0x1204] sm:$0xf]  ;;  %v4335_v62 = vadd.f32 %v4334_v16, %v4320_v21  ;;  %v13964_v25 = vor.u32 %v17853_v6, %v13961_v31  ;;  %v13945_v52 = vld [vmem:[%s27770_s1 + $0x1210] sm:$0xf0]  ;;  %v17816_v6 = vld [vmem:[%s27770_s1 + $0x10f4] sm:$0xf0] }
 0x2ba   : > { %5399 = vmatpush.bf16.msrb.mxu0 %v13740_v22  ;;  %5413 = vmatpush.bf16.msrb.mxu1 %v13868_v41  ;;  %v14108_v22 = vor.u32 %v17889_v36, %v14105_v43  ;;  %v13833_v41 = vld [vmem:[%s27770_s1 + $0x1130] sm:$0xf0]  ;;  %v17817_v43 = vld [vmem:[%s27770_s1 + $0x1104] sm:$0xf]  ;;  %v13935_v21 = vld [vmem:[%s27770_s1 + $0x11e8] sm:$0xf] }
 0x2bb   : > { %v13836_v36 = vor.u32 %v17821_v0, %v13833_v41  ;;  %v17881_v51 = vld [vmem:[%s27770_s1 + $0x1304] sm:$0xf]  ;;  %v4348_v41 = vpop.f32.mrf.mxu2  ;;  %v17848_v16 = vld [vmem:[%s27770_s1 + $0x11f4] sm:$0xf0]  ;;  %v14063_v31 = vld [vmem:[%s27770_s1 + $0x12e8] sm:$0xf]  ;;  %v13820_v56 = vor.u32 %v17817_v43, %v13817_v5 }
 0x2bc   : > { %5428 = vmatpush.bf16.msrb.mxu2 %v13980_v46  ;;  %5442 = vmatpush.bf16.msrb.mxu3 %v14108_v22  ;;  %v14073_v46 = vld [vmem:[%s27770_s1 + $0x1310] sm:$0xf0]  ;;  %v13807_v22 = vld [vmem:[%s27770_s1 + $0x10e8] sm:$0xf]  ;;  %v4349_v47 = vadd.f32 %v4348_v41, %v4335_v62  ;;  %v17880_v62 = vld [vmem:[%s27770_s1 + $0x12f4] sm:$0xf0] }
 0x2bd   : > { %v14191_v41 = vld [vmem:[%s27770_s1 + $0x13e8] sm:$0xf]  ;;  %v17812_v43 = vld [vmem:[%s27770_s1 + $0x10d4] sm:$0xf0] }
 0x2be   : > { %5400 = vmatpush.bf16.msrb.mxu0 %v13724_v27  ;;  %5414 = vmatpush.bf16.msrb.mxu1 %v13852_v37  ;;  %v14092_v27 = vor.u32 %v17885_v2, %v14089_v24  ;;  %v27895_v37 = vand.u32 15, %v22634_v40  ;;  %v3362_v2 = vadd.f32 %v21971_v13, %v3348_v45  ;;  %v4362_v24 = vpop.f32.mrf.mxu3  ;;  %v13948_v45 = vor.u32 %v17849_v19, %v13945_v52  ;;  %v13919_v5 = vld [vmem:[%s27770_s1 + $0x11c8] sm:$0xf]  ;;  %v17844_v52 = vld [vmem:[%s27770_s1 + $0x11d4] sm:$0xf0] }
 0x2bf   : > { %v4363_v13 = vadd.f32 %v4362_v24, %v4349_v47  ;;  %v14064_v47 = vor.u32 %v17880_v62, %v14063_v31  ;;  %v14192_v19 = vor.u32 %v17912_v50, %v14191_v41  ;;  %v17908_v50 = vld [vmem:[%s27770_s1 + $0x13d4] sm:$0xf0]  ;;  %v13920_v24 = vor.u32 %v17844_v52, %v13919_v5  ;;  %v13759_v5 = vld [vmem:[%s27770_s1 + $0x1088] sm:$0xf] }
 0x2c0   : > { %v22693_v0 = vadd.s32 1, %v27895_v37  ;;  %v13692_v37 = vor.u32 %v17785_v18, %v13689_v29  ;;  %5429 = vmatpush.bf16.msrb.mxu2 %v13964_v25  ;;  %5443 = vmatpush.bf16.msrb.mxu3 %v14092_v27  ;;  %v14076_v18 = vor.u32 %v17881_v51, %v14073_v46  ;;  %v13808_v29 = vor.u32 %v17816_v6, %v13807_v22  ;;  %v14047_v51 = vld [vmem:[%s27770_s1 + $0x12c8] sm:$0xf]  ;;  %v17876_v46 = vld [vmem:[%s27770_s1 + $0x12d4] sm:$0xf0] }
 0x2c1   : > { %v4533_v25 = vrot.slane %v22654_v11, 1  ;;  %v4537_v27 = vrot.slane %v4363_v13, 1  ;;  %v14175_v11 = vld [vmem:[%s27770_s1 + $0x13c8] sm:$0xf]  ;;  %v3536_v22 = vadd.f32 %v3362_v2, %v21064_v9  ;;  %v17808_v2 = vld [vmem:[%s27770_s1 + $0x10b4] sm:$0xf0]  ;;  %v14048_v62 = vor.u32 %v17876_v46, %v14047_v51 }
 0x2c2   : > { %5401 = vmatpush.bf16.msrb.mxu0 %v13708_v48  ;;  %5415 = vmatpush.bf16.msrb.mxu1 %v13836_v36  ;;  %vm465_vm5 = vcmp.lt.s32.totalorder %v22693_v0, 16  ;;  %v13936_v48 = vor.u32 %v17848_v16, %v13935_v21  ;;  %v13791_v36 = vld [vmem:[%s27770_s1 + $0x10c8] sm:$0xf]  ;;  %v14176_v41 = vor.u32 %v17908_v50, %v14175_v11  ;;  %v17840_v13 = vld [vmem:[%s27770_s1 + $0x11b4] sm:$0xf0] }
 0x2c3   : > { %v4542_v6 = vsel %vm4541_vm4, %v4533_v25, %v4537_v27  ;;  %v13792_v31 = vor.u32 %v17812_v43, %v13791_v36  ;;  %v13775_v9 = vld [vmem:[%s27770_s1 + $0x10a8] sm:$0xf]  ;;  %v17836_v52 = vld [vmem:[%s27770_s1 + $0x1194] sm:$0xf0]  ;;  %v27529_v0 = vld [vmem:[%s27773_s4] sm:$0xf] }
 0x2c4   : > { %5430 = vmatpush.bf16.msrb.mxu2 %v13948_v45  ;;  %5444 = vmatpush.bf16.msrb.mxu3 %v14076_v18  ;;  %v22763_v16 = vadd.f32 %v4542_v6, %v21839_v10  ;;  %v13903_v10 = vld [vmem:[%s27770_s1 + $0x11a8] sm:$0xf]  ;;  %v17872_v18 = vld [vmem:[%s27770_s1 + $0x12b4] sm:$0xf0]  ;;  %v13776_v36 = vor.u32 %v17808_v2, %v13775_v9 }
 0x2c5   : > { %v14031_v45 = vld [vmem:[%s27770_s1 + $0x12a8] sm:$0xf]  ;;  %v13904_v43 = vor.u32 %v17840_v13, %v13903_v10  ;;  %v17868_v46 = vld [vmem:[%s27770_s1 + $0x1294] sm:$0xf0] }
 0x2c6   : > { %5402 = vmatpush.bf16.msrb.mxu0 %v13692_v37  ;;  %5416 = vmatpush.bf16.msrb.mxu1 %v13820_v56  ;;  %v4546_v56 = vsel %vm4541_vm4, %v4537_v27, %v4533_v25  ;;  %v17804_v25 = vld [vmem:[%s27770_s1 + $0x1094] sm:$0xf0]  ;;  %v14032_v27 = vor.u32 %v17872_v18, %v14031_v45  ;;  %v14015_v51 = vld [vmem:[%s27770_s1 + $0x1288] sm:$0xf]  ;;  %v4388_v6 = vpop.f32.mrf.mxu1 }
 0x2c7   : > { %v4558_v21 = vsel %vm465_vm5, %v4546_v56, 0.0  ;;  %5431 = vmatmul.bf16.vlgmr.msrb.gmra.mxu2 %v19364_v33  ;;  %5445 = vmatmul.bf16.vlgmr.msrb.gmra.mxu3 %v19366_v54  ;;  %v14143_v11 = vld [vmem:[%s27770_s1 + $0x1388] sm:$0xf]  ;;  %v17900_v50 = vld [vmem:[%s27770_s1 + $0x1394] sm:$0xf0]  ;;  %v14016_v2 = vor.u32 %v17868_v46, %v14015_v51 }
 0x2c8   : > { %v22771_v37 = vadd.f32 %v4558_v21, %v3536_v22  ;;  %5479 = vmatpush.bf16.msra.mxu2 %v14064_v47  ;;  %5493 = vmatpush.bf16.msra.mxu3 %v14192_v19  ;;  %v13887_v19 = vld [vmem:[%s27770_s1 + $0x1188] sm:$0xf]  ;;  %v4374_v22 = vpop.f32.mrf.mxu0  ;;  %v13760_v21 = vor.u32 %v17804_v25, %v13759_v5  ;;  %v17800_v9 = vld [vmem:[%s27770_s1 + $0x1074] sm:$0xf0] }
 0x2c9   : > { %5403 = vmatmul.bf16.vlgmr.msrb.gmra.mxu0 %v19374_v28  ;;  %5417 = vmatmul.bf16.vlgmr.msrb.gmra.mxu1 %v19376_v58  ;;  %v4389_v56 = vadd.f32 %v4388_v6, %v4374_v22  ;;  %v17832_v10 = vld [vmem:[%s27770_s1 + $0x1174] sm:$0xf0]  ;;  %v13999_v13 = vld [vmem:[%s27770_s1 + $0x1268] sm:$0xf] }
 0x2ca   : > { %5451 = vmatpush.bf16.msra.mxu0 %v13808_v29  ;;  %5465 = vmatpush.bf16.msra.mxu1 %v13936_v48  ;;  %v14159_v29 = vld [vmem:[%s27770_s1 + $0x13a8] sm:$0xf]  ;;  %v17904_v48 = vld [vmem:[%s27770_s1 + $0x13b4] sm:$0xf0]  ;;  %v4402_v51 = vpop.f32.mrf.mxu2  ;;  %v4416_v46 = vpop.f32.mrf.mxu3 }
 0x2cb   : > { %v14160_v47 = vor.u32 %v17904_v48, %v14159_v29  ;;  %v17864_v45 = vld [vmem:[%s27770_s1 + $0x1274] sm:$0xf0]  ;;  %v14127_v18 = vld [vmem:[%s27770_s1 + $0x1368] sm:$0xf]  ;;  %v4403_v6 = vadd.f32 %v4402_v51, %v4389_v56 }
 0x2cc   : > { %5480 = vmatpush.bf16.msra.mxu2 %v14048_v62  ;;  %5494 = vmatpush.bf16.msra.mxu3 %v14176_v41  ;;  %v14144_v62 = vor.u32 %v17900_v50, %v14143_v11  ;;  %v13871_v41 = vld [vmem:[%s27770_s1 + $0x1168] sm:$0xf]  ;;  %v17896_v29 = vld [vmem:[%s27770_s1 + $0x1374] sm:$0xf0]  ;;  %v14000_v25 = vor.u32 %v17864_v45, %v13999_v13  ;;  %v3390_v45 = vadd.f32 %v22122_v7, %v22120_v61 }
 0x2cd   : > { %v17796_v5 = vld [vmem:[%s27770_s1 + $0x1054] sm:$0xf0]  ;;  %v14111_v50 = vld [vmem:[%s27770_s1 + $0x1348] sm:$0xf] }
 0x2ce   : > { %5452 = vmatpush.bf16.msra.mxu0 %v13792_v31  ;;  %5466 = vmatpush.bf16.msra.mxu1 %v13920_v24  ;;  %v13888_v31 = vor.u32 %v17836_v52, %v13887_v19  ;;  %v13743_v24 = vld [vmem:[%s27770_s1 + $0x1068] sm:$0xf]  ;;  %v17828_v19 = vld [vmem:[%s27770_s1 + $0x1154] sm:$0xf0]  ;;  %v3404_v61 = vadd.f32 %v22167_v59, %v3390_v45 }
 0x2cf   : > { %v13744_v48 = vor.u32 %v17800_v9, %v13743_v24  ;;  %v13983_v52 = vld [vmem:[%s27770_s1 + $0x1248] sm:$0xf]  ;;  %v17860_v11 = vld [vmem:[%s27770_s1 + $0x1254] sm:$0xf0] }
 0x2d0   : > { %5481 = vmatpush.bf16.msra.mxu2 %v14032_v27  ;;  %5495 = vmatpush.bf16.msra.mxu3 %v14160_v47  ;;  %v14128_v27 = vor.u32 %v17896_v29, %v14127_v18  ;;  %v13855_v47 = vld [vmem:[%s27770_s1 + $0x1148] sm:$0xf]  ;;  %v17892_v22 = vld [vmem:[%s27770_s1 + $0x1354] sm:$0xf0]  ;;  %v4376_v18 = vpop.f32.mrf.mxu0  ;;  %v4390_v29 = vpop.f32.mrf.mxu1 }
 0x2d1   : > { %v13711_v24 = vld [vmem:[%s27770_s1 + $0x1028] sm:$0xf]  ;;  %v17792_v9 = vld [vmem:[%s27770_s1 + $0x1034] sm:$0xf0] }
 0x2d2   : > { %5453 = vmatpush.bf16.msra.mxu0 %v13776_v36  ;;  %5467 = vmatpush.bf16.msra.mxu1 %v13904_v43  ;;  %v13872_v36 = vor.u32 %v17832_v10, %v13871_v41  ;;  %v13727_v43 = vld [vmem:[%s27770_s1 + $0x1048] sm:$0xf]  ;;  %v14112_v41 = vor.u32 %v17892_v22, %v14111_v50  ;;  %v17824_v10 = vld [vmem:[%s27770_s1 + $0x1134] sm:$0xf0]  ;;  %v13712_v7 = vor.u32 %v17792_v9, %v13711_v24  ;;  %v4404_v22 = vpop.f32.mrf.mxu2  ;;  %v17846_v9 = vld [vmem:[%s27770_s1 + $0x11ec] sm:$0xf] }
 0x2d3   : > { %v13839_v56 = vld [vmem:[%s27770_s1 + $0x1128] sm:$0xf] }
 0x2d4   : > { %5482 = vmatpush.bf16.msra.mxu2 %v14016_v2  ;;  %5496 = vmatpush.bf16.msra.mxu3 %v14144_v62  ;;  %v22873_v2 = vadd.f32 %v4416_v46, %v4403_v6  ;;  %v13984_v62 = vor.u32 %v17860_v11, %v13983_v52  ;;  %v13967_v13 = vld [vmem:[%s27770_s1 + $0x1228] sm:$0xf]  ;;  %v4391_v52 = vadd.f32 %v4390_v29, %v4376_v18  ;;  %v17852_v11 = vld [vmem:[%s27770_s1 + $0x1214] sm:$0xf0]  ;;  %v14065_v18 = vld [vmem:[%s27770_s1 + $0x12f8] sm:$0xf0] }
 0x2d5   : > { %v13951_v46 = vld [vmem:[%s27770_s1 + $0x1208] sm:$0xf]  ;;  %v17884_v6 = vld [vmem:[%s27770_s1 + $0x1314] sm:$0xf0]  ;;  %v17910_v29 = vld [vmem:[%s27770_s1 + $0x13ec] sm:$0xf] }
 0x2d6   : > { %5454 = vmatpush.bf16.msra.mxu0 %v13760_v21  ;;  %5468 = vmatpush.bf16.msra.mxu1 %v13888_v31  ;;  %v13728_v21 = vor.u32 %v17796_v5, %v13727_v43  ;;  %v13856_v31 = vor.u32 %v17828_v19, %v13855_v47  ;;  %v17888_v43 = vld [vmem:[%s27770_s1 + $0x1334] sm:$0xf0]  ;;  %v13695_v5 = vld [vmem:[%s27770_s1 + $0x1008] sm:$0xf]  ;;  %v4405_v24 = vadd.f32 %v4404_v22, %v4391_v52 }
 0x2d7   : > { %v13823_v47 = vld [vmem:[%s27770_s1 + $0x1108] sm:$0xf]  ;;  %v17820_v19 = vld [vmem:[%s27770_s1 + $0x1114] sm:$0xf0] }
 0x2d8   : > { %5483 = vmatpush.bf16.msra.mxu2 %v14000_v25  ;;  %5497 = vmatpush.bf16.msra.mxu3 %v14128_v27  ;;  %v13840_v25 = vor.u32 %v17824_v10, %v13839_v56  ;;  %v17788_v27 = vld [vmem:[%s27770_s1 + $0x1014] sm:$0xf0]  ;;  %v14079_v50 = vld [vmem:[%s27770_s1 + $0x1308] sm:$0xf]  ;;  %v3418_v56 = vadd.f32 %v22178_v4, %v3404_v61  ;;  %v4418_v10 = vpop.f32.mrf.mxu3  ;;  %v13824_v45 = vor.u32 %v17820_v19, %v13823_v47  ;;  %v4534_v47 = vrot.slane %v22873_v2, 1 }
 0x2d9   : > { %v4419_v4 = vadd.f32 %v4418_v10, %v4405_v24  ;;  %v17906_v2 = vld [vmem:[%s27770_s1 + $0x13cc] sm:$0xf] }
 0x2da   : > { %5455 = vmatpush.bf16.msra.mxu0 %v13744_v48  ;;  %5469 = vmatpush.bf16.msra.mxu1 %v13872_v36  ;;  %v17856_v48 = vld [vmem:[%s27770_s1 + $0x1234] sm:$0xf0]  ;;  %v14095_v36 = vld [vmem:[%s27770_s1 + $0x1328] sm:$0xf]  ;;  %v3537_v22 = vadd.f32 %v3418_v56, %v21284_v34  ;;  %v17806_v34 = vld [vmem:[%s27770_s1 + $0x10ac] sm:$0xf] }
 0x2db   : > { %v13968_v59 = vor.u32 %v17856_v48, %v13967_v13  ;;  %v14096_v51 = vor.u32 %v17888_v43, %v14095_v36  ;;  %v13696_v13 = vor.u32 %v17788_v27, %v13695_v5  ;;  %v14193_v48 = vld [vmem:[%s27770_s1 + $0x13f8] sm:$0xf0]  ;;  %v13952_v36 = vor.u32 %v17852_v11, %v13951_v46  ;;  %v17842_v27 = vld [vmem:[%s27770_s1 + $0x11cc] sm:$0xf] }
 0x2dc   : > { %5484 = vmatpush.bf16.msra.mxu2 %v13984_v62  ;;  %5498 = vmatpush.bf16.msra.mxu3 %v14112_v41  ;;  %v13937_v62 = vld [vmem:[%s27770_s1 + $0x11f8] sm:$0xf0]  ;;  %v17878_v41 = vld [vmem:[%s27770_s1 + $0x12ec] sm:$0xf]  ;;  %v14080_v43 = vor.u32 %v17884_v6, %v14079_v50  ;;  %v4538_v19 = vrot.slane %v4419_v4, 1 }
 0x2dd   : > { %v13940_v5 = vor.u32 %v17846_v9, %v13937_v62  ;;  %v14068_v52 = vor.u32 %v17878_v41, %v14065_v18  ;;  %v17874_v46 = vld [vmem:[%s27770_s1 + $0x12cc] sm:$0xf]  ;;  %v14049_v11 = vld [vmem:[%s27770_s1 + $0x12d8] sm:$0xf0] }
 0x2de   : > { %5456 = vmatpush.bf16.msra.mxu0 %v13728_v21  ;;  %5470 = vmatpush.bf16.msra.mxu1 %v13856_v31  ;;  %v17814_v21 = vld [vmem:[%s27770_s1 + $0x10ec] sm:$0xf]  ;;  %v13809_v31 = vld [vmem:[%s27770_s1 + $0x10f8] sm:$0xf0]  ;;  %v4543_v6 = vsel %vm4541_vm4, %v4534_v47, %v4538_v19  ;;  %v14052_v10 = vor.u32 %v17874_v46, %v14049_v11 }
 0x2df   : > { %v13812_v61 = vor.u32 %v17814_v21, %v13809_v31  ;;  %v14177_v50 = vld [vmem:[%s27770_s1 + $0x13d8] sm:$0xf0]  ;;  %v4547_v21 = vsel %vm4541_vm4, %v4538_v19, %v4534_v47  ;;  %v22978_v24 = vadd.f32 %v4543_v6, %v22046_v17  ;;  %v17838_v17 = vld [vmem:[%s27770_s1 + $0x11ac] sm:$0xf] }
 0x2e0   : > { %5485 = vmatpush.bf16.msra.mxu2 %v13968_v59  ;;  %5499 = vmatpush.bf16.msra.mxu3 %v14096_v51  ;;  %v14196_v59 = vor.u32 %v17910_v29, %v14193_v48  ;;  %v13921_v51 = vld [vmem:[%s27770_s1 + $0x11d8] sm:$0xf0]  ;;  %v4559_v31 = vsel %vm465_vm5, %v4547_v21, 0.0  ;;  %v17870_v18 = vld [vmem:[%s27770_s1 + $0x12ac] sm:$0xf] }
 0x2e1   : > { %v13924_v62 = vor.u32 %v17842_v27, %v13921_v51  ;;  %v13777_v41 = vld [vmem:[%s27770_s1 + $0x10b8] sm:$0xf0]  ;;  %v22986_v56 = vadd.f32 %v4559_v31, %v3537_v22  ;;  %v17902_v48 = vld [vmem:[%s27770_s1 + $0x13ac] sm:$0xf] }
 0x2e2   : > { %5457 = vmatpush.bf16.msra.mxu0 %v13712_v7  ;;  %5471 = vmatpush.bf16.msra.mxu1 %v13840_v25  ;;  %v17810_v7 = vld [vmem:[%s27770_s1 + $0x10cc] sm:$0xf]  ;;  %v13793_v25 = vld [vmem:[%s27770_s1 + $0x10d8] sm:$0xf0] }
 0x2e3   : > { %v13796_v9 = vor.u32 %v17810_v7, %v13793_v25  ;;  %v14033_v29 = vld [vmem:[%s27770_s1 + $0x12b8] sm:$0xf0]  ;;  %v17834_v27 = vld [vmem:[%s27770_s1 + $0x118c] sm:$0xf] }
 0x2e4   : > { %5486 = vmatpush.bf16.msra.mxu2 %v13952_v36  ;;  %5500 = vmatpush.bf16.msra.mxu3 %v14080_v43  ;;  %v14161_v4 = vld [vmem:[%s27770_s1 + $0x13b8] sm:$0xf0]  ;;  %v13780_v36 = vor.u32 %v17806_v34, %v13777_v41  ;;  %v14036_v7 = vor.u32 %v17870_v18, %v14033_v29  ;;  %v17866_v19 = vld [vmem:[%s27770_s1 + $0x128c] sm:$0xf] }
 0x2e5   : > { %v14164_v25 = vor.u32 %v17902_v48, %v14161_v4  ;;  %v13889_v47 = vld [vmem:[%s27770_s1 + $0x1198] sm:$0xf0]  ;;  %v17798_v6 = vld [vmem:[%s27770_s1 + $0x106c] sm:$0xf] }
 0x2e6   : > { %5458 = vmatpush.bf16.msra.mxu0 %v13696_v13  ;;  %5472 = vmatpush.bf16.msra.mxu1 %v13824_v45  ;;  %v14180_v13 = vor.u32 %v17906_v2, %v14177_v50  ;;  %v13905_v45 = vld [vmem:[%s27770_s1 + $0x11b8] sm:$0xf0]  ;;  %v4430_v46 = vpop.f32.mrf.mxu0  ;;  %v4444_v11 = vpop.f32.mrf.mxu1  ;;  %v13892_v22 = vor.u32 %v17834_v27, %v13889_v47  ;;  %v17862_v41 = vld [vmem:[%s27770_s1 + $0x126c] sm:$0xf] }
 0x2e7   : > { %5487 = vmatmul.bf16.vlgmr.msra.gmra.mxu2 %v19364_v33  ;;  %5501 = vmatmul.bf16.vlgmr.msra.gmra.mxu3 %v19366_v54  ;;  %v13908_v43 = vor.u32 %v17838_v17, %v13905_v45  ;;  %v14145_v51 = vld [vmem:[%s27770_s1 + $0x1398] sm:$0xf0]  ;;  %v4445_v2 = vadd.f32 %v4444_v11, %v4430_v46  ;;  %v17794_v29 = vld [vmem:[%s27770_s1 + $0x104c] sm:$0xf] }
 0x2e8   : > { %5535 = vmatpush.bf16.msrb.mxu2 %v14068_v52  ;;  %5549 = vmatpush.bf16.msrb.mxu3 %v14196_v59  ;;  %v14017_v52 = vld [vmem:[%s27770_s1 + $0x1298] sm:$0xf0]  ;;  %v17898_v59 = vld [vmem:[%s27770_s1 + $0x138c] sm:$0xf] }
 0x2e9   : > { %5459 = vmatmul.bf16.vlgmr.msra.gmra.mxu0 %v19374_v28  ;;  %5473 = vmatmul.bf16.vlgmr.msra.gmra.mxu1 %v19376_v58  ;;  %v13745_v21 = vld [vmem:[%s27770_s1 + $0x1078] sm:$0xf0]  ;;  %v14020_v31 = vor.u32 %v17866_v19, %v14017_v52  ;;  %v17890_v47 = vld [vmem:[%s27770_s1 + $0x134c] sm:$0xf] }
 0x2ea   : > { %5507 = vmatpush.bf16.msrb.mxu0 %v13812_v61  ;;  %5521 = vmatpush.bf16.msrb.mxu1 %v13940_v5  ;;  %v17802_v61 = vld [vmem:[%s27770_s1 + $0x108c] sm:$0xf]  ;;  %v13761_v5 = vld [vmem:[%s27770_s1 + $0x1098] sm:$0xf0]  ;;  %v13748_v45 = vor.u32 %v17798_v6, %v13745_v21 }
 0x2eb   : > { %v13764_v50 = vor.u32 %v17802_v61, %v13761_v5  ;;  %v13873_v34 = vld [vmem:[%s27770_s1 + $0x1178] sm:$0xf0]  ;;  %v17858_v5 = vld [vmem:[%s27770_s1 + $0x124c] sm:$0xf] }
 0x2ec   : > { %5536 = vmatpush.bf16.msrb.mxu2 %v14052_v10  ;;  %5550 = vmatpush.bf16.msrb.mxu3 %v14180_v13  ;;  %v14001_v10 = vld [vmem:[%s27770_s1 + $0x1278] sm:$0xf0]  ;;  %v17894_v13 = vld [vmem:[%s27770_s1 + $0x136c] sm:$0xf] }
 0x2ed   : > { %v14129_v17 = vld [vmem:[%s27770_s1 + $0x1378] sm:$0xf0]  ;;  %v14004_v4 = vor.u32 %v17862_v41, %v14001_v10  ;;  %v17790_v46 = vld [vmem:[%s27770_s1 + $0x102c] sm:$0xf] }
 0x2ee   : > { %5508 = vmatpush.bf16.msrb.mxu0 %v13796_v9  ;;  %5522 = vmatpush.bf16.msrb.mxu1 %v13924_v62  ;;  %v14148_v9 = vor.u32 %v17898_v59, %v14145_v51  ;;  %v17830_v62 = vld [vmem:[%s27770_s1 + $0x116c] sm:$0xf]  ;;  %v13729_v48 = vld [vmem:[%s27770_s1 + $0x1058] sm:$0xf0] }
 0x2ef   : > { %v13876_v18 = vor.u32 %v17830_v62, %v13873_v34  ;;  %v13857_v61 = vld [vmem:[%s27770_s1 + $0x1158] sm:$0xf0]  ;;  %v13732_v59 = vor.u32 %v17794_v29, %v13729_v48  ;;  %v4432_v62 = vpop.f32.mrf.mxu0  ;;  %v4446_v34 = vpop.f32.mrf.mxu1  ;;  %v17886_v10 = vld [vmem:[%s27770_s1 + $0x132c] sm:$0xf] }
 0x2f0   : > { %5537 = vmatpush.bf16.msrb.mxu2 %v14036_v7  ;;  %5551 = vmatpush.bf16.msrb.mxu3 %v14164_v25  ;;  %v4458_v7 = vpop.f32.mrf.mxu2  ;;  %v4472_v25 = vpop.f32.mrf.mxu3  ;;  %v13985_v27 = vld [vmem:[%s27770_s1 + $0x1258] sm:$0xf0]  ;;  %v4447_v29 = vadd.f32 %v4446_v34, %v4432_v62 }
 0x2f1   : > { %v14113_v19 = vld [vmem:[%s27770_s1 + $0x1358] sm:$0xf0]  ;;  %v4459_v52 = vadd.f32 %v4458_v7, %v4445_v2  ;;  %v17822_v2 = vld [vmem:[%s27770_s1 + $0x112c] sm:$0xf] }
 0x2f2   : > { %5509 = vmatpush.bf16.msrb.mxu0 %v13780_v36  ;;  %5523 = vmatpush.bf16.msrb.mxu1 %v13908_v43  ;;  %v14132_v36 = vor.u32 %v17894_v13, %v14129_v17  ;;  %v17826_v43 = vld [vmem:[%s27770_s1 + $0x114c] sm:$0xf]  ;;  %v13713_v11 = vld [vmem:[%s27770_s1 + $0x1038] sm:$0xf0]  ;;  %v14116_v6 = vor.u32 %v17890_v47, %v14113_v19  ;;  %v14311_v47 = vld [vmem:[%s27772_s3 + $0xe0] sm:$0xf] }
 0x2f3   : > { %v13860_v51 = vor.u32 %v17826_v43, %v13857_v61  ;;  %v13841_v21 = vld [vmem:[%s27770_s1 + $0x1138] sm:$0xf0]  ;;  %v17850_v43 = vld [vmem:[%s27770_s1 + $0x120c] sm:$0xf]  ;;  %v17943_v19 = vld [vmem:[%s27772_s3 + $0xec] sm:$0xf0] }
 0x2f4   : > { %5538 = vmatpush.bf16.msrb.mxu2 %v14020_v31  ;;  %5552 = vmatpush.bf16.msrb.mxu3 %v14148_v9  ;;  %v17854_v31 = vld [vmem:[%s27770_s1 + $0x122c] sm:$0xf]  ;;  %v3446_v9 = vadd.f32 %v22329_v49, %v22327_v1  ;;  %v13969_v41 = vld [vmem:[%s27770_s1 + $0x1238] sm:$0xf0]  ;;  %v13844_v1 = vor.u32 %v17822_v2, %v13841_v21  ;;  %v14312_v2 = vor.u32 %v17943_v19, %v14311_v47 }
 0x2f5   : > { %v14097_v13 = vld [vmem:[%s27770_s1 + $0x1338] sm:$0xf0]  ;;  %v17786_v49 = vld [vmem:[%s27770_s1 + $0x100c] sm:$0xf]  ;;  %v13972_v48 = vor.u32 %v17854_v31, %v13969_v41 }
 0x2f6   : > { %5510 = vmatpush.bf16.msrb.mxu0 %v13764_v50  ;;  %5524 = vmatpush.bf16.msrb.mxu1 %v13892_v22  ;;  %v4473_v50 = vadd.f32 %v4472_v25, %v4459_v52  ;;  %v13988_v22 = vor.u32 %v17858_v5, %v13985_v27  ;;  %v3460_v17 = vadd.f32 %v22374_v55, %v3446_v9  ;;  %v17818_v55 = vld [vmem:[%s27770_s1 + $0x110c] sm:$0xf]  ;;  %v13953_v5 = vld [vmem:[%s27770_s1 + $0x1218] sm:$0xf0]  ;;  %v14295_v9 = vld [vmem:[%s27772_s3 + $0xc0] sm:$0xf] }
 0x2f7   : > { %v17882_v7 = vld [vmem:[%s27770_s1 + $0x130c] sm:$0xf]  ;;  %v14081_v25 = vld [vmem:[%s27770_s1 + $0x1318] sm:$0xf0] }
 0x2f8   : > { %5539 = vmatpush.bf16.msrb.mxu2 %v14004_v4  ;;  %5553 = vmatpush.bf16.msrb.mxu3 %v14132_v36  ;;  %v14100_v4 = vor.u32 %v17886_v10, %v14097_v13  ;;  %v13825_v36 = vld [vmem:[%s27770_s1 + $0x1118] sm:$0xf0]  ;;  %v4460_v61 = vpop.f32.mrf.mxu2  ;;  %v3474_v52 = vadd.f32 %v22385_v60, %v3460_v17  ;;  %v4535_v21 = vrot.slane %v4473_v50, 1  ;;  %v17939_v60 = vld [vmem:[%s27772_s3 + $0xcc] sm:$0xf0] }
 0x2f9   : > { %v4461_v27 = vadd.f32 %v4460_v61, %v4447_v29  ;;  %v14296_v13 = vor.u32 %v17939_v60, %v14295_v9  ;;  %v14391_v9 = vld [vmem:[%s27772_s3 + $0x180] sm:$0xf]  ;;  %v17963_v60 = vld [vmem:[%s27772_s3 + $0x18c] sm:$0xf0] }
 0x2fa   : > { %5511 = vmatpush.bf16.msrb.mxu0 %v13748_v45  ;;  %5525 = vmatpush.bf16.msrb.mxu1 %v13876_v18  ;;  %v13716_v45 = vor.u32 %v17790_v46, %v13713_v11  ;;  %v13697_v18 = vld [vmem:[%s27770_s1 + $0x1018] sm:$0xf0]  ;;  %v13828_v46 = vor.u32 %v17818_v55, %v13825_v36  ;;  %v3538_v62 = vadd.f32 %v3474_v52, %v21504_v39  ;;  %v14279_v39 = vld [vmem:[%s27772_s3 + $0xa0] sm:$0xf]  ;;  %v17927_v55 = vld [vmem:[%s27772_s3 + $0x6c] sm:$0xf0] }
 0x2fb   : > { %v14423_v36 = vld [vmem:[%s27772_s3 + $0x1c0] sm:$0xf] }
 0x2fc   : > { %5540 = vmatpush.bf16.msrb.mxu2 %v13988_v22  ;;  %5554 = vmatpush.bf16.msrb.mxu3 %v14116_v6  ;;  %v13956_v22 = vor.u32 %v17850_v43, %v13953_v5  ;;  %v14084_v6 = vor.u32 %v17882_v7, %v14081_v25  ;;  %v17971_v43 = vld [vmem:[%s27772_s3 + $0x1cc] sm:$0xf0]  ;;  %v14231_v7 = vld [vmem:[%s27772_s3 + $0x40] sm:$0xf] }
 0x2fd   : > { %v14424_v5 = vor.u32 %v17971_v43, %v14423_v36  ;;  %v17923_v25 = vld [vmem:[%s27772_s3 + $0x4c] sm:$0xf0]  ;;  %v14407_v52 = vld [vmem:[%s27772_s3 + $0x1a0] sm:$0xf] }
 0x2fe   : > { %5512 = vmatpush.bf16.msrb.mxu0 %v13732_v59  ;;  %5526 = vmatpush.bf16.msrb.mxu1 %v13860_v51  ;;  %v4474_v59 = vpop.f32.mrf.mxu3  ;;  %v13700_v51 = vor.u32 %v17786_v49, %v13697_v18  ;;  %v14359_v36 = vld [vmem:[%s27772_s3 + $0x140] sm:$0xf] }
 0x2ff   : > { %v4475_v11 = vadd.f32 %v4474_v59, %v4461_v27  ;;  %v17967_v59 = vld [vmem:[%s27772_s3 + $0x1ac] sm:$0xf0] }
 0x300   : > { %5541 = vmatpush.bf16.msrb.mxu2 %v13972_v48  ;;  %5555 = vmatpush.bf16.msrb.mxu3 %v14100_v4  ;;  %v14247_v4 = vld [vmem:[%s27772_s3 + $0x60] sm:$0xf] }
 0x301   : > { %v4539_v31 = vrot.slane %v4475_v11, 1  ;;  %v14248_v61 = vor.u32 %v17927_v55, %v14247_v4 }
 0x302   : > { %5513 = vmatpush.bf16.msrb.mxu0 %v13716_v45  ;;  %5527 = vmatpush.bf16.msrb.mxu1 %v13844_v1  ;;  %v17935_v45 = vld [vmem:[%s27772_s3 + $0xac] sm:$0xf0]  ;;  %v14439_v1 = vld [vmem:[%s27772_s3 + $0x1e0] sm:$0xf] }
 0x303   : > { %v4544_v34 = vsel %vm4541_vm4, %v4535_v21, %v4539_v31  ;;  %v4548_v41 = vsel %vm4541_vm4, %v4539_v31, %v4535_v21  ;;  %v3502_v31 = vadd.f32 %v22536_v42, %v22534_v3  ;;  %v17915_v3 = vld [vmem:[%s27772_s3 + $0xc] sm:$0xf0] }
 0x304   : > { %5542 = vmatpush.bf16.msrb.mxu2 %v13956_v22  ;;  %5556 = vmatpush.bf16.msrb.mxu3 %v14084_v6  ;;  %v4560_v50 = vsel %vm465_vm5, %v4548_v41, 0.0  ;;  %v23154_v10 = vadd.f32 %v4544_v34, %v22253_v12  ;;  %v14280_v12 = vor.u32 %v17935_v45, %v14279_v39  ;;  %v14215_v22 = vld [vmem:[%s27772_s3 + $0x20] sm:$0xf]  ;;  %v17919_v6 = vld [vmem:[%s27772_s3 + $0x2c] sm:$0xf0]  ;;  %v14392_v34 = vor.u32 %v17963_v60, %v14391_v9 }
 0x305   : > { %v23156_v17 = vadd.f32 %v4560_v50, %v3538_v62  ;;  %v14216_v62 = vor.u32 %v17919_v6, %v14215_v22  ;;  %v3516_v41 = vadd.f32 %v22581_v23, %v3502_v31  ;;  %v17941_v39 = vld [vmem:[%s27772_s3 + $0xe4] sm:$0xf]  ;;  %v14313_v45 = vld [vmem:[%s27772_s3 + $0xf0] sm:$0xf0]  ;;  %v14327_v6 = vld [vmem:[%s27772_s3 + $0x100] sm:$0xf] }
 0x306   : > { %5514 = vmatpush.bf16.msrb.mxu0 %v13700_v51  ;;  %5528 = vmatpush.bf16.msrb.mxu1 %v13828_v46  ;;  %v4486_v49 = vpop.f32.mrf.mxu0  ;;  %v4500_v18 = vpop.f32.mrf.mxu1  ;;  %v14232_v51 = vor.u32 %v17923_v25, %v14231_v7  ;;  %v14408_v46 = vor.u32 %v17967_v59, %v14407_v52  ;;  %v14343_v59 = vld [vmem:[%s27772_s3 + $0x120] sm:$0xf]  ;;  %v14265_v22 = vld [vmem:[%s27772_s3 + $0x90] sm:$0xf0]  ;;  %v18007_v9 = vld [vmem:[%s27772_s3 + $0x2ec] sm:$0xf0] }
 0x307   : > { %5543 = vmatmul.bf16.vlgmr.msrb.gmra.mxu2 %v19364_v33  ;;  %5557 = vmatmul.bf16.vlgmr.msrb.gmra.mxu3 %v19366_v54  ;;  %v17975_v33 = vld [vmem:[%s27772_s3 + $0x1ec] sm:$0xf0]  ;;  %v4501_v54 = vadd.f32 %v4500_v18, %v4486_v49  ;;  %v3530_v18 = vadd.f32 %v22583_v53, %v3516_v41  ;;  %v14567_v31 = vld [vmem:[%s27772_s3 + $0x2e0] sm:$0xf]  ;;  %v14441_v41 = vld [vmem:[%s27772_s3 + $0x1f0] sm:$0xf0] }
 0x308   : > { %v14440_v48 = vor.u32 %v17975_v33, %v14439_v1  ;;  %v17955_v53 = vld [vmem:[%s27772_s3 + $0x14c] sm:$0xf0] }
 0x309   : > { %5515 = vmatmul.bf16.vlgmr.msrb.gmra.mxu0 %v19374_v28  ;;  %5529 = vmatmul.bf16.vlgmr.msrb.gmra.mxu1 %v19376_v58  ;;  %v14263_v28 = vld [vmem:[%s27772_s3 + $0x80] sm:$0xf]  ;;  %v17931_v58 = vld [vmem:[%s27772_s3 + $0x8c] sm:$0xf0]  ;;  %v14360_v43 = vor.u32 %v17955_v53, %v14359_v36 }
 0x30a   : > { %6398 = vmatpush.bf16.msra.mxu0 %v14312_v2  ;;  %v14264_v29 = vor.u32 %v17931_v58, %v14263_v28  ;;  %6412 = vmatpush.bf16.msra.mxu1 %v14440_v48  ;;  %v4514_v27 = vpop.f32.mrf.mxu2  ;;  %v4528_v47 = vpop.f32.mrf.mxu3  ;;  %v17959_v28 = vld [vmem:[%s27772_s3 + $0x16c] sm:$0xf0]  ;;  %v14297_v48 = vld [vmem:[%s27772_s3 + $0xd0] sm:$0xf0] }
 0x30b   : > { %v4515_v19 = vadd.f32 %v4514_v27, %v4501_v54  ;;  %v14316_v54 = vor.u32 %v17941_v39, %v14313_v45  ;;  %v14551_v45 = vld [vmem:[%s27772_s3 + $0x2c0] sm:$0xf] }
 0x30d   : > { %v4529_v11 = vadd.f32 %v4528_v47, %v4515_v19  ;;  %v17933_v19 = vld [vmem:[%s27772_s3 + $0xa4] sm:$0xf] }
 0x30e   : > { %6399 = vmatpush.bf16.msra.mxu0 %v14296_v13  ;;  %6413 = vmatpush.bf16.msra.mxu1 %v14424_v5  ;;  %v4488_v2 = vpop.f32.mrf.mxu0  ;;  %v4502_v21 = vpop.f32.mrf.mxu1  ;;  %v14199_v13 = vld [vmem:[%s27772_s3] sm:$0xf] }
 0x30f   : > { %v4503_v50 = vadd.f32 %v4502_v21, %v4488_v2  ;;  %v14200_v1 = vor.u32 %v17915_v3, %v14199_v13  ;;  %v4536_v4 = vrot.slane %v4529_v11, 1  ;;  %v17929_v11 = vld [vmem:[%s27772_s3 + $0x84] sm:$0xf]  ;;  %v17947_v2 = vld [vmem:[%s27772_s3 + $0x10c] sm:$0xf0] }
 0x310   : > { %v14328_v21 = vor.u32 %v17947_v2, %v14327_v6  ;;  %v14268_v60 = vor.u32 %v17929_v11, %v14265_v22  ;;  %v17925_v3 = vld [vmem:[%s27772_s3 + $0x64] sm:$0xf]  ;;  %v14393_v22 = vld [vmem:[%s27772_s3 + $0x190] sm:$0xf0] }
 0x311   : > { %v17913_v6 = vld [vmem:[%s27772_s3 + $0x4] sm:$0xf]  ;;  %v14201_v2 = vld [vmem:[%s27772_s3 + $0x10] sm:$0xf0] }
 0x312   : > { %6400 = vmatpush.bf16.msra.mxu0 %v14280_v12  ;;  %6414 = vmatpush.bf16.msra.mxu1 %v14408_v46  ;;  %v4516_v42 = vpop.f32.mrf.mxu2  ;;  %v14375_v12 = vld [vmem:[%s27772_s3 + $0x160] sm:$0xf]  ;;  %v4530_v58 = vpop.f32.mrf.mxu3 }
 0x313   : > { %v4517_v23 = vadd.f32 %v4516_v42, %v4503_v50  ;;  %v14376_v49 = vor.u32 %v17959_v28, %v14375_v12  ;;  %v14249_v42 = vld [vmem:[%s27772_s3 + $0x70] sm:$0xf0]  ;;  %v17969_v12 = vld [vmem:[%s27772_s3 + $0x1c4] sm:$0xf] }
 0x314   : > { %v14252_v28 = vor.u32 %v17925_v3, %v14249_v42 }
 0x315   : > { %v4531_v33 = vadd.f32 %v4530_v58, %v4517_v23  ;;  %v18003_v23 = vld [vmem:[%s27772_s3 + $0x2cc] sm:$0xf0] }
 0x316   : > { %6401 = vmatpush.bf16.msra.mxu0 %v14264_v29  ;;  %6415 = vmatpush.bf16.msra.mxu1 %v14392_v34  ;;  %v17937_v29 = vld [vmem:[%s27772_s3 + $0xc4] sm:$0xf]  ;;  %v14552_v58 = vor.u32 %v18003_v23, %v14551_v45 }
 0x317   : > { %v4540_v55 = vrot.slane %v4531_v33, 1  ;;  %v14300_v25 = vor.u32 %v17937_v29, %v14297_v48  ;;  %v17973_v34 = vld [vmem:[%s27772_s3 + $0x1e4] sm:$0xf]  ;;  %v14535_v48 = vld [vmem:[%s27772_s3 + $0x2a0] sm:$0xf] }
 0x318   : > { %v14444_v39 = vor.u32 %v17973_v34, %v14441_v41  ;;  %v14503_v34 = vld [vmem:[%s27772_s3 + $0x260] sm:$0xf]  ;;  %v17991_v41 = vld [vmem:[%s27772_s3 + $0x26c] sm:$0xf0] }
 0x319   : > { %v4545_v5 = vsel %vm4541_vm4, %v4536_v4, %v4540_v55  ;;  %v4549_v7 = vsel %vm4541_vm4, %v4540_v55, %v4536_v4  ;;  %v17999_v4 = vld [vmem:[%s27772_s3 + $0x2ac] sm:$0xf0]  ;;  %v17965_v55 = vld [vmem:[%s27772_s3 + $0x1a4] sm:$0xf]  ;;  %v14504_v42 = vor.u32 %v17991_v41, %v14503_v34  ;;  %v14695_v41 = vld [vmem:[%s27772_s3 + $0x3e0] sm:$0xf] }
 0x31a   : > { %6402 = vmatpush.bf16.msra.mxu0 %v14248_v61  ;;  %6416 = vmatpush.bf16.msra.mxu1 %v14376_v49  ;;  %v3539_v61 = vadd.f32 %v3530_v18, %v21724_v57  ;;  %v4561_v27 = vsel %vm465_vm5, %v4549_v7, 0.0  ;;  %v23258_v47 = vadd.f32 %v4545_v5, %v22460_v63  ;;  %v14281_v57 = vld [vmem:[%s27772_s3 + $0xb0] sm:$0xf0]  ;;  %v17951_v63 = vld [vmem:[%s27772_s3 + $0x12c] sm:$0xf0]  ;;  %v14536_v53 = vor.u32 %v17999_v4, %v14535_v48 }
 0x31b   : > { %v14284_v46 = vor.u32 %v17933_v19, %v14281_v57  ;;  %v17921_v49 = vld [vmem:[%s27772_s3 + $0x44] sm:$0xf]  ;;  %v14233_v18 = vld [vmem:[%s27772_s3 + $0x50] sm:$0xf0]  ;;  %v14519_v57 = vld [vmem:[%s27772_s3 + $0x280] sm:$0xf] }
 0x31c   : > { %v23266_v52 = vadd.f32 %v4561_v27, %v3539_v61  ;;  %v14236_v36 = vor.u32 %v17921_v49, %v14233_v18  ;;  %v17917_v61 = vld [vmem:[%s27772_s3 + $0x24] sm:$0xf]  ;;  %v14217_v5 = vld [vmem:[%s27772_s3 + $0x30] sm:$0xf0] }
 0x31d   : > { %v17953_v49 = vld [vmem:[%s27772_s3 + $0x144] sm:$0xf] }
 0x31e   : > { %6403 = vmatpush.bf16.msra.mxu0 %v14232_v51  ;;  %6417 = vmatpush.bf16.msra.mxu1 %v14360_v43  ;;  %v14344_v51 = vor.u32 %v17951_v63, %v14343_v59  ;;  %v14409_v43 = vld [vmem:[%s27772_s3 + $0x1b0] sm:$0xf0]  ;;  %v17995_v59 = vld [vmem:[%s27772_s3 + $0x28c] sm:$0xf0]  ;;  %v17961_v63 = vld [vmem:[%s27772_s3 + $0x184] sm:$0xf] }
 0x31f   : > { %v14412_v7 = vor.u32 %v17965_v55, %v14409_v43  ;;  %v14520_v11 = vor.u32 %v17995_v59, %v14519_v57 }
 0x322   : > { %6404 = vmatpush.bf16.msra.mxu0 %v14216_v62  ;;  %6418 = vmatpush.bf16.msra.mxu1 %v14344_v51  ;;  %v14568_v62 = vor.u32 %v18007_v9, %v14567_v31  ;;  %v27896_v9 = vand.u32 15, %v22634_v40  ;;  %v14204_v40 = vor.u32 %v17913_v6, %v14201_v2  ;;  %v17945_v2 = vld [vmem:[%s27772_s3 + $0x104] sm:$0xf] }
 0x324   : > { %6426 = vmatpush.bf16.msra.mxu2 %v14568_v62 }
 0x326   : > { %6405 = vmatpush.bf16.msra.mxu0 %v14200_v1  ;;  %v5348_v50 = vpop.f32.mrf.mxu0  ;;  %v5362_v13 = vpop.f32.mrf.mxu1  ;;  %6419 = vmatpush.bf16.msra.mxu1 %v14328_v21  ;;  %v14425_v1 = vld [vmem:[%s27772_s3 + $0x1d0] sm:$0xf0]  ;;  %v14396_v21 = vor.u32 %v17961_v63, %v14393_v22  ;;  %v14319_v63 = vld [vmem:[%s27772_s3 + $0xe8] sm:$0xf] }
 0x327   : > { %v14428_v33 = vor.u32 %v17969_v12, %v14425_v1  ;;  %v17987_v1 = vld [vmem:[%s27772_s3 + $0x24c] sm:$0xf0] }
 0x328   : > { %6427 = vmatpush.bf16.msra.mxu2 %v14552_v58  ;;  %v14487_v58 = vld [vmem:[%s27772_s3 + $0x240] sm:$0xf] }
 0x32a   : > { %6454 = vmatpush.bf16.msrb.mxu0 %v14316_v54  ;;  %6468 = vmatpush.bf16.msrb.mxu1 %v14444_v39  ;;  %v5376_v54 = vpop.f32.mrf.mxu2  ;;  %v5390_v29 = vpop.f32.mrf.mxu3  ;;  %v14377_v39 = vld [vmem:[%s27772_s3 + $0x170] sm:$0xf0] }
 0x32c   : > { %6428 = vmatpush.bf16.msra.mxu2 %v14536_v53 }
 0x32e   : > { %6455 = vmatpush.bf16.msrb.mxu0 %v14300_v25  ;;  %6469 = vmatpush.bf16.msrb.mxu1 %v14428_v33  ;;  %v5363_v25 = vadd.f32 %v5362_v13, %v5348_v50  ;;  %v5350_v27 = vpop.f32.mrf.mxu0  ;;  %v5364_v19 = vpop.f32.mrf.mxu1  ;;  %v17957_v50 = vld [vmem:[%s27772_s3 + $0x164] sm:$0xf] }
 0x32f   : > { %v5365_v31 = vadd.f32 %v5364_v19, %v5350_v27  ;;  %v14380_v23 = vor.u32 %v17957_v50, %v14377_v39  ;;  %v17949_v27 = vld [vmem:[%s27772_s3 + $0x124] sm:$0xf] }
 0x330   : > { %v5377_v51 = vadd.f32 %v5376_v54, %v5363_v25  ;;  %6429 = vmatpush.bf16.msra.mxu2 %v14520_v11  ;;  %v14488_v54 = vor.u32 %v17987_v1, %v14487_v58  ;;  %v17979_v11 = vld [vmem:[%s27772_s3 + $0x20c] sm:$0xf0] }
 0x331   : > { %v18035_v58 = vld [vmem:[%s27772_s3 + $0x3cc] sm:$0xf0] }
 0x332   : > { %6456 = vmatpush.bf16.msrb.mxu0 %v14284_v46  ;;  %6470 = vmatpush.bf16.msrb.mxu1 %v14412_v7  ;;  %v14220_v46 = vor.u32 %v17917_v61, %v14217_v5  ;;  %v5378_v62 = vpop.f32.mrf.mxu2  ;;  %v5391_v13 = vadd.f32 %v5390_v29, %v5377_v51  ;;  %v5392_v45 = vpop.f32.mrf.mxu3  ;;  %v14361_v29 = vld [vmem:[%s27772_s3 + $0x150] sm:$0xf0]  ;;  %v14471_v61 = vld [vmem:[%s27772_s3 + $0x220] sm:$0xf]  ;;  %v17983_v5 = vld [vmem:[%s27772_s3 + $0x22c] sm:$0xf0] }
 0x333   : > { %v5379_v3 = vadd.f32 %v5378_v62, %v5365_v31  ;;  %v14364_v4 = vor.u32 %v17953_v49, %v14361_v29  ;;  %v14472_v25 = vor.u32 %v17983_v5, %v14471_v61  ;;  %v17940_v62 = vld [vmem:[%s27772_s3 + $0xd4] sm:$0xf0] }
 0x334   : > { %6430 = vmatpush.bf16.msra.mxu2 %v14504_v42  ;;  %v5563_v18 = vrot.slane %v5391_v13, 2  ;;  %v18039_v13 = vld [vmem:[%s27772_s3 + $0x3ec] sm:$0xf0]  ;;  %v17936_v29 = vld [vmem:[%s27772_s3 + $0xb4] sm:$0xf0] }
 0x335   : > { %v5393_v12 = vadd.f32 %v5392_v45, %v5379_v3  ;;  %v18005_v3 = vld [vmem:[%s27772_s3 + $0x2e4] sm:$0xf]  ;;  %v14696_v45 = vor.u32 %v18039_v13, %v14695_v41 }
 0x336   : > { %6457 = vmatpush.bf16.msrb.mxu0 %v14268_v60  ;;  %v23360_v60 = vadd.s32 2, %v27896_v9  ;;  %6471 = vmatpush.bf16.msrb.mxu1 %v14396_v21  ;;  %v14329_v21 = vld [vmem:[%s27772_s3 + $0x110] sm:$0xf0]  ;;  %v14303_v9 = vld [vmem:[%s27772_s3 + $0xc8] sm:$0xf] }
 0x337   : > { %v5567_v33 = vrot.slane %v5393_v12, 2  ;;  %v14332_v34 = vor.u32 %v17945_v2, %v14329_v21  ;;  %v14679_v12 = vld [vmem:[%s27772_s3 + $0x3c0] sm:$0xf]  ;;  %v14304_v1 = vor.u32 %v17940_v62, %v14303_v9  ;;  %6440 = vmatpush.bf16.msra.mxu3 %v14696_v45  ;;  %v14255_v2 = vld [vmem:[%s27772_s3 + $0x68] sm:$0xf] }
 0x338   : > { %vm473_vm7 = vcmp.lt.s32.totalorder %v23360_v60, 16  ;;  %6431 = vmatpush.bf16.msra.mxu2 %v14488_v54  ;;  %v14680_v49 = vor.u32 %v18035_v58, %v14679_v12  ;;  %v14287_v54 = vld [vmem:[%s27772_s3 + $0xa8] sm:$0xf]  ;;  %v17928_v21 = vld [vmem:[%s27772_s3 + $0x74] sm:$0xf0]  ;;  %v18646_v60 = vld [vmem:[%s18701_s23] sm:$0xff] }
 0x339   : > { %v5572_v55 = vsel %vm5571_vm6, %v5563_v18, %v5567_v33  ;;  %v14288_v61 = vor.u32 %v17936_v29, %v14287_v54  ;;  %v14631_v62 = vld [vmem:[%s27772_s3 + $0x360] sm:$0xf]  ;;  %v17989_v41 = vld [vmem:[%s27772_s3 + $0x264] sm:$0xf]  ;;  %v17924_v12 = vld [vmem:[%s27772_s3 + $0x54] sm:$0xf0] }
 0x33a   : > { %6458 = vmatpush.bf16.msrb.mxu0 %v14252_v28  ;;  %v23378_v28 = vld [vmem:[%s27771_s2] sm:$0xf]  ;;  %6472 = vmatpush.bf16.msrb.mxu1 %v14380_v23  ;;  %v5592_v43 = vadd.f32 %v5572_v55, %v22763_v16  ;;  %v14345_v16 = vld [vmem:[%s27772_s3 + $0x130] sm:$0xf0]  ;;  %v18031_v55 = vld [vmem:[%s27772_s3 + $0x3ac] sm:$0xf0] }
 0x33b   : > { %v5602_v48 = vperm.slane %v23378_v28, 0  ;;  %v14348_v57 = vor.u32 %v17949_v27, %v14345_v16  ;;  %6441 = vmatpush.bf16.msra.mxu3 %v14680_v49  ;;  %v17932_v27 = vld [vmem:[%s27772_s3 + $0x94] sm:$0xf0]  ;;  %v17985_v54 = vld [vmem:[%s27772_s3 + $0x244] sm:$0xf] }
 0x33c   : > { %6432 = vmatpush.bf16.msra.mxu2 %v14472_v25  ;;  %v14271_v25 = vld [vmem:[%s27772_s3 + $0x88] sm:$0xf] }
 0x33d   : > { %v5610_v19 = vadd.f32 %v5602_v48, %v5592_v43 }
 0x33e   : > { %6459 = vmatpush.bf16.msrb.mxu0 %v14236_v36  ;;  %v5576_v36 = vsel %vm5571_vm6, %v5567_v33, %v5563_v18  ;;  %6473 = vmatpush.bf16.msrb.mxu1 %v14364_v4  ;;  %v18001_v18 = vld [vmem:[%s27772_s3 + $0x2c4] sm:$0xf]  ;;  %v14553_v33 = vld [vmem:[%s27772_s3 + $0x2d0] sm:$0xf0]  ;;  %v14663_v4 = vld [vmem:[%s27772_s3 + $0x3a0] sm:$0xf] }
 0x33f   : > { %v5588_v53 = vsel %vm473_vm7, %v5576_v36, 0.0  ;;  %v5618_v51 = vmax.f32 %v5610_v19, 0.0  ;;  %v17997_v36 = vld [vmem:[%s27772_s3 + $0x2a4] sm:$0xf]  ;;  %v14664_v5 = vor.u32 %v18031_v55, %v14663_v4  ;;  %v14489_v4 = vld [vmem:[%s27772_s3 + $0x250] sm:$0xf0] }
 0x340   : > { %v5596_v7 = vadd.f32 %v5588_v53, %v22771_v37  ;;  %v17944_v37 = vld [vmem:[%s27772_s3 + $0xf4] sm:$0xf0] }
 0x341   : > { %v14320_v31 = vor.u32 %v17944_v37, %v14319_v63  ;;  %v17993_v63 = vld [vmem:[%s27772_s3 + $0x284] sm:$0xf]  ;;  %6442 = vmatpush.bf16.msra.mxu3 %v14664_v5  ;;  %v5603_v5 = vperm.slane %v23378_v28, 1 }
 0x342   : > { %6460 = vmatpush.bf16.msrb.mxu0 %v14220_v46  ;;  %v5614_v59 = vadd.f32 %v5602_v48, %v5596_v7  ;;  %6474 = vmatpush.bf16.msrb.mxu1 %v14348_v57  ;;  %v14455_v46 = vld [vmem:[%s27772_s3 + $0x200] sm:$0xf]  ;;  %v14556_v48 = vor.u32 %v18001_v18, %v14553_v33  ;;  %v14537_v7 = vld [vmem:[%s27772_s3 + $0x2b0] sm:$0xf0]  ;;  %v18019_v33 = vld [vmem:[%s27772_s3 + $0x34c] sm:$0xf0] }
 0x343   : > { %v14456_v6 = vor.u32 %v17979_v11, %v14455_v46  ;;  %v14540_v16 = vor.u32 %v17997_v36, %v14537_v7  ;;  %v14647_v57 = vld [vmem:[%s27772_s3 + $0x380] sm:$0xf]  ;;  %v14272_v46 = vor.u32 %v17932_v27, %v14271_v25 }
 0x344   : > { %v5622_v22 = vmax.f32 %v5614_v59, 0.0  ;;  %v18027_v59 = vld [vmem:[%s27772_s3 + $0x38c] sm:$0xf0]  ;;  %v14615_v18 = vld [vmem:[%s27772_s3 + $0x340] sm:$0xf] }
 0x345   : > { %6433 = vmatpush.bf16.msra.mxu2 %v14456_v6  ;;  %v14648_v11 = vor.u32 %v18027_v59, %v14647_v57  ;;  %v14599_v27 = vld [vmem:[%s27772_s3 + $0x320] sm:$0xf] }
 0x346   : > { %6461 = vmatpush.bf16.msrb.mxu0 %v14204_v40  ;;  %v23441_v50 = vpack.c.bf16 %v5622_v22, %v5618_v51  ;;  %v14569_v40 = vld [vmem:[%s27772_s3 + $0x2f0] sm:$0xf0]  ;;  %v5404_v42 = vpop.f32.mrf.mxu0  ;;  %v5418_v39 = vpop.f32.mrf.mxu1  ;;  %6475 = vmatpush.bf16.msrb.mxu1 %v14332_v34  ;;  %v18023_v34 = vld [vmem:[%s27772_s3 + $0x36c] sm:$0xf0] }
 0x347   : > { %v14572_v23 = vor.u32 %v18005_v3, %v14569_v40  ;;  %v5419_v19 = vadd.f32 %v5418_v39, %v5404_v42  ;;  %v14521_v22 = vld [vmem:[%s27772_s3 + $0x290] sm:$0xf0]  ;;  %v14256_v3 = vor.u32 %v17928_v21, %v14255_v2  ;;  %6443 = vmatpush.bf16.msra.mxu3 %v14648_v11  ;;  %v14632_v40 = vor.u32 %v18023_v34, %v14631_v62  ;;  %v14207_v11 = vld [vmem:[%s27772_s3 + $0x8] sm:$0xf]  ;;  %v17976_v21 = vld [vmem:[%s27772_s3 + $0x1f4] sm:$0xf0] }
 0x348   : > { %6406 = vmatmul.bf16.vlgmr.msra.gmra.mxu0 %v23441_v50  ;;  %v14505_v42 = vld [vmem:[%s27772_s3 + $0x270] sm:$0xf0]  ;;  %v14583_v62 = vld [vmem:[%s27772_s3 + $0x300] sm:$0xf]  ;;  %v18011_v34 = vld [vmem:[%s27772_s3 + $0x30c] sm:$0xf0] }
 0x349   : > { %6482 = vmatpush.bf16.msrb.mxu2 %v14572_v23  ;;  %v14239_v23 = vld [vmem:[%s27772_s3 + $0x48] sm:$0xf]  ;;  %v14508_v58 = vor.u32 %v17989_v41, %v14505_v42  ;;  %v17977_v41 = vld [vmem:[%s27772_s3 + $0x204] sm:$0xf]  ;;  %v14457_v42 = vld [vmem:[%s27772_s3 + $0x210] sm:$0xf0] }
 0x34a   : > { %6510 = vmatpush.bf16.msra.mxu0 %v14320_v31  ;;  %v5432_v53 = vpop.f32.mrf.mxu2  ;;  %v5446_v43 = vpop.f32.mrf.mxu3  ;;  %v14524_v31 = vor.u32 %v17993_v63, %v14521_v22  ;;  %v14240_v29 = vor.u32 %v17924_v12, %v14239_v23  ;;  %v17916_v22 = vld [vmem:[%s27772_s3 + $0x14] sm:$0xf0]  ;;  %v17938_v23 = vld [vmem:[%s27772_s3 + $0xcc] sm:$0xf] }
 0x34b   : > { %v5433_v6 = vadd.f32 %v5432_v53, %v5419_v19  ;;  %6444 = vmatpush.bf16.msra.mxu3 %v14632_v40  ;;  %v14223_v53 = vld [vmem:[%s27772_s3 + $0x28] sm:$0xf]  ;;  %v17981_v19 = vld [vmem:[%s27772_s3 + $0x224] sm:$0xf]  ;;  %v14584_v40 = vor.u32 %v18011_v34, %v14583_v62 }
 0x34d   : > { %6483 = vmatpush.bf16.msrb.mxu2 %v14556_v48  ;;  %v5447_v39 = vadd.f32 %v5446_v43, %v5433_v6  ;;  %v14616_v48 = vor.u32 %v18019_v33, %v14615_v18  ;;  %v17920_v43 = vld [vmem:[%s27772_s3 + $0x34] sm:$0xf0]  ;;  %v14697_v18 = vld [vmem:[%s27772_s3 + $0x3f0] sm:$0xf0] }
 0x34e   : > { %6511 = vmatpush.bf16.msra.mxu0 %v14304_v1  ;;  %v5406_v37 = vpop.f32.mrf.mxu0  ;;  %v5420_v51 = vpop.f32.mrf.mxu1  ;;  %v14224_v63 = vor.u32 %v17920_v43, %v14223_v53  ;;  %v18033_v53 = vld [vmem:[%s27772_s3 + $0x3c4] sm:$0xf]  ;;  %v14681_v43 = vld [vmem:[%s27772_s3 + $0x3d0] sm:$0xf0] }
 0x34f   : > { %v5421_v9 = vadd.f32 %v5420_v51, %v5406_v37  ;;  %v5564_v55 = vrot.slane %v5447_v39, 2  ;;  %6445 = vmatpush.bf16.msra.mxu3 %v14616_v48  ;;  %v14473_v51 = vld [vmem:[%s27772_s3 + $0x230] sm:$0xf0] }
 0x350   : > { %v14476_v6 = vor.u32 %v17981_v19, %v14473_v51 }
 0x351   : > { %6484 = vmatpush.bf16.msrb.mxu2 %v14540_v16  ;;  %v18015_v16 = vld [vmem:[%s27772_s3 + $0x32c] sm:$0xf0] }
 0x352   : > { %6512 = vmatpush.bf16.msra.mxu0 %v14288_v61  ;;  %v5434_v13 = vpop.f32.mrf.mxu2  ;;  %v5448_v1 = vpop.f32.mrf.mxu3  ;;  %v14492_v61 = vor.u32 %v17985_v54, %v14489_v4  ;;  %v14600_v37 = vor.u32 %v18015_v16, %v14599_v27  ;;  %v14431_v54 = vld [vmem:[%s27772_s3 + $0x1c8] sm:$0xf]  ;;  %v17968_v27 = vld [vmem:[%s27772_s3 + $0x1b4] sm:$0xf0]  ;;  %v14684_v16 = vor.u32 %v18033_v53, %v14681_v43 }
 0x353   : > { %v5435_v45 = vadd.f32 %v5434_v13, %v5421_v9 }
 0x354   : > { %6446 = vmatpush.bf16.msra.mxu3 %v14600_v37 }
 0x355   : > { %6485 = vmatpush.bf16.msrb.mxu2 %v14524_v31  ;;  %v5449_v49 = vadd.f32 %v5448_v1, %v5435_v45  ;;  %v14321_v31 = vld [vmem:[%s27772_s3 + $0xf8] sm:$0xf0]  ;;  %v14460_v1 = vor.u32 %v17977_v41, %v14457_v42  ;;  %v17926_v41 = vld [vmem:[%s27772_s3 + $0x6c] sm:$0xf]  ;;  %v17960_v42 = vld [vmem:[%s27772_s3 + $0x174] sm:$0xf0] }
 0x356   : > { %6513 = vmatpush.bf16.msra.mxu0 %v14272_v46 }
 0x357   : > { %v5568_v36 = vrot.slane %v5449_v49, 2  ;;  %v18037_v49 = vld [vmem:[%s27772_s3 + $0x3e4] sm:$0xf] }
 0x358   : > { %6462 = vmatmul.bf16.vlgmr.msrb.gmra.mxu0 %v23441_v50  ;;  %v14700_v48 = vor.u32 %v18037_v49, %v14697_v18  ;;  %6447 = vmatpush.bf16.msra.mxu3 %v14584_v40  ;;  %v14383_v40 = vld [vmem:[%s27772_s3 + $0x168] sm:$0xf]  ;;  %v17922_v18 = vld [vmem:[%s27772_s3 + $0x4c] sm:$0xf] }
 0x359   : > { %6486 = vmatpush.bf16.msrb.mxu2 %v14508_v58  ;;  %v5573_v7 = vsel %vm5571_vm6, %v5564_v55, %v5568_v36  ;;  %v5577_v25 = vsel %vm5571_vm6, %v5568_v36, %v5564_v55  ;;  %v14305_v58 = vld [vmem:[%s27772_s3 + $0xd8] sm:$0xf0]  ;;  %v14384_v49 = vor.u32 %v17960_v42, %v14383_v40  ;;  %v17974_v42 = vld [vmem:[%s27772_s3 + $0x1ec] sm:$0xf] }
 0x35a   : > { %6514 = vmatpush.bf16.msra.mxu0 %v14256_v3  ;;  %v5589_v57 = vsel %vm473_vm7, %v5577_v25, 0.0  ;;  %v5593_v59 = vadd.f32 %v5573_v7, %v22978_v24  ;;  %v14447_v24 = vld [vmem:[%s27772_s3 + $0x1e8] sm:$0xf]  ;;  %v14208_v3 = vor.u32 %v17916_v22, %v14207_v11  ;;  %v14308_v36 = vor.u32 %v17938_v23, %v14305_v58  ;;  %v14289_v7 = vld [vmem:[%s27772_s3 + $0xb8] sm:$0xf0] }
 0x35b   : > { %v5597_v46 = vadd.f32 %v5589_v57, %v22986_v56  ;;  %v17942_v56 = vld [vmem:[%s27772_s3 + $0xec] sm:$0xf]  ;;  %v14448_v12 = vor.u32 %v17976_v21, %v14447_v24  ;;  %v14415_v25 = vld [vmem:[%s27772_s3 + $0x1a8] sm:$0xf]  ;;  %v18029_v57 = vld [vmem:[%s27772_s3 + $0x3a4] sm:$0xf] }
 0x35c   : > { %v5611_v2 = vadd.f32 %v5603_v5, %v5593_v59  ;;  %v14324_v45 = vor.u32 %v17942_v56, %v14321_v31  ;;  %6496 = vmatpush.bf16.msrb.mxu3 %v14700_v48  ;;  %v14665_v59 = vld [vmem:[%s27772_s3 + $0x3b0] sm:$0xf0]  ;;  %v14416_v51 = vor.u32 %v17968_v27, %v14415_v25  ;;  %v14273_v11 = vld [vmem:[%s27772_s3 + $0x98] sm:$0xf0]  ;;  %v14399_v22 = vld [vmem:[%s27772_s3 + $0x188] sm:$0xf] }
 0x35d   : > { %6487 = vmatpush.bf16.msrb.mxu2 %v14492_v61  ;;  %v5615_v9 = vadd.f32 %v5603_v5, %v5597_v46  ;;  %v17934_v5 = vld [vmem:[%s27772_s3 + $0xac] sm:$0xf]  ;;  %v17964_v24 = vld [vmem:[%s27772_s3 + $0x194] sm:$0xf0]  ;;  %v18025_v56 = vld [vmem:[%s27772_s3 + $0x384] sm:$0xf] }
 0x35e   : > { %6515 = vmatpush.bf16.msra.mxu0 %v14240_v29  ;;  %v5619_v13 = vmax.f32 %v5611_v2, 0.0  ;;  %v17972_v29 = vld [vmem:[%s27772_s3 + $0x1d4] sm:$0xf0]  ;;  %v14292_v19 = vor.u32 %v17934_v5, %v14289_v7  ;;  %v17930_v46 = vld [vmem:[%s27772_s3 + $0x8c] sm:$0xf]  ;;  %v14400_v34 = vor.u32 %v17964_v24, %v14399_v22 }
 0x35f   : > { %v5623_v39 = vmax.f32 %v5615_v9, 0.0  ;;  %v14432_v61 = vor.u32 %v17972_v29, %v14431_v54  ;;  %v14276_v21 = vor.u32 %v17930_v46, %v14273_v11  ;;  %v14649_v31 = vld [vmem:[%s27772_s3 + $0x390] sm:$0xf0]  ;;  %v14241_v54 = vld [vmem:[%s27772_s3 + $0x58] sm:$0xf0] }
 0x360   : > { %6497 = vmatpush.bf16.msrb.mxu3 %v14684_v16  ;;  %v14633_v58 = vld [vmem:[%s27772_s3 + $0x370] sm:$0xf0]  ;;  %v18017_v5 = vld [vmem:[%s27772_s3 + $0x344] sm:$0xf]  ;;  %v17918_v27 = vld [vmem:[%s27772_s3 + $0x2c] sm:$0xf] }
 0x361   : > { %6488 = vmatpush.bf16.msrb.mxu2 %v14476_v6  ;;  %v23607_v33 = vpack.c.bf16 %v5623_v39, %v5619_v13  ;;  %v14668_v6 = vor.u32 %v18029_v57, %v14665_v59  ;;  %v14257_v13 = vld [vmem:[%s27772_s3 + $0x78] sm:$0xf0]  ;;  %v14652_v39 = vor.u32 %v18025_v56, %v14649_v31  ;;  %v14617_v7 = vld [vmem:[%s27772_s3 + $0x350] sm:$0xf0]  ;;  %v14351_v59 = vld [vmem:[%s27772_s3 + $0x128] sm:$0xf] }
 0x362   : > { %6516 = vmatpush.bf16.msra.mxu0 %v14224_v63  ;;  %v14260_v23 = vor.u32 %v17926_v41, %v14257_v13  ;;  %v14225_v16 = vld [vmem:[%s27772_s3 + $0x38] sm:$0xf0]  ;;  %v14335_v24 = vld [vmem:[%s27772_s3 + $0x108] sm:$0xf]  ;;  %v17948_v41 = vld [vmem:[%s27772_s3 + $0x114] sm:$0xf0] }
 0x363   : > { %6420 = vmatmul.bf16.vlgmr.msra.gmra.mxu1 %v23607_v33  ;;  %v14228_v22 = vor.u32 %v17918_v27, %v14225_v16  ;;  %v18071_v13 = vld [vmem:[%s27772_s3 + $0x4ec] sm:$0xf0]  ;;  %v18004_v27 = vld [vmem:[%s27772_s3 + $0x2d4] sm:$0xf0] }
 0x364   : > { %6524 = vmatpush.bf16.msra.mxu1 %v14448_v12  ;;  %6498 = vmatpush.bf16.msrb.mxu3 %v14668_v6  ;;  %v18021_v12 = vld [vmem:[%s27772_s3 + $0x364] sm:$0xf] }
 0x365   : > { %6489 = vmatpush.bf16.msrb.mxu2 %v14460_v1  ;;  %v18013_v6 = vld [vmem:[%s27772_s3 + $0x324] sm:$0xf] }
 0x366   : > { %v5460_v4 = vpop.f32.mrf.mxu0  ;;  %v5474_v55 = vpop.f32.mrf.mxu1  ;;  %6517 = vmatpush.bf16.msra.mxu0 %v14208_v3 }
 0x367   : > { %v5475_v2 = vadd.f32 %v5474_v55, %v5460_v4  ;;  %v14367_v4 = vld [vmem:[%s27772_s3 + $0x148] sm:$0xf]  ;;  %v17956_v55 = vld [vmem:[%s27772_s3 + $0x154] sm:$0xf0] }
 0x368   : > { %6525 = vmatpush.bf16.msra.mxu1 %v14432_v61  ;;  %6499 = vmatpush.bf16.msrb.mxu3 %v14652_v39  ;;  %v14244_v61 = vor.u32 %v17922_v18, %v14241_v54  ;;  %v14368_v25 = vor.u32 %v17956_v55, %v14367_v4  ;;  %v18009_v18 = vld [vmem:[%s27772_s3 + $0x304] sm:$0xf]  ;;  %v14585_v54 = vld [vmem:[%s27772_s3 + $0x310] sm:$0xf0]  ;;  %v14935_v4 = vld [vmem:[%s27772_s3 + $0x4c0] sm:$0xf] }
 0x369   : > { %6518 = vmatmul.bf16.vlgmr.msra.gmra.mxu0 %v23441_v50  ;;  %v18067_v55 = vld [vmem:[%s27772_s3 + $0x4cc] sm:$0xf0]  ;;  %v14588_v16 = vor.u32 %v18009_v18, %v14585_v54  ;;  %v17992_v18 = vld [vmem:[%s27772_s3 + $0x274] sm:$0xf0] }
 0x36a   : > { %6566 = vmatpush.bf16.msrb.mxu0 %v14324_v45  ;;  %v5488_v63 = vpop.f32.mrf.mxu2  ;;  %v5502_v37 = vpop.f32.mrf.mxu3 }
 0x36b   : > { %v5489_v3 = vadd.f32 %v5488_v63, %v5475_v2  ;;  %v17952_v63 = vld [vmem:[%s27772_s3 + $0x134] sm:$0xf0]  ;;  %v14601_v2 = vld [vmem:[%s27772_s3 + $0x330] sm:$0xf0] }
 0x36c   : > { %6526 = vmatpush.bf16.msra.mxu1 %v14416_v51  ;;  %v5604_v51 = vperm.slane %v23378_v28, 2  ;;  %v14352_v31 = vor.u32 %v17952_v63, %v14351_v59  ;;  %v14919_v59 = vld [vmem:[%s27772_s3 + $0x4a0] sm:$0xf]  ;;  %v18063_v63 = vld [vmem:[%s27772_s3 + $0x4ac] sm:$0xf0] }
 0x36d   : > { %v5503_v29 = vadd.f32 %v5502_v37, %v5489_v3  ;;  %v14620_v37 = vor.u32 %v18017_v5, %v14617_v7  ;;  %v14604_v3 = vor.u32 %v18013_v6, %v14601_v2 }
 0x36e   : > { %6567 = vmatpush.bf16.msrb.mxu0 %v14308_v36  ;;  %v5462_v9 = vpop.f32.mrf.mxu0  ;;  %v5476_v62 = vpop.f32.mrf.mxu1  ;;  %v14636_v36 = vor.u32 %v18021_v12, %v14633_v58  ;;  %v18008_v12 = vld [vmem:[%s27772_s3 + $0x2f4] sm:$0xf0] }
 0x36f   : > { %v5477_v45 = vadd.f32 %v5476_v62, %v5462_v9  ;;  %v17914_v9 = vld [vmem:[%s27772_s3 + $0xc] sm:$0xf]  ;;  %v14209_v62 = vld [vmem:[%s27772_s3 + $0x18] sm:$0xf0] }
 0x370   : > { %6527 = vmatpush.bf16.msra.mxu1 %v14400_v34  ;;  %6500 = vmatpush.bf16.msrb.mxu3 %v14636_v36 }
 0x372   : > { %6568 = vmatpush.bf16.msrb.mxu0 %v14292_v19  ;;  %v5490_v1 = vpop.f32.mrf.mxu2  ;;  %v5504_v53 = vpop.f32.mrf.mxu3  ;;  %v5565_v19 = vrot.slane %v5503_v29, 2 }
 0x373   : > { %v5491_v48 = vadd.f32 %v5490_v1, %v5477_v45  ;;  %6476 = vmatmul.bf16.vlgmr.msrb.gmra.mxu1 %v23607_v33  ;;  %v14212_v45 = vor.u32 %v17914_v9, %v14209_v62  ;;  %v14336_v1 = vor.u32 %v17948_v41, %v14335_v24  ;;  %v14920_v24 = vor.u32 %v18063_v63, %v14919_v59  ;;  %v17962_v62 = vld [vmem:[%s27772_s3 + $0x18c] sm:$0xf]  ;;  %v14527_v41 = vld [vmem:[%s27772_s3 + $0x288] sm:$0xf] }
 0x374   : > { %6528 = vmatpush.bf16.msra.mxu1 %v14384_v49  ;;  %6501 = vmatpush.bf16.msrb.mxu3 %v14620_v37 }
 0x375   : > { %v5505_v43 = vadd.f32 %v5504_v53, %v5491_v48  ;;  %v17970_v53 = vld [vmem:[%s27772_s3 + $0x1cc] sm:$0xf] }
 0x376   : > { %6569 = vmatpush.bf16.msrb.mxu0 %v14276_v21 }
 0x377   : > { %v5569_v57 = vrot.slane %v5505_v43, 2  ;;  %v14433_v43 = vld [vmem:[%s27772_s3 + $0x1d8] sm:$0xf0] }
 0x378   : > { %6529 = vmatpush.bf16.msra.mxu1 %v14368_v25  ;;  %6502 = vmatpush.bf16.msrb.mxu3 %v14604_v3  ;;  %v14559_v25 = vld [vmem:[%s27772_s3 + $0x2c8] sm:$0xf] }
 0x379   : > { %v5574_v46 = vsel %vm5571_vm6, %v5565_v19, %v5569_v57  ;;  %v5578_v11 = vsel %vm5571_vm6, %v5569_v57, %v5565_v19  ;;  %v14936_v19 = vor.u32 %v18067_v55, %v14935_v4  ;;  %v14436_v57 = vor.u32 %v17970_v53, %v14433_v43  ;;  %v14871_v55 = vld [vmem:[%s27772_s3 + $0x440] sm:$0xf] }
 0x37a   : > { %6570 = vmatpush.bf16.msrb.mxu0 %v14260_v23  ;;  %v5590_v21 = vsel %vm473_vm7, %v5578_v11, 0.0  ;;  %v5594_v56 = vadd.f32 %v5574_v46, %v23154_v10  ;;  %v14951_v10 = vld [vmem:[%s27772_s3 + $0x4e0] sm:$0xf]  ;;  %v14575_v23 = vld [vmem:[%s27772_s3 + $0x2e8] sm:$0xf]  ;;  %v14560_v37 = vor.u32 %v18004_v27, %v14559_v25 }
 0x37b   : > { %v5598_v34 = vadd.f32 %v5590_v21, %v23156_v17  ;;  %v14449_v17 = vld [vmem:[%s27772_s3 + $0x1f8] sm:$0xf0]  ;;  %v14952_v49 = vor.u32 %v18071_v13, %v14951_v10  ;;  %v14576_v36 = vor.u32 %v18008_v12, %v14575_v23  ;;  %v14543_v11 = vld [vmem:[%s27772_s3 + $0x2a8] sm:$0xf]  ;;  %v17996_v10 = vld [vmem:[%s27772_s3 + $0x294] sm:$0xf0] }
 0x37c   : > { %v5612_v40 = vadd.f32 %v5604_v51, %v5594_v56  ;;  %6530 = vmatpush.bf16.msra.mxu1 %v14352_v31  ;;  %v14452_v48 = vor.u32 %v17974_v42, %v14449_v17  ;;  %v14417_v46 = vld [vmem:[%s27772_s3 + $0x1b8] sm:$0xf0]  ;;  %6503 = vmatpush.bf16.msrb.mxu3 %v14588_v16  ;;  %v14903_v56 = vld [vmem:[%s27772_s3 + $0x480] sm:$0xf]  ;;  %v18059_v31 = vld [vmem:[%s27772_s3 + $0x48c] sm:$0xf0]  ;;  %v14528_v12 = vor.u32 %v17996_v10, %v14527_v41 }
 0x37d   : > { %v5616_v39 = vadd.f32 %v5604_v51, %v5598_v34  ;;  %v17966_v51 = vld [vmem:[%s27772_s3 + $0x1ac] sm:$0xf]  ;;  %v14401_v34 = vld [vmem:[%s27772_s3 + $0x198] sm:$0xf0]  ;;  %v14904_v3 = vor.u32 %v18059_v31, %v14903_v56  ;;  %v14495_v16 = vld [vmem:[%s27772_s3 + $0x248] sm:$0xf] }
 0x37e   : > { %6571 = vmatpush.bf16.msrb.mxu0 %v14244_v61  ;;  %v5620_v58 = vmax.f32 %v5612_v40, 0.0  ;;  %v14420_v21 = vor.u32 %v17966_v51, %v14417_v46  ;;  %v14404_v17 = vor.u32 %v17962_v62, %v14401_v34  ;;  %v14369_v25 = vld [vmem:[%s27772_s3 + $0x158] sm:$0xf0]  ;;  %v18047_v51 = vld [vmem:[%s27772_s3 + $0x42c] sm:$0xf0] }
 0x37f   : > { %v5624_v29 = vmax.f32 %v5616_v39, 0.0  ;;  %v14887_v39 = vld [vmem:[%s27772_s3 + $0x460] sm:$0xf]  ;;  %v17984_v56 = vld [vmem:[%s27772_s3 + $0x234] sm:$0xf0] }
 0x380   : > { %6531 = vmatpush.bf16.msra.mxu1 %v14336_v1  ;;  %v14385_v1 = vld [vmem:[%s27772_s3 + $0x178] sm:$0xf0] }
 0x381   : > { %v23771_v61 = vpack.c.bf16 %v5624_v29, %v5620_v58  ;;  %v17958_v58 = vld [vmem:[%s27772_s3 + $0x16c] sm:$0xf] }
 0x382   : > { %6572 = vmatpush.bf16.msrb.mxu0 %v14228_v22  ;;  %v18000_v22 = vld [vmem:[%s27772_s3 + $0x2b4] sm:$0xf0]  ;;  %v14388_v4 = vor.u32 %v17958_v58, %v14385_v1 }
 0x383   : > { %6434 = vmatmul.bf16.vlgmr.msra.gmra.mxu2 %v23771_v61  ;;  %6532 = vmatmul.bf16.vlgmr.msra.gmra.mxu1 %v23607_v33  ;;  %v14544_v9 = vor.u32 %v18000_v22, %v14543_v11 }
 0x384   : > { %6580 = vmatpush.bf16.msrb.mxu1 %v14452_v48  ;;  %6538 = vmatpush.bf16.msra.mxu2 %v14576_v36  ;;  %v18051_v36 = vld [vmem:[%s27772_s3 + $0x44c] sm:$0xf0] }
 0x385   : > { %v14872_v59 = vor.u32 %v18051_v36, %v14871_v55  ;;  %v18103_v55 = vld [vmem:[%s27772_s3 + $0x5ec] sm:$0xf0] }
 0x386   : > { %v5516_v5 = vpop.f32.mrf.mxu0  ;;  %v5530_v7 = vpop.f32.mrf.mxu1  ;;  %6573 = vmatpush.bf16.msrb.mxu0 %v14212_v45  ;;  %v18055_v45 = vld [vmem:[%s27772_s3 + $0x46c] sm:$0xf0] }
 0x387   : > { %v5531_v13 = vadd.f32 %v5530_v7, %v5516_v5  ;;  %v14888_v29 = vor.u32 %v18055_v45, %v14887_v39  ;;  %v17954_v7 = vld [vmem:[%s27772_s3 + $0x14c] sm:$0xf]  ;;  %v14953_v39 = vld [vmem:[%s27772_s3 + $0x4f0] sm:$0xf0] }
 0x388   : > { %6581 = vmatpush.bf16.msrb.mxu1 %v14436_v57  ;;  %6539 = vmatpush.bf16.msra.mxu2 %v14560_v37  ;;  %v14372_v63 = vor.u32 %v17954_v7, %v14369_v25  ;;  %v14855_v37 = vld [vmem:[%s27772_s3 + $0x420] sm:$0xf]  ;;  %v14687_v25 = vld [vmem:[%s27772_s3 + $0x3c8] sm:$0xf] }
 0x389   : > { %6574 = vmatmul.bf16.vlgmr.msrb.gmra.mxu0 %v23441_v50  ;;  %v14856_v62 = vor.u32 %v18047_v51, %v14855_v37  ;;  %v14561_v37 = vld [vmem:[%s27772_s3 + $0x2d8] sm:$0xf0]  ;;  %v15063_v51 = vld [vmem:[%s27772_s3 + $0x5c0] sm:$0xf] }
 0x38a   : > { %7415 = vmatpush.bf16.msra.mxu0 %v14952_v49  ;;  %v5544_v6 = vpop.f32.mrf.mxu2  ;;  %v5558_v2 = vpop.f32.mrf.mxu3  ;;  %v14511_v49 = vld [vmem:[%s27772_s3 + $0x268] sm:$0xf] }
 0x38b   : > { %v5545_v23 = vadd.f32 %v5544_v6, %v5531_v13  ;;  %v14512_v5 = vor.u32 %v17992_v18, %v14511_v49  ;;  %v14353_v6 = vld [vmem:[%s27772_s3 + $0x138] sm:$0xf0]  ;;  %v14839_v13 = vld [vmem:[%s27772_s3 + $0x400] sm:$0xf]  ;;  %v18040_v49 = vld [vmem:[%s27772_s3 + $0x3f4] sm:$0xf0] }
 0x38c   : > { %6582 = vmatpush.bf16.msrb.mxu1 %v14420_v21  ;;  %6540 = vmatpush.bf16.msra.mxu2 %v14544_v9  ;;  %v14479_v21 = vld [vmem:[%s27772_s3 + $0x228] sm:$0xf]  ;;  %v18006_v18 = vld [vmem:[%s27772_s3 + $0x2ec] sm:$0xf] }
 0x38d   : > { %v5559_v53 = vadd.f32 %v5558_v2, %v5545_v23  ;;  %v5605_v2 = vperm.slane %v23378_v28, 3  ;;  %v17946_v28 = vld [vmem:[%s27772_s3 + $0x10c] sm:$0xf]  ;;  %v14463_v23 = vld [vmem:[%s27772_s3 + $0x208] sm:$0xf] }
 0x38e   : > { %7416 = vmatpush.bf16.msra.mxu0 %v14936_v19  ;;  %v5518_v40 = vpop.f32.mrf.mxu0  ;;  %v5532_v42 = vpop.f32.mrf.mxu1  ;;  %v17988_v19 = vld [vmem:[%s27772_s3 + $0x254] sm:$0xf0] }
 0x38f   : > { %v5533_v54 = vadd.f32 %v5532_v42, %v5518_v40  ;;  %v5566_v46 = vrot.slane %v5559_v53, 2  ;;  %v14496_v22 = vor.u32 %v17988_v19, %v14495_v16  ;;  %v14480_v42 = vor.u32 %v17984_v56, %v14479_v21  ;;  %v14937_v16 = vld [vmem:[%s27772_s3 + $0x4d0] sm:$0xf0] }
 0x390   : > { %6583 = vmatpush.bf16.msrb.mxu1 %v14404_v17  ;;  %6541 = vmatpush.bf16.msra.mxu2 %v14528_v12  ;;  %v14337_v17 = vld [vmem:[%s27772_s3 + $0x118] sm:$0xf0]  ;;  %v14703_v12 = vld [vmem:[%s27772_s3 + $0x3e8] sm:$0xf]  ;;  %v14921_v21 = vld [vmem:[%s27772_s3 + $0x4b0] sm:$0xf0] }
 0x392   : > { %7417 = vmatpush.bf16.msra.mxu0 %v14920_v24  ;;  %v5546_v48 = vpop.f32.mrf.mxu2  ;;  %v5560_v27 = vpop.f32.mrf.mxu3  ;;  %v17950_v24 = vld [vmem:[%s27772_s3 + $0x12c] sm:$0xf] }
 0x393   : > { %v5547_v43 = vadd.f32 %v5546_v48, %v5533_v54  ;;  %6490 = vmatmul.bf16.vlgmr.msrb.gmra.mxu2 %v23771_v61  ;;  %v14356_v10 = vor.u32 %v17950_v24, %v14353_v6  ;;  %v14577_v54 = vld [vmem:[%s27772_s3 + $0x2f8] sm:$0xf0]  ;;  %v14340_v48 = vor.u32 %v17946_v28, %v14337_v17  ;;  %v14671_v6 = vld [vmem:[%s27772_s3 + $0x3a8] sm:$0xf]  ;;  %v15047_v28 = vld [vmem:[%s27772_s3 + $0x5a0] sm:$0xf] }
 0x394   : > { %6584 = vmatpush.bf16.msrb.mxu1 %v14388_v4  ;;  %6542 = vmatpush.bf16.msra.mxu2 %v14512_v5  ;;  %v15079_v4 = vld [vmem:[%s27772_s3 + $0x5e0] sm:$0xf]  ;;  %v14704_v5 = vor.u32 %v18040_v49, %v14703_v12  ;;  %v14580_v7 = vor.u32 %v18006_v18, %v14577_v54  ;;  %v14639_v49 = vld [vmem:[%s27772_s3 + $0x368] sm:$0xf]  ;;  %v18053_v18 = vld [vmem:[%s27772_s3 + $0x464] sm:$0xf] }
 0x395   : > { %v5561_v57 = vadd.f32 %v5560_v27, %v5547_v43  ;;  %v18065_v27 = vld [vmem:[%s27772_s3 + $0x4c4] sm:$0xf]  ;;  %v14889_v54 = vld [vmem:[%s27772_s3 + $0x470] sm:$0xf0] }
 0x396   : > { %7418 = vmatpush.bf16.msra.mxu0 %v14904_v3  ;;  %v18043_v3 = vld [vmem:[%s27772_s3 + $0x40c] sm:$0xf0] }
 0x397   : > { %v5570_v11 = vrot.slane %v5561_v57, 2  ;;  %v14840_v1 = vor.u32 %v18043_v3, %v14839_v13  ;;  %v15080_v57 = vor.u32 %v18103_v55, %v15079_v4  ;;  %v14655_v3 = vld [vmem:[%s27772_s3 + $0x388] sm:$0xf]  ;;  %v17990_v4 = vld [vmem:[%s27772_s3 + $0x26c] sm:$0xf] }
 0x398   : > { %6585 = vmatpush.bf16.msrb.mxu1 %v14372_v63  ;;  %6543 = vmatpush.bf16.msra.mxu2 %v14496_v22  ;;  %v18002_v63 = vld [vmem:[%s27772_s3 + $0x2cc] sm:$0xf]  ;;  %v14513_v55 = vld [vmem:[%s27772_s3 + $0x278] sm:$0xf0] }
 0x399   : > { %v5575_v31 = vsel %vm5571_vm6, %v5566_v46, %v5570_v11  ;;  %v5579_v9 = vsel %vm5571_vm6, %v5570_v11, %v5566_v46  ;;  %v18099_v46 = vld [vmem:[%s27772_s3 + $0x5cc] sm:$0xf0]  ;;  %v14940_v11 = vor.u32 %v18065_v27, %v14937_v16  ;;  %v14564_v24 = vor.u32 %v18002_v63, %v14561_v37  ;;  %v18049_v27 = vld [vmem:[%s27772_s3 + $0x444] sm:$0xf]  ;;  %v14873_v16 = vld [vmem:[%s27772_s3 + $0x450] sm:$0xf0] }
 0x39a   : > { %7419 = vmatpush.bf16.msra.mxu0 %v14888_v29  ;;  %v5591_v34 = vsel %vm473_vm7, %v5579_v9, 0.0  ;;  %v5595_v41 = vadd.f32 %v5575_v31, %v23258_v47  ;;  %v18069_v47 = vld [vmem:[%s27772_s3 + $0x4e4] sm:$0xf]  ;;  %v15064_v56 = vor.u32 %v18099_v46, %v15063_v51  ;;  %v18032_v31 = vld [vmem:[%s27772_s3 + $0x3b4] sm:$0xf0] }
 0x39b   : > { %v5599_v40 = vadd.f32 %v5591_v34, %v23266_v52  ;;  %v17980_v52 = vld [vmem:[%s27772_s3 + $0x214] sm:$0xf0]  ;;  %v14956_v36 = vor.u32 %v18069_v47, %v14953_v39  ;;  %v17998_v9 = vld [vmem:[%s27772_s3 + $0x2ac] sm:$0xf]  ;;  %v18095_v34 = vld [vmem:[%s27772_s3 + $0x5ac] sm:$0xf0] }
 0x39c   : > { %v5613_v45 = vadd.f32 %v5605_v2, %v5595_v41  ;;  %6586 = vmatpush.bf16.msrb.mxu1 %v14356_v10  ;;  %6544 = vmatpush.bf16.msra.mxu2 %v14480_v42  ;;  %v14464_v43 = vor.u32 %v17980_v52, %v14463_v23  ;;  %v14672_v10 = vor.u32 %v18032_v31, %v14671_v6  ;;  %v14905_v42 = vld [vmem:[%s27772_s3 + $0x490] sm:$0xf0]  ;;  %v18028_v47 = vld [vmem:[%s27772_s3 + $0x394] sm:$0xf0]  ;;  %v17994_v39 = vld [vmem:[%s27772_s3 + $0x28c] sm:$0xf] }
 0x39d   : > { %v5617_v58 = vadd.f32 %v5605_v2, %v5599_v40  ;;  %v18061_v2 = vld [vmem:[%s27772_s3 + $0x4a4] sm:$0xf]  ;;  %v15048_v17 = vor.u32 %v18095_v34, %v15047_v28  ;;  %v15031_v23 = vld [vmem:[%s27772_s3 + $0x580] sm:$0xf]  ;;  %v18091_v52 = vld [vmem:[%s27772_s3 + $0x58c] sm:$0xf0] }
 0x39e   : > { %7420 = vmatpush.bf16.msra.mxu0 %v14872_v59  ;;  %v5621_v29 = vmax.f32 %v5613_v45, 0.0  ;;  %v18036_v59 = vld [vmem:[%s27772_s3 + $0x3d4] sm:$0xf0]  ;;  %v14924_v41 = vor.u32 %v18061_v2, %v14921_v21  ;;  %v18057_v40 = vld [vmem:[%s27772_s3 + $0x484] sm:$0xf] }
 0x39f   : > { %v5625_v53 = vmax.f32 %v5617_v58, 0.0  ;;  %v14688_v22 = vor.u32 %v18036_v59, %v14687_v25  ;;  %v14529_v45 = vld [vmem:[%s27772_s3 + $0x298] sm:$0xf0]  ;;  %v14908_v12 = vor.u32 %v18057_v40, %v14905_v42  ;;  %v14656_v58 = vor.u32 %v18028_v47, %v14655_v3  ;;  %v14623_v25 = vld [vmem:[%s27772_s3 + $0x348] sm:$0xf] }
 0x3a0   : > { %6587 = vmatpush.bf16.msrb.mxu1 %v14340_v48  ;;  %6545 = vmatpush.bf16.msra.mxu2 %v14464_v43  ;;  %v18024_v48 = vld [vmem:[%s27772_s3 + $0x374] sm:$0xf0]  ;;  %v14892_v43 = vor.u32 %v18053_v18, %v14889_v54  ;;  %v17986_v63 = vld [vmem:[%s27772_s3 + $0x24c] sm:$0xf]  ;;  %v14497_v37 = vld [vmem:[%s27772_s3 + $0x258] sm:$0xf0] }
 0x3a1   : > { %v23933_v19 = vpack.c.bf16 %v5625_v53, %v5621_v29  ;;  %v15032_v29 = vor.u32 %v18091_v52, %v15031_v23  ;;  %v18087_v53 = vld [vmem:[%s27772_s3 + $0x56c] sm:$0xf0]  ;;  %v18020_v59 = vld [vmem:[%s27772_s3 + $0x354] sm:$0xf0]  ;;  %v14999_v51 = vld [vmem:[%s27772_s3 + $0x540] sm:$0xf] }
 0x3a2   : > { %7421 = vmatpush.bf16.msra.mxu0 %v14856_v62  ;;  %v14545_v62 = vld [vmem:[%s27772_s3 + $0x2b8] sm:$0xf0]  ;;  %v18083_v46 = vld [vmem:[%s27772_s3 + $0x54c] sm:$0xf0]  ;;  %v14607_v6 = vld [vmem:[%s27772_s3 + $0x328] sm:$0xf] }
 0x3a3   : > { %6448 = vmatmul.bf16.vlgmr.msra.gmra.mxu3 %v23933_v19  ;;  %6588 = vmatmul.bf16.vlgmr.msrb.gmra.mxu1 %v23607_v33  ;;  %v14548_v13 = vor.u32 %v17998_v9, %v14545_v62  ;;  %v18045_v2 = vld [vmem:[%s27772_s3 + $0x424] sm:$0xf]  ;;  %v14857_v21 = vld [vmem:[%s27772_s3 + $0x430] sm:$0xf0]  ;;  %v18016_v31 = vld [vmem:[%s27772_s3 + $0x334] sm:$0xf0] }
 0x3a4   : > { %6552 = vmatpush.bf16.msra.mxu3 %v14704_v5  ;;  %6594 = vmatpush.bf16.msrb.mxu2 %v14580_v7  ;;  %v14640_v5 = vor.u32 %v18024_v48, %v14639_v49  ;;  %v14516_v7 = vor.u32 %v17990_v4, %v14513_v55  ;;  %v17982_v9 = vld [vmem:[%s27772_s3 + $0x22c] sm:$0xf]  ;;  %v14481_v62 = vld [vmem:[%s27772_s3 + $0x238] sm:$0xf0]  ;;  %v14983_v28 = vld [vmem:[%s27772_s3 + $0x520] sm:$0xf]  ;;  %v14608_v3 = vor.u32 %v18016_v31, %v14607_v6 }
 0x3a5   : > { %7429 = vmatpush.bf16.msra.mxu1 %v15080_v57  ;;  %6546 = vmatmul.bf16.vlgmr.msra.gmra.mxu2 %v23771_v61  ;;  %v18079_v34 = vld [vmem:[%s27772_s3 + $0x52c] sm:$0xf0]  ;;  %v14484_v40 = vor.u32 %v17982_v9, %v14481_v62  ;;  %v17978_v42 = vld [vmem:[%s27772_s3 + $0x20c] sm:$0xf]  ;;  %v14841_v47 = vld [vmem:[%s27772_s3 + $0x410] sm:$0xf0] }
 0x3a6   : > { %7422 = vmatpush.bf16.msra.mxu0 %v14840_v1  ;;  %v14532_v1 = vor.u32 %v17994_v39, %v14529_v45  ;;  %v14984_v39 = vor.u32 %v18079_v34, %v14983_v28  ;;  %v14465_v45 = vld [vmem:[%s27772_s3 + $0x218] sm:$0xf0]  ;;  %v14967_v23 = vld [vmem:[%s27772_s3 + $0x500] sm:$0xf]  ;;  %v18075_v52 = vld [vmem:[%s27772_s3 + $0x50c] sm:$0xf0] }
 0x3a7   : > { %v18135_v18 = vld [vmem:[%s27772_s3 + $0x6ec] sm:$0xf0]  ;;  %v18101_v54 = vld [vmem:[%s27772_s3 + $0x5e4] sm:$0xf]  ;;  %v14468_v4 = vor.u32 %v17978_v42, %v14465_v45  ;;  %v14959_v55 = vld [vmem:[%s27772_s3 + $0x4e8] sm:$0xf] }
 0x3a8   : > { %6553 = vmatpush.bf16.msra.mxu3 %v14688_v22  ;;  %6595 = vmatpush.bf16.msrb.mxu2 %v14564_v24  ;;  %v14624_v22 = vor.u32 %v18020_v59, %v14623_v25  ;;  %v14500_v24 = vor.u32 %v17986_v63, %v14497_v37  ;;  %v18034_v25 = vld [vmem:[%s27772_s3 + $0x3cc] sm:$0xf]  ;;  %v18131_v59 = vld [vmem:[%s27772_s3 + $0x6cc] sm:$0xf0]  ;;  %v18097_v63 = vld [vmem:[%s27772_s3 + $0x5c4] sm:$0xf] }
 0x3a9   : > { %7423 = vmatmul.bf16.vlgmr.msra.gmra.mxu0 %v23441_v50  ;;  %7430 = vmatpush.bf16.msra.mxu1 %v15064_v56  ;;  %v15000_v56 = vor.u32 %v18083_v46, %v14999_v51  ;;  %v15065_v37 = vld [vmem:[%s27772_s3 + $0x5d0] sm:$0xf0]  ;;  %v14943_v51 = vld [vmem:[%s27772_s3 + $0x4c8] sm:$0xf]  ;;  %v18068_v46 = vld [vmem:[%s27772_s3 + $0x4d4] sm:$0xf0] }
 0x3aa   : > { %7471 = vmatpush.bf16.msrb.mxu0 %v14956_v36  ;;  %v15015_v36 = vld [vmem:[%s27772_s3 + $0x560] sm:$0xf]  ;;  %v14673_v6 = vld [vmem:[%s27772_s3 + $0x3b8] sm:$0xf0]  ;;  %v18127_v31 = vld [vmem:[%s27772_s3 + $0x6ac] sm:$0xf0] }
 0x3ab   : > { %v15016_v57 = vor.u32 %v18087_v53, %v15015_v36  ;;  %v18072_v36 = vld [vmem:[%s27772_s3 + $0x4f4] sm:$0xf0]  ;;  %v14968_v53 = vor.u32 %v18075_v52, %v14967_v23  ;;  %v18093_v9 = vld [vmem:[%s27772_s3 + $0x5a4] sm:$0xf]  ;;  %v15049_v62 = vld [vmem:[%s27772_s3 + $0x5b0] sm:$0xf0] }
 0x3ac   : > { %6554 = vmatpush.bf16.msra.mxu3 %v14672_v10  ;;  %6596 = vmatpush.bf16.msrb.mxu2 %v14548_v13  ;;  %v14591_v10 = vld [vmem:[%s27772_s3 + $0x308] sm:$0xf]  ;;  %v18012_v13 = vld [vmem:[%s27772_s3 + $0x314] sm:$0xf0]  ;;  %v15033_v45 = vld [vmem:[%s27772_s3 + $0x590] sm:$0xf0] }
 0x3ad   : > { %7431 = vmatpush.bf16.msra.mxu1 %v15048_v17  ;;  %v18041_v17 = vld [vmem:[%s27772_s3 + $0x404] sm:$0xf]  ;;  %v14592_v48 = vor.u32 %v18012_v13, %v14591_v10  ;;  %v14927_v28 = vld [vmem:[%s27772_s3 + $0x4a8] sm:$0xf]  ;;  %v18064_v34 = vld [vmem:[%s27772_s3 + $0x4b4] sm:$0xf0] }
 0x3ae   : > { %7472 = vmatpush.bf16.msrb.mxu0 %v14940_v11  ;;  %v14876_v11 = vor.u32 %v18049_v27, %v14873_v16  ;;  %v14844_v49 = vor.u32 %v18041_v17, %v14841_v47  ;;  %v14689_v27 = vld [vmem:[%s27772_s3 + $0x3d8] sm:$0xf0]  ;;  %v14960_v16 = vor.u32 %v18072_v36, %v14959_v55  ;;  %v18026_v13 = vld [vmem:[%s27772_s3 + $0x38c] sm:$0xf]  ;;  %v14928_v42 = vor.u32 %v18064_v34, %v14927_v28  ;;  %v15159_v17 = vld [vmem:[%s27772_s3 + $0x680] sm:$0xf] }
 0x3af   : > { %v18123_v47 = vld [vmem:[%s27772_s3 + $0x68c] sm:$0xf0]  ;;  %v14911_v23 = vld [vmem:[%s27772_s3 + $0x488] sm:$0xf]  ;;  %v18060_v52 = vld [vmem:[%s27772_s3 + $0x494] sm:$0xf0] }
 0x3b0   : > { %6555 = vmatpush.bf16.msra.mxu3 %v14656_v58  ;;  %6597 = vmatpush.bf16.msrb.mxu2 %v14532_v1  ;;  %v14705_v58 = vld [vmem:[%s27772_s3 + $0x3f8] sm:$0xf0]  ;;  %v15207_v1 = vld [vmem:[%s27772_s3 + $0x6e0] sm:$0xf]  ;;  %v15017_v55 = vld [vmem:[%s27772_s3 + $0x570] sm:$0xf0] }
 0x3b1   : > { %7432 = vmatpush.bf16.msra.mxu1 %v15032_v29  ;;  %v15081_v29 = vld [vmem:[%s27772_s3 + $0x5f0] sm:$0xf0]  ;;  %v14895_v36 = vld [vmem:[%s27772_s3 + $0x468] sm:$0xf]  ;;  %v18048_v34 = vld [vmem:[%s27772_s3 + $0x434] sm:$0xf0] }
 0x3b2   : > { %7473 = vmatpush.bf16.msrb.mxu0 %v14924_v41  ;;  %v14860_v41 = vor.u32 %v18045_v2, %v14857_v21  ;;  %v15068_v2 = vor.u32 %v18097_v63, %v15065_v37  ;;  %v14944_v21 = vor.u32 %v18068_v46, %v14943_v51  ;;  %v18081_v63 = vld [vmem:[%s27772_s3 + $0x544] sm:$0xf]  ;;  %v15001_v37 = vld [vmem:[%s27772_s3 + $0x550] sm:$0xf0]  ;;  %v14879_v51 = vld [vmem:[%s27772_s3 + $0x448] sm:$0xf] }
 0x3b3   : > { %6504 = vmatmul.bf16.vlgmr.msrb.gmra.mxu3 %v23933_v19  ;;  %v18052_v46 = vld [vmem:[%s27772_s3 + $0x454] sm:$0xf0]  ;;  %v14863_v28 = vld [vmem:[%s27772_s3 + $0x428] sm:$0xf] }
 0x3b4   : > { %6556 = vmatpush.bf16.msra.mxu3 %v14640_v5  ;;  %6598 = vmatpush.bf16.msrb.mxu2 %v14516_v7  ;;  %v15208_v5 = vor.u32 %v18135_v18, %v15207_v1  ;;  %v15084_v7 = vor.u32 %v18101_v54, %v15081_v29  ;;  %v18022_v1 = vld [vmem:[%s27772_s3 + $0x36c] sm:$0xf]  ;;  %v14912_v54 = vor.u32 %v18060_v52, %v14911_v23  ;;  %v15143_v29 = vld [vmem:[%s27772_s3 + $0x660] sm:$0xf]  ;;  %v14847_v23 = vld [vmem:[%s27772_s3 + $0x408] sm:$0xf] }
 0x3b5   : > { %7433 = vmatpush.bf16.msra.mxu1 %v15016_v57  ;;  %v15191_v57 = vld [vmem:[%s27772_s3 + $0x6c0] sm:$0xf]  ;;  %v18044_v52 = vld [vmem:[%s27772_s3 + $0x414] sm:$0xf0] }
 0x3b6   : > { %7474 = vmatpush.bf16.msrb.mxu0 %v14908_v12  ;;  %v18038_v12 = vld [vmem:[%s27772_s3 + $0x3ec] sm:$0xf] }
 0x3b8   : > { %6557 = vmatpush.bf16.msra.mxu3 %v14624_v22  ;;  %6599 = vmatpush.bf16.msrb.mxu2 %v14500_v24  ;;  %v15192_v22 = vor.u32 %v18131_v59, %v15191_v57  ;;  %v18030_v24 = vld [vmem:[%s27772_s3 + $0x3ac] sm:$0xf]  ;;  %v15127_v57 = vld [vmem:[%s27772_s3 + $0x640] sm:$0xf]  ;;  %v18115_v59 = vld [vmem:[%s27772_s3 + $0x64c] sm:$0xf0] }
 0x3b9   : > { %7434 = vmatpush.bf16.msra.mxu1 %v15000_v56  ;;  %v15175_v56 = vld [vmem:[%s27772_s3 + $0x6a0] sm:$0xf] }
 0x3ba   : > { %7475 = vmatpush.bf16.msrb.mxu0 %v14892_v43  ;;  %v14708_v43 = vor.u32 %v18038_v12, %v14705_v58  ;;  %v15176_v10 = vor.u32 %v18127_v31, %v15175_v56  ;;  %v15160_v58 = vor.u32 %v18123_v47, %v15159_v17  ;;  %v15111_v56 = vld [vmem:[%s27772_s3 + $0x620] sm:$0xf]  ;;  %v18111_v31 = vld [vmem:[%s27772_s3 + $0x62c] sm:$0xf0]  ;;  %v14864_v47 = vor.u32 %v18048_v34, %v14863_v28  ;;  %v18096_v28 = vld [vmem:[%s27772_s3 + $0x5b4] sm:$0xf0] }
 0x3bb   : > { %v18062_v34 = vld [vmem:[%s27772_s3 + $0x4ac] sm:$0xf] }
 0x3bc   : > { %6558 = vmatpush.bf16.msra.mxu3 %v14608_v3  ;;  %6600 = vmatpush.bf16.msrb.mxu2 %v14484_v40  ;;  %v14657_v3 = vld [vmem:[%s27772_s3 + $0x398] sm:$0xf0]  ;;  %v15052_v40 = vor.u32 %v18093_v9, %v15049_v62  ;;  %v18077_v9 = vld [vmem:[%s27772_s3 + $0x524] sm:$0xf]  ;;  %v14985_v62 = vld [vmem:[%s27772_s3 + $0x530] sm:$0xf0] }
 0x3bd   : > { %7435 = vmatpush.bf16.msra.mxu1 %v14984_v39  ;;  %v18089_v39 = vld [vmem:[%s27772_s3 + $0x584] sm:$0xf]  ;;  %v14660_v12 = vor.u32 %v18026_v13, %v14657_v3  ;;  %v15112_v13 = vor.u32 %v18111_v31, %v15111_v56  ;;  %v14593_v3 = vld [vmem:[%s27772_s3 + $0x318] sm:$0xf0]  ;;  %v14988_v17 = vor.u32 %v18077_v9, %v14985_v62  ;;  %v15177_v9 = vld [vmem:[%s27772_s3 + $0x6b0] sm:$0xf0] }
 0x3be   : > { %7476 = vmatpush.bf16.msrb.mxu0 %v14876_v11  ;;  %v14692_v11 = vor.u32 %v18034_v25, %v14689_v27  ;;  %v15036_v18 = vor.u32 %v18089_v39, %v15033_v45  ;;  %v14625_v25 = vld [vmem:[%s27772_s3 + $0x358] sm:$0xf0]  ;;  %v18073_v39 = vld [vmem:[%s27772_s3 + $0x504] sm:$0xf]  ;;  %v14969_v45 = vld [vmem:[%s27772_s3 + $0x510] sm:$0xf0] }
 0x3bf   : > { %v18125_v31 = vld [vmem:[%s27772_s3 + $0x6a4] sm:$0xf]  ;;  %v15055_v62 = vld [vmem:[%s27772_s3 + $0x5a8] sm:$0xf] }
 0x3c0   : > { %6559 = vmatpush.bf16.msra.mxu3 %v14592_v48  ;;  %6601 = vmatpush.bf16.msrb.mxu2 %v14468_v4  ;;  %v18119_v48 = vld [vmem:[%s27772_s3 + $0x66c] sm:$0xf0]  ;;  %v18085_v4 = vld [vmem:[%s27772_s3 + $0x564] sm:$0xf] }
 0x3c1   : > { %7436 = vmatpush.bf16.msra.mxu1 %v14968_v53  ;;  %v18056_v53 = vld [vmem:[%s27772_s3 + $0x474] sm:$0xf0]  ;;  %v15020_v27 = vor.u32 %v18085_v4, %v15017_v55  ;;  %v18070_v4 = vld [vmem:[%s27772_s3 + $0x4ec] sm:$0xf]  ;;  %v14961_v55 = vld [vmem:[%s27772_s3 + $0x4f8] sm:$0xf0] }
 0x3c2   : > { %7477 = vmatpush.bf16.msrb.mxu0 %v14860_v41  ;;  %v14676_v41 = vor.u32 %v18030_v24, %v14673_v6  ;;  %v18014_v24 = vld [vmem:[%s27772_s3 + $0x32c] sm:$0xf]  ;;  %v14609_v6 = vld [vmem:[%s27772_s3 + $0x338] sm:$0xf0] }
 0x3c3   : > { %6602 = vmatmul.bf16.vlgmr.msrb.gmra.mxu2 %v23771_v61  ;;  %6560 = vmatmul.bf16.vlgmr.msra.gmra.mxu3 %v23933_v19 }
 0x3c4   : > { %6608 = vmatpush.bf16.msrb.mxu3 %v14708_v43  ;;  %7443 = vmatpush.bf16.msra.mxu2 %v15208_v5  ;;  %v15144_v5 = vor.u32 %v18119_v48, %v15143_v29  ;;  %v18104_v48 = vld [vmem:[%s27772_s3 + $0x5f4] sm:$0xf0] }
 0x3c5   : > { %7485 = vmatpush.bf16.msrb.mxu1 %v15084_v7  ;;  %v18018_v7 = vld [vmem:[%s27772_s3 + $0x34c] sm:$0xf] }
 0x3c6   : > { %7478 = vmatpush.bf16.msrb.mxu0 %v14844_v49  ;;  %7437 = vmatmul.bf16.vlgmr.msra.gmra.mxu1 %v23607_v33  ;;  %v14641_v49 = vld [vmem:[%s27772_s3 + $0x378] sm:$0xf0] }
 0x3c7   : > { %v14644_v43 = vor.u32 %v18022_v1, %v14641_v49  ;;  %v18133_v1 = vld [vmem:[%s27772_s3 + $0x6e4] sm:$0xf]  ;;  %v15209_v49 = vld [vmem:[%s27772_s3 + $0x6f0] sm:$0xf0] }
 0x3c8   : > { %6609 = vmatpush.bf16.msrb.mxu3 %v14692_v11  ;;  %7444 = vmatpush.bf16.msra.mxu2 %v15192_v22  ;;  %v14628_v11 = vor.u32 %v18018_v7, %v14625_v25  ;;  %v15128_v22 = vor.u32 %v18115_v59, %v15127_v57  ;;  %v15319_v7 = vld [vmem:[%s27772_s3 + $0x7c0] sm:$0xf]  ;;  %v18163_v25 = vld [vmem:[%s27772_s3 + $0x7cc] sm:$0xf0]  ;;  %v14964_v57 = vor.u32 %v18070_v4, %v14961_v55  ;;  %v18129_v59 = vld [vmem:[%s27772_s3 + $0x6c4] sm:$0xf] }
 0x3c9   : > { %7479 = vmatmul.bf16.vlgmr.msrb.gmra.mxu0 %v23441_v50  ;;  %7486 = vmatpush.bf16.msrb.mxu1 %v15068_v2  ;;  %v15004_v2 = vor.u32 %v18081_v63, %v15001_v37  ;;  %v15193_v63 = vld [vmem:[%s27772_s3 + $0x6d0] sm:$0xf0]  ;;  %v15071_v37 = vld [vmem:[%s27772_s3 + $0x5c8] sm:$0xf] }
 0x3ca   : > { %7527 = vmatpush.bf16.msra.mxu0 %v14960_v16  ;;  %v14896_v16 = vor.u32 %v18056_v53, %v14895_v36  ;;  %v14972_v36 = vor.u32 %v18073_v39, %v14969_v45  ;;  %v14848_v53 = vor.u32 %v18044_v52, %v14847_v23  ;;  %v18121_v39 = vld [vmem:[%s27772_s3 + $0x684] sm:$0xf]  ;;  %v15161_v45 = vld [vmem:[%s27772_s3 + $0x690] sm:$0xf0]  ;;  %v15039_v23 = vld [vmem:[%s27772_s3 + $0x588] sm:$0xf] }
 0x3cc   : > { %6610 = vmatpush.bf16.msrb.mxu3 %v14676_v41  ;;  %7445 = vmatpush.bf16.msra.mxu2 %v15176_v10  ;;  %v18010_v41 = vld [vmem:[%s27772_s3 + $0x30c] sm:$0xf]  ;;  %v14612_v10 = vor.u32 %v18014_v24, %v14609_v6  ;;  %v15196_v24 = vor.u32 %v18129_v59, %v15193_v63  ;;  %v15303_v6 = vld [vmem:[%s27772_s3 + $0x7a0] sm:$0xf]  ;;  %v18147_v59 = vld [vmem:[%s27772_s3 + $0x74c] sm:$0xf0] }
 0x3cd   : > { %7487 = vmatpush.bf16.msrb.mxu1 %v15052_v40  ;;  %v15095_v40 = vld [vmem:[%s27772_s3 + $0x600] sm:$0xf] }
 0x3ce   : > { %7528 = vmatpush.bf16.msra.mxu0 %v14944_v21  ;;  %v14880_v21 = vor.u32 %v18052_v46, %v14879_v51  ;;  %v18100_v51 = vld [vmem:[%s27772_s3 + $0x5d4] sm:$0xf0]  ;;  %v18066_v46 = vld [vmem:[%s27772_s3 + $0x4cc] sm:$0xf] }
 0x3d0   : > { %6611 = vmatpush.bf16.msrb.mxu3 %v14660_v12  ;;  %7446 = vmatpush.bf16.msra.mxu2 %v15160_v58  ;;  %v15335_v12 = vld [vmem:[%s27772_s3 + $0x7e0] sm:$0xf]  ;;  %v18167_v58 = vld [vmem:[%s27772_s3 + $0x7ec] sm:$0xf0] }
 0x3d1   : > { %7488 = vmatpush.bf16.msrb.mxu1 %v15036_v18  ;;  %v15087_v18 = vld [vmem:[%s27772_s3 + $0x5e8] sm:$0xf] }
 0x3d2   : > { %7529 = vmatpush.bf16.msra.mxu0 %v14928_v42  ;;  %v18107_v42 = vld [vmem:[%s27772_s3 + $0x60c] sm:$0xf0] }
 0x3d3   : > { %v15096_v29 = vor.u32 %v18107_v42, %v15095_v40  ;;  %v18155_v40 = vld [vmem:[%s27772_s3 + $0x78c] sm:$0xf0]  ;;  %v15056_v42 = vor.u32 %v18096_v28, %v15055_v62 }
 0x3d4   : > { %6612 = vmatpush.bf16.msrb.mxu3 %v14644_v43  ;;  %7447 = vmatpush.bf16.msra.mxu2 %v15144_v5  ;;  %v15336_v43 = vor.u32 %v18167_v58, %v15335_v12  ;;  %v15212_v5 = vor.u32 %v18133_v1, %v15209_v49  ;;  %v18092_v12 = vld [vmem:[%s27772_s3 + $0x594] sm:$0xf0]  ;;  %v18058_v58 = vld [vmem:[%s27772_s3 + $0x48c] sm:$0xf]  ;;  %v14913_v1 = vld [vmem:[%s27772_s3 + $0x498] sm:$0xf0] }
 0x3d5   : > { %7489 = vmatpush.bf16.msrb.mxu1 %v15020_v27  ;;  %v6407_v27 = vpop.f32.mrf.mxu0  ;;  %v15040_v4 = vor.u32 %v18092_v12, %v15039_v23  ;;  %v14916_v55 = vor.u32 %v18058_v58, %v14913_v1  ;;  %v18105_v23 = vld [vmem:[%s27772_s3 + $0x604] sm:$0xf]  ;;  %v15097_v12 = vld [vmem:[%s27772_s3 + $0x610] sm:$0xf0] }
 0x3d6   : > { %7530 = vmatpush.bf16.msra.mxu0 %v14912_v54  ;;  %v14596_v54 = vor.u32 %v18010_v41, %v14593_v3  ;;  %v14929_v41 = vld [vmem:[%s27772_s3 + $0x4b8] sm:$0xf0]  ;;  %v15287_v3 = vld [vmem:[%s27772_s3 + $0x780] sm:$0xf] }
 0x3d8   : > { %6613 = vmatpush.bf16.msrb.mxu3 %v14628_v11  ;;  %7448 = vmatpush.bf16.msra.mxu2 %v15128_v22  ;;  %v14945_v11 = vld [vmem:[%s27772_s3 + $0x4d8] sm:$0xf0]  ;;  %v15320_v22 = vor.u32 %v18163_v25, %v15319_v7  ;;  %v18054_v7 = vld [vmem:[%s27772_s3 + $0x46c] sm:$0xf] }
 0x3d9   : > { %7490 = vmatpush.bf16.msrb.mxu1 %v15004_v2  ;;  %v18159_v2 = vld [vmem:[%s27772_s3 + $0x7ac] sm:$0xf0]  ;;  %v14948_v56 = vor.u32 %v18066_v46, %v14945_v11  ;;  %v14897_v25 = vld [vmem:[%s27772_s3 + $0x478] sm:$0xf0]  ;;  %v18113_v46 = vld [vmem:[%s27772_s3 + $0x644] sm:$0xf] }
 0x3da   : > { %7531 = vmatpush.bf16.msra.mxu0 %v14896_v16  ;;  %v15088_v16 = vor.u32 %v18104_v48, %v15087_v18  ;;  %v15288_v18 = vor.u32 %v18155_v40, %v15287_v3  ;;  %v18151_v48 = vld [vmem:[%s27772_s3 + $0x76c] sm:$0xf0]  ;;  %v15129_v11 = vld [vmem:[%s27772_s3 + $0x650] sm:$0xf0]  ;;  %v18080_v3 = vld [vmem:[%s27772_s3 + $0x534] sm:$0xf0] }
 0x3db   : > { %v18046_v40 = vld [vmem:[%s27772_s3 + $0x42c] sm:$0xf] }
 0x3dc   : > { %6614 = vmatpush.bf16.msrb.mxu3 %v14612_v10  ;;  %7449 = vmatpush.bf16.msra.mxu2 %v15112_v13  ;;  %v15304_v10 = vor.u32 %v18159_v2, %v15303_v6  ;;  %v15180_v13 = vor.u32 %v18125_v31, %v15177_v9  ;;  %v18050_v6 = vld [vmem:[%s27772_s3 + $0x44c] sm:$0xf]  ;;  %v14881_v2 = vld [vmem:[%s27772_s3 + $0x458] sm:$0xf0]  ;;  %v15239_v31 = vld [vmem:[%s27772_s3 + $0x720] sm:$0xf] }
 0x3dd   : > { %7491 = vmatpush.bf16.msrb.mxu1 %v14988_v17  ;;  %v14932_v17 = vor.u32 %v18062_v34, %v14929_v41  ;;  %v24397_v49 = vpop.f32.mrf.mxu0  ;;  %v18143_v9 = vld [vmem:[%s27772_s3 + $0x72c] sm:$0xf0]  ;;  %v14884_v34 = vor.u32 %v18050_v6, %v14881_v2  ;;  %v18109_v41 = vld [vmem:[%s27772_s3 + $0x624] sm:$0xf] }
 0x3de   : > { %7532 = vmatpush.bf16.msra.mxu0 %v14880_v21  ;;  %v15072_v21 = vor.u32 %v18100_v51, %v15071_v37  ;;  %v14900_v37 = vor.u32 %v18054_v7, %v14897_v25  ;;  %v18102_v7 = vld [vmem:[%s27772_s3 + $0x5ec] sm:$0xf] }
 0x3e0   : > { %6615 = vmatpush.bf16.msrb.mxu3 %v14596_v54  ;;  %7450 = vmatpush.bf16.msra.mxu2 %v15096_v29  ;;  %v15164_v54 = vor.u32 %v18121_v39, %v15161_v45  ;;  %v15271_v29 = vld [vmem:[%s27772_s3 + $0x760] sm:$0xf]  ;;  %v18139_v45 = vld [vmem:[%s27772_s3 + $0x70c] sm:$0xf0] }
 0x3e1   : > { %7492 = vmatpush.bf16.msrb.mxu1 %v14972_v36  ;;  %v18117_v36 = vld [vmem:[%s27772_s3 + $0x664] sm:$0xf] }
 0x3e2   : > { %7533 = vmatpush.bf16.msra.mxu0 %v14864_v47  ;;  %v6421_v47 = vpop.f32.mrf.mxu1 }
 0x3e3   : > { %6616 = vmatmul.bf16.vlgmr.msrb.gmra.mxu3 %v23933_v19  ;;  %7451 = vmatmul.bf16.vlgmr.msra.gmra.mxu2 %v23771_v61  ;;  %v24386_v52 = vadd.f32 %v6421_v47, %v6407_v27  ;;  %v15272_v27 = vor.u32 %v18151_v48, %v15271_v29  ;;  %v15240_v47 = vor.u32 %v18143_v9, %v15239_v31  ;;  %v18076_v29 = vld [vmem:[%s27772_s3 + $0x514] sm:$0xf0]  ;;  %v18042_v48 = vld [vmem:[%s27772_s3 + $0x40c] sm:$0xf] }
 0x3e4   : > { %7457 = vmatpush.bf16.msra.mxu3 %v15336_v43  ;;  %7499 = vmatpush.bf16.msrb.mxu2 %v15212_v5  ;;  %v15023_v43 = vld [vmem:[%s27772_s3 + $0x568] sm:$0xf]  ;;  %v18088_v5 = vld [vmem:[%s27772_s3 + $0x574] sm:$0xf0]  ;;  %v18098_v9 = vld [vmem:[%s27772_s3 + $0x5cc] sm:$0xf] }
 0x3e5   : > { %7541 = vmatpush.bf16.msra.mxu1 %v15088_v16  ;;  %v15024_v63 = vor.u32 %v18088_v5, %v15023_v43  ;;  %v6463_v62 = vpop.f32.mrf.mxu0  ;;  %v15215_v43 = vld [vmem:[%s27772_s3 + $0x6e8] sm:$0xf]  ;;  %v18136_v5 = vld [vmem:[%s27772_s3 + $0x6f4] sm:$0xf0] }
 0x3e6   : > { %7534 = vmatpush.bf16.msra.mxu0 %v14848_v53  ;;  %7493 = vmatmul.bf16.vlgmr.msrb.gmra.mxu1 %v23607_v33  ;;  %v15145_v53 = vld [vmem:[%s27772_s3 + $0x670] sm:$0xf0]  ;;  %v18132_v31 = vld [vmem:[%s27772_s3 + $0x6d4] sm:$0xf0] }
 0x3e7   : > { %v15148_v16 = vor.u32 %v18117_v36, %v15145_v53  ;;  %v18165_v36 = vld [vmem:[%s27772_s3 + $0x7e4] sm:$0xf]  ;;  %v15337_v53 = vld [vmem:[%s27772_s3 + $0x7f0] sm:$0xf0] }
 0x3e8   : > { %7458 = vmatpush.bf16.msra.mxu3 %v15320_v22  ;;  %7500 = vmatpush.bf16.msrb.mxu2 %v15196_v24  ;;  %v15007_v22 = vld [vmem:[%s27772_s3 + $0x548] sm:$0xf]  ;;  %v18084_v24 = vld [vmem:[%s27772_s3 + $0x554] sm:$0xf0] }
 0x3e9   : > { %7535 = vmatmul.bf16.vlgmr.msra.gmra.mxu0 %v23441_v50  ;;  %7542 = vmatpush.bf16.msra.mxu1 %v15072_v21  ;;  %v15008_v28 = vor.u32 %v18084_v24, %v15007_v22  ;;  %v18161_v22 = vld [vmem:[%s27772_s3 + $0x7c4] sm:$0xf]  ;;  %v15321_v24 = vld [vmem:[%s27772_s3 + $0x7d0] sm:$0xf0] }
 0x3ea   : > { %7583 = vmatpush.bf16.msrb.mxu0 %v14964_v57  ;;  %v15255_v57 = vld [vmem:[%s27772_s3 + $0x740] sm:$0xf]  ;;  %v24429_v51 = vpop.f32.mrf.mxu1 }
 0x3eb   : > { %v15256_v21 = vor.u32 %v18147_v59, %v15255_v57  ;;  %v15591_v57 = vld [vmem:[%s27772_s3 + $0x8e0] sm:$0xf]  ;;  %v18199_v59 = vld [vmem:[%s27772_s3 + $0x8ec] sm:$0xf0] }
 0x3ec   : > { %7459 = vmatpush.bf16.msra.mxu3 %v15304_v10  ;;  %7501 = vmatpush.bf16.msrb.mxu2 %v15180_v13  ;;  %v15113_v10 = vld [vmem:[%s27772_s3 + $0x630] sm:$0xf0]  ;;  %v14991_v13 = vld [vmem:[%s27772_s3 + $0x528] sm:$0xf] }
 0x3ed   : > { %7543 = vmatpush.bf16.msra.mxu1 %v15056_v42  ;;  %v14865_v42 = vld [vmem:[%s27772_s3 + $0x438] sm:$0xf0]  ;;  %v15116_v39 = vor.u32 %v18109_v41, %v15113_v10  ;;  %v14992_v58 = vor.u32 %v18080_v3, %v14991_v13  ;;  %v24529_v6 = vpop.f32.mrf.mxu0  ;;  %v15324_v10 = vor.u32 %v18161_v22, %v15321_v24  ;;  %v18157_v3 = vld [vmem:[%s27772_s3 + $0x7a4] sm:$0xf]  ;;  %v15151_v24 = vld [vmem:[%s27772_s3 + $0x668] sm:$0xf] }
 0x3ee   : > { %7584 = vmatpush.bf16.msrb.mxu0 %v14948_v56  ;;  %v15132_v56 = vor.u32 %v18113_v46, %v15129_v11  ;;  %v14868_v1 = vor.u32 %v18046_v40, %v14865_v42  ;;  %v15340_v46 = vor.u32 %v18165_v36, %v15337_v53  ;;  %v15216_v11 = vor.u32 %v18136_v5, %v15215_v43  ;;  %v15305_v40 = vld [vmem:[%s27772_s3 + $0x7b0] sm:$0xf0]  ;;  %v15167_v36 = vld [vmem:[%s27772_s3 + $0x688] sm:$0xf]  ;;  %v18124_v53 = vld [vmem:[%s27772_s3 + $0x694] sm:$0xf0] }
 0x3ef   : > { %v18090_v43 = vld [vmem:[%s27772_s3 + $0x58c] sm:$0xf]  ;;  %v15041_v5 = vld [vmem:[%s27772_s3 + $0x598] sm:$0xf0] }
 0x3f0   : > { %7460 = vmatpush.bf16.msra.mxu3 %v15288_v18  ;;  %7502 = vmatpush.bf16.msrb.mxu2 %v15164_v54  ;;  %v14975_v54 = vld [vmem:[%s27772_s3 + $0x508] sm:$0xf] }
 0x3f1   : > { %7544 = vmatpush.bf16.msra.mxu1 %v15040_v4 }
 0x3f2   : > { %7585 = vmatpush.bf16.msrb.mxu0 %v14932_v17  ;;  %v15223_v17 = vld [vmem:[%s27772_s3 + $0x700] sm:$0xf]  ;;  %v6477_v18 = vpop.f32.mrf.mxu1 }
 0x3f3   : > { %v24494_v4 = vadd.f32 %v6477_v18, %v6463_v62  ;;  %v15224_v25 = vor.u32 %v18139_v45, %v15223_v17  ;;  %v15073_v62 = vld [vmem:[%s27772_s3 + $0x5d8] sm:$0xf0]  ;;  %v18094_v45 = vld [vmem:[%s27772_s3 + $0x5ac] sm:$0xf] }
 0x3f4   : > { %7461 = vmatpush.bf16.msra.mxu3 %v15272_v27  ;;  %7503 = vmatpush.bf16.msrb.mxu2 %v15148_v16  ;;  %v15100_v27 = vor.u32 %v18105_v23, %v15097_v12  ;;  %v15089_v16 = vld [vmem:[%s27772_s3 + $0x5f8] sm:$0xf0]  ;;  %v15076_v42 = vor.u32 %v18098_v9, %v15073_v62  ;;  %v15559_v12 = vld [vmem:[%s27772_s3 + $0x8a0] sm:$0xf]  ;;  %v18183_v9 = vld [vmem:[%s27772_s3 + $0x86c] sm:$0xf0] }
 0x3f5   : > { %7545 = vmatpush.bf16.msra.mxu1 %v15024_v63  ;;  %v14976_v63 = vor.u32 %v18076_v29, %v14975_v54  ;;  %v15092_v2 = vor.u32 %v18102_v7, %v15089_v16  ;;  %v15057_v23 = vld [vmem:[%s27772_s3 + $0x5b8] sm:$0xf0]  ;;  %v18153_v54 = vld [vmem:[%s27772_s3 + $0x784] sm:$0xf]  ;;  %v15289_v29 = vld [vmem:[%s27772_s3 + $0x790] sm:$0xf0] }
 0x3f6   : > { %7586 = vmatpush.bf16.msrb.mxu0 %v14916_v55  ;;  %v14849_v55 = vld [vmem:[%s27772_s3 + $0x418] sm:$0xf0]  ;;  %v15543_v7 = vld [vmem:[%s27772_s3 + $0x880] sm:$0xf] }
 0x3f8   : > { %7462 = vmatpush.bf16.msra.mxu3 %v15256_v21  ;;  %7504 = vmatpush.bf16.msrb.mxu2 %v15132_v56  ;;  %v15592_v21 = vor.u32 %v18199_v59, %v15591_v57  ;;  %v15199_v56 = vld [vmem:[%s27772_s3 + $0x6c8] sm:$0xf]  ;;  %v15292_v59 = vor.u32 %v18153_v54, %v15289_v29 }
 0x3f9   : > { %7546 = vmatpush.bf16.msra.mxu1 %v15008_v28  ;;  %v15575_v28 = vld [vmem:[%s27772_s3 + $0x8c0] sm:$0xf]  ;;  %v15200_v13 = vor.u32 %v18132_v31, %v15199_v56  ;;  %v15025_v56 = vld [vmem:[%s27772_s3 + $0x578] sm:$0xf0] }
 0x3fa   : > { %7587 = vmatpush.bf16.msrb.mxu0 %v14900_v37  ;;  %v14852_v37 = vor.u32 %v18042_v48, %v14849_v55  ;;  %v24549_v41 = vpop.f32.mrf.mxu1  ;;  %v15060_v48 = vor.u32 %v18094_v45, %v15057_v23  ;;  %v15527_v31 = vld [vmem:[%s27772_s3 + $0x860] sm:$0xf]  ;;  %v18179_v23 = vld [vmem:[%s27772_s3 + $0x84c] sm:$0xf0] }
 0x3fb   : > { %v15511_v45 = vld [vmem:[%s27772_s3 + $0x840] sm:$0xf] }
 0x3fc   : > { %7463 = vmatpush.bf16.msra.mxu3 %v15240_v47  ;;  %7505 = vmatpush.bf16.msrb.mxu2 %v15116_v39  ;;  %v15183_v47 = vld [vmem:[%s27772_s3 + $0x6a8] sm:$0xf]  ;;  %v18128_v39 = vld [vmem:[%s27772_s3 + $0x6b4] sm:$0xf0]  ;;  %v15512_v29 = vor.u32 %v18179_v23, %v15511_v45 }
 0x3fd   : > { %7547 = vmatpush.bf16.msra.mxu1 %v14992_v58  ;;  %v18191_v58 = vld [vmem:[%s27772_s3 + $0x8ac] sm:$0xf0]  ;;  %v15184_v18 = vor.u32 %v18128_v39, %v15183_v47  ;;  %v18082_v47 = vld [vmem:[%s27772_s3 + $0x54c] sm:$0xf]  ;;  %v15009_v39 = vld [vmem:[%s27772_s3 + $0x558] sm:$0xf0] }
 0x3fe   : > { %7588 = vmatpush.bf16.msrb.mxu0 %v14884_v34  ;;  %v18195_v34 = vld [vmem:[%s27772_s3 + $0x8cc] sm:$0xf0]  ;;  %v15560_v55 = vor.u32 %v18191_v58, %v15559_v12  ;;  %v15012_v54 = vor.u32 %v18082_v47, %v15009_v39  ;;  %v15327_v45 = vld [vmem:[%s27772_s3 + $0x7c8] sm:$0xf]  ;;  %v18164_v23 = vld [vmem:[%s27772_s3 + $0x7d4] sm:$0xf0] }
 0x3ff   : > { %v15576_v17 = vor.u32 %v18195_v34, %v15575_v28 }
 0x400   : > { %7464 = vmatpush.bf16.msra.mxu3 %v15224_v25  ;;  %7506 = vmatpush.bf16.msrb.mxu2 %v15100_v27  ;;  %v18187_v25 = vld [vmem:[%s27772_s3 + $0x88c] sm:$0xf0]  ;;  %v6519_v27 = vpop.f32.mrf.mxu0 }
 0x401   : > { %7548 = vmatpush.bf16.msra.mxu1 %v14976_v63  ;;  %v15168_v63 = vor.u32 %v18124_v53, %v15167_v36  ;;  %v15544_v22 = vor.u32 %v18187_v25, %v15543_v7  ;;  %v18078_v36 = vld [vmem:[%s27772_s3 + $0x52c] sm:$0xf]  ;;  %v14993_v53 = vld [vmem:[%s27772_s3 + $0x538] sm:$0xf0]  ;;  %v18137_v25 = vld [vmem:[%s27772_s3 + $0x704] sm:$0xf] }
 0x402   : > { %7589 = vmatpush.bf16.msrb.mxu0 %v14868_v1  ;;  %v15308_v1 = vor.u32 %v18157_v3, %v15305_v40  ;;  %v6533_v16 = vpop.f32.mrf.mxu1  ;;  %v15257_v3 = vld [vmem:[%s27772_s3 + $0x750] sm:$0xf0] }
 0x403   : > { %7465 = vmatmul.bf16.vlgmr.msra.gmra.mxu3 %v23933_v19  ;;  %7507 = vmatmul.bf16.vlgmr.msrb.gmra.mxu2 %v23771_v61  ;;  %v24603_v57 = vadd.f32 %v6533_v16, %v6519_v27 }
 0x404   : > { %7513 = vmatpush.bf16.msrb.mxu3 %v15340_v46  ;;  %7555 = vmatpush.bf16.msra.mxu2 %v15216_v11  ;;  %v15273_v46 = vld [vmem:[%s27772_s3 + $0x770] sm:$0xf0]  ;;  %v15044_v11 = vor.u32 %v18090_v43, %v15041_v5  ;;  %v15495_v43 = vld [vmem:[%s27772_s3 + $0x820] sm:$0xf]  ;;  %v18175_v5 = vld [vmem:[%s27772_s3 + $0x82c] sm:$0xf0] }
 0x405   : > { %7597 = vmatpush.bf16.msrb.mxu1 %v15092_v2  ;;  %v18120_v2 = vld [vmem:[%s27772_s3 + $0x674] sm:$0xf0] }
 0x406   : > { %7590 = vmatpush.bf16.msrb.mxu0 %v14852_v37  ;;  %7549 = vmatmul.bf16.vlgmr.msra.gmra.mxu1 %v23607_v33  ;;  %v18149_v37 = vld [vmem:[%s27772_s3 + $0x764] sm:$0xf]  ;;  %v6435_v62 = vpop.f32.mrf.mxu2 }
 0x407   : > { %v24630_v28 = vadd.f32 %v6435_v62, %v24386_v52  ;;  %v15276_v34 = vor.u32 %v18149_v37, %v15273_v46  ;;  %v18116_v52 = vld [vmem:[%s27772_s3 + $0x654] sm:$0xf0]  ;;  %v14996_v46 = vor.u32 %v18078_v36, %v14993_v53  ;;  %v15217_v62 = vld [vmem:[%s27772_s3 + $0x6f8] sm:$0xf0]  ;;  %v18193_v36 = vld [vmem:[%s27772_s3 + $0x8c4] sm:$0xf] }
 0x408   : > { %7514 = vmatpush.bf16.msrb.mxu3 %v15324_v10  ;;  %7556 = vmatpush.bf16.msra.mxu2 %v15200_v13  ;;  %v15152_v10 = vor.u32 %v18120_v2, %v15151_v24  ;;  %v18145_v13 = vld [vmem:[%s27772_s3 + $0x744] sm:$0xf]  ;;  %v18108_v37 = vld [vmem:[%s27772_s3 + $0x614] sm:$0xf0]  ;;  %v14977_v24 = vld [vmem:[%s27772_s3 + $0x518] sm:$0xf0] }
 0x409   : > { %7591 = vmatmul.bf16.vlgmr.msrb.gmra.mxu0 %v23441_v50  ;;  %7598 = vmatpush.bf16.msrb.mxu1 %v15076_v42  ;;  %v15528_v42 = vor.u32 %v18183_v9, %v15527_v31  ;;  %v15260_v12 = vor.u32 %v18145_v13, %v15257_v3  ;;  %v15479_v2 = vld [vmem:[%s27772_s3 + $0x800] sm:$0xf]  ;;  %v18168_v31 = vld [vmem:[%s27772_s3 + $0x7f4] sm:$0xf0]  ;;  %v18134_v9 = vld [vmem:[%s27772_s3 + $0x6ec] sm:$0xf] }
 0x40a   : > { %8440 = vmatpush.bf16.msra.mxu0 %v15592_v21  ;;  %v18086_v21 = vld [vmem:[%s27772_s3 + $0x56c] sm:$0xf]  ;;  %v18231_v3 = vld [vmem:[%s27772_s3 + $0x9ec] sm:$0xf0]  ;;  %v15220_v39 = vor.u32 %v18134_v9, %v15217_v62  ;;  %v15577_v53 = vld [vmem:[%s27772_s3 + $0x8d0] sm:$0xf0] }
 0x40b   : > { %v15028_v40 = vor.u32 %v18086_v21, %v15025_v56  ;;  %v18171_v21 = vld [vmem:[%s27772_s3 + $0x80c] sm:$0xf0]  ;;  %v15343_v56 = vld [vmem:[%s27772_s3 + $0x7e8] sm:$0xf]  ;;  %v18156_v9 = vld [vmem:[%s27772_s3 + $0x794] sm:$0xf0] }
 0x40c   : > { %7515 = vmatpush.bf16.msrb.mxu3 %v15308_v1  ;;  %7557 = vmatpush.bf16.msra.mxu2 %v15184_v18  ;;  %v18141_v1 = vld [vmem:[%s27772_s3 + $0x724] sm:$0xf]  ;;  %v15241_v18 = vld [vmem:[%s27772_s3 + $0x730] sm:$0xf0]  ;;  %v15344_v47 = vor.u32 %v18168_v31, %v15343_v56  ;;  %v15295_v31 = vld [vmem:[%s27772_s3 + $0x788] sm:$0xf] }
 0x40d   : > { %7599 = vmatpush.bf16.msrb.mxu1 %v15060_v48  ;;  %v15119_v48 = vld [vmem:[%s27772_s3 + $0x628] sm:$0xf]  ;;  %v15244_v27 = vor.u32 %v18141_v1, %v15241_v18  ;;  %v18130_v18 = vld [vmem:[%s27772_s3 + $0x6cc] sm:$0xf] }
 0x40e   : > { %8441 = vmatpush.bf16.msra.mxu0 %v15576_v17  ;;  %v15135_v17 = vld [vmem:[%s27772_s3 + $0x648] sm:$0xf]  ;;  %v24680_v7 = vpop.f32.mrf.mxu2 }
 0x40f   : > { %v15136_v58 = vor.u32 %v18116_v52, %v15135_v17  ;;  %v15480_v52 = vor.u32 %v18171_v21, %v15479_v2  ;;  %v15561_v2 = vld [vmem:[%s27772_s3 + $0x8b0] sm:$0xf0] }
 0x410   : > { %7516 = vmatpush.bf16.msrb.mxu3 %v15292_v59  ;;  %7558 = vmatpush.bf16.msra.mxu2 %v15168_v63  ;;  %v15225_v59 = vld [vmem:[%s27772_s3 + $0x710] sm:$0xf0]  ;;  %v15103_v63 = vld [vmem:[%s27772_s3 + $0x608] sm:$0xf] }
 0x411   : > { %7600 = vmatpush.bf16.msrb.mxu1 %v15044_v11  ;;  %v15496_v11 = vor.u32 %v18175_v5, %v15495_v43  ;;  %v15104_v13 = vor.u32 %v18108_v37, %v15103_v63  ;;  %v24757_v43 = vpop.f32.mrf.mxu0  ;;  %v24759_v5 = vpop.f32.mrf.mxu1  ;;  %v15580_v63 = vor.u32 %v18193_v36, %v15577_v53  ;;  %v18126_v37 = vld [vmem:[%s27772_s3 + $0x6ac] sm:$0xf]  ;;  %v15655_v36 = vld [vmem:[%s27772_s3 + $0x960] sm:$0xf] }
 0x412   : > { %8442 = vmatpush.bf16.msra.mxu0 %v15560_v55  ;;  %v18112_v55 = vld [vmem:[%s27772_s3 + $0x634] sm:$0xf0] }
 0x413   : > { %v15120_v16 = vor.u32 %v18112_v55, %v15119_v48  ;;  %v18227_v55 = vld [vmem:[%s27772_s3 + $0x9cc] sm:$0xf0] }
 0x414   : > { %7517 = vmatpush.bf16.msrb.mxu3 %v15276_v34  ;;  %7559 = vmatpush.bf16.msra.mxu2 %v15152_v10  ;;  %v15719_v34 = vld [vmem:[%s27772_s3 + $0x9e0] sm:$0xf]  ;;  %v15228_v10 = vor.u32 %v18137_v25, %v15225_v59 }
 0x415   : > { %7601 = vmatpush.bf16.msrb.mxu1 %v15028_v40  ;;  %v18197_v40 = vld [vmem:[%s27772_s3 + $0x8e4] sm:$0xf] }
 0x416   : > { %8443 = vmatpush.bf16.msra.mxu0 %v15544_v22  ;;  %v18074_v22 = vld [vmem:[%s27772_s3 + $0x50c] sm:$0xf]  ;;  %v6491_v1 = vpop.f32.mrf.mxu2 }
 0x417   : > { %v14980_v17 = vor.u32 %v18074_v22, %v14977_v24  ;;  %v24746_v48 = vadd.f32 %v6491_v1, %v24494_v4  ;;  %v15328_v4 = vor.u32 %v18164_v23, %v15327_v45  ;;  %v18223_v22 = vld [vmem:[%s27772_s3 + $0x9ac] sm:$0xf0]  ;;  %v18189_v24 = vld [vmem:[%s27772_s3 + $0x8a4] sm:$0xf]  ;;  %v15296_v23 = vor.u32 %v18156_v9, %v15295_v31  ;;  %v18152_v1 = vld [vmem:[%s27772_s3 + $0x774] sm:$0xf0] }
 0x418   : > { %7518 = vmatpush.bf16.msrb.mxu3 %v15260_v12  ;;  %7560 = vmatpush.bf16.msra.mxu2 %v15136_v58  ;;  %v15720_v12 = vor.u32 %v18231_v3, %v15719_v34  ;;  %v15564_v34 = vor.u32 %v18189_v24, %v15561_v2  ;;  %v15169_v3 = vld [vmem:[%s27772_s3 + $0x698] sm:$0xf0]  ;;  %v18211_v31 = vld [vmem:[%s27772_s3 + $0x94c] sm:$0xf0]  ;;  %v18177_v9 = vld [vmem:[%s27772_s3 + $0x844] sm:$0xf] }
 0x419   : > { %7602 = vmatpush.bf16.msrb.mxu1 %v15012_v54  ;;  %v15201_v54 = vld [vmem:[%s27772_s3 + $0x6d8] sm:$0xf0] }
 0x41a   : > { %8444 = vmatpush.bf16.msra.mxu0 %v15528_v42  ;;  %v15593_v42 = vld [vmem:[%s27772_s3 + $0x8f0] sm:$0xf0]  ;;  %v15204_v25 = vor.u32 %v18130_v18, %v15201_v54  ;;  %v15137_v2 = vld [vmem:[%s27772_s3 + $0x658] sm:$0xf0] }
 0x41b   : > { %v15596_v58 = vor.u32 %v18197_v40, %v15593_v42  ;;  %v15671_v40 = vld [vmem:[%s27772_s3 + $0x980] sm:$0xf]  ;;  %v18219_v42 = vld [vmem:[%s27772_s3 + $0x98c] sm:$0xf0] }
 0x41c   : > { %7519 = vmatpush.bf16.msrb.mxu3 %v15244_v27  ;;  %7561 = vmatpush.bf16.msra.mxu2 %v15120_v16  ;;  %v15311_v27 = vld [vmem:[%s27772_s3 + $0x7a8] sm:$0xf]  ;;  %v18160_v16 = vld [vmem:[%s27772_s3 + $0x7b4] sm:$0xf0]  ;;  %v15672_v18 = vor.u32 %v18219_v42, %v15671_v40 }
 0x41d   : > { %7603 = vmatpush.bf16.msrb.mxu1 %v14996_v46  ;;  %v15185_v46 = vld [vmem:[%s27772_s3 + $0x6b8] sm:$0xf0]  ;;  %v15312_v21 = vor.u32 %v18160_v16, %v15311_v27  ;;  %v15529_v27 = vld [vmem:[%s27772_s3 + $0x870] sm:$0xf0] }
 0x41e   : > { %8445 = vmatpush.bf16.msra.mxu0 %v15512_v29  ;;  %v15703_v29 = vld [vmem:[%s27772_s3 + $0x9c0] sm:$0xf]  ;;  %v15188_v56 = vor.u32 %v18126_v37, %v15185_v46  ;;  %v15263_v37 = vld [vmem:[%s27772_s3 + $0x748] sm:$0xf]  ;;  %v18148_v46 = vld [vmem:[%s27772_s3 + $0x754] sm:$0xf0] }
 0x41f   : > { %v15704_v59 = vor.u32 %v18227_v55, %v15703_v29  ;;  %v18118_v29 = vld [vmem:[%s27772_s3 + $0x66c] sm:$0xf]  ;;  %v15153_v55 = vld [vmem:[%s27772_s3 + $0x678] sm:$0xf0] }
 0x420   : > { %7520 = vmatpush.bf16.msrb.mxu3 %v15228_v10  ;;  %7562 = vmatpush.bf16.msra.mxu2 %v15104_v13  ;;  %v24795_v10 = vpop.f32.mrf.mxu2  ;;  %v18122_v13 = vld [vmem:[%s27772_s3 + $0x68c] sm:$0xf] }
 0x421   : > { %7604 = vmatpush.bf16.msrb.mxu1 %v14980_v17  ;;  %v18185_v17 = vld [vmem:[%s27772_s3 + $0x884] sm:$0xf] }
 0x422   : > { %8446 = vmatpush.bf16.msra.mxu0 %v15496_v11  ;;  %v15687_v11 = vld [vmem:[%s27772_s3 + $0x9a0] sm:$0xf] }
 0x423   : > { %7521 = vmatmul.bf16.vlgmr.msrb.gmra.mxu3 %v23933_v19  ;;  %7563 = vmatmul.bf16.vlgmr.msra.gmra.mxu2 %v23771_v61  ;;  %v15688_v62 = vor.u32 %v18223_v22, %v15687_v11 }
 0x424   : > { %7569 = vmatpush.bf16.msra.mxu3 %v15344_v47  ;;  %7611 = vmatpush.bf16.msrb.mxu2 %v15220_v39  ;;  %v6575_v47 = vpop.f32.mrf.mxu0  ;;  %v6589_v39 = vpop.f32.mrf.mxu1 }
 0x425   : > { %8454 = vmatpush.bf16.msra.mxu1 %v15720_v12  ;;  %v24815_v45 = vadd.f32 %v6589_v39, %v6575_v47  ;;  %v15172_v12 = vor.u32 %v18122_v13, %v15169_v3  ;;  %v18144_v3 = vld [vmem:[%s27772_s3 + $0x734] sm:$0xf0]  ;;  %v15623_v47 = vld [vmem:[%s27772_s3 + $0x920] sm:$0xf] }
 0x426   : > { %8447 = vmatpush.bf16.msra.mxu0 %v15480_v52  ;;  %7605 = vmatmul.bf16.vlgmr.msrb.gmra.mxu1 %v23607_v33  ;;  %v15545_v52 = vld [vmem:[%s27772_s3 + $0x890] sm:$0xf0]  ;;  %v6449_v53 = vpop.f32.mrf.mxu3 }
 0x427   : > { %v15548_v54 = vor.u32 %v18185_v17, %v15545_v52  ;;  %v24842_v16 = vadd.f32 %v6449_v53, %v24630_v28  ;;  %v18114_v28 = vld [vmem:[%s27772_s3 + $0x64c] sm:$0xf]  ;;  %v15121_v52 = vld [vmem:[%s27772_s3 + $0x638] sm:$0xf0] }
 0x428   : > { %7570 = vmatpush.bf16.msra.mxu3 %v15328_v4  ;;  %7612 = vmatpush.bf16.msrb.mxu2 %v15204_v25  ;;  %v18215_v4 = vld [vmem:[%s27772_s3 + $0x96c] sm:$0xf0]  ;;  %v18181_v25 = vld [vmem:[%s27772_s3 + $0x864] sm:$0xf]  ;;  %v6547_v24 = vpop.f32.mrf.mxu2  ;;  %v15140_v13 = vor.u32 %v18114_v28, %v15137_v2  ;;  %v18110_v17 = vld [vmem:[%s27772_s3 + $0x62c] sm:$0xf] }
 0x429   : > { %8448 = vmatmul.bf16.vlgmr.msra.gmra.mxu0 %v23441_v50  ;;  %8455 = vmatpush.bf16.msra.mxu1 %v15704_v59  ;;  %v15656_v11 = vor.u32 %v18215_v4, %v15655_v36  ;;  %v15532_v22 = vor.u32 %v18181_v25, %v15529_v27  ;;  %v15105_v36 = vld [vmem:[%s27772_s3 + $0x618] sm:$0xf0]  ;;  %v15607_v25 = vld [vmem:[%s27772_s3 + $0x900] sm:$0xf]  ;;  %v18203_v27 = vld [vmem:[%s27772_s3 + $0x90c] sm:$0xf0] }
 0x42a   : > { %8496 = vmatpush.bf16.msrb.mxu0 %v15596_v58  ;;  %v15279_v58 = vld [vmem:[%s27772_s3 + $0x768] sm:$0xf] }
 0x42b   : > { %v15280_v59 = vor.u32 %v18152_v1, %v15279_v58  ;;  %v15497_v58 = vld [vmem:[%s27772_s3 + $0x830] sm:$0xf0]  ;;  %v15231_v1 = vld [vmem:[%s27772_s3 + $0x708] sm:$0xf] }
 0x42c   : > { %7571 = vmatpush.bf16.msra.mxu3 %v15312_v21  ;;  %7613 = vmatpush.bf16.msrb.mxu2 %v15188_v56  ;;  %v15639_v21 = vld [vmem:[%s27772_s3 + $0x940] sm:$0xf]  ;;  %v24860_v56 = vadd.f32 %v6547_v24, %v24603_v57  ;;  %v15247_v57 = vld [vmem:[%s27772_s3 + $0x728] sm:$0xf]  ;;  %v18229_v24 = vld [vmem:[%s27772_s3 + $0x9e4] sm:$0xf] }
 0x42d   : > { %8456 = vmatpush.bf16.msra.mxu1 %v15688_v62  ;;  %v15513_v62 = vld [vmem:[%s27772_s3 + $0x850] sm:$0xf0]  ;;  %v15640_v40 = vor.u32 %v18211_v31, %v15639_v21  ;;  %v15599_v31 = vld [vmem:[%s27772_s3 + $0x8e8] sm:$0xf] }
 0x42e   : > { %8497 = vmatpush.bf16.msrb.mxu0 %v15580_v63  ;;  %v15156_v63 = vor.u32 %v18118_v29, %v15153_v55  ;;  %v15516_v42 = vor.u32 %v18177_v9, %v15513_v62  ;;  %v24886_v39 = vpop.f32.mrf.mxu3  ;;  %v18140_v29 = vld [vmem:[%s27772_s3 + $0x714] sm:$0xf0]  ;;  %v18106_v55 = vld [vmem:[%s27772_s3 + $0x60c] sm:$0xf]  ;;  %v15721_v21 = vld [vmem:[%s27772_s3 + $0x9f0] sm:$0xf0]  ;;  %v15608_v62 = vor.u32 %v18203_v27, %v15607_v25 }
 0x42f   : > { %v15232_v28 = vor.u32 %v18140_v29, %v15231_v1  ;;  %v15108_v2 = vor.u32 %v18106_v55, %v15105_v36  ;;  %v18200_v9 = vld [vmem:[%s27772_s3 + $0x8f4] sm:$0xf0]  ;;  %v15705_v1 = vld [vmem:[%s27772_s3 + $0x9d0] sm:$0xf0]  ;;  %v24974_v29 = vpop.f32.mrf.mxu1 }
 0x430   : > { %7572 = vmatpush.bf16.msra.mxu3 %v15296_v23  ;;  %7614 = vmatpush.bf16.msrb.mxu2 %v15172_v12  ;;  %v18207_v23 = vld [vmem:[%s27772_s3 + $0x92c] sm:$0xf0]  ;;  %v18173_v12 = vld [vmem:[%s27772_s3 + $0x824] sm:$0xf] }
 0x431   : > { %8457 = vmatpush.bf16.msra.mxu1 %v15672_v18  ;;  %v15248_v18 = vor.u32 %v18144_v3, %v15247_v57  ;;  %v15624_v53 = vor.u32 %v18207_v23, %v15623_v47  ;;  %v15500_v4 = vor.u32 %v18173_v12, %v15497_v58  ;;  %v15831_v23 = vld [vmem:[%s27772_s3 + $0xac0] sm:$0xf]  ;;  %v18259_v12 = vld [vmem:[%s27772_s3 + $0xacc] sm:$0xf0]  ;;  %v18225_v58 = vld [vmem:[%s27772_s3 + $0x9c4] sm:$0xf] }
 0x432   : > { %8498 = vmatpush.bf16.msrb.mxu0 %v15564_v34  ;;  %v15264_v34 = vor.u32 %v18148_v46, %v15263_v37  ;;  %v18166_v37 = vld [vmem:[%s27772_s3 + $0x7ec] sm:$0xf]  ;;  %v15345_v46 = vld [vmem:[%s27772_s3 + $0x7f8] sm:$0xf0]  ;;  %v15832_v36 = vor.u32 %v18259_v12, %v15831_v23  ;;  %v15708_v25 = vor.u32 %v18225_v58, %v15705_v1 }
 0x434   : > { %7573 = vmatpush.bf16.msra.mxu3 %v15280_v59  ;;  %7615 = vmatpush.bf16.msrb.mxu2 %v15156_v63  ;;  %v18169_v59 = vld [vmem:[%s27772_s3 + $0x804] sm:$0xf]  ;;  %v15481_v63 = vld [vmem:[%s27772_s3 + $0x810] sm:$0xf0] }
 0x435   : > { %8458 = vmatpush.bf16.msra.mxu1 %v15656_v11  ;;  %v15847_v11 = vld [vmem:[%s27772_s3 + $0xae0] sm:$0xf] }
 0x436   : > { %8499 = vmatpush.bf16.msrb.mxu0 %v15548_v54  ;;  %v15124_v54 = vor.u32 %v18110_v17, %v15121_v52  ;;  %v6505_v3 = vpop.f32.mrf.mxu3  ;;  %v15724_v17 = vor.u32 %v18229_v24, %v15721_v21  ;;  %v15600_v52 = vor.u32 %v18200_v9, %v15599_v31  ;;  %v25004_v24 = vpop.f32.mrf.mxu2  ;;  %v18154_v31 = vld [vmem:[%s27772_s3 + $0x78c] sm:$0xf]  ;;  %v15297_v9 = vld [vmem:[%s27772_s3 + $0x798] sm:$0xf0] }
 0x437   : > { %v24952_v47 = vadd.f32 %v6505_v3, %v24746_v48  ;;  %v15583_v48 = vld [vmem:[%s27772_s3 + $0x8c8] sm:$0xf]  ;;  %v18217_v3 = vld [vmem:[%s27772_s3 + $0x984] sm:$0xf]  ;;  %v15300_v58 = vor.u32 %v18154_v31, %v15297_v9 }
 0x438   : > { %7574 = vmatpush.bf16.msra.mxu3 %v15264_v34  ;;  %7616 = vmatpush.bf16.msrb.mxu2 %v15140_v13  ;;  %v15484_v34 = vor.u32 %v18169_v59, %v15481_v63  ;;  %v15348_v13 = vor.u32 %v18166_v37, %v15345_v46  ;;  %v15815_v59 = vld [vmem:[%s27772_s3 + $0xaa0] sm:$0xf]  ;;  %v18255_v63 = vld [vmem:[%s27772_s3 + $0xaac] sm:$0xf0]  ;;  %v18221_v37 = vld [vmem:[%s27772_s3 + $0x9a4] sm:$0xf] }
 0x439   : > { %8459 = vmatpush.bf16.msra.mxu1 %v15640_v40  ;;  %v18162_v40 = vld [vmem:[%s27772_s3 + $0x7cc] sm:$0xf]  ;;  %v15689_v46 = vld [vmem:[%s27772_s3 + $0x9b0] sm:$0xf0] }
 0x43a   : > { %8500 = vmatpush.bf16.msrb.mxu0 %v15532_v22  ;;  %v18263_v22 = vld [vmem:[%s27772_s3 + $0xaec] sm:$0xf0] }
 0x43b   : > { %v15848_v57 = vor.u32 %v18263_v22, %v15847_v11  ;;  %v15567_v11 = vld [vmem:[%s27772_s3 + $0x8a8] sm:$0xf]  ;;  %v18192_v22 = vld [vmem:[%s27772_s3 + $0x8b4] sm:$0xf0] }
 0x43c   : > { %7575 = vmatpush.bf16.msra.mxu3 %v15248_v18  ;;  %7617 = vmatpush.bf16.msrb.mxu2 %v15124_v54  ;;  %v18196_v18 = vld [vmem:[%s27772_s3 + $0x8d4] sm:$0xf0]  ;;  %v24972_v54 = vpop.f32.mrf.mxu0 }
 0x43d   : > { %8460 = vmatpush.bf16.msra.mxu1 %v15624_v53  ;;  %v18158_v53 = vld [vmem:[%s27772_s3 + $0x7ac] sm:$0xf]  ;;  %v15584_v27 = vor.u32 %v18196_v18, %v15583_v48  ;;  %v15281_v18 = vld [vmem:[%s27772_s3 + $0x778] sm:$0xf0] }
 0x43e   : > { %8501 = vmatpush.bf16.msrb.mxu0 %v15516_v42  ;;  %v15329_v42 = vld [vmem:[%s27772_s3 + $0x7d8] sm:$0xf0]  ;;  %v25006_v21 = vpop.f32.mrf.mxu3  ;;  %v18150_v48 = vld [vmem:[%s27772_s3 + $0x76c] sm:$0xf] }
 0x43f   : > { %v15332_v55 = vor.u32 %v18162_v40, %v15329_v42  ;;  %v15673_v40 = vld [vmem:[%s27772_s3 + $0x990] sm:$0xf0]  ;;  %v15551_v42 = vld [vmem:[%s27772_s3 + $0x888] sm:$0xf] }
 0x440   : > { %7576 = vmatpush.bf16.msra.mxu3 %v15232_v28  ;;  %7618 = vmatpush.bf16.msrb.mxu2 %v15108_v2  ;;  %v15816_v2 = vor.u32 %v18255_v63, %v15815_v59  ;;  %v15535_v59 = vld [vmem:[%s27772_s3 + $0x868] sm:$0xf]  ;;  %v18184_v63 = vld [vmem:[%s27772_s3 + $0x874] sm:$0xf0] }
 0x441   : > { %8461 = vmatpush.bf16.msra.mxu1 %v15608_v62  ;;  %v15692_v62 = vor.u32 %v18221_v37, %v15689_v46  ;;  %v15284_v37 = vor.u32 %v18150_v48, %v15281_v18  ;;  %v15536_v31 = vor.u32 %v18184_v63, %v15535_v59  ;;  %v18239_v18 = vld [vmem:[%s27772_s3 + $0xa2c] sm:$0xf0]  ;;  %v15233_v63 = vld [vmem:[%s27772_s3 + $0x718] sm:$0xf0] }
 0x442   : > { %8502 = vmatpush.bf16.msrb.mxu0 %v15500_v4  ;;  %v15313_v4 = vld [vmem:[%s27772_s3 + $0x7b8] sm:$0xf0] }
 0x443   : > { %7577 = vmatmul.bf16.vlgmr.msra.gmra.mxu3 %v23933_v19  ;;  %7619 = vmatmul.bf16.vlgmr.msrb.gmra.mxu2 %v23771_v61  ;;  %v15316_v28 = vor.u32 %v18158_v53, %v15313_v4  ;;  %v7438_v23 = vpop.f32.mrf.mxu1  ;;  %v15783_v53 = vld [vmem:[%s27772_s3 + $0xa60] sm:$0xf]  ;;  %v18247_v4 = vld [vmem:[%s27772_s3 + $0xa6c] sm:$0xf0] }
 0x444   : > { %7625 = vmatpush.bf16.msrb.mxu3 %v15348_v13  ;;  %8468 = vmatpush.bf16.msra.mxu2 %v15848_v57  ;;  %v15799_v13 = vld [vmem:[%s27772_s3 + $0xa80] sm:$0xf]  ;;  %v18251_v57 = vld [vmem:[%s27772_s3 + $0xa8c] sm:$0xf0]  ;;  %v15784_v46 = vor.u32 %v18247_v4, %v15783_v53  ;;  %v15503_v53 = vld [vmem:[%s27772_s3 + $0x828] sm:$0xf] }
 0x445   : > { %8510 = vmatpush.bf16.msrb.mxu1 %v15724_v17  ;;  %v18188_v17 = vld [vmem:[%s27772_s3 + $0x894] sm:$0xf0]  ;;  %v15800_v1 = vor.u32 %v18251_v57, %v15799_v13  ;;  %v18209_v13 = vld [vmem:[%s27772_s3 + $0x944] sm:$0xf] }
 0x446   : > { %8503 = vmatpush.bf16.msrb.mxu0 %v15484_v34  ;;  %8462 = vmatmul.bf16.vlgmr.msra.gmra.mxu1 %v23607_v33  ;;  %v15568_v34 = vor.u32 %v18192_v22, %v15567_v11  ;;  %v6603_v11 = vpop.f32.mrf.mxu2  ;;  %v18146_v22 = vld [vmem:[%s27772_s3 + $0x74c] sm:$0xf]  ;;  %v6561_v57 = vpop.f32.mrf.mxu3  ;;  %v18176_v4 = vld [vmem:[%s27772_s3 + $0x834] sm:$0xf0] }
 0x447   : > { %v25065_v9 = vadd.f32 %v6603_v11, %v24815_v45  ;;  %v15519_v45 = vld [vmem:[%s27772_s3 + $0x848] sm:$0xf] }
 0x448   : > { %7626 = vmatpush.bf16.msrb.mxu3 %v15332_v55  ;;  %8469 = vmatpush.bf16.msra.mxu2 %v15832_v36  ;;  %v15676_v55 = vor.u32 %v18217_v3, %v15673_v40  ;;  %v15552_v36 = vor.u32 %v18188_v17, %v15551_v42  ;;  %v15641_v3 = vld [vmem:[%s27772_s3 + $0x950] sm:$0xf0]  ;;  %v18180_v40 = vld [vmem:[%s27772_s3 + $0x854] sm:$0xf0]  ;;  %v25086_v42 = vadd.f32 %v6561_v57, %v24860_v56  ;;  %v15751_v56 = vld [vmem:[%s27772_s3 + $0xa20] sm:$0xf] }
 0x449   : > { %8504 = vmatmul.bf16.vlgmr.msrb.gmra.mxu0 %v23441_v50  ;;  %8511 = vmatpush.bf16.msrb.mxu1 %v15708_v25  ;;  %v18213_v25 = vld [vmem:[%s27772_s3 + $0x964] sm:$0xf]  ;;  %v15520_v48 = vor.u32 %v18180_v40, %v15519_v45  ;;  %v15752_v59 = vor.u32 %v18239_v18, %v15751_v56  ;;  %v15727_v45 = vld [vmem:[%s27772_s3 + $0x9e8] sm:$0xf] }
 0x44a   : > { %8552 = vmatpush.bf16.msra.mxu0 %v15600_v52  ;;  %v7424_v52 = vpop.f32.mrf.mxu0  ;;  %v18261_v57 = vld [vmem:[%s27772_s3 + $0xae4] sm:$0xf] }
 0x44b   : > { %v25032_v12 = vadd.f32 %v7438_v23, %v7424_v52  ;;  %v18142_v23 = vld [vmem:[%s27772_s3 + $0x72c] sm:$0xf] }
 0x44c   : > { %7627 = vmatpush.bf16.msrb.mxu3 %v15316_v28  ;;  %8470 = vmatpush.bf16.msra.mxu2 %v15816_v2  ;;  %v15265_v28 = vld [vmem:[%s27772_s3 + $0x758] sm:$0xf0] }
 0x44d   : > { %8512 = vmatpush.bf16.msrb.mxu1 %v15692_v62  ;;  %v15767_v62 = vld [vmem:[%s27772_s3 + $0xa40] sm:$0xf]  ;;  %v15268_v17 = vor.u32 %v18146_v22, %v15265_v28  ;;  %v15504_v22 = vor.u32 %v18176_v4, %v15503_v53  ;;  %v18201_v28 = vld [vmem:[%s27772_s3 + $0x904] sm:$0xf] }
 0x44e   : > { %8553 = vmatpush.bf16.msra.mxu0 %v15584_v27  ;;  %v15657_v27 = vld [vmem:[%s27772_s3 + $0x970] sm:$0xf0] }
 0x44f   : > { %v15660_v2 = vor.u32 %v18213_v25, %v15657_v27  ;;  %v18138_v25 = vld [vmem:[%s27772_s3 + $0x70c] sm:$0xf] }
 0x450   : > { %7628 = vmatpush.bf16.msrb.mxu3 %v15300_v58  ;;  %8471 = vmatpush.bf16.msra.mxu2 %v15800_v1  ;;  %v15249_v58 = vld [vmem:[%s27772_s3 + $0x738] sm:$0xf0]  ;;  %v15644_v1 = vor.u32 %v18209_v13, %v15641_v3  ;;  %v18295_v13 = vld [vmem:[%s27772_s3 + $0xbec] sm:$0xf0]  ;;  %v15849_v3 = vld [vmem:[%s27772_s3 + $0xaf0] sm:$0xf0]  ;;  %v15236_v40 = vor.u32 %v18138_v25, %v15233_v63 }
 0x451   : > { %8513 = vmatpush.bf16.msrb.mxu1 %v15676_v55  ;;  %v18205_v55 = vld [vmem:[%s27772_s3 + $0x924] sm:$0xf]  ;;  %v15252_v27 = vor.u32 %v18142_v23, %v15249_v58  ;;  %v18198_v23 = vld [vmem:[%s27772_s3 + $0x8ec] sm:$0xf]  ;;  %v15601_v58 = vld [vmem:[%s27772_s3 + $0x8f8] sm:$0xf0]  ;;  %v15852_v18 = vor.u32 %v18261_v57, %v15849_v3 }
 0x452   : > { %8554 = vmatpush.bf16.msra.mxu0 %v15568_v34  ;;  %v18243_v34 = vld [vmem:[%s27772_s3 + $0xa4c] sm:$0xf0]  ;;  %v15604_v4 = vor.u32 %v18198_v23, %v15601_v58  ;;  %v18257_v25 = vld [vmem:[%s27772_s3 + $0xac4] sm:$0xf]  ;;  %v18228_v63 = vld [vmem:[%s27772_s3 + $0x9d4] sm:$0xf0] }
 0x453   : > { %v15768_v52 = vor.u32 %v18243_v34, %v15767_v62  ;;  %v18172_v62 = vld [vmem:[%s27772_s3 + $0x814] sm:$0xf0]  ;;  %v15975_v34 = vld [vmem:[%s27772_s3 + $0xbe0] sm:$0xf]  ;;  %v18253_v57 = vld [vmem:[%s27772_s3 + $0xaa4] sm:$0xf] }
 0x454   : > { %7629 = vmatpush.bf16.msrb.mxu3 %v15284_v37  ;;  %8472 = vmatpush.bf16.msra.mxu2 %v15784_v46  ;;  %v15735_v37 = vld [vmem:[%s27772_s3 + $0xa00] sm:$0xf]  ;;  %v18235_v46 = vld [vmem:[%s27772_s3 + $0xa0c] sm:$0xf0]  ;;  %v15976_v56 = vor.u32 %v18295_v13, %v15975_v34  ;;  %v15817_v3 = vld [vmem:[%s27772_s3 + $0xab0] sm:$0xf0] }
 0x455   : > { %8514 = vmatpush.bf16.msrb.mxu1 %v15660_v2  ;;  %v15609_v2 = vld [vmem:[%s27772_s3 + $0x910] sm:$0xf0]  ;;  %v15820_v58 = vor.u32 %v18253_v57, %v15817_v3  ;;  %v18245_v3 = vld [vmem:[%s27772_s3 + $0xa64] sm:$0xf] }
 0x456   : > { %8555 = vmatpush.bf16.msra.mxu0 %v15552_v36  ;;  %v15625_v36 = vld [vmem:[%s27772_s3 + $0x930] sm:$0xf0] }
 0x457   : > { %v15628_v11 = vor.u32 %v18205_v55, %v15625_v36  ;;  %v15959_v55 = vld [vmem:[%s27772_s3 + $0xbc0] sm:$0xf]  ;;  %v18291_v36 = vld [vmem:[%s27772_s3 + $0xbcc] sm:$0xf0] }
 0x458   : > { %7630 = vmatpush.bf16.msrb.mxu3 %v15268_v17  ;;  %8473 = vmatpush.bf16.msra.mxu2 %v15768_v52  ;;  %v15736_v17 = vor.u32 %v18235_v46, %v15735_v37  ;;  %v18232_v52 = vld [vmem:[%s27772_s3 + $0x9f4] sm:$0xf0]  ;;  %v18194_v37 = vld [vmem:[%s27772_s3 + $0x8cc] sm:$0xf]  ;;  %v15585_v46 = vld [vmem:[%s27772_s3 + $0x8d8] sm:$0xf0] }
 0x459   : > { %8515 = vmatpush.bf16.msrb.mxu1 %v15644_v1  ;;  %v15612_v1 = vor.u32 %v18201_v28, %v15609_v2  ;;  %v15728_v53 = vor.u32 %v18232_v52, %v15727_v45  ;;  %v15960_v28 = vor.u32 %v18291_v36, %v15959_v55  ;;  %v15588_v13 = vor.u32 %v18194_v37, %v15585_v46  ;;  %v15695_v45 = vld [vmem:[%s27772_s3 + $0x9a8] sm:$0xf]  ;;  %v15569_v52 = vld [vmem:[%s27772_s3 + $0x8b8] sm:$0xf0] }
 0x45a   : > { %8556 = vmatpush.bf16.msra.mxu0 %v15536_v31  ;;  %v15487_v31 = vld [vmem:[%s27772_s3 + $0x808] sm:$0xf] }
 0x45c   : > { %7631 = vmatpush.bf16.msrb.mxu3 %v15252_v27  ;;  %8474 = vmatpush.bf16.msra.mxu2 %v15752_v59  ;;  %v15833_v27 = vld [vmem:[%s27772_s3 + $0xad0] sm:$0xf0]  ;;  %v15711_v59 = vld [vmem:[%s27772_s3 + $0x9c8] sm:$0xf] }
 0x45d   : > { %8516 = vmatpush.bf16.msrb.mxu1 %v15628_v11  ;;  %v25184_v11 = vpop.f32.mrf.mxu0  ;;  %v15836_v2 = vor.u32 %v18257_v25, %v15833_v27  ;;  %v15712_v34 = vor.u32 %v18228_v63, %v15711_v59  ;;  %v15679_v25 = vld [vmem:[%s27772_s3 + $0x988] sm:$0xf]  ;;  %v18220_v27 = vld [vmem:[%s27772_s3 + $0x994] sm:$0xf0]  ;;  %v18186_v59 = vld [vmem:[%s27772_s3 + $0x88c] sm:$0xf] }
 0x45e   : > { %8557 = vmatpush.bf16.msra.mxu0 %v15520_v48  ;;  %v15488_v48 = vor.u32 %v18172_v62, %v15487_v31  ;;  %v15943_v31 = vld [vmem:[%s27772_s3 + $0xba0] sm:$0xf]  ;;  %v18287_v62 = vld [vmem:[%s27772_s3 + $0xbac] sm:$0xf0]  ;;  %v15553_v63 = vld [vmem:[%s27772_s3 + $0x898] sm:$0xf0] }
 0x45f   : > { %v15944_v23 = vor.u32 %v18287_v62, %v15943_v31  ;;  %v15911_v31 = vld [vmem:[%s27772_s3 + $0xb60] sm:$0xf]  ;;  %v18279_v62 = vld [vmem:[%s27772_s3 + $0xb6c] sm:$0xf0]  ;;  %v15556_v57 = vor.u32 %v18186_v59, %v15553_v63  ;;  %v15769_v59 = vld [vmem:[%s27772_s3 + $0xa50] sm:$0xf0] }
 0x460   : > { %7632 = vmatpush.bf16.msrb.mxu3 %v15236_v40  ;;  %8475 = vmatpush.bf16.msra.mxu2 %v15736_v17  ;;  %v18224_v40 = vld [vmem:[%s27772_s3 + $0x9b4] sm:$0xf0]  ;;  %v18190_v17 = vld [vmem:[%s27772_s3 + $0x8ac] sm:$0xf]  ;;  %v15647_v63 = vld [vmem:[%s27772_s3 + $0x948] sm:$0xf] }
 0x461   : > { %8517 = vmatpush.bf16.msrb.mxu1 %v15612_v1  ;;  %v15927_v1 = vld [vmem:[%s27772_s3 + $0xb80] sm:$0xf]  ;;  %v15696_v55 = vor.u32 %v18224_v40, %v15695_v45  ;;  %v15572_v36 = vor.u32 %v18190_v17, %v15569_v52  ;;  %v15785_v45 = vld [vmem:[%s27772_s3 + $0xa70] sm:$0xf0]  ;;  %v15663_v40 = vld [vmem:[%s27772_s3 + $0x968] sm:$0xf] }
 0x462   : > { %8558 = vmatpush.bf16.msra.mxu0 %v15504_v22  ;;  %v25186_v22 = vpop.f32.mrf.mxu1  ;;  %v18216_v17 = vld [vmem:[%s27772_s3 + $0x974] sm:$0xf0]  ;;  %v18182_v52 = vld [vmem:[%s27772_s3 + $0x86c] sm:$0xf] }
 0x463   : > { %7633 = vmatmul.bf16.vlgmr.msrb.gmra.mxu3 %v23933_v19  ;;  %8476 = vmatmul.bf16.vlgmr.msra.gmra.mxu2 %v23771_v61 }
 0x464   : > { %8482 = vmatpush.bf16.msra.mxu3 %v15976_v56  ;;  %8524 = vmatpush.bf16.msrb.mxu2 %v15852_v18  ;;  %v25222_v56 = vpop.f32.mrf.mxu2  ;;  %v25224_v18 = vpop.f32.mrf.mxu3 }
 0x465   : > { %8566 = vmatpush.bf16.msra.mxu1 %v15728_v53  ;;  %v18249_v53 = vld [vmem:[%s27772_s3 + $0xa84] sm:$0xf]  ;;  %v7480_v37 = vpop.f32.mrf.mxu0 }
 0x466   : > { %8559 = vmatpush.bf16.msra.mxu0 %v15488_v48  ;;  %8518 = vmatmul.bf16.vlgmr.msrb.gmra.mxu1 %v23607_v33  ;;  %v18283_v48 = vld [vmem:[%s27772_s3 + $0xb8c] sm:$0xf0] }
 0x468   : > { %8483 = vmatpush.bf16.msra.mxu3 %v15960_v28  ;;  %8525 = vmatpush.bf16.msrb.mxu2 %v15836_v2  ;;  %v15928_v28 = vor.u32 %v18283_v48, %v15927_v1  ;;  %v15788_v1 = vor.u32 %v18245_v3, %v15785_v45  ;;  %v15895_v48 = vld [vmem:[%s27772_s3 + $0xb40] sm:$0xf]  ;;  %v18237_v45 = vld [vmem:[%s27772_s3 + $0xa24] sm:$0xf] }
 0x469   : > { %8560 = vmatmul.bf16.vlgmr.msra.gmra.mxu0 %v23441_v50  ;;  %8567 = vmatpush.bf16.msra.mxu1 %v15712_v34 }
 0x46a   : > { %8608 = vmatpush.bf16.msrb.mxu0 %v15604_v4  ;;  %v15801_v4 = vld [vmem:[%s27772_s3 + $0xa90] sm:$0xf0]  ;;  %v7494_v46 = vpop.f32.mrf.mxu1 }
 0x46b   : > { %v15804_v2 = vor.u32 %v18249_v53, %v15801_v4  ;;  %v25250_v34 = vadd.f32 %v7494_v46, %v7480_v37 }
 0x46c   : > { %8484 = vmatpush.bf16.msra.mxu3 %v15944_v23  ;;  %8526 = vmatpush.bf16.msrb.mxu2 %v15820_v58  ;;  %v15537_v23 = vld [vmem:[%s27772_s3 + $0x878] sm:$0xf0]  ;;  %v15912_v58 = vor.u32 %v18279_v62, %v15911_v31  ;;  %v6617_v4 = vpop.f32.mrf.mxu3 }
 0x46d   : > { %8568 = vmatpush.bf16.msra.mxu1 %v15696_v55  ;;  %v18275_v55 = vld [vmem:[%s27772_s3 + $0xb4c] sm:$0xf0]  ;;  %v15540_v53 = vor.u32 %v18182_v52, %v15537_v23  ;;  %v25286_v37 = vadd.f32 %v6617_v4, %v25065_v9  ;;  %v15521_v31 = vld [vmem:[%s27772_s3 + $0x858] sm:$0xf0]  ;;  %v18208_v52 = vld [vmem:[%s27772_s3 + $0x934] sm:$0xf0] }
 0x46e   : > { %8609 = vmatpush.bf16.msrb.mxu0 %v15588_v13  ;;  %v15680_v13 = vor.u32 %v18220_v27, %v15679_v25  ;;  %v7452_v25 = vpop.f32.mrf.mxu2  ;;  %v18241_v27 = vld [vmem:[%s27772_s3 + $0xa44] sm:$0xf]  ;;  %v15896_v62 = vor.u32 %v18275_v55, %v15895_v48  ;;  %v18174_v23 = vld [vmem:[%s27772_s3 + $0x82c] sm:$0xf]  ;;  %v15737_v4 = vld [vmem:[%s27772_s3 + $0xa10] sm:$0xf0] }
 0x46f   : > { %v25289_v46 = vadd.f32 %v7452_v25, %v25032_v12  ;;  %v15772_v9 = vor.u32 %v18241_v27, %v15769_v59  ;;  %v15879_v12 = vld [vmem:[%s27772_s3 + $0xb20] sm:$0xf]  ;;  %v15615_v59 = vld [vmem:[%s27772_s3 + $0x908] sm:$0xf] }
 0x470   : > { %8485 = vmatpush.bf16.msra.mxu3 %v15928_v28  ;;  %8527 = vmatpush.bf16.msrb.mxu2 %v15804_v2  ;;  %v18212_v28 = vld [vmem:[%s27772_s3 + $0x954] sm:$0xf0]  ;;  %v18178_v2 = vld [vmem:[%s27772_s3 + $0x84c] sm:$0xf] }
 0x471   : > { %8569 = vmatpush.bf16.msra.mxu1 %v15680_v13  ;;  %v18271_v13 = vld [vmem:[%s27772_s3 + $0xb2c] sm:$0xf0]  ;;  %v15524_v3 = vor.u32 %v18178_v2, %v15521_v31  ;;  %v15489_v2 = vld [vmem:[%s27772_s3 + $0x818] sm:$0xf0]  ;;  %v18293_v31 = vld [vmem:[%s27772_s3 + $0xbe4] sm:$0xf] }
 0x472   : > { %8610 = vmatpush.bf16.msrb.mxu0 %v15572_v36  ;;  %v15664_v36 = vor.u32 %v18216_v17, %v15663_v40  ;;  %v15753_v40 = vld [vmem:[%s27772_s3 + $0xa30] sm:$0xf0]  ;;  %v15631_v17 = vld [vmem:[%s27772_s3 + $0x928] sm:$0xf]  ;;  %v15880_v48 = vor.u32 %v18271_v13, %v15879_v12  ;;  %v18264_v12 = vld [vmem:[%s27772_s3 + $0xaf4] sm:$0xf0] }
 0x473   : > { %v15756_v55 = vor.u32 %v18237_v45, %v15753_v40  ;;  %v15632_v25 = vor.u32 %v18208_v52, %v15631_v17  ;;  %v18230_v13 = vld [vmem:[%s27772_s3 + $0x9ec] sm:$0xf]  ;;  %v15729_v45 = vld [vmem:[%s27772_s3 + $0x9f8] sm:$0xf0]  ;;  %v16231_v40 = vld [vmem:[%s27772_s3 + $0xce0] sm:$0xf] }
 0x474   : > { %8486 = vmatpush.bf16.msra.mxu3 %v15912_v58  ;;  %8528 = vmatpush.bf16.msrb.mxu2 %v15788_v1  ;;  %v15505_v58 = vld [vmem:[%s27772_s3 + $0x838] sm:$0xf0]  ;;  %v15863_v1 = vld [vmem:[%s27772_s3 + $0xb00] sm:$0xf]  ;;  %v18327_v17 = vld [vmem:[%s27772_s3 + $0xcec] sm:$0xf0] }
 0x475   : > { %8570 = vmatpush.bf16.msra.mxu1 %v15664_v36  ;;  %v18267_v36 = vld [vmem:[%s27772_s3 + $0xb0c] sm:$0xf0]  ;;  %v15508_v27 = vor.u32 %v18174_v23, %v15505_v58 }
 0x476   : > { %8611 = vmatpush.bf16.msrb.mxu0 %v15556_v57  ;;  %v15648_v57 = vor.u32 %v18212_v28, %v15647_v63  ;;  %v18204_v63 = vld [vmem:[%s27772_s3 + $0x914] sm:$0xf0]  ;;  %v18170_v28 = vld [vmem:[%s27772_s3 + $0x80c] sm:$0xf] }
 0x477   : > { %v15616_v52 = vor.u32 %v18204_v63, %v15615_v59  ;;  %v15492_v23 = vor.u32 %v18170_v28, %v15489_v2  ;;  %v15713_v59 = vld [vmem:[%s27772_s3 + $0x9d8] sm:$0xf0]  ;;  %v16215_v63 = vld [vmem:[%s27772_s3 + $0xcc0] sm:$0xf]  ;;  %v18323_v28 = vld [vmem:[%s27772_s3 + $0xccc] sm:$0xf0]  ;;  %v25396_v2 = vpop.f32.mrf.mxu0 }
 0x478   : > { %8487 = vmatpush.bf16.msra.mxu3 %v15896_v62  ;;  %8529 = vmatpush.bf16.msrb.mxu2 %v15772_v9  ;;  %v15977_v62 = vld [vmem:[%s27772_s3 + $0xbf0] sm:$0xf0]  ;;  %v15855_v9 = vld [vmem:[%s27772_s3 + $0xae8] sm:$0xf] }
 0x479   : > { %8571 = vmatpush.bf16.msra.mxu1 %v15648_v57  ;;  %v15864_v57 = vor.u32 %v18267_v36, %v15863_v1  ;;  %v15980_v58 = vor.u32 %v18293_v31, %v15977_v62  ;;  %v18289_v1 = vld [vmem:[%s27772_s3 + $0xbc4] sm:$0xf]  ;;  %v15732_v36 = vor.u32 %v18230_v13, %v15729_v45  ;;  %v25398_v31 = vpop.f32.mrf.mxu1  ;;  %v15945_v13 = vld [vmem:[%s27772_s3 + $0xbb0] sm:$0xf0]  ;;  %v15823_v45 = vld [vmem:[%s27772_s3 + $0xaa8] sm:$0xf] }
 0x47a   : > { %8612 = vmatpush.bf16.msrb.mxu0 %v15540_v53  ;;  %v18233_v53 = vld [vmem:[%s27772_s3 + $0xa04] sm:$0xf] }
 0x47c   : > { %8488 = vmatpush.bf16.msra.mxu3 %v15880_v48  ;;  %8530 = vmatpush.bf16.msrb.mxu2 %v15756_v55  ;;  %v15856_v48 = vor.u32 %v18264_v12, %v15855_v9  ;;  %v15961_v55 = vld [vmem:[%s27772_s3 + $0xbd0] sm:$0xf0]  ;;  %v18285_v12 = vld [vmem:[%s27772_s3 + $0xba4] sm:$0xf] }
 0x47d   : > { %8572 = vmatpush.bf16.msra.mxu1 %v15632_v25  ;;  %v18260_v25 = vld [vmem:[%s27772_s3 + $0xad4] sm:$0xf0]  ;;  %v15964_v62 = vor.u32 %v18289_v1, %v15961_v55  ;;  %v18281_v55 = vld [vmem:[%s27772_s3 + $0xb84] sm:$0xf] }
 0x47e   : > { %8613 = vmatpush.bf16.msrb.mxu0 %v15524_v3  ;;  %v15740_v3 = vor.u32 %v18233_v53, %v15737_v4  ;;  %v16232_v53 = vor.u32 %v18327_v17, %v16231_v40  ;;  %v15839_v4 = vld [vmem:[%s27772_s3 + $0xac8] sm:$0xf]  ;;  %v18256_v40 = vld [vmem:[%s27772_s3 + $0xab4] sm:$0xf0]  ;;  %v18222_v17 = vld [vmem:[%s27772_s3 + $0x9ac] sm:$0xf] }
 0x47f   : > { %v15840_v9 = vor.u32 %v18260_v25, %v15839_v4  ;;  %v15824_v1 = vor.u32 %v18256_v40, %v15823_v45  ;;  %v25436_v4 = vpop.f32.mrf.mxu2  ;;  %v18277_v40 = vld [vmem:[%s27772_s3 + $0xb64] sm:$0xf] }
 0x480   : > { %8489 = vmatpush.bf16.msra.mxu3 %v15864_v57  ;;  %8531 = vmatpush.bf16.msrb.mxu2 %v15740_v3  ;;  %v16216_v3 = vor.u32 %v18323_v28, %v16215_v63  ;;  %v18252_v63 = vld [vmem:[%s27772_s3 + $0xa94] sm:$0xf0]  ;;  %v18218_v28 = vld [vmem:[%s27772_s3 + $0x98c] sm:$0xf] }
 0x481   : > { %8573 = vmatpush.bf16.msra.mxu1 %v15616_v52  ;;  %v15697_v52 = vld [vmem:[%s27772_s3 + $0x9b8] sm:$0xf0] }
 0x482   : > { %8614 = vmatpush.bf16.msrb.mxu0 %v15508_v27  ;;  %v18226_v27 = vld [vmem:[%s27772_s3 + $0x9cc] sm:$0xf]  ;;  %v15700_v25 = vor.u32 %v18222_v17, %v15697_v52  ;;  %v15913_v17 = vld [vmem:[%s27772_s3 + $0xb70] sm:$0xf0] }
 0x483   : > { %v15716_v57 = vor.u32 %v18226_v27, %v15713_v59  ;;  %8490 = vmatmul.bf16.vlgmr.msra.gmra.mxu3 %v23933_v19  ;;  %8532 = vmatmul.bf16.vlgmr.msrb.gmra.mxu2 %v23771_v61  ;;  %v15807_v59 = vld [vmem:[%s27772_s3 + $0xa88] sm:$0xf] }
 0x484   : > { %8538 = vmatpush.bf16.msrb.mxu3 %v15980_v58  ;;  %8580 = vmatpush.bf16.msra.mxu2 %v15856_v48  ;;  %v18319_v58 = vld [vmem:[%s27772_s3 + $0xcac] sm:$0xf0]  ;;  %v15948_v48 = vor.u32 %v18285_v12, %v15945_v13  ;;  %v7536_v13 = vpop.f32.mrf.mxu0  ;;  %v15808_v45 = vor.u32 %v18252_v63, %v15807_v59  ;;  %v6424_v59 = vadd.f32 %v24429_v51, %v24397_v49  ;;  %v15775_v51 = vld [vmem:[%s27772_s3 + $0xa48] sm:$0xf] }
 0x485   : > { %8622 = vmatpush.bf16.msrb.mxu1 %v15732_v36  ;;  %v15929_v36 = vld [vmem:[%s27772_s3 + $0xb90] sm:$0xf0]  ;;  %v18315_v12 = vld [vmem:[%s27772_s3 + $0xc8c] sm:$0xf0]  ;;  %v15916_v63 = vor.u32 %v18277_v40, %v15913_v17  ;;  %v15649_v17 = vld [vmem:[%s27772_s3 + $0x958] sm:$0xf0] }
 0x486   : > { %8615 = vmatpush.bf16.msrb.mxu0 %v15492_v23  ;;  %v16199_v23 = vld [vmem:[%s27772_s3 + $0xca0] sm:$0xf]  ;;  %8574 = vmatmul.bf16.vlgmr.msra.gmra.mxu1 %v23607_v33 }
 0x487   : > { %v16200_v27 = vor.u32 %v18319_v58, %v16199_v23  ;;  %v7508_v49 = vpop.f32.mrf.mxu2 }
 0x488   : > { %8539 = vmatpush.bf16.msrb.mxu3 %v15964_v62  ;;  %8581 = vmatpush.bf16.msra.mxu2 %v15840_v9  ;;  %v15681_v62 = vld [vmem:[%s27772_s3 + $0x998] sm:$0xf0]  ;;  %v16183_v9 = vld [vmem:[%s27772_s3 + $0xc80] sm:$0xf]  ;;  %v25504_v40 = vadd.f32 %v7508_v49, %v25250_v34  ;;  %v18269_v34 = vld [vmem:[%s27772_s3 + $0xb24] sm:$0xf] }
 0x489   : > { %8616 = vmatmul.bf16.vlgmr.msrb.gmra.mxu0 %v23441_v50  ;;  %8623 = vmatpush.bf16.msrb.mxu1 %v15716_v57  ;;  %v7550_v57 = vpop.f32.mrf.mxu1  ;;  %v15684_v23 = vor.u32 %v18218_v28, %v15681_v62  ;;  %v16184_v58 = vor.u32 %v18315_v12, %v16183_v9  ;;  %v18273_v62 = vld [vmem:[%s27772_s3 + $0xb44] sm:$0xf]  ;;  %v15897_v9 = vld [vmem:[%s27772_s3 + $0xb50] sm:$0xf0]  ;;  %v6438_v12 = vadd.f32 %v24680_v7, %v6424_v59 }
 0x48a   : > { %9441 = vmatpush.bf16.msra.mxu0 %v16232_v53  ;;  %v25434_v53 = vpop.f32.mrf.mxu3  ;;  %v25462_v52 = vadd.f32 %v7550_v57, %v7536_v13  ;;  %v7441_v59 = vadd.f32 %v25186_v22, %v25184_v11  ;;  %v15865_v11 = vld [vmem:[%s27772_s3 + $0xb10] sm:$0xf0] }
 0x48c   : > { %8540 = vmatpush.bf16.msrb.mxu3 %v15948_v48  ;;  %8582 = vmatpush.bf16.msra.mxu2 %v15824_v1  ;;  %v15791_v48 = vld [vmem:[%s27772_s3 + $0xa68] sm:$0xf]  ;;  %v18248_v1 = vld [vmem:[%s27772_s3 + $0xa74] sm:$0xf0]  ;;  %v7455_v22 = vadd.f32 %v25436_v4, %v7441_v59 }
 0x48d   : > { %8624 = vmatpush.bf16.msrb.mxu1 %v15700_v25  ;;  %v16167_v25 = vld [vmem:[%s27772_s3 + $0xc60] sm:$0xf]  ;;  %v15792_v28 = vor.u32 %v18248_v1, %v15791_v48  ;;  %v6452_v48 = vadd.f32 %v24886_v39, %v6438_v12  ;;  %v15881_v1 = vld [vmem:[%s27772_s3 + $0xb30] sm:$0xf0]  ;;  %v15759_v39 = vld [vmem:[%s27772_s3 + $0xa28] sm:$0xf] }
 0x48e   : > { %9442 = vmatpush.bf16.msra.mxu0 %v16216_v3  ;;  %v15932_v3 = vor.u32 %v18281_v55, %v15929_v36  ;;  %v18214_v55 = vld [vmem:[%s27772_s3 + $0x96c] sm:$0xf]  ;;  %v15665_v36 = vld [vmem:[%s27772_s3 + $0x978] sm:$0xf0] }
 0x48f   : > { %v15668_v13 = vor.u32 %v18214_v55, %v15665_v36  ;;  %v6626_v12 = vrot.slane %v6452_v48, 6  ;;  %v18299_v48 = vld [vmem:[%s27772_s3 + $0xc0c] sm:$0xf0] }
 0x490   : > { %8541 = vmatpush.bf16.msrb.mxu3 %v15932_v3  ;;  %8583 = vmatpush.bf16.msra.mxu2 %v15808_v45  ;;  %v18244_v3 = vld [vmem:[%s27772_s3 + $0xa54] sm:$0xf0]  ;;  %v18210_v45 = vld [vmem:[%s27772_s3 + $0x94c] sm:$0xf] }
 0x491   : > { %8625 = vmatpush.bf16.msrb.mxu1 %v15684_v23  ;;  %v16151_v23 = vld [vmem:[%s27772_s3 + $0xc40] sm:$0xf]  ;;  %v15652_v55 = vor.u32 %v18210_v45, %v15649_v17 }
 0x492   : > { %9443 = vmatpush.bf16.msra.mxu0 %v16200_v27  ;;  %v18311_v27 = vld [vmem:[%s27772_s3 + $0xc6c] sm:$0xf0]  ;;  %v7466_v44 = vpop.f32.mrf.mxu3 }
 0x493   : > { %v16168_v57 = vor.u32 %v18311_v27, %v16167_v25  ;;  %v25501_v7 = vadd.f32 %v7466_v44, %v25289_v46  ;;  %v15900_v44 = vor.u32 %v18273_v62, %v15897_v9  ;;  %v15776_v46 = vor.u32 %v18244_v3, %v15775_v51  ;;  %v18240_v25 = vld [vmem:[%s27772_s3 + $0xa34] sm:$0xf0]  ;;  %v18206_v27 = vld [vmem:[%s27772_s3 + $0x92c] sm:$0xf]  ;;  %v18303_v62 = vld [vmem:[%s27772_s3 + $0xc2c] sm:$0xf0] }
 0x494   : > { %8542 = vmatpush.bf16.msrb.mxu3 %v15916_v63  ;;  %8584 = vmatpush.bf16.msra.mxu2 %v15792_v28  ;;  %v15633_v63 = vld [vmem:[%s27772_s3 + $0x938] sm:$0xf0]  ;;  %v16135_v28 = vld [vmem:[%s27772_s3 + $0xc20] sm:$0xf]  ;;  %v6622_v9 = vrot.slane %v24842_v16, 6  ;;  %v15760_v49 = vor.u32 %v18240_v25, %v15759_v39 }
 0x495   : > { %8626 = vmatpush.bf16.msrb.mxu1 %v15668_v13  ;;  %v18265_v13 = vld [vmem:[%s27772_s3 + $0xb04] sm:$0xf]  ;;  %v15743_v51 = vld [vmem:[%s27772_s3 + $0xa08] sm:$0xf]  ;;  %v18236_v16 = vld [vmem:[%s27772_s3 + $0xa14] sm:$0xf0]  ;;  %v15636_v45 = vor.u32 %v18206_v27, %v15633_v63  ;;  %v16136_v4 = vor.u32 %v18303_v62, %v16135_v28 }
 0x496   : > { %9444 = vmatpush.bf16.msra.mxu0 %v16184_v58  ;;  %v18307_v58 = vld [vmem:[%s27772_s3 + $0xc4c] sm:$0xf0]  ;;  %v18202_v3 = vld [vmem:[%s27772_s3 + $0x90c] sm:$0xf]  ;;  %v6634_v25 = vsel %vm1488_vm0, %v6626_v12, %v6622_v9  ;;  %v7639_v27 = vrot.slane %v25501_v7, 7  ;;  %v15868_v63 = vor.u32 %v18265_v13, %v15865_v11  ;;  %v15744_v28 = vor.u32 %v18236_v16, %v15743_v51 }
 0x497   : > { %v16152_v36 = vor.u32 %v18307_v58, %v16151_v23  ;;  %v15617_v23 = vld [vmem:[%s27772_s3 + $0x918] sm:$0xf0]  ;;  %v16119_v58 = vld [vmem:[%s27772_s3 + $0xc00] sm:$0xf]  ;;  %v18359_v39 = vld [vmem:[%s27772_s3 + $0xdec] sm:$0xf0]  ;;  %v6630_v7 = vsel %vm1488_vm0, %v6622_v9, %v6626_v12 }
 0x498   : > { %8543 = vmatpush.bf16.msrb.mxu3 %v15900_v44  ;;  %8585 = vmatpush.bf16.msra.mxu2 %v15776_v46  ;;  %v15983_v46 = vld [vmem:[%s27772_s3 + $0xbe8] sm:$0xf]  ;;  %v18325_v62 = vld [vmem:[%s27772_s3 + $0xce4] sm:$0xf]  ;;  %v16120_v38 = vor.u32 %v18299_v48, %v16119_v58  ;;  %v18292_v11 = vld [vmem:[%s27772_s3 + $0xbd4] sm:$0xf0] }
 0x499   : > { %8627 = vmatpush.bf16.msrb.mxu1 %v15652_v55  ;;  %v15857_v55 = vld [vmem:[%s27772_s3 + $0xaf8] sm:$0xf0]  ;;  %v15967_v13 = vld [vmem:[%s27772_s3 + $0xbc8] sm:$0xf]  ;;  %v18258_v9 = vld [vmem:[%s27772_s3 + $0xacc] sm:$0xf] }
 0x49a   : > { %9445 = vmatpush.bf16.msra.mxu0 %v16168_v57  ;;  %v15884_v57 = vor.u32 %v18269_v34, %v15881_v1  ;;  %v7468_v17 = vpop.f32.mrf.mxu3  ;;  %v18296_v34 = vld [vmem:[%s27772_s3 + $0xbf4] sm:$0xf0]  ;;  %v18262_v1 = vld [vmem:[%s27772_s3 + $0xaec] sm:$0xf]  ;;  %v15841_v12 = vld [vmem:[%s27772_s3 + $0xad8] sm:$0xf0] }
 0x49b   : > { %v7469_v44 = vadd.f32 %v7468_v17, %v7455_v22  ;;  %v16233_v22 = vld [vmem:[%s27772_s3 + $0xcf0] sm:$0xf0]  ;;  %v15620_v17 = vor.u32 %v18202_v3, %v15617_v23  ;;  %v18355_v58 = vld [vmem:[%s27772_s3 + $0xdcc] sm:$0xf0]  ;;  %v18321_v48 = vld [vmem:[%s27772_s3 + $0xcc4] sm:$0xf] }
 0x49c   : > { %8544 = vmatpush.bf16.msrb.mxu3 %v15884_v57  ;;  %8586 = vmatpush.bf16.msra.mxu2 %v15760_v49  ;;  %v15984_v57 = vor.u32 %v18296_v34, %v15983_v46  ;;  %v15860_v49 = vor.u32 %v18262_v1, %v15857_v55  ;;  %v6638_v46 = vsel %vm446_vm1, %v6634_v25, 0.0  ;;  %v25631_v1 = vpop.f32.mrf.mxu0  ;;  %v25633_v55 = vpop.f32.mrf.mxu1 }
 0x49d   : > { %v7643_v59 = vrot.slane %v7469_v44, 7  ;;  %8628 = vmatpush.bf16.msrb.mxu1 %v15636_v45  ;;  %v16236_v45 = vor.u32 %v18325_v62, %v16233_v22  ;;  %v16217_v44 = vld [vmem:[%s27772_s3 + $0xcd0] sm:$0xf0]  ;;  %v15825_v62 = vld [vmem:[%s27772_s3 + $0xab8] sm:$0xf0] }
 0x49e   : > { %9446 = vmatpush.bf16.msra.mxu0 %v16152_v36  ;;  %v16359_v36 = vld [vmem:[%s27772_s3 + $0xde0] sm:$0xf] }
 0x49f   : > { %v7651_v51 = vsel %vm2510_vm2, %v7643_v59, %v7639_v27  ;;  %v7647_v16 = vsel %vm2510_vm2, %v7639_v27, %v7643_v59  ;;  %v16360_v3 = vor.u32 %v18359_v39, %v16359_v36  ;;  %v15968_v36 = vor.u32 %v18292_v11, %v15967_v13  ;;  %v15951_v27 = vld [vmem:[%s27772_s3 + $0xba8] sm:$0xf]  ;;  %v16327_v22 = vld [vmem:[%s27772_s3 + $0xda0] sm:$0xf] }
 0x4a0   : > { %v25616_v23 = vadd.f32 %v7647_v16, %v6630_v7  ;;  %8545 = vmatpush.bf16.msrb.mxu3 %v15868_v63  ;;  %8587 = vmatpush.bf16.msra.mxu2 %v15744_v28  ;;  %v7655_v34 = vsel %vm454_vm3, %v7651_v51, 0.0  ;;  %v15844_v39 = vor.u32 %v18258_v9, %v15841_v12  ;;  %v16220_v63 = vor.u32 %v18321_v48, %v16217_v44  ;;  %v18254_v28 = vld [vmem:[%s27772_s3 + $0xaac] sm:$0xf]  ;;  %v18317_v7 = vld [vmem:[%s27772_s3 + $0xca4] sm:$0xf]  ;;  %v25671_v16 = vpop.f32.mrf.mxu2 }
 0x4a1   : > { %8629 = vmatpush.bf16.msrb.mxu1 %v15620_v17  ;;  %v25641_v25 = vadd.f32 %v7655_v34, %v6638_v46  ;;  %v18351_v17 = vld [vmem:[%s27772_s3 + $0xdac] sm:$0xf0]  ;;  %v15828_v13 = vor.u32 %v18254_v28, %v15825_v62  ;;  %v15935_v11 = vld [vmem:[%s27772_s3 + $0xb88] sm:$0xf]  ;;  %v18284_v51 = vld [vmem:[%s27772_s3 + $0xb94] sm:$0xf0] }
 0x4a2   : > { %9447 = vmatpush.bf16.msra.mxu0 %v16136_v4  ;;  %v16343_v4 = vld [vmem:[%s27772_s3 + $0xdc0] sm:$0xf]  ;;  %v18250_v9 = vld [vmem:[%s27772_s3 + $0xa8c] sm:$0xf]  ;;  %v15809_v12 = vld [vmem:[%s27772_s3 + $0xa98] sm:$0xf0] }
 0x4a3   : > { %v16344_v59 = vor.u32 %v18355_v58, %v16343_v4  ;;  %8546 = vmatmul.bf16.vlgmr.msrb.gmra.mxu3 %v23933_v19  ;;  %8588 = vmatmul.bf16.vlgmr.msra.gmra.mxu2 %v23771_v61  ;;  %v16311_v4 = vld [vmem:[%s27772_s3 + $0xd80] sm:$0xf]  ;;  %v18347_v58 = vld [vmem:[%s27772_s3 + $0xd8c] sm:$0xf0]  ;;  %v18313_v48 = vld [vmem:[%s27772_s3 + $0xc84] sm:$0xf] }
 0x4a4   : > { %8594 = vmatpush.bf16.msra.mxu3 %v15984_v57  ;;  %8636 = vmatpush.bf16.msrb.mxu2 %v15860_v49  ;;  %v16201_v57 = vld [vmem:[%s27772_s3 + $0xcb0] sm:$0xf0]  ;;  %v7592_v46 = vpop.f32.mrf.mxu0  ;;  %v7606_v34 = vpop.f32.mrf.mxu1  ;;  %v18246_v62 = vld [vmem:[%s27772_s3 + $0xa6c] sm:$0xf] }
 0x4a5   : > { %9455 = vmatpush.bf16.msra.mxu1 %v16360_v3  ;;  %v16328_v3 = vor.u32 %v18351_v17, %v16327_v22  ;;  %v16185_v44 = vld [vmem:[%s27772_s3 + $0xc90] sm:$0xf0]  ;;  %v15793_v22 = vld [vmem:[%s27772_s3 + $0xa78] sm:$0xf0]  ;;  %v16295_v17 = vld [vmem:[%s27772_s3 + $0xd60] sm:$0xf] }
 0x4a6   : > { %9448 = vmatpush.bf16.msra.mxu0 %v16120_v38  ;;  %v18288_v38 = vld [vmem:[%s27772_s3 + $0xbb4] sm:$0xf0]  ;;  %8630 = vmatmul.bf16.vlgmr.msrb.gmra.mxu1 %v23607_v33  ;;  %v16188_v28 = vor.u32 %v18313_v48, %v16185_v44  ;;  %v15777_v48 = vld [vmem:[%s27772_s3 + $0xa58] sm:$0xf0]  ;;  %v16279_v44 = vld [vmem:[%s27772_s3 + $0xd40] sm:$0xf] }
 0x4a7   : > { %v15952_v49 = vor.u32 %v18288_v38, %v15951_v27  ;;  %v15919_v27 = vld [vmem:[%s27772_s3 + $0xb68] sm:$0xf]  ;;  %v18280_v38 = vld [vmem:[%s27772_s3 + $0xb74] sm:$0xf0] }
 0x4a8   : > { %8595 = vmatpush.bf16.msra.mxu3 %v15968_v36  ;;  %8637 = vmatpush.bf16.msrb.mxu2 %v15844_v39  ;;  %v15936_v36 = vor.u32 %v18284_v51, %v15935_v11  ;;  %v15812_v39 = vor.u32 %v18250_v9, %v15809_v12  ;;  %v15920_v11 = vor.u32 %v18280_v38, %v15919_v27 }
 0x4a9   : > { %9449 = vmatmul.bf16.vlgmr.msra.gmra.mxu0 %v23441_v50  ;;  %9456 = vmatpush.bf16.msra.mxu1 %v16344_v59  ;;  %v25697_v59 = vadd.f32 %v7606_v34, %v7592_v46  ;;  %v15796_v51 = vor.u32 %v18246_v62, %v15793_v22  ;;  %v18339_v34 = vld [vmem:[%s27772_s3 + $0xd4c] sm:$0xf0]  ;;  %v15761_v22 = vld [vmem:[%s27772_s3 + $0xa38] sm:$0xf0] }
 0x4aa   : > { %9497 = vmatpush.bf16.msrb.mxu0 %v16236_v45  ;;  %v16204_v45 = vor.u32 %v18317_v7, %v16201_v57  ;;  %v18343_v7 = vld [vmem:[%s27772_s3 + $0xd6c] sm:$0xf0]  ;;  %v18309_v57 = vld [vmem:[%s27772_s3 + $0xc64] sm:$0xf] }
 0x4ab   : > { %v16296_v12 = vor.u32 %v18343_v7, %v16295_v17  ;;  %v16263_v17 = vld [vmem:[%s27772_s3 + $0xd20] sm:$0xf]  ;;  %v7497_v7 = vadd.f32 %v25398_v31, %v25396_v2  ;;  %v18268_v2 = vld [vmem:[%s27772_s3 + $0xb14] sm:$0xf0] }
 0x4ac   : > { %8596 = vmatpush.bf16.msra.mxu3 %v15952_v49  ;;  %8638 = vmatpush.bf16.msrb.mxu2 %v15828_v13  ;;  %v16169_v49 = vld [vmem:[%s27772_s3 + $0xc70] sm:$0xf0]  ;;  %v6480_v13 = vadd.f32 %v24549_v41, %v24529_v6  ;;  %v7564_v6 = vpop.f32.mrf.mxu2  ;;  %v18242_v41 = vld [vmem:[%s27772_s3 + $0xa4c] sm:$0xf] }
 0x4ad   : > { %9457 = vmatpush.bf16.msra.mxu1 %v16328_v3  ;;  %v15903_v3 = vld [vmem:[%s27772_s3 + $0xb48] sm:$0xf]  ;;  %v25739_v46 = vadd.f32 %v7564_v6, %v25462_v52  ;;  %v15780_v38 = vor.u32 %v18242_v41, %v15777_v48  ;;  %v7511_v31 = vadd.f32 %v25671_v16, %v7497_v7  ;;  %v18331_v41 = vld [vmem:[%s27772_s3 + $0xd0c] sm:$0xf0]  ;;  %v18297_v48 = vld [vmem:[%s27772_s3 + $0xc04] sm:$0xf] }
 0x4ae   : > { %9498 = vmatpush.bf16.msrb.mxu0 %v16220_v63  ;;  %v16312_v63 = vor.u32 %v18347_v58, %v16311_v4  ;;  %v6494_v9 = vadd.f32 %v24795_v10, %v6480_v13  ;;  %v16172_v4 = vor.u32 %v18309_v57, %v16169_v49  ;;  %v7522_v58 = vpop.f32.mrf.mxu3  ;;  %v15887_v52 = vld [vmem:[%s27772_s3 + $0xb28] sm:$0xf]  ;;  %v18335_v57 = vld [vmem:[%s27772_s3 + $0xd2c] sm:$0xf0]  ;;  %v18301_v49 = vld [vmem:[%s27772_s3 + $0xc24] sm:$0xf] }
 0x4af   : > { %v25736_v10 = vadd.f32 %v7522_v58, %v25504_v40  ;;  %v16137_v13 = vld [vmem:[%s27772_s3 + $0xc30] sm:$0xf0]  ;;  %v16264_v58 = vor.u32 %v18335_v57, %v16263_v17  ;;  %v16239_v17 = vld [vmem:[%s27772_s3 + $0xce8] sm:$0xf]  ;;  %v18328_v7 = vld [vmem:[%s27772_s3 + $0xcf4] sm:$0xf0] }
 0x4b0   : > { %8597 = vmatpush.bf16.msra.mxu3 %v15936_v36  ;;  %8639 = vmatpush.bf16.msrb.mxu2 %v15812_v39  ;;  %v18305_v36 = vld [vmem:[%s27772_s3 + $0xc44] sm:$0xf]  ;;  %v16153_v39 = vld [vmem:[%s27772_s3 + $0xc50] sm:$0xf0]  ;;  %v6508_v27 = vadd.f32 %v25006_v21, %v6494_v9  ;;  %v18238_v21 = vld [vmem:[%s27772_s3 + $0xa2c] sm:$0xf]  ;;  %v16140_v16 = vor.u32 %v18301_v49, %v16137_v13 }
 0x4b1   : > { %9458 = vmatpush.bf16.msra.mxu1 %v16312_v63  ;;  %v18272_v63 = vld [vmem:[%s27772_s3 + $0xb34] sm:$0xf0]  ;;  %v16156_v62 = vor.u32 %v18305_v36, %v16153_v39  ;;  %v15764_v9 = vor.u32 %v18238_v21, %v15761_v22  ;;  %v18294_v36 = vld [vmem:[%s27772_s3 + $0xbec] sm:$0xf]  ;;  %v15985_v39 = vld [vmem:[%s27772_s3 + $0xbf8] sm:$0xf0] }
 0x4b2   : > { %9499 = vmatpush.bf16.msrb.mxu0 %v16204_v45  ;;  %v18276_v45 = vld [vmem:[%s27772_s3 + $0xb54] sm:$0xf0]  ;;  %v15988_v13 = vor.u32 %v18294_v36, %v15985_v39  ;;  %v25868_v36 = vpop.f32.mrf.mxu1 }
 0x4b3   : > { %v15904_v40 = vor.u32 %v18276_v45, %v15903_v3  ;;  %v15871_v3 = vld [vmem:[%s27772_s3 + $0xb08] sm:$0xf]  ;;  %v15888_v45 = vor.u32 %v18272_v63, %v15887_v52  ;;  %v16361_v52 = vld [vmem:[%s27772_s3 + $0xdf0] sm:$0xf0] }
 0x4b4   : > { %8598 = vmatpush.bf16.msra.mxu3 %v15920_v11  ;;  %8640 = vmatpush.bf16.msrb.mxu2 %v15796_v51  ;;  %v6623_v11 = vrot.slane %v24952_v47, 6  ;;  %v6627_v51 = vrot.slane %v6508_v27, 6  ;;  %v15745_v47 = vld [vmem:[%s27772_s3 + $0xa18] sm:$0xf0]  ;;  %v16487_v27 = vld [vmem:[%s27772_s3 + $0xee0] sm:$0xf]  ;;  %v15872_v21 = vor.u32 %v18268_v2, %v15871_v3 }
 0x4b5   : > { %9459 = vmatpush.bf16.msra.mxu1 %v16296_v12  ;;  %v18234_v12 = vld [vmem:[%s27772_s3 + $0xa0c] sm:$0xf]  ;;  %v15969_v2 = vld [vmem:[%s27772_s3 + $0xbd8] sm:$0xf0] }
 0x4b6   : > { %9500 = vmatpush.bf16.msrb.mxu0 %v16188_v28  ;;  %v16280_v28 = vor.u32 %v18339_v34, %v16279_v44  ;;  %v7524_v6 = vpop.f32.mrf.mxu3  ;;  %v16121_v44 = vld [vmem:[%s27772_s3 + $0xc10] sm:$0xf0]  ;;  %v6635_v63 = vsel %vm1488_vm0, %v6627_v51, %v6623_v11  ;;  %v15748_v22 = vor.u32 %v18234_v12, %v15745_v47  ;;  %v18290_v3 = vld [vmem:[%s27772_s3 + $0xbcc] sm:$0xf]  ;;  %v16240_v47 = vor.u32 %v18328_v7, %v16239_v17  ;;  %v16207_v7 = vld [vmem:[%s27772_s3 + $0xca8] sm:$0xf] }
 0x4b7   : > { %v7525_v34 = vadd.f32 %v7524_v6, %v7511_v31  ;;  %v16124_v49 = vor.u32 %v18297_v48, %v16121_v44  ;;  %v16345_v6 = vld [vmem:[%s27772_s3 + $0xdd0] sm:$0xf0]  ;;  %v18324_v48 = vld [vmem:[%s27772_s3 + $0xcd4] sm:$0xf0]  ;;  %v6639_v44 = vsel %vm446_vm1, %v6635_v63, 0.0  ;;  %v15972_v39 = vor.u32 %v18290_v3, %v15969_v2  ;;  %v25906_v3 = vpop.f32.mrf.mxu2 }
 0x4b8   : > { %8599 = vmatpush.bf16.msra.mxu3 %v15904_v40  ;;  %8641 = vmatpush.bf16.msrb.mxu2 %v15780_v38  ;;  %v18391_v40 = vld [vmem:[%s27772_s3 + $0xeec] sm:$0xf0]  ;;  %v18357_v38 = vld [vmem:[%s27772_s3 + $0xde4] sm:$0xf]  ;;  %v16329_v17 = vld [vmem:[%s27772_s3 + $0xdb0] sm:$0xf0] }
 0x4b9   : > { %9460 = vmatpush.bf16.msra.mxu1 %v16280_v28  ;;  %v7640_v28 = vrot.slane %v25736_v10, 7  ;;  %v6631_v10 = vsel %vm1488_vm0, %v6623_v11, %v6627_v51  ;;  %v16488_v31 = vor.u32 %v18391_v40, %v16487_v27  ;;  %v16364_v12 = vor.u32 %v18357_v38, %v16361_v52  ;;  %v16471_v11 = vld [vmem:[%s27772_s3 + $0xec0] sm:$0xf]  ;;  %v18387_v51 = vld [vmem:[%s27772_s3 + $0xecc] sm:$0xf0] }
 0x4ba   : > { %9501 = vmatpush.bf16.msrb.mxu0 %v16172_v4  ;;  %v16247_v4 = vld [vmem:[%s27772_s3 + $0xd00] sm:$0xf]  ;;  %v16472_v27 = vor.u32 %v18387_v51, %v16471_v11  ;;  %v18286_v40 = vld [vmem:[%s27772_s3 + $0xbac] sm:$0xf]  ;;  %v15953_v38 = vld [vmem:[%s27772_s3 + $0xbb8] sm:$0xf0] }
 0x4bb   : > { %v16248_v57 = vor.u32 %v18331_v41, %v16247_v4  ;;  %v18353_v4 = vld [vmem:[%s27772_s3 + $0xdc4] sm:$0xf]  ;;  %v16223_v41 = vld [vmem:[%s27772_s3 + $0xcc8] sm:$0xf]  ;;  %v16313_v51 = vld [vmem:[%s27772_s3 + $0xd90] sm:$0xf0] }
 0x4bc   : > { %8600 = vmatpush.bf16.msra.mxu3 %v15888_v45  ;;  %8642 = vmatpush.bf16.msrb.mxu2 %v15764_v9  ;;  %v16348_v63 = vor.u32 %v18353_v4, %v16345_v6  ;;  %v16191_v4 = vld [vmem:[%s27772_s3 + $0xc88] sm:$0xf]  ;;  %v18316_v6 = vld [vmem:[%s27772_s3 + $0xc94] sm:$0xf0] }
 0x4bd   : > { %9461 = vmatpush.bf16.msra.mxu1 %v16264_v58 }
 0x4be   : > { %9502 = vmatpush.bf16.msrb.mxu0 %v16156_v62  ;;  %v7644_v62 = vrot.slane %v7525_v34, 7 }
 0x4c0   : > { %v7652_v45 = vsel %vm2510_vm2, %v7644_v62, %v7640_v28  ;;  %v7648_v9 = vsel %vm2510_vm2, %v7640_v28, %v7644_v62  ;;  %8601 = vmatpush.bf16.msra.mxu3 %v15872_v21  ;;  %8643 = vmatpush.bf16.msrb.mxu2 %v15748_v22  ;;  %v16224_v28 = vor.u32 %v18324_v48, %v16223_v41  ;;  %v16455_v62 = vld [vmem:[%s27772_s3 + $0xea0] sm:$0xf]  ;;  %v18383_v21 = vld [vmem:[%s27772_s3 + $0xeac] sm:$0xf0]  ;;  %v18349_v22 = vld [vmem:[%s27772_s3 + $0xda4] sm:$0xf] }
 0x4c1   : > { %v25851_v58 = vadd.f32 %v7648_v9, %v6631_v10  ;;  %9462 = vmatpush.bf16.msra.mxu1 %v16248_v57  ;;  %v7656_v34 = vsel %vm454_vm3, %v7652_v45, 0.0  ;;  %v18320_v57 = vld [vmem:[%s27772_s3 + $0xcb4] sm:$0xf0]  ;;  %v16456_v10 = vor.u32 %v18383_v21, %v16455_v62  ;;  %v16332_v2 = vor.u32 %v18349_v22, %v16329_v17  ;;  %v16439_v9 = vld [vmem:[%s27772_s3 + $0xe80] sm:$0xf] }
 0x4c2   : > { %9503 = vmatpush.bf16.msrb.mxu0 %v16140_v16  ;;  %v25853_v16 = vpop.f32.mrf.mxu0  ;;  %v25876_v52 = vadd.f32 %v7656_v34, %v6639_v44  ;;  %v16208_v45 = vor.u32 %v18320_v57, %v16207_v7  ;;  %v18278_v34 = vld [vmem:[%s27772_s3 + $0xb6c] sm:$0xf]  ;;  %v18341_v62 = vld [vmem:[%s27772_s3 + $0xd64] sm:$0xf]  ;;  %v16297_v21 = vld [vmem:[%s27772_s3 + $0xd70] sm:$0xf0]  ;;  %v6536_v7 = vadd.f32 %v24759_v5, %v24757_v43 }
 0x4c3   : > { %8602 = vmatmul.bf16.vlgmr.msra.gmra.mxu3 %v23933_v19  ;;  %8644 = vmatmul.bf16.vlgmr.msrb.gmra.mxu2 %v23771_v61  ;;  %v8463_v41 = vpop.f32.mrf.mxu1  ;;  %v16175_v22 = vld [vmem:[%s27772_s3 + $0xc68] sm:$0xf]  ;;  %v18312_v17 = vld [vmem:[%s27772_s3 + $0xc74] sm:$0xf0]  ;;  %v16407_v5 = vld [vmem:[%s27772_s3 + $0xe40] sm:$0xf] }
 0x4c4   : > { %8650 = vmatpush.bf16.msrb.mxu3 %v15988_v13  ;;  %9469 = vmatpush.bf16.msra.mxu2 %v16488_v31  ;;  %v18282_v13 = vld [vmem:[%s27772_s3 + $0xb8c] sm:$0xf]  ;;  %v15937_v31 = vld [vmem:[%s27772_s3 + $0xb98] sm:$0xf0] }
 0x4c5   : > { %9511 = vmatpush.bf16.msrb.mxu1 %v16364_v12  ;;  %v18379_v12 = vld [vmem:[%s27772_s3 + $0xe8c] sm:$0xf0]  ;;  %v15940_v48 = vor.u32 %v18282_v13, %v15937_v31  ;;  %v15905_v13 = vld [vmem:[%s27772_s3 + $0xb58] sm:$0xf0]  ;;  %v6550_v31 = vadd.f32 %v25004_v24, %v6536_v7  ;;  %v18304_v7 = vld [vmem:[%s27772_s3 + $0xc34] sm:$0xf0] }
 0x4c6   : > { %9504 = vmatpush.bf16.msrb.mxu0 %v16124_v49  ;;  %9463 = vmatmul.bf16.vlgmr.msra.gmra.mxu1 %v23607_v33  ;;  %v15956_v49 = vor.u32 %v18286_v40, %v15953_v38  ;;  %v16440_v44 = vor.u32 %v18379_v12, %v16439_v9  ;;  %v16192_v38 = vor.u32 %v18316_v6, %v16191_v4  ;;  %v7578_v9 = vpop.f32.mrf.mxu3  ;;  %v7620_v43 = vpop.f32.mrf.mxu2  ;;  %v18371_v12 = vld [vmem:[%s27772_s3 + $0xe4c] sm:$0xf0]  ;;  %v16159_v4 = vld [vmem:[%s27772_s3 + $0xc48] sm:$0xf]  ;;  %v18308_v6 = vld [vmem:[%s27772_s3 + $0xc54] sm:$0xf0] }
 0x4c7   : > { %v25971_v24 = vadd.f32 %v7578_v9, %v25739_v46 }
 0x4c8   : > { %8651 = vmatpush.bf16.msrb.mxu3 %v15972_v39  ;;  %9470 = vmatpush.bf16.msra.mxu2 %v16472_v27  ;;  %v15921_v39 = vld [vmem:[%s27772_s3 + $0xb78] sm:$0xf0] }
 0x4c9   : > { %9505 = vmatmul.bf16.vlgmr.msrb.gmra.mxu0 %v23441_v50  ;;  %9512 = vmatpush.bf16.msrb.mxu1 %v16348_v63  ;;  %v16423_v63 = vld [vmem:[%s27772_s3 + $0xe60] sm:$0xf]  ;;  %v15924_v57 = vor.u32 %v18278_v34, %v15921_v39  ;;  %v18270_v34 = vld [vmem:[%s27772_s3 + $0xb2c] sm:$0xf]  ;;  %v15889_v39 = vld [vmem:[%s27772_s3 + $0xb38] sm:$0xf0] }
 0x4ca   : > { %9553 = vmatpush.bf16.msra.mxu0 %v16240_v47  ;;  %v18345_v47 = vld [vmem:[%s27772_s3 + $0xd84] sm:$0xf]  ;;  %v8449_v11 = vpop.f32.mrf.mxu0 }
 0x4cb   : > { %v25932_v27 = vadd.f32 %v8463_v41, %v8449_v11  ;;  %v16316_v40 = vor.u32 %v18345_v47, %v16313_v51  ;;  %v18337_v47 = vld [vmem:[%s27772_s3 + $0xd44] sm:$0xf]  ;;  %v25974_v11 = vadd.f32 %v7620_v43, %v25697_v59  ;;  %v16281_v51 = vld [vmem:[%s27772_s3 + $0xd50] sm:$0xf0]  ;;  %v25986_v41 = vadd.f32 %v25224_v18, %v6550_v31  ;;  %v8465_v59 = vpop.f32.mrf.mxu1 }
 0x4cc   : > { %8652 = vmatpush.bf16.msrb.mxu3 %v15956_v49  ;;  %9471 = vmatpush.bf16.msra.mxu2 %v16456_v10  ;;  %v18274_v10 = vld [vmem:[%s27772_s3 + $0xb4c] sm:$0xf]  ;;  %v16284_v18 = vor.u32 %v18337_v47, %v16281_v51  ;;  %v18300_v47 = vld [vmem:[%s27772_s3 + $0xc14] sm:$0xf0] }
 0x4cd   : > { %9513 = vmatpush.bf16.msrb.mxu1 %v16332_v2  ;;  %v16300_v2 = vor.u32 %v18341_v62, %v16297_v21  ;;  %v18333_v62 = vld [vmem:[%s27772_s3 + $0xd24] sm:$0xf]  ;;  %v7553_v21 = vadd.f32 %v25633_v55, %v25631_v1  ;;  %v18266_v1 = vld [vmem:[%s27772_s3 + $0xb0c] sm:$0xf]  ;;  %v15873_v55 = vld [vmem:[%s27772_s3 + $0xb18] sm:$0xf0] }
 0x4ce   : > { %9554 = vmatpush.bf16.msra.mxu0 %v16224_v28  ;;  %v18375_v28 = vld [vmem:[%s27772_s3 + $0xe6c] sm:$0xf0]  ;;  %v7580_v43 = vpop.f32.mrf.mxu3 }
 0x4cf   : > { %v16424_v49 = vor.u32 %v18375_v28, %v16423_v63  ;;  %v16391_v63 = vld [vmem:[%s27772_s3 + $0xe20] sm:$0xf]  ;;  %v18367_v28 = vld [vmem:[%s27772_s3 + $0xe2c] sm:$0xf0] }
 0x4d0   : > { %8653 = vmatpush.bf16.msrb.mxu3 %v15940_v48  ;;  %9472 = vmatpush.bf16.msra.mxu2 %v16440_v44  ;;  %v15908_v48 = vor.u32 %v18274_v10, %v15905_v13  ;;  %v16408_v44 = vor.u32 %v18371_v12, %v16407_v5  ;;  %v7567_v10 = vadd.f32 %v25906_v3, %v7553_v21  ;;  %v16249_v5 = vld [vmem:[%s27772_s3 + $0xd10] sm:$0xf0]  ;;  %v16127_v12 = vld [vmem:[%s27772_s3 + $0xc08] sm:$0xf] }
 0x4d1   : > { %9514 = vmatpush.bf16.msrb.mxu1 %v16316_v40  ;;  %v15892_v13 = vor.u32 %v18270_v34, %v15889_v39  ;;  %v16392_v31 = vor.u32 %v18367_v28, %v16391_v63  ;;  %v7641_v34 = vrot.slane %v25971_v24, 7  ;;  %v18326_v63 = vld [vmem:[%s27772_s3 + $0xcec] sm:$0xf]  ;;  %v16241_v28 = vld [vmem:[%s27772_s3 + $0xcf8] sm:$0xf0]  ;;  %v16128_v21 = vor.u32 %v18300_v47, %v16127_v12 }
 0x4d2   : > { %9555 = vmatpush.bf16.msra.mxu0 %v16208_v45  ;;  %v16176_v45 = vor.u32 %v18312_v17, %v16175_v22  ;;  %v8451_v46 = vpop.f32.mrf.mxu0  ;;  %v16265_v22 = vld [vmem:[%s27772_s3 + $0xd30] sm:$0xf0]  ;;  %v16143_v17 = vld [vmem:[%s27772_s3 + $0xc28] sm:$0xf]  ;;  %v7581_v51 = vadd.f32 %v7580_v43, %v7567_v10 }
 0x4d3   : > { %v25994_v40 = vadd.f32 %v8465_v59, %v8451_v46  ;;  %v16268_v9 = vor.u32 %v18333_v62, %v16265_v22  ;;  %v16144_v3 = vor.u32 %v18304_v7, %v16143_v17  ;;  %v16489_v46 = vld [vmem:[%s27772_s3 + $0xef0] sm:$0xf0]  ;;  %v16367_v59 = vld [vmem:[%s27772_s3 + $0xde8] sm:$0xf]  ;;  %v16599_v7 = vld [vmem:[%s27772_s3 + $0xfc0] sm:$0xf] }
 0x4d4   : > { %8654 = vmatpush.bf16.msrb.mxu3 %v15924_v57  ;;  %9473 = vmatpush.bf16.msra.mxu2 %v16424_v49  ;;  %v6624_v57 = vrot.slane %v25086_v42, 6  ;;  %v6628_v49 = vrot.slane %v25986_v41, 6  ;;  %v16375_v42 = vld [vmem:[%s27772_s3 + $0xe00] sm:$0xf]  ;;  %v18389_v41 = vld [vmem:[%s27772_s3 + $0xee4] sm:$0xf] }
 0x4d5   : > { %9515 = vmatpush.bf16.msrb.mxu1 %v16300_v2  ;;  %v18363_v2 = vld [vmem:[%s27772_s3 + $0xe0c] sm:$0xf0]  ;;  %v7645_v39 = vrot.slane %v7581_v51, 7  ;;  %v16492_v17 = vor.u32 %v18389_v41, %v16489_v46  ;;  %v16583_v51 = vld [vmem:[%s27772_s3 + $0xfa0] sm:$0xf] }
 0x4d6   : > { %9556 = vmatpush.bf16.msra.mxu0 %v16192_v38  ;;  %v16160_v38 = vor.u32 %v18308_v6, %v16159_v4  ;;  %v16615_v4 = vld [vmem:[%s27772_s3 + $0xfe0] sm:$0xf]  ;;  %v18423_v6 = vld [vmem:[%s27772_s3 + $0xfec] sm:$0xf0]  ;;  %v6632_v24 = vsel %vm1488_vm0, %v6624_v57, %v6628_v49 }
 0x4d7   : > { %v16616_v22 = vor.u32 %v18423_v6, %v16615_v4  ;;  %v7649_v10 = vsel %vm2510_vm2, %v7641_v34, %v7645_v39  ;;  %v18415_v4 = vld [vmem:[%s27772_s3 + $0xfac] sm:$0xf0] }
 0x4d8   : > { %8655 = vmatpush.bf16.msrb.mxu3 %v15908_v48  ;;  %9474 = vmatpush.bf16.msra.mxu2 %v16408_v44  ;;  %v18360_v48 = vld [vmem:[%s27772_s3 + $0xdf4] sm:$0xf0]  ;;  %v6636_v44 = vsel %vm1488_vm0, %v6628_v49, %v6624_v57  ;;  %v18385_v57 = vld [vmem:[%s27772_s3 + $0xec4] sm:$0xf]  ;;  %v16473_v49 = vld [vmem:[%s27772_s3 + $0xed0] sm:$0xf0] }
 0x4d9   : > { %9516 = vmatpush.bf16.msrb.mxu1 %v16284_v18  ;;  %v15876_v18 = vor.u32 %v18266_v1, %v15873_v55  ;;  %v18419_v1 = vld [vmem:[%s27772_s3 + $0xfcc] sm:$0xf0]  ;;  %v7653_v55 = vsel %vm2510_vm2, %v7645_v39, %v7641_v34  ;;  %v6640_v43 = vsel %vm446_vm1, %v6636_v44, 0.0  ;;  %v16476_v47 = vor.u32 %v18385_v57, %v16473_v49  ;;  %v16335_v44 = vld [vmem:[%s27772_s3 + $0xda8] sm:$0xf] }
 0x4da   : > { %9557 = vmatpush.bf16.msra.mxu0 %v16176_v45  ;;  %v18329_v45 = vld [vmem:[%s27772_s3 + $0xd04] sm:$0xf]  ;;  %v16600_v12 = vor.u32 %v18419_v1, %v16599_v7  ;;  %v18352_v34 = vld [vmem:[%s27772_s3 + $0xdb4] sm:$0xf0]  ;;  %v18318_v39 = vld [vmem:[%s27772_s3 + $0xcac] sm:$0xf] }
 0x4db   : > { %v16252_v62 = vor.u32 %v18329_v45, %v16249_v5  ;;  %v18356_v45 = vld [vmem:[%s27772_s3 + $0xdd4] sm:$0xf0]  ;;  %v7657_v5 = vsel %vm454_vm3, %v7653_v55, 0.0  ;;  %v16441_v7 = vld [vmem:[%s27772_s3 + $0xe90] sm:$0xf0]  ;;  %v8505_v55 = vpop.f32.mrf.mxu0 }
 0x4dc   : > { %8656 = vmatpush.bf16.msrb.mxu3 %v15892_v13  ;;  %9475 = vmatpush.bf16.msra.mxu2 %v16392_v31  ;;  %v16368_v13 = vor.u32 %v18360_v48, %v16367_v59  ;;  %v16244_v31 = vor.u32 %v18326_v63, %v16241_v28  ;;  %v26112_v6 = vadd.f32 %v7657_v5, %v6640_v43  ;;  %v18381_v59 = vld [vmem:[%s27772_s3 + $0xea4] sm:$0xf]  ;;  %v16457_v48 = vld [vmem:[%s27772_s3 + $0xeb0] sm:$0xf0]  ;;  %v16567_v28 = vld [vmem:[%s27772_s3 + $0xf80] sm:$0xf] }
 0x4dd   : > { %9517 = vmatpush.bf16.msrb.mxu1 %v16268_v9  ;;  %v18322_v9 = vld [vmem:[%s27772_s3 + $0xccc] sm:$0xf]  ;;  %v16460_v63 = vor.u32 %v18381_v59, %v16457_v48  ;;  %v16319_v1 = vld [vmem:[%s27772_s3 + $0xd88] sm:$0xf]  ;;  %v6592_v59 = vadd.f32 %v24974_v29, %v24972_v54  ;;  %v18369_v29 = vld [vmem:[%s27772_s3 + $0xe44] sm:$0xf] }
 0x4de   : > { %9558 = vmatpush.bf16.msra.mxu0 %v16160_v38  ;;  %v16376_v38 = vor.u32 %v18363_v2, %v16375_v42  ;;  %v16351_v42 = vld [vmem:[%s27772_s3 + $0xdc8] sm:$0xf]  ;;  %v26091_v2 = vadd.f32 %v7649_v10, %v6632_v24  ;;  %v16336_v24 = vor.u32 %v18352_v34, %v16335_v44  ;;  %v18348_v10 = vld [vmem:[%s27772_s3 + $0xd94] sm:$0xf0]  ;;  %v16535_v34 = vld [vmem:[%s27772_s3 + $0xf40] sm:$0xf] }
 0x4df   : > { %v16352_v41 = vor.u32 %v18356_v45, %v16351_v42  ;;  %v16551_v45 = vld [vmem:[%s27772_s3 + $0xf60] sm:$0xf]  ;;  %v16320_v43 = vor.u32 %v18348_v10, %v16319_v1  ;;  %v16161_v1 = vld [vmem:[%s27772_s3 + $0xc58] sm:$0xf0] }
 0x4e0   : > { %8657 = vmatpush.bf16.msrb.mxu3 %v15876_v18  ;;  %9476 = vmatpush.bf16.msra.mxu2 %v16376_v38  ;;  %v16209_v18 = vld [vmem:[%s27772_s3 + $0xcb8] sm:$0xf0]  ;;  %v16584_v38 = vor.u32 %v18415_v4, %v16583_v51  ;;  %v16303_v51 = vld [vmem:[%s27772_s3 + $0xd68] sm:$0xf]  ;;  %v18344_v4 = vld [vmem:[%s27772_s3 + $0xd74] sm:$0xf0] }
 0x4e1   : > { %9518 = vmatpush.bf16.msrb.mxu1 %v16252_v62  ;;  %v18411_v62 = vld [vmem:[%s27772_s3 + $0xf8c] sm:$0xf0] }
 0x4e2   : > { %9559 = vmatpush.bf16.msra.mxu0 %v16144_v3  ;;  %v16225_v3 = vld [vmem:[%s27772_s3 + $0xcd8] sm:$0xf0]  ;;  %v16568_v49 = vor.u32 %v18411_v62, %v16567_v28  ;;  %v16409_v62 = vld [vmem:[%s27772_s3 + $0xe50] sm:$0xf0] }
 0x4e3   : > { %v16228_v46 = vor.u32 %v18322_v9, %v16225_v3  ;;  %8658 = vmatmul.bf16.vlgmr.msrb.gmra.mxu3 %v23933_v19  ;;  %9477 = vmatmul.bf16.vlgmr.msra.gmra.mxu2 %v23771_v61  ;;  %v8519_v57 = vpop.f32.mrf.mxu1  ;;  %v18407_v9 = vld [vmem:[%s27772_s3 + $0xf6c] sm:$0xf0] }
 0x4e4   : > { %9483 = vmatpush.bf16.msra.mxu3 %v16616_v22  ;;  %9525 = vmatpush.bf16.msrb.mxu2 %v16492_v17  ;;  %v16212_v22 = vor.u32 %v18318_v39, %v16209_v18  ;;  %v18377_v17 = vld [vmem:[%s27772_s3 + $0xe84] sm:$0xf]  ;;  %v26168_v3 = vadd.f32 %v8519_v57, %v8505_v55  ;;  %v16552_v48 = vor.u32 %v18407_v9, %v16551_v45  ;;  %v18403_v39 = vld [vmem:[%s27772_s3 + $0xf4c] sm:$0xf0]  ;;  %v16393_v9 = vld [vmem:[%s27772_s3 + $0xe30] sm:$0xf0] }
 0x4e5   : > { %9567 = vmatpush.bf16.msra.mxu1 %v16368_v13  ;;  %v18314_v13 = vld [vmem:[%s27772_s3 + $0xc8c] sm:$0xf]  ;;  %v16444_v42 = vor.u32 %v18377_v17, %v16441_v7  ;;  %v6606_v18 = vadd.f32 %v25222_v56, %v6592_v59  ;;  %v18340_v17 = vld [vmem:[%s27772_s3 + $0xd54] sm:$0xf0]  ;;  %v16536_v10 = vor.u32 %v18403_v39, %v16535_v34  ;;  %v18399_v57 = vld [vmem:[%s27772_s3 + $0xf2c] sm:$0xf0] }
 0x4e6   : > { %9560 = vmatpush.bf16.msra.mxu0 %v16128_v21  ;;  %9519 = vmatmul.bf16.vlgmr.msrb.gmra.mxu1 %v23607_v33  ;;  %v26142_v21 = vpop.f32.mrf.mxu2  ;;  %v7634_v28 = vpop.f32.mrf.mxu3  ;;  %v18306_v7 = vld [vmem:[%s27772_s3 + $0xc4c] sm:$0xf]  ;;  %v18365_v45 = vld [vmem:[%s27772_s3 + $0xe24] sm:$0xf]  ;;  %v16255_v34 = vld [vmem:[%s27772_s3 + $0xd08] sm:$0xf] }
 0x4e7   : > { %v26207_v56 = vadd.f32 %v7634_v28, %v25974_v11  ;;  %v26222_v55 = vadd.f32 %v25434_v53, %v6606_v18  ;;  %v8507_v11 = vpop.f32.mrf.mxu0  ;;  %v18298_v28 = vld [vmem:[%s27772_s3 + $0xc0c] sm:$0xf] }
 0x4e8   : > { %9484 = vmatpush.bf16.msra.mxu3 %v16600_v12  ;;  %9526 = vmatpush.bf16.msrb.mxu2 %v16476_v47  ;;  %v18373_v12 = vld [vmem:[%s27772_s3 + $0xe64] sm:$0xf]  ;;  %v16425_v47 = vld [vmem:[%s27772_s3 + $0xe70] sm:$0xf0] }
 0x4e9   : > { %9561 = vmatmul.bf16.vlgmr.msra.gmra.mxu0 %v23441_v50  ;;  %9568 = vmatpush.bf16.msra.mxu1 %v16352_v41  ;;  %v18310_v41 = vld [vmem:[%s27772_s3 + $0xc6c] sm:$0xf]  ;;  %v16428_v44 = vor.u32 %v18373_v12, %v16425_v47  ;;  %v18336_v12 = vld [vmem:[%s27772_s3 + $0xd34] sm:$0xf0] }
 0x4ea   : > { %9609 = vmatpush.bf16.msrb.mxu0 %v16244_v31  ;;  %v16193_v31 = vld [vmem:[%s27772_s3 + $0xc98] sm:$0xf0]  ;;  %v18302_v47 = vld [vmem:[%s27772_s3 + $0xc2c] sm:$0xf] }
 0x4eb   : > { %v16196_v5 = vor.u32 %v18314_v13, %v16193_v31  ;;  %v16412_v13 = vor.u32 %v18369_v29, %v16409_v62  ;;  %v16519_v31 = vld [vmem:[%s27772_s3 + $0xf20] sm:$0xf] }
 0x4ec   : > { %9485 = vmatpush.bf16.msra.mxu3 %v16584_v38  ;;  %9527 = vmatpush.bf16.msrb.mxu2 %v16460_v63  ;;  %v16304_v38 = vor.u32 %v18344_v4, %v16303_v51  ;;  %v16145_v51 = vld [vmem:[%s27772_s3 + $0xc38] sm:$0xf0]  ;;  %v6625_v4 = vrot.slane %v25286_v37, 6  ;;  %v16520_v59 = vor.u32 %v18399_v57, %v16519_v31  ;;  %v18361_v37 = vld [vmem:[%s27772_s3 + $0xe04] sm:$0xf] }
 0x4ed   : > { %9569 = vmatpush.bf16.msra.mxu1 %v16336_v24  ;;  %v16287_v24 = vld [vmem:[%s27772_s3 + $0xd48] sm:$0xf]  ;;  %v16871_v57 = vld [vmem:[%s27772_s3 + $0x10e0] sm:$0xf] }
 0x4ee   : > { %9610 = vmatpush.bf16.msrb.mxu0 %v16228_v46  ;;  %v16177_v46 = vld [vmem:[%s27772_s3 + $0xc78] sm:$0xf0]  ;;  %v8477_v54 = vpop.f32.mrf.mxu2  ;;  %v16288_v53 = vor.u32 %v18340_v17, %v16287_v24  ;;  %v7636_v18 = vpop.f32.mrf.mxu3  ;;  %v18421_v24 = vld [vmem:[%s27772_s3 + $0xfe4] sm:$0xf]  ;;  %v16617_v17 = vld [vmem:[%s27772_s3 + $0xff0] sm:$0xf0] }
 0x4ef   : > { %v16180_v63 = vor.u32 %v18310_v41, %v16177_v46  ;;  %v6629_v41 = vrot.slane %v26222_v55, 6  ;;  %v16369_v55 = vld [vmem:[%s27772_s3 + $0xdf8] sm:$0xf0] }
 0x4f0   : > { %9486 = vmatpush.bf16.msra.mxu3 %v16568_v49  ;;  %9528 = vmatpush.bf16.msrb.mxu2 %v16444_v42  ;;  %v16164_v42 = vor.u32 %v18306_v7, %v16161_v1  ;;  %v16495_v7 = vld [vmem:[%s27772_s3 + $0xee8] sm:$0xf]  ;;  %v18392_v1 = vld [vmem:[%s27772_s3 + $0xef4] sm:$0xf0] }
 0x4f1   : > { %9570 = vmatpush.bf16.msra.mxu1 %v16320_v43  ;;  %v16271_v43 = vld [vmem:[%s27772_s3 + $0xd28] sm:$0xf] }
 0x4f2   : > { %9611 = vmatpush.bf16.msrb.mxu0 %v16212_v22  ;;  %v26210_v22 = vadd.f32 %v8477_v54, %v25932_v27  ;;  %v8521_v27 = vpop.f32.mrf.mxu1  ;;  %v16272_v39 = vor.u32 %v18336_v12, %v16271_v43  ;;  %v16129_v54 = vld [vmem:[%s27772_s3 + $0xc18] sm:$0xf0]  ;;  %v16496_v43 = vor.u32 %v18392_v1, %v16495_v7  ;;  %v16601_v12 = vld [vmem:[%s27772_s3 + $0xfd0] sm:$0xf0]  ;;  %v16839_v7 = vld [vmem:[%s27772_s3 + $0x10a0] sm:$0xf] }
 0x4f3   : > { %v26230_v49 = vadd.f32 %v8521_v27, %v8507_v11  ;;  %v6637_v11 = vsel %vm1488_vm0, %v6629_v41, %v6625_v4  ;;  %v7642_v27 = vrot.slane %v26207_v56, 7  ;;  %v6633_v56 = vsel %vm1488_vm0, %v6625_v4, %v6629_v41  ;;  %v16479_v4 = vld [vmem:[%s27772_s3 + $0xec8] sm:$0xf]  ;;  %v18388_v41 = vld [vmem:[%s27772_s3 + $0xed4] sm:$0xf0] }
 0x4f4   : > { %9487 = vmatpush.bf16.msra.mxu3 %v16552_v48  ;;  %9529 = vmatpush.bf16.msrb.mxu2 %v16428_v44  ;;  %v16396_v48 = vor.u32 %v18365_v45, %v16393_v9  ;;  %v16377_v44 = vld [vmem:[%s27772_s3 + $0xe10] sm:$0xf0]  ;;  %v16132_v45 = vor.u32 %v18298_v28, %v16129_v54  ;;  %v16620_v9 = vor.u32 %v18421_v24, %v16617_v17  ;;  %v18350_v24 = vld [vmem:[%s27772_s3 + $0xdac] sm:$0xf]  ;;  %v16337_v17 = vld [vmem:[%s27772_s3 + $0xdb8] sm:$0xf0] }
 0x4f5   : > { %9571 = vmatpush.bf16.msra.mxu1 %v16304_v38  ;;  %v16380_v31 = vor.u32 %v18361_v37, %v16377_v44  ;;  %v16855_v37 = vld [vmem:[%s27772_s3 + $0x10c0] sm:$0xf]  ;;  %v18451_v44 = vld [vmem:[%s27772_s3 + $0x10cc] sm:$0xf0] }
 0x4f6   : > { %9612 = vmatpush.bf16.msrb.mxu0 %v16196_v5  ;;  %v7609_v5 = vadd.f32 %v25868_v36, %v25853_v16  ;;  %v16503_v16 = vld [vmem:[%s27772_s3 + $0xf00] sm:$0xf]  ;;  %v18395_v36 = vld [vmem:[%s27772_s3 + $0xf0c] sm:$0xf0]  ;;  %v8479_v38 = vpop.f32.mrf.mxu2  ;;  %v16856_v54 = vor.u32 %v18451_v44, %v16855_v37  ;;  %v16305_v37 = vld [vmem:[%s27772_s3 + $0xd78] sm:$0xf0] }
 0x4f7   : > { %v26280_v62 = vadd.f32 %v8479_v38, %v25994_v40  ;;  %v18358_v40 = vld [vmem:[%s27772_s3 + $0xdec] sm:$0xf]  ;;  %v18413_v38 = vld [vmem:[%s27772_s3 + $0xfa4] sm:$0xf]  ;;  %v18447_v1 = vld [vmem:[%s27772_s3 + $0x10ac] sm:$0xf0] }
 0x4f8   : > { %v7623_v46 = vadd.f32 %v26142_v21, %v7609_v5  ;;  %9488 = vmatpush.bf16.msra.mxu3 %v16536_v10  ;;  %9530 = vmatpush.bf16.msrb.mxu2 %v16412_v13  ;;  %v16148_v21 = vor.u32 %v18302_v47, %v16145_v51  ;;  %v16504_v13 = vor.u32 %v18395_v36, %v16503_v16  ;;  %v18417_v5 = vld [vmem:[%s27772_s3 + $0xfc4] sm:$0xf]  ;;  %v16807_v44 = vld [vmem:[%s27772_s3 + $0x1060] sm:$0xf] }
 0x4f9   : > { %9572 = vmatpush.bf16.msra.mxu1 %v16288_v53  ;;  %v18455_v53 = vld [vmem:[%s27772_s3 + $0x10ec] sm:$0xf0]  ;;  %v16372_v16 = vor.u32 %v18358_v40, %v16369_v55 }
 0x4fa   : > { %9613 = vmatpush.bf16.msrb.mxu0 %v16180_v63  ;;  %v18332_v63 = vld [vmem:[%s27772_s3 + $0xd14] sm:$0xf0]  ;;  %v7637_v29 = vadd.f32 %v7636_v18, %v7623_v46  ;;  %v16872_v36 = vor.u32 %v18455_v53, %v16871_v57  ;;  %v18354_v46 = vld [vmem:[%s27772_s3 + $0xdcc] sm:$0xf]  ;;  %v16480_v18 = vor.u32 %v18388_v41, %v16479_v4  ;;  %v16431_v41 = vld [vmem:[%s27772_s3 + $0xe68] sm:$0xf] }
 0x4fb   : > { %v18380_v57 = vld [vmem:[%s27772_s3 + $0xe94] sm:$0xf0]  ;;  %v18346_v53 = vld [vmem:[%s27772_s3 + $0xd8c] sm:$0xf] }
 0x4fc   : > { %9489 = vmatpush.bf16.msra.mxu3 %v16520_v59  ;;  %9531 = vmatpush.bf16.msrb.mxu2 %v16396_v48  ;;  %v7646_v10 = vrot.slane %v7637_v29, 7  ;;  %v16353_v48 = vld [vmem:[%s27772_s3 + $0xdd8] sm:$0xf0]  ;;  %v18384_v29 = vld [vmem:[%s27772_s3 + $0xeb4] sm:$0xf0] }
 0x4fd   : > { %9573 = vmatpush.bf16.msra.mxu1 %v16272_v39  ;;  %v16356_v15 = vor.u32 %v18354_v46, %v16353_v48  ;;  %v16464_v55 = vor.u32 %v18384_v29, %v16463_v35  ;;  %v18376_v46 = vld [vmem:[%s27772_s3 + $0xe74] sm:$0xf0]  ;;  %v18342_v48 = vld [vmem:[%s27772_s3 + $0xd6c] sm:$0xf]  ;;  %v16415_v29 = vld [vmem:[%s27772_s3 + $0xe48] sm:$0xf] }
 0x4fe   : > { %9614 = vmatpush.bf16.msrb.mxu0 %v16164_v42  ;;  %v16256_v42 = vor.u32 %v18332_v63, %v16255_v34  ;;  %v7654_v47 = vsel %vm2510_vm2, %v7646_v10, %v7642_v27  ;;  %v7650_v51 = vsel %vm2510_vm2, %v7642_v27, %v7646_v10  ;;  %v6641_v34 = vsel %vm446_vm1, %v6637_v11, 0.0  ;;  %v16585_v63 = vld [vmem:[%s27772_s3 + $0xfb0] sm:$0xf0]  ;;  %v18409_v11 = vld [vmem:[%s27772_s3 + $0xf84] sm:$0xf] }
 0x4ff   : > { %v26330_v59 = vadd.f32 %v7650_v51, %v6633_v56  ;;  %v7658_v39 = vsel %vm454_vm3, %v7654_v47, 0.0  ;;  %v16588_v40 = vor.u32 %v18413_v38, %v16585_v63  ;;  %v16569_v27 = vld [vmem:[%s27772_s3 + $0xf90] sm:$0xf0]  ;;  %v16340_v10 = vor.u32 %v18350_v24, %v16337_v17  ;;  %v16823_v56 = vld [vmem:[%s27772_s3 + $0x1080] sm:$0xf] }
 0x500   : > { %9490 = vmatpush.bf16.msra.mxu3 %v16504_v13  ;;  %9532 = vmatpush.bf16.msrb.mxu2 %v16380_v31  ;;  %v26351_v28 = vadd.f32 %v7658_v39, %v6641_v34  ;;  %v16840_v13 = vor.u32 %v18447_v1, %v16839_v7  ;;  %v16447_v31 = vld [vmem:[%s27772_s3 + $0xe88] sm:$0xf]  ;;  %v18405_v47 = vld [vmem:[%s27772_s3 + $0xf64] sm:$0xf]  ;;  %v16553_v51 = vld [vmem:[%s27772_s3 + $0xf70] sm:$0xf0]  ;;  %v16308_v63 = vor.u32 %v18342_v48, %v16305_v37 }
 0x501   : > { %9574 = vmatpush.bf16.msra.mxu1 %v16256_v42  ;;  %v8561_v42 = vpop.f32.mrf.mxu0  ;;  %v18439_v34 = vld [vmem:[%s27772_s3 + $0x106c] sm:$0xf0]  ;;  %v16556_v39 = vor.u32 %v18405_v47, %v16553_v51  ;;  %v16537_v38 = vld [vmem:[%s27772_s3 + $0xf50] sm:$0xf0]  ;;  %v18372_v24 = vld [vmem:[%s27772_s3 + $0xe54] sm:$0xf0] }
 0x502   : > { %9615 = vmatpush.bf16.msrb.mxu0 %v16148_v21  ;;  %v16604_v21 = vor.u32 %v18417_v5, %v16601_v12  ;;  %v16572_v5 = vor.u32 %v18409_v11, %v16569_v27  ;;  %v16448_v12 = vor.u32 %v18380_v57, %v16447_v31  ;;  %v18338_v17 = vld [vmem:[%s27772_s3 + $0xd4c] sm:$0xf]  ;;  %v18435_v11 = vld [vmem:[%s27772_s3 + $0x104c] sm:$0xf0]  ;;  %v18397_v31 = vld [vmem:[%s27772_s3 + $0xf24] sm:$0xf] }
 0x503   : > { %9491 = vmatmul.bf16.vlgmr.msra.gmra.mxu3 %v23933_v19  ;;  %9533 = vmatmul.bf16.vlgmr.msrb.gmra.mxu2 %v23771_v61  ;;  %v16521_v57 = vld [vmem:[%s27772_s3 + $0xf30] sm:$0xf0]  ;;  %v18393_v47 = vld [vmem:[%s27772_s3 + $0xf04] sm:$0xf] }
 0x504   : > { %9539 = vmatpush.bf16.msrb.mxu3 %v16620_v9  ;;  %9581 = vmatpush.bf16.msra.mxu2 %v16496_v43  ;;  %v18443_v9 = vld [vmem:[%s27772_s3 + $0x108c] sm:$0xf0]  ;;  %v8575_v43 = vpop.f32.mrf.mxu1  ;;  %v16524_v51 = vor.u32 %v18397_v31, %v16521_v57  ;;  %v18420_v31 = vld [vmem:[%s27772_s3 + $0xfd4] sm:$0xf0] }
 0x505   : > { %9623 = vmatpush.bf16.msrb.mxu1 %v16372_v16  ;;  %v26405_v16 = vadd.f32 %v8575_v43, %v8561_v42  ;;  %v16824_v4 = vor.u32 %v18443_v9, %v16823_v56  ;;  %v18368_v56 = vld [vmem:[%s27772_s3 + $0xe34] sm:$0xf0]  ;;  %v18334_v9 = vld [vmem:[%s27772_s3 + $0xd2c] sm:$0xf]  ;;  %v16273_v43 = vld [vmem:[%s27772_s3 + $0xd38] sm:$0xf0] }
 0x506   : > { %9616 = vmatpush.bf16.msrb.mxu0 %v16132_v45  ;;  %9575 = vmatmul.bf16.vlgmr.msra.gmra.mxu1 %v23607_v33  ;;  %v16321_v45 = vld [vmem:[%s27772_s3 + $0xd98] sm:$0xf0]  ;;  %v8533_v35 = vpop.f32.mrf.mxu2  ;;  %v16276_v48 = vor.u32 %v18334_v9, %v16273_v43  ;;  %v18483_v9 = vld [vmem:[%s27772_s3 + $0x11cc] sm:$0xf0]  ;;  %v18449_v43 = vld [vmem:[%s27772_s3 + $0x10c4] sm:$0xf] }
 0x507   : > { %v26442_v1 = vadd.f32 %v8533_v35, %v26168_v3  ;;  %v18424_v35 = vld [vmem:[%s27772_s3 + $0xff4] sm:$0xf0] }
 0x508   : > { %9540 = vmatpush.bf16.msrb.mxu3 %v16604_v21  ;;  %9582 = vmatpush.bf16.msra.mxu2 %v16480_v18  ;;  %v16432_v21 = vor.u32 %v18376_v46, %v16431_v41  ;;  %v18401_v18 = vld [vmem:[%s27772_s3 + $0xf44] sm:$0xf]  ;;  %v16383_v41 = vld [vmem:[%s27772_s3 + $0xe08] sm:$0xf]  ;;  %v18364_v46 = vld [vmem:[%s27772_s3 + $0xe14] sm:$0xf0] }
 0x509   : > { %9617 = vmatmul.bf16.vlgmr.msrb.gmra.mxu0 %v23441_v50  ;;  %9624 = vmatpush.bf16.msrb.mxu1 %v16356_v15  ;;  %v16808_v15 = vor.u32 %v18439_v34, %v16807_v44  ;;  %v8563_v27 = vpop.f32.mrf.mxu0 }
 0x50a   : > { %10466 = vmatpush.bf16.msra.mxu0 %v16872_v36  ;;  %v16324_v36 = vor.u32 %v18346_v53, %v16321_v45 }
 0x50c   : > { %9541 = vmatpush.bf16.msrb.mxu3 %v16588_v40  ;;  %9583 = vmatpush.bf16.msra.mxu2 %v16464_v55  ;;  %v16289_v40 = vld [vmem:[%s27772_s3 + $0xd58] sm:$0xf0]  ;;  %v16791_v55 = vld [vmem:[%s27772_s3 + $0x1040] sm:$0xf]  ;;  %v8577_v3 = vpop.f32.mrf.mxu1 }
 0x50d   : > { %9625 = vmatpush.bf16.msrb.mxu1 %v16340_v10  ;;  %v16540_v10 = vor.u32 %v18401_v18, %v16537_v38  ;;  %v26462_v53 = vadd.f32 %v8577_v3, %v8563_v27  ;;  %v16292_v42 = vor.u32 %v18338_v17, %v16289_v40  ;;  %v16792_v45 = vor.u32 %v18435_v11, %v16791_v55  ;;  %v16759_v18 = vld [vmem:[%s27772_s3 + $0x1000] sm:$0xf]  ;;  %v18487_v40 = vld [vmem:[%s27772_s3 + $0x11ec] sm:$0xf0]  ;;  %v18453_v55 = vld [vmem:[%s27772_s3 + $0x10e4] sm:$0xf] }
 0x50e   : > { %10467 = vmatpush.bf16.msra.mxu0 %v16856_v54  ;;  %v8491_v54 = vpop.f32.mrf.mxu3  ;;  %v8535_v34 = vpop.f32.mrf.mxu2  ;;  %v16873_v11 = vld [vmem:[%s27772_s3 + $0x10f0] sm:$0xf0] }
 0x50f   : > { %v8492_v7 = vadd.f32 %v8491_v54, %v26210_v22  ;;  %v16623_v54 = vld [vmem:[%s27772_s3 + $0xfe8] sm:$0xf] }
 0x510   : > { %9542 = vmatpush.bf16.msrb.mxu3 %v16572_v5  ;;  %9584 = vmatpush.bf16.msra.mxu2 %v16448_v12  ;;  %v16775_v5 = vld [vmem:[%s27772_s3 + $0x1020] sm:$0xf]  ;;  %v18431_v12 = vld [vmem:[%s27772_s3 + $0x102c] sm:$0xf0] }
 0x511   : > { %9626 = vmatpush.bf16.msrb.mxu1 %v16324_v36  ;;  %v26454_v22 = vadd.f32 %v8492_v7, %v25641_v25  ;;  %v16399_v25 = vld [vmem:[%s27772_s3 + $0xe28] sm:$0xf]  ;;  %v16776_v37 = vor.u32 %v18431_v12, %v16775_v5  ;;  %v16384_v7 = vor.u32 %v18364_v46, %v16383_v41  ;;  %v16857_v5 = vld [vmem:[%s27772_s3 + $0x10d0] sm:$0xf0]  ;;  %v18382_v46 = vld [vmem:[%s27772_s3 + $0xeac] sm:$0xf] }
 0x512   : > { %10468 = vmatpush.bf16.msra.mxu0 %v16840_v13  ;;  %v16416_v13 = vor.u32 %v18372_v24, %v16415_v29  ;;  %v16400_v36 = vor.u32 %v18368_v56, %v16399_v25  ;;  %v18390_v29 = vld [vmem:[%s27772_s3 + $0xeec] sm:$0xf]  ;;  %v16481_v25 = vld [vmem:[%s27772_s3 + $0xed8] sm:$0xf0]  ;;  %v16983_v56 = vld [vmem:[%s27772_s3 + $0x11c0] sm:$0xf]  ;;  %v16860_v41 = vor.u32 %v18449_v43, %v16857_v5 }
 0x513   : > { %v16809_v43 = vld [vmem:[%s27772_s3 + $0x1070] sm:$0xf0] }
 0x514   : > { %9543 = vmatpush.bf16.msrb.mxu3 %v16556_v39  ;;  %9585 = vmatpush.bf16.msra.mxu2 %v16432_v21  ;;  %v18330_v39 = vld [vmem:[%s27772_s3 + $0xd0c] sm:$0xf]  ;;  %v16257_v21 = vld [vmem:[%s27772_s3 + $0xd18] sm:$0xf0] }
 0x515   : > { %9627 = vmatpush.bf16.msrb.mxu1 %v16308_v63  ;;  %v26505_v63 = vadd.f32 %v8535_v34, %v26230_v49  ;;  %v16497_v49 = vld [vmem:[%s27772_s3 + $0xef8] sm:$0xf0]  ;;  %v16260_v27 = vor.u32 %v18330_v39, %v16257_v21  ;;  %v18445_v34 = vld [vmem:[%s27772_s3 + $0x10a4] sm:$0xf]  ;;  %v16841_v39 = vld [vmem:[%s27772_s3 + $0x10b0] sm:$0xf0] }
 0x516   : > { %10469 = vmatpush.bf16.msra.mxu0 %v16824_v4  ;;  %v16505_v4 = vld [vmem:[%s27772_s3 + $0xf10] sm:$0xf0]  ;;  %v8493_v44 = vpop.f32.mrf.mxu3 }
 0x517   : > { %v8494_v38 = vadd.f32 %v8493_v44, %v26280_v62  ;;  %v16999_v62 = vld [vmem:[%s27772_s3 + $0x11e0] sm:$0xf]  ;;  %v16508_v17 = vor.u32 %v18393_v47, %v16505_v4  ;;  %v16984_v4 = vor.u32 %v18483_v9, %v16983_v56  ;;  %v18479_v44 = vld [vmem:[%s27772_s3 + $0x11ac] sm:$0xf0]  ;;  %v18437_v9 = vld [vmem:[%s27772_s3 + $0x1064] sm:$0xf] }
 0x518   : > { %9544 = vmatpush.bf16.msrb.mxu3 %v16540_v10  ;;  %9586 = vmatpush.bf16.msra.mxu2 %v16416_v13  ;;  %v16500_v10 = vor.u32 %v18390_v29, %v16497_v49  ;;  %v16607_v13 = vld [vmem:[%s27772_s3 + $0xfc8] sm:$0xf]  ;;  %v17000_v57 = vor.u32 %v18487_v40, %v16999_v62  ;;  %v18378_v29 = vld [vmem:[%s27772_s3 + $0xe8c] sm:$0xf]  ;;  %v16449_v49 = vld [vmem:[%s27772_s3 + $0xe98] sm:$0xf0] }
 0x519   : > { %9628 = vmatpush.bf16.msrb.mxu1 %v16292_v42  ;;  %v26526_v24 = vadd.f32 %v8494_v38, %v25616_v23  ;;  %v16624_v23 = vor.u32 %v18424_v35, %v16623_v54  ;;  %v16876_v42 = vor.u32 %v18453_v55, %v16873_v11  ;;  %v16608_v12 = vor.u32 %v18420_v31, %v16607_v13  ;;  %v16575_v38 = vld [vmem:[%s27772_s3 + $0xf88] sm:$0xf]  ;;  %v16951_v62 = vld [vmem:[%s27772_s3 + $0x1180] sm:$0xf]  ;;  %v18441_v40 = vld [vmem:[%s27772_s3 + $0x1084] sm:$0xf] }
 0x51a   : > { %10470 = vmatpush.bf16.msra.mxu0 %v16808_v15  ;;  %v18427_v15 = vld [vmem:[%s27772_s3 + $0x100c] sm:$0xf0]  ;;  %v16844_v35 = vor.u32 %v18445_v34, %v16841_v39  ;;  %v16825_v55 = vld [vmem:[%s27772_s3 + $0x1090] sm:$0xf0] }
 0x51b   : > { %v16760_v3 = vor.u32 %v18427_v15, %v16759_v18  ;;  %v18412_v15 = vld [vmem:[%s27772_s3 + $0xf94] sm:$0xf0]  ;;  %v18471_v56 = vld [vmem:[%s27772_s3 + $0x116c] sm:$0xf0] }
 0x51c   : > { %9545 = vmatpush.bf16.msrb.mxu3 %v16524_v51  ;;  %9587 = vmatpush.bf16.msra.mxu2 %v16400_v36  ;;  %v16591_v51 = vld [vmem:[%s27772_s3 + $0xfa8] sm:$0xf]  ;;  %v18416_v36 = vld [vmem:[%s27772_s3 + $0xfb4] sm:$0xf0] }
 0x51d   : > { %9629 = vmatpush.bf16.msrb.mxu1 %v16276_v48  ;;  %v16465_v48 = vld [vmem:[%s27772_s3 + $0xeb8] sm:$0xf0]  ;;  %v16592_v21 = vor.u32 %v18416_v36, %v16591_v51  ;;  %v18404_v51 = vld [vmem:[%s27772_s3 + $0xf54] sm:$0xf0] }
 0x51e   : > { %10471 = vmatpush.bf16.msra.mxu0 %v16792_v45  ;;  %v18386_v45 = vld [vmem:[%s27772_s3 + $0xecc] sm:$0xf]  ;;  %v16468_v18 = vor.u32 %v18382_v46, %v16465_v48 }
 0x51f   : > { %v16484_v47 = vor.u32 %v18386_v45, %v16481_v25  ;;  %v16433_v45 = vld [vmem:[%s27772_s3 + $0xe78] sm:$0xf0]  ;;  %v16935_v25 = vld [vmem:[%s27772_s3 + $0x1160] sm:$0xf]  ;;  %v18370_v48 = vld [vmem:[%s27772_s3 + $0xe4c] sm:$0xf] }
 0x520   : > { %9546 = vmatpush.bf16.msrb.mxu3 %v16508_v17  ;;  %9588 = vmatpush.bf16.msra.mxu2 %v16384_v7  ;;  %v8617_v17 = vpop.f32.mrf.mxu0  ;;  %v18475_v7 = vld [vmem:[%s27772_s3 + $0x118c] sm:$0xf0]  ;;  %v16936_v36 = vor.u32 %v18471_v56, %v16935_v25 }
 0x521   : > { %9630 = vmatpush.bf16.msrb.mxu1 %v16260_v27  ;;  %v16576_v27 = vor.u32 %v18412_v15, %v16575_v38  ;;  %v16952_v31 = vor.u32 %v18475_v7, %v16951_v62  ;;  %v16793_v38 = vld [vmem:[%s27772_s3 + $0x1050] sm:$0xf0] }
 0x522   : > { %10472 = vmatpush.bf16.msra.mxu0 %v16776_v37  ;;  %v16967_v37 = vld [vmem:[%s27772_s3 + $0x11a0] sm:$0xf] }
 0x523   : > { %9547 = vmatmul.bf16.vlgmr.msrb.gmra.mxu3 %v23933_v19  ;;  %9589 = vmatmul.bf16.vlgmr.msra.gmra.mxu2 %v23771_v61  ;;  %v16968_v54 = vor.u32 %v18479_v44, %v16967_v37  ;;  %v8631_v11 = vpop.f32.mrf.mxu1  ;;  %v16417_v37 = vld [vmem:[%s27772_s3 + $0xe58] sm:$0xf0]  ;;  %v16919_v44 = vld [vmem:[%s27772_s3 + $0x1140] sm:$0xf] }
 0x524   : > { %9595 = vmatpush.bf16.msra.mxu3 %v16624_v23  ;;  %9637 = vmatpush.bf16.msrb.mxu2 %v16500_v10  ;;  %v16559_v23 = vld [vmem:[%s27772_s3 + $0xf68] sm:$0xf]  ;;  %v18408_v10 = vld [vmem:[%s27772_s3 + $0xf74] sm:$0xf0]  ;;  %v26619_v13 = vadd.f32 %v8631_v11, %v8617_v17  ;;  %v18463_v11 = vld [vmem:[%s27772_s3 + $0x112c] sm:$0xf0] }
 0x525   : > { %10480 = vmatpush.bf16.msra.mxu1 %v17000_v57  ;;  %v16828_v57 = vor.u32 %v18441_v40, %v16825_v55  ;;  %v16560_v5 = vor.u32 %v18408_v10, %v16559_v23  ;;  %v16401_v40 = vld [vmem:[%s27772_s3 + $0xe38] sm:$0xf0]  ;;  %v16903_v55 = vld [vmem:[%s27772_s3 + $0x1120] sm:$0xf]  ;;  %v16511_v23 = vld [vmem:[%s27772_s3 + $0xf08] sm:$0xf] }
 0x526   : > { %10473 = vmatpush.bf16.msra.mxu0 %v16760_v3  ;;  %9631 = vmatmul.bf16.vlgmr.msrb.gmra.mxu1 %v23607_v33  ;;  %v16452_v3 = vor.u32 %v18378_v29, %v16449_v49  ;;  %v8589_v46 = vpop.f32.mrf.mxu2  ;;  %v16527_v29 = vld [vmem:[%s27772_s3 + $0xf28] sm:$0xf]  ;;  %v18400_v49 = vld [vmem:[%s27772_s3 + $0xf34] sm:$0xf0]  ;;  %v16904_v25 = vor.u32 %v18463_v11, %v16903_v55  ;;  %v16985_v55 = vld [vmem:[%s27772_s3 + $0x11d0] sm:$0xf0] }
 0x527   : > { %v26656_v39 = vadd.f32 %v8589_v46, %v26405_v16  ;;  %v16528_v10 = vor.u32 %v18400_v49, %v16527_v29  ;;  %v16625_v46 = vld [vmem:[%s27772_s3 + $0xff8] sm:$0xf0]  ;;  %v16863_v11 = vld [vmem:[%s27772_s3 + $0x10c8] sm:$0xf] }
 0x528   : > { %9596 = vmatpush.bf16.msra.mxu3 %v16608_v12  ;;  %9638 = vmatpush.bf16.msrb.mxu2 %v16484_v47  ;;  %v16543_v47 = vld [vmem:[%s27772_s3 + $0xf48] sm:$0xf]  ;;  %v8619_v15 = vpop.f32.mrf.mxu0  ;;  %v16609_v29 = vld [vmem:[%s27772_s3 + $0xfd8] sm:$0xf0] }
 0x529   : > { %10474 = vmatmul.bf16.vlgmr.msra.gmra.mxu0 %v23441_v50  ;;  %10481 = vmatpush.bf16.msra.mxu1 %v16984_v4  ;;  %v16812_v4 = vor.u32 %v18437_v9, %v16809_v43 }
 0x52a   : > { %10522 = vmatpush.bf16.msrb.mxu0 %v16876_v42  ;;  %v18374_v42 = vld [vmem:[%s27772_s3 + $0xe6c] sm:$0xf] }
 0x52b   : > { %v16436_v12 = vor.u32 %v18374_v42, %v16433_v45  ;;  %v8633_v16 = vpop.f32.mrf.mxu1  ;;  %v18362_v42 = vld [vmem:[%s27772_s3 + $0xe0c] sm:$0xf]  ;;  %v16385_v45 = vld [vmem:[%s27772_s3 + $0xe18] sm:$0xf0] }
 0x52c   : > { %9597 = vmatpush.bf16.msra.mxu3 %v16592_v21  ;;  %9639 = vmatpush.bf16.msrb.mxu2 %v16468_v18  ;;  %v18467_v21 = vld [vmem:[%s27772_s3 + $0x114c] sm:$0xf0]  ;;  %v18433_v18 = vld [vmem:[%s27772_s3 + $0x1044] sm:$0xf]  ;;  %v26676_v62 = vadd.f32 %v8633_v16, %v8619_v15 }
 0x52d   : > { %10482 = vmatpush.bf16.msra.mxu1 %v16968_v54  ;;  %v16544_v54 = vor.u32 %v18404_v51, %v16543_v47  ;;  %v16920_v17 = vor.u32 %v18467_v21, %v16919_v44  ;;  %v16796_v7 = vor.u32 %v18433_v18, %v16793_v38  ;;  %v18425_v47 = vld [vmem:[%s27772_s3 + $0x1004] sm:$0xf]  ;;  %v17001_v21 = vld [vmem:[%s27772_s3 + $0x11f0] sm:$0xf0]  ;;  %v16879_v18 = vld [vmem:[%s27772_s3 + $0x10e8] sm:$0xf] }
 0x52e   : > { %10523 = vmatpush.bf16.msrb.mxu0 %v16860_v41  ;;  %v8547_v41 = vpop.f32.mrf.mxu3  ;;  %v8591_v43 = vpop.f32.mrf.mxu2  ;;  %v18456_v38 = vld [vmem:[%s27772_s3 + $0x10f4] sm:$0xf0] }
 0x52f   : > { %v8548_v34 = vadd.f32 %v8547_v41, %v26442_v1  ;;  %v18422_v41 = vld [vmem:[%s27772_s3 + $0xfec] sm:$0xf] }
 0x530   : > { %9598 = vmatpush.bf16.msra.mxu3 %v16576_v27  ;;  %9640 = vmatpush.bf16.msrb.mxu2 %v16452_v3  ;;  %v18429_v27 = vld [vmem:[%s27772_s3 + $0x1024] sm:$0xf]  ;;  %v16777_v3 = vld [vmem:[%s27772_s3 + $0x1030] sm:$0xf0] }
 0x531   : > { %10483 = vmatpush.bf16.msra.mxu1 %v16952_v31  ;;  %v26668_v1 = vadd.f32 %v8548_v34, %v25876_v52  ;;  %v18366_v52 = vld [vmem:[%s27772_s3 + $0xe2c] sm:$0xf]  ;;  %v16780_v56 = vor.u32 %v18429_v27, %v16777_v3  ;;  %v16388_v34 = vor.u32 %v18362_v42, %v16385_v45  ;;  %v18452_v27 = vld [vmem:[%s27772_s3 + $0x10d4] sm:$0xf0]  ;;  %v17095_v45 = vld [vmem:[%s27772_s3 + $0x12a0] sm:$0xf] }
 0x532   : > { %10524 = vmatpush.bf16.msrb.mxu0 %v16844_v35  ;;  %v16420_v35 = vor.u32 %v18370_v48, %v16417_v37  ;;  %v16404_v31 = vor.u32 %v18366_v52, %v16401_v40  ;;  %v17127_v48 = vld [vmem:[%s27772_s3 + $0x12e0] sm:$0xf]  ;;  %v18515_v52 = vld [vmem:[%s27772_s3 + $0x12cc] sm:$0xf0]  ;;  %v18481_v40 = vld [vmem:[%s27772_s3 + $0x11c4] sm:$0xf]  ;;  %v16864_v42 = vor.u32 %v18452_v27, %v16863_v11 }
 0x533   : > { %v18440_v11 = vld [vmem:[%s27772_s3 + $0x1074] sm:$0xf0] }
 0x534   : > { %9599 = vmatpush.bf16.msra.mxu3 %v16560_v5  ;;  %9641 = vmatpush.bf16.msrb.mxu2 %v16436_v12  ;;  %v16887_v5 = vld [vmem:[%s27772_s3 + $0x1100] sm:$0xf]  ;;  %v18459_v12 = vld [vmem:[%s27772_s3 + $0x110c] sm:$0xf0] }
 0x535   : > { %10484 = vmatpush.bf16.msra.mxu1 %v16936_v36  ;;  %v26719_v36 = vadd.f32 %v8591_v43, %v26462_v53  ;;  %v18519_v53 = vld [vmem:[%s27772_s3 + $0x12ec] sm:$0xf0]  ;;  %v16888_v15 = vor.u32 %v18459_v12, %v16887_v5  ;;  %v16847_v43 = vld [vmem:[%s27772_s3 + $0x10a8] sm:$0xf]  ;;  %v18448_v5 = vld [vmem:[%s27772_s3 + $0x10b4] sm:$0xf0] }
 0x536   : > { %10525 = vmatpush.bf16.msrb.mxu0 %v16828_v57  ;;  %v18396_v57 = vld [vmem:[%s27772_s3 + $0xf14] sm:$0xf0]  ;;  %v8549_v9 = vpop.f32.mrf.mxu3 }
 0x537   : > { %v8550_v51 = vadd.f32 %v8549_v9, %v26505_v63  ;;  %v18485_v63 = vld [vmem:[%s27772_s3 + $0x11e4] sm:$0xf]  ;;  %v16512_v44 = vor.u32 %v18396_v57, %v16511_v23  ;;  %v16988_v57 = vor.u32 %v18481_v40, %v16985_v55  ;;  %v16969_v9 = vld [vmem:[%s27772_s3 + $0x11b0] sm:$0xf0]  ;;  %v16815_v55 = vld [vmem:[%s27772_s3 + $0x1068] sm:$0xf] }
 0x538   : > { %9600 = vmatpush.bf16.msra.mxu3 %v16544_v54  ;;  %9642 = vmatpush.bf16.msrb.mxu2 %v16420_v35  ;;  %v17128_v54 = vor.u32 %v18519_v53, %v17127_v48  ;;  %v18418_v35 = vld [vmem:[%s27772_s3 + $0xfcc] sm:$0xf]  ;;  %v17004_v49 = vor.u32 %v18485_v63, %v17001_v21  ;;  %v17079_v48 = vld [vmem:[%s27772_s3 + $0x1280] sm:$0xf]  ;;  %v18507_v53 = vld [vmem:[%s27772_s3 + $0x128c] sm:$0xf0] }
 0x539   : > { %10485 = vmatpush.bf16.msra.mxu1 %v16920_v17  ;;  %v26740_v37 = vadd.f32 %v8550_v51, %v25851_v58  ;;  %v16628_v58 = vor.u32 %v18422_v41, %v16625_v46  ;;  %v16880_v17 = vor.u32 %v18456_v38, %v16879_v18  ;;  %v16612_v3 = vor.u32 %v18418_v35, %v16609_v29  ;;  %v18410_v51 = vld [vmem:[%s27772_s3 + $0xf8c] sm:$0xf]  ;;  %v18473_v63 = vld [vmem:[%s27772_s3 + $0x1184] sm:$0xf]  ;;  %v18444_v21 = vld [vmem:[%s27772_s3 + $0x1094] sm:$0xf0]  ;;  %v9450_v18 = vpop.f32.mrf.mxu0 }
 0x53a   : > { %10526 = vmatpush.bf16.msrb.mxu0 %v16812_v4  ;;  %v16761_v4 = vld [vmem:[%s27772_s3 + $0x1010] sm:$0xf0]  ;;  %v16848_v46 = vor.u32 %v18448_v5, %v16847_v43 }
 0x53b   : > { %v16764_v16 = vor.u32 %v18425_v47, %v16761_v4  ;;  %v16577_v4 = vld [vmem:[%s27772_s3 + $0xf98] sm:$0xf0]  ;;  %v16937_v40 = vld [vmem:[%s27772_s3 + $0x1170] sm:$0xf0] }
 0x53c   : > { %9601 = vmatpush.bf16.msra.mxu3 %v16528_v10  ;;  %9643 = vmatpush.bf16.msrb.mxu2 %v16404_v31  ;;  %v18414_v10 = vld [vmem:[%s27772_s3 + $0xfac] sm:$0xf]  ;;  %v16593_v31 = vld [vmem:[%s27772_s3 + $0xfb8] sm:$0xf0] }
 0x53d   : > { %10486 = vmatpush.bf16.msra.mxu1 %v16904_v25  ;;  %v18511_v25 = vld [vmem:[%s27772_s3 + $0x12ac] sm:$0xf0]  ;;  %v16596_v12 = vor.u32 %v18414_v10, %v16593_v31  ;;  %v16545_v10 = vld [vmem:[%s27772_s3 + $0xf58] sm:$0xf0] }
 0x53e   : > { %10527 = vmatpush.bf16.msrb.mxu0 %v16796_v7  ;;  %v17111_v7 = vld [vmem:[%s27772_s3 + $0x12c0] sm:$0xf]  ;;  %v17096_v47 = vor.u32 %v18511_v25, %v17095_v45 }
 0x53f   : > { %v17112_v23 = vor.u32 %v18515_v52, %v17111_v7  ;;  %v18503_v7 = vld [vmem:[%s27772_s3 + $0x126c] sm:$0xf0]  ;;  %v18469_v52 = vld [vmem:[%s27772_s3 + $0x1164] sm:$0xf]  ;;  %v17047_v25 = vld [vmem:[%s27772_s3 + $0x1240] sm:$0xf] }
 0x540   : > { %9602 = vmatpush.bf16.msra.mxu3 %v16512_v44  ;;  %9644 = vmatpush.bf16.msrb.mxu2 %v16388_v34  ;;  %v16953_v44 = vld [vmem:[%s27772_s3 + $0x1190] sm:$0xf0]  ;;  %v16831_v34 = vld [vmem:[%s27772_s3 + $0x1088] sm:$0xf]  ;;  %v16940_v31 = vor.u32 %v18469_v52, %v16937_v40  ;;  %v18457_v40 = vld [vmem:[%s27772_s3 + $0x1104] sm:$0xf] }
 0x541   : > { %10487 = vmatpush.bf16.msra.mxu1 %v16888_v15  ;;  %v16580_v15 = vor.u32 %v18410_v51, %v16577_v4  ;;  %v16956_v29 = vor.u32 %v18473_v63, %v16953_v44  ;;  %v18436_v51 = vld [vmem:[%s27772_s3 + $0x1054] sm:$0xf0]  ;;  %v17031_v63 = vld [vmem:[%s27772_s3 + $0x1220] sm:$0xf]  ;;  %v18461_v44 = vld [vmem:[%s27772_s3 + $0x1124] sm:$0xf] }
 0x542   : > { %10528 = vmatpush.bf16.msrb.mxu0 %v16780_v56  ;;  %v18477_v56 = vld [vmem:[%s27772_s3 + $0x11a4] sm:$0xf] }
 0x543   : > { %9603 = vmatmul.bf16.vlgmr.msra.gmra.mxu3 %v23933_v19  ;;  %9645 = vmatmul.bf16.vlgmr.msrb.gmra.mxu2 %v23771_v61  ;;  %v16972_v41 = vor.u32 %v18477_v56, %v16969_v9  ;;  %v9464_v38 = vpop.f32.mrf.mxu1  ;;  %v18499_v56 = vld [vmem:[%s27772_s3 + $0x124c] sm:$0xf0]  ;;  %v18465_v9 = vld [vmem:[%s27772_s3 + $0x1144] sm:$0xf] }
 0x544   : > { %9651 = vmatpush.bf16.msrb.mxu3 %v16628_v58  ;;  %10494 = vmatpush.bf16.msra.mxu2 %v17128_v54  ;;  %v18406_v58 = vld [vmem:[%s27772_s3 + $0xf6c] sm:$0xf]  ;;  %v16561_v54 = vld [vmem:[%s27772_s3 + $0xf78] sm:$0xf0]  ;;  %v26833_v35 = vadd.f32 %v9464_v38, %v9450_v18  ;;  %v18432_v18 = vld [vmem:[%s27772_s3 + $0x1034] sm:$0xf0] }
 0x545   : > { %10536 = vmatpush.bf16.msrb.mxu1 %v17004_v49  ;;  %v16832_v49 = vor.u32 %v18444_v21, %v16831_v34  ;;  %v16564_v27 = vor.u32 %v18406_v58, %v16561_v54  ;;  %v16905_v34 = vld [vmem:[%s27772_s3 + $0x1130] sm:$0xf0]  ;;  %v16783_v21 = vld [vmem:[%s27772_s3 + $0x1028] sm:$0xf]  ;;  %v18394_v38 = vld [vmem:[%s27772_s3 + $0xf0c] sm:$0xf] }
 0x546   : > { %10529 = vmatpush.bf16.msrb.mxu0 %v16764_v16  ;;  %10488 = vmatmul.bf16.vlgmr.msra.gmra.mxu1 %v23607_v33  ;;  %v17080_v16 = vor.u32 %v18507_v53, %v17079_v48  ;;  %v8645_v45 = vpop.f32.mrf.mxu2  ;;  %v16513_v58 = vld [vmem:[%s27772_s3 + $0xf18] sm:$0xf0]  ;;  %v17015_v54 = vld [vmem:[%s27772_s3 + $0x1200] sm:$0xf] }
 0x547   : > { %v26870_v5 = vadd.f32 %v8645_v45, %v26619_v13  ;;  %v17048_v13 = vor.u32 %v18499_v56, %v17047_v25  ;;  %v16516_v45 = vor.u32 %v18394_v38, %v16513_v58  ;;  %v18488_v56 = vld [vmem:[%s27772_s3 + $0x11f4] sm:$0xf0]  ;;  %v18543_v58 = vld [vmem:[%s27772_s3 + $0x13ac] sm:$0xf0] }
 0x548   : > { %9652 = vmatpush.bf16.msrb.mxu3 %v16612_v3  ;;  %10495 = vmatpush.bf16.msra.mxu2 %v17112_v23  ;;  %v18402_v23 = vld [vmem:[%s27772_s3 + $0xf4c] sm:$0xf] }
 0x549   : > { %10530 = vmatmul.bf16.vlgmr.msrb.gmra.mxu0 %v23441_v50  ;;  %10537 = vmatpush.bf16.msrb.mxu1 %v16988_v57  ;;  %v16816_v57 = vor.u32 %v18440_v11, %v16815_v55  ;;  %v16889_v55 = vld [vmem:[%s27772_s3 + $0x1110] sm:$0xf0]  ;;  %v16767_v11 = vld [vmem:[%s27772_s3 + $0x1008] sm:$0xf] }
 0x54a   : > { %10578 = vmatpush.bf16.msra.mxu0 %v16880_v17  ;;  %v17063_v17 = vld [vmem:[%s27772_s3 + $0x1260] sm:$0xf] }
 0x54b   : > { %v17064_v3 = vor.u32 %v18503_v7, %v17063_v17  ;;  %v16784_v17 = vor.u32 %v18432_v18, %v16783_v21  ;;  %v16865_v21 = vld [vmem:[%s27772_s3 + $0x10d8] sm:$0xf0]  ;;  %v26989_v18 = vpop.f32.mrf.mxu1 }
 0x54c   : > { %9653 = vmatpush.bf16.msrb.mxu3 %v16596_v12  ;;  %10496 = vmatpush.bf16.msra.mxu2 %v17096_v47  ;;  %v16921_v12 = vld [vmem:[%s27772_s3 + $0x1150] sm:$0xf0]  ;;  %v16799_v47 = vld [vmem:[%s27772_s3 + $0x1048] sm:$0xf] }
 0x54d   : > { %10538 = vmatpush.bf16.msrb.mxu1 %v16972_v41  ;;  %v18398_v41 = vld [vmem:[%s27772_s3 + $0xf2c] sm:$0xf]  ;;  %v16924_v48 = vor.u32 %v18465_v9, %v16921_v12  ;;  %v16800_v53 = vor.u32 %v18436_v51, %v16799_v47  ;;  %v16892_v12 = vor.u32 %v18457_v40, %v16889_v55  ;;  %v16849_v55 = vld [vmem:[%s27772_s3 + $0x10b8] sm:$0xf0] }
 0x54e   : > { %10579 = vmatpush.bf16.msra.mxu0 %v16864_v42  ;;  %v8603_v42 = vpop.f32.mrf.mxu3  ;;  %v8647_v52 = vpop.f32.mrf.mxu2  ;;  %v18454_v9 = vld [vmem:[%s27772_s3 + $0x10ec] sm:$0xf] }
 0x54f   : > { %v8604_v43 = vadd.f32 %v8603_v42, %v26656_v39  ;;  %v16548_v39 = vor.u32 %v18402_v23, %v16545_v10  ;;  %v18428_v23 = vld [vmem:[%s27772_s3 + $0x1014] sm:$0xf0]  ;;  %v17255_v10 = vld [vmem:[%s27772_s3 + $0x13e0] sm:$0xf]  ;;  %v18446_v40 = vld [vmem:[%s27772_s3 + $0x10ac] sm:$0xf] }
 0x550   : > { %9654 = vmatpush.bf16.msrb.mxu3 %v16580_v15  ;;  %10497 = vmatpush.bf16.msra.mxu2 %v17080_v16  ;;  %v16768_v47 = vor.u32 %v18428_v23, %v16767_v11  ;;  %v17207_v23 = vld [vmem:[%s27772_s3 + $0x1380] sm:$0xf] }
 0x551   : > { %10539 = vmatpush.bf16.msrb.mxu1 %v16956_v29  ;;  %v26882_v4 = vadd.f32 %v8604_v43, %v26112_v6  ;;  %v18495_v6 = vld [vmem:[%s27772_s3 + $0x122c] sm:$0xf0]  ;;  %v16881_v43 = vld [vmem:[%s27772_s3 + $0x10f8] sm:$0xf0] }
 0x552   : > { %10580 = vmatpush.bf16.msra.mxu0 %v16848_v46  ;;  %v16529_v46 = vld [vmem:[%s27772_s3 + $0xf38] sm:$0xf0]  ;;  %v17032_v16 = vor.u32 %v18495_v6, %v17031_v63  ;;  %v18491_v29 = vld [vmem:[%s27772_s3 + $0x120c] sm:$0xf0]  ;;  %v16991_v63 = vld [vmem:[%s27772_s3 + $0x11c8] sm:$0xf]  ;;  %v26978_v6 = vpop.f32.mrf.mxu0 }
 0x553   : > { %v16532_v15 = vor.u32 %v18398_v41, %v16529_v46  ;;  %v17016_v25 = vor.u32 %v18491_v29, %v17015_v54  ;;  %v16884_v46 = vor.u32 %v18454_v9, %v16881_v43  ;;  %v18442_v9 = vld [vmem:[%s27772_s3 + $0x108c] sm:$0xf]  ;;  %v16833_v43 = vld [vmem:[%s27772_s3 + $0x1098] sm:$0xf0] }
 0x554   : > { %9655 = vmatpush.bf16.msrb.mxu3 %v16564_v27  ;;  %10498 = vmatpush.bf16.msra.mxu2 %v17064_v3  ;;  %v26931_v3 = vadd.f32 %v8647_v52, %v26676_v62  ;;  %v17129_v62 = vld [vmem:[%s27772_s3 + $0x12f0] sm:$0xf0]  ;;  %v18480_v52 = vld [vmem:[%s27772_s3 + $0x11b4] sm:$0xf0] }
 0x555   : > { %10540 = vmatpush.bf16.msrb.mxu1 %v16940_v31  ;;  %v18551_v31 = vld [vmem:[%s27772_s3 + $0x13ec] sm:$0xf0] }
 0x556   : > { %10581 = vmatpush.bf16.msra.mxu0 %v16832_v49  ;;  %v16908_v49 = vor.u32 %v18461_v44, %v16905_v34  ;;  %v8605_v7 = vpop.f32.mrf.mxu3  ;;  %v18484_v44 = vld [vmem:[%s27772_s3 + $0x11d4] sm:$0xf0]  ;;  %v18450_v34 = vld [vmem:[%s27772_s3 + $0x10cc] sm:$0xf] }
 0x557   : > { %v8606_v27 = vadd.f32 %v8605_v7, %v26719_v36  ;;  %v17007_v36 = vld [vmem:[%s27772_s3 + $0x11e8] sm:$0xf]  ;;  %v16992_v54 = vor.u32 %v18484_v44, %v16991_v63  ;;  %v16868_v29 = vor.u32 %v18450_v34, %v16865_v21  ;;  %v18472_v44 = vld [vmem:[%s27772_s3 + $0x1174] sm:$0xf0]  ;;  %v18438_v34 = vld [vmem:[%s27772_s3 + $0x106c] sm:$0xf] }
 0x558   : > { %9656 = vmatpush.bf16.msrb.mxu3 %v16548_v39  ;;  %10499 = vmatpush.bf16.msra.mxu2 %v17048_v13  ;;  %v17239_v39 = vld [vmem:[%s27772_s3 + $0x13c0] sm:$0xf]  ;;  %v18547_v13 = vld [vmem:[%s27772_s3 + $0x13cc] sm:$0xf0]  ;;  %v17008_v41 = vor.u32 %v18488_v56, %v17007_v36  ;;  %v16975_v7 = vld [vmem:[%s27772_s3 + $0x11a8] sm:$0xf] }
 0x559   : > { %10541 = vmatpush.bf16.msrb.mxu1 %v16924_v48  ;;  %v26952_v42 = vadd.f32 %v8606_v27, %v26091_v2  ;;  %v17256_v2 = vor.u32 %v18551_v31, %v17255_v10  ;;  %v18513_v48 = vld [vmem:[%s27772_s3 + $0x12c4] sm:$0xf]  ;;  %v17240_v38 = vor.u32 %v18547_v13, %v17239_v39  ;;  %v18539_v10 = vld [vmem:[%s27772_s3 + $0x138c] sm:$0xf0]  ;;  %v16976_v31 = vor.u32 %v18480_v52, %v16975_v7  ;;  %v17081_v36 = vld [vmem:[%s27772_s3 + $0x1290] sm:$0xf0] }
 0x55a   : > { %10582 = vmatpush.bf16.msra.mxu0 %v16816_v57  ;;  %v18517_v57 = vld [vmem:[%s27772_s3 + $0x12e4] sm:$0xf]  ;;  %v18476_v56 = vld [vmem:[%s27772_s3 + $0x1194] sm:$0xf0]  ;;  %v18535_v39 = vld [vmem:[%s27772_s3 + $0x136c] sm:$0xf0] }
 0x55b   : > { %v17132_v51 = vor.u32 %v18517_v57, %v17129_v62  ;;  %v16852_v57 = vor.u32 %v18446_v40, %v16849_v55  ;;  %v18505_v62 = vld [vmem:[%s27772_s3 + $0x1284] sm:$0xf]  ;;  %v16943_v63 = vld [vmem:[%s27772_s3 + $0x1168] sm:$0xf]  ;;  %v16817_v21 = vld [vmem:[%s27772_s3 + $0x1078] sm:$0xf0] }
 0x55c   : > { %9657 = vmatpush.bf16.msrb.mxu3 %v16532_v15  ;;  %10500 = vmatpush.bf16.msra.mxu2 %v17032_v16  ;;  %v17223_v16 = vld [vmem:[%s27772_s3 + $0x13a0] sm:$0xf]  ;;  %v18497_v7 = vld [vmem:[%s27772_s3 + $0x1244] sm:$0xf]  ;;  %v17049_v52 = vld [vmem:[%s27772_s3 + $0x1250] sm:$0xf0] }
 0x55d   : > { %10542 = vmatpush.bf16.msrb.mxu1 %v16908_v49  ;;  %v18509_v49 = vld [vmem:[%s27772_s3 + $0x12a4] sm:$0xf]  ;;  %v17224_v11 = vor.u32 %v18543_v58, %v17223_v16  ;;  %v17175_v16 = vld [vmem:[%s27772_s3 + $0x1340] sm:$0xf]  ;;  %v18531_v58 = vld [vmem:[%s27772_s3 + $0x134c] sm:$0xf0] }
 0x55e   : > { %10583 = vmatpush.bf16.msra.mxu0 %v16800_v53  ;;  %v17113_v53 = vld [vmem:[%s27772_s3 + $0x12d0] sm:$0xf0]  ;;  %v16927_v40 = vld [vmem:[%s27772_s3 + $0x1148] sm:$0xf] }
 0x55f   : > { %v17116_v15 = vor.u32 %v18513_v48, %v17113_v53  ;;  %v18501_v48 = vld [vmem:[%s27772_s3 + $0x1264] sm:$0xf]  ;;  %v17065_v53 = vld [vmem:[%s27772_s3 + $0x1270] sm:$0xf0] }
 0x560   : > { %9658 = vmatpush.bf16.msrb.mxu3 %v16516_v45  ;;  %10501 = vmatpush.bf16.msra.mxu2 %v17016_v25  ;;  %v16959_v45 = vld [vmem:[%s27772_s3 + $0x1188] sm:$0xf]  ;;  %v9506_v25 = vpop.f32.mrf.mxu0 }
 0x561   : > { %10543 = vmatpush.bf16.msrb.mxu1 %v16892_v12 }
 0x562   : > { %10584 = vmatpush.bf16.msra.mxu0 %v16784_v17  ;;  %v17097_v17 = vld [vmem:[%s27772_s3 + $0x12b0] sm:$0xf0] }
 0x563   : > { %9659 = vmatmul.bf16.vlgmr.msrb.gmra.mxu3 %v23933_v19  ;;  %10502 = vmatmul.bf16.vlgmr.msra.gmra.mxu2 %v23771_v61  ;;  %v17100_v27 = vor.u32 %v18509_v49, %v17097_v17  ;;  %v9520_v12 = vpop.f32.mrf.mxu1 }
 0x564   : > { %10508 = vmatpush.bf16.msra.mxu3 %v17256_v2  ;;  %10550 = vmatpush.bf16.msrb.mxu2 %v17132_v51  ;;  %v17084_v2 = vor.u32 %v18505_v62, %v17081_v36  ;;  %v17191_v51 = vld [vmem:[%s27772_s3 + $0x1360] sm:$0xf]  ;;  %v27049_v13 = vadd.f32 %v9520_v12, %v9506_v25  ;;  %v17052_v62 = vor.u32 %v18497_v7, %v17049_v52  ;;  %v16911_v12 = vld [vmem:[%s27772_s3 + $0x1128] sm:$0xf] }
 0x565   : > { %10592 = vmatpush.bf16.msra.mxu1 %v17008_v41  ;;  %v16960_v41 = vor.u32 %v18476_v56, %v16959_v45  ;;  %v17159_v36 = vld [vmem:[%s27772_s3 + $0x1320] sm:$0xf]  ;;  %v18527_v45 = vld [vmem:[%s27772_s3 + $0x132c] sm:$0xf0] }
 0x566   : > { %10585 = vmatpush.bf16.msra.mxu0 %v16768_v47  ;;  %10544 = vmatmul.bf16.vlgmr.msrb.gmra.mxu1 %v23607_v33  ;;  %v17208_v47 = vor.u32 %v18539_v10, %v17207_v23  ;;  %v8659_v49 = vpop.f32.mrf.mxu3  ;;  %v9478_v17 = vpop.f32.mrf.mxu2  ;;  %v18434_v23 = vld [vmem:[%s27772_s3 + $0x104c] sm:$0xf]  ;;  %v16801_v10 = vld [vmem:[%s27772_s3 + $0x1058] sm:$0xf0] }
 0x567   : > { %v8660_v55 = vadd.f32 %v8659_v49, %v26870_v5  ;;  %v17257_v49 = vld [vmem:[%s27772_s3 + $0x13f0] sm:$0xf0] }
 0x568   : > { %10509 = vmatpush.bf16.msra.mxu3 %v17240_v38  ;;  %10551 = vmatpush.bf16.msrb.mxu2 %v17116_v15  ;;  %v17192_v38 = vor.u32 %v18535_v39, %v17191_v51  ;;  %v17068_v15 = vor.u32 %v18501_v48, %v17065_v53  ;;  %v16785_v51 = vld [vmem:[%s27772_s3 + $0x1038] sm:$0xf0]  ;;  %v17160_v39 = vor.u32 %v18527_v45, %v17159_v36  ;;  %v18523_v48 = vld [vmem:[%s27772_s3 + $0x130c] sm:$0xf0]  ;;  %v18489_v53 = vld [vmem:[%s27772_s3 + $0x1204] sm:$0xf] }
 0x569   : > { %10586 = vmatmul.bf16.vlgmr.msra.gmra.mxu0 %v23441_v50  ;;  %10593 = vmatpush.bf16.msra.mxu1 %v16992_v54  ;;  %v16944_v54 = vor.u32 %v18472_v44, %v16943_v63  ;;  %v27098_v5 = vadd.f32 %v8660_v55, %v26351_v28  ;;  %v18493_v28 = vld [vmem:[%s27772_s3 + $0x1224] sm:$0xf]  ;;  %v18486_v55 = vld [vmem:[%s27772_s3 + $0x11ec] sm:$0xf]  ;;  %v17119_v36 = vld [vmem:[%s27772_s3 + $0x12c8] sm:$0xf] }
 0x56a   : > { %10634 = vmatpush.bf16.msrb.mxu0 %v16884_v46  ;;  %v16836_v46 = vor.u32 %v18442_v9, %v16833_v43  ;;  %v16804_v9 = vor.u32 %v18434_v23, %v16801_v10  ;;  %v17033_v43 = vld [vmem:[%s27772_s3 + $0x1230] sm:$0xf0]  ;;  %v18516_v45 = vld [vmem:[%s27772_s3 + $0x12d4] sm:$0xf0] }
 0x56c   : > { %10510 = vmatpush.bf16.msra.mxu3 %v17224_v11  ;;  %10552 = vmatpush.bf16.msrb.mxu2 %v17100_v27  ;;  %v27086_v11 = vadd.f32 %v9478_v17, %v26833_v35  ;;  %v18468_v27 = vld [vmem:[%s27772_s3 + $0x1154] sm:$0xf0]  ;;  %v9522_v35 = vpop.f32.mrf.mxu1 }
 0x56d   : > { %10594 = vmatpush.bf16.msra.mxu1 %v16976_v31  ;;  %v9508_v31 = vpop.f32.mrf.mxu0  ;;  %v16928_v56 = vor.u32 %v18468_v27, %v16927_v40  ;;  %v18520_v17 = vld [vmem:[%s27772_s3 + $0x12f4] sm:$0xf0]  ;;  %v17009_v27 = vld [vmem:[%s27772_s3 + $0x11f8] sm:$0xf0] }
 0x56e   : > { %10635 = vmatpush.bf16.msrb.mxu0 %v16868_v29  ;;  %v16820_v29 = vor.u32 %v18438_v34, %v16817_v21  ;;  %v27106_v25 = vadd.f32 %v9522_v35, %v9508_v31  ;;  %v8661_v34 = vpop.f32.mrf.mxu3  ;;  %v17017_v21 = vld [vmem:[%s27772_s3 + $0x1210] sm:$0xf0] }
 0x56f   : > { %v17020_v40 = vor.u32 %v18489_v53, %v17017_v21  ;;  %v17209_v21 = vld [vmem:[%s27772_s3 + $0x1390] sm:$0xf0] }
 0x570   : > { %10511 = vmatpush.bf16.msra.mxu3 %v17208_v47  ;;  %10553 = vmatpush.bf16.msrb.mxu2 %v17084_v2  ;;  %v18464_v47 = vld [vmem:[%s27772_s3 + $0x1134] sm:$0xf0]  ;;  %v18430_v2 = vld [vmem:[%s27772_s3 + $0x102c] sm:$0xf] }
 0x571   : > { %10595 = vmatpush.bf16.msra.mxu1 %v16960_v41  ;;  %v17036_v41 = vor.u32 %v18493_v28, %v17033_v43  ;;  %v16912_v63 = vor.u32 %v18464_v47, %v16911_v12  ;;  %v16788_v44 = vor.u32 %v18430_v2, %v16785_v51  ;;  %v17120_v43 = vor.u32 %v18516_v45, %v17119_v36  ;;  %v18541_v12 = vld [vmem:[%s27772_s3 + $0x13a4] sm:$0xf]  ;;  %v17225_v2 = vld [vmem:[%s27772_s3 + $0x13b0] sm:$0xf0]  ;;  %v17103_v51 = vld [vmem:[%s27772_s3 + $0x12a8] sm:$0xf] }
 0x572   : > { %10636 = vmatpush.bf16.msrb.mxu0 %v16852_v57  ;;  %v17176_v57 = vor.u32 %v18531_v58, %v17175_v16  ;;  %v8662_v16 = vadd.f32 %v8661_v34, %v26931_v3  ;;  %v18426_v58 = vld [vmem:[%s27772_s3 + $0x100c] sm:$0xf]  ;;  %v17135_v3 = vld [vmem:[%s27772_s3 + $0x12e8] sm:$0xf]  ;;  %v17177_v45 = vld [vmem:[%s27772_s3 + $0x1350] sm:$0xf0] }
 0x573   : > { %v17136_v35 = vor.u32 %v18520_v17, %v17135_v3  ;;  %v18533_v3 = vld [vmem:[%s27772_s3 + $0x1364] sm:$0xf] }
 0x574   : > { %10512 = vmatpush.bf16.msra.mxu3 %v17192_v38  ;;  %10554 = vmatpush.bf16.msrb.mxu2 %v17068_v15  ;;  %v16895_v38 = vld [vmem:[%s27772_s3 + $0x1108] sm:$0xf]  ;;  %v18460_v15 = vld [vmem:[%s27772_s3 + $0x1114] sm:$0xf0]  ;;  %v27164_v7 = vadd.f32 %v8662_v16, %v26330_v59  ;;  %v18545_v59 = vld [vmem:[%s27772_s3 + $0x13c4] sm:$0xf] }
 0x575   : > { %10596 = vmatpush.bf16.msra.mxu1 %v16944_v54  ;;  %v16769_v54 = vld [vmem:[%s27772_s3 + $0x1018] sm:$0xf0]  ;;  %v16896_v23 = vor.u32 %v18460_v15, %v16895_v38  ;;  %v17087_v38 = vld [vmem:[%s27772_s3 + $0x1288] sm:$0xf]  ;;  %v9562_v15 = vpop.f32.mrf.mxu0  ;;  %v18474_v16 = vld [vmem:[%s27772_s3 + $0x118c] sm:$0xf] }
 0x576   : > { %10637 = vmatpush.bf16.msrb.mxu0 %v16836_v46  ;;  %v17143_v46 = vld [vmem:[%s27772_s3 + $0x1300] sm:$0xf]  ;;  %v16772_v10 = vor.u32 %v18426_v58, %v16769_v54  ;;  %v16961_v58 = vld [vmem:[%s27772_s3 + $0x1198] sm:$0xf0] }
 0x577   : > { %v17144_v52 = vor.u32 %v18523_v48, %v17143_v46  ;;  %v16977_v46 = vld [vmem:[%s27772_s3 + $0x11b8] sm:$0xf0]  ;;  %v17228_v48 = vor.u32 %v18541_v12, %v17225_v2  ;;  %v18466_v12 = vld [vmem:[%s27772_s3 + $0x114c] sm:$0xf] }
 0x578   : > { %10513 = vmatpush.bf16.msra.mxu3 %v17176_v57  ;;  %10555 = vmatpush.bf16.msrb.mxu2 %v17052_v62  ;;  %v17012_v57 = vor.u32 %v18486_v55, %v17009_v27  ;;  %v17241_v62 = vld [vmem:[%s27772_s3 + $0x13d0] sm:$0xf0]  ;;  %v17071_v55 = vld [vmem:[%s27772_s3 + $0x1268] sm:$0xf]  ;;  %v18504_v27 = vld [vmem:[%s27772_s3 + $0x1274] sm:$0xf0] }
 0x579   : > { %10597 = vmatpush.bf16.msra.mxu1 %v16928_v56  ;;  %v18482_v56 = vld [vmem:[%s27772_s3 + $0x11cc] sm:$0xf]  ;;  %v17244_v28 = vor.u32 %v18545_v59, %v17241_v62  ;;  %v18529_v59 = vld [vmem:[%s27772_s3 + $0x1344] sm:$0xf] }
 0x57a   : > { %10638 = vmatpush.bf16.msrb.mxu0 %v16820_v29  ;;  %v18549_v29 = vld [vmem:[%s27772_s3 + $0x13e4] sm:$0xf] }
 0x57b   : > { %v17260_v31 = vor.u32 %v18549_v29, %v17257_v49 }
 0x57c   : > { %10514 = vmatpush.bf16.msra.mxu3 %v17160_v39  ;;  %10556 = vmatpush.bf16.msrb.mxu2 %v17036_v41  ;;  %v18512_v39 = vld [vmem:[%s27772_s3 + $0x12b4] sm:$0xf0]  ;;  %v18478_v41 = vld [vmem:[%s27772_s3 + $0x11ac] sm:$0xf] }
 0x57d   : > { %10598 = vmatpush.bf16.msra.mxu1 %v16912_v63  ;;  %v17104_v53 = vor.u32 %v18512_v39, %v17103_v51  ;;  %v18537_v63 = vld [vmem:[%s27772_s3 + $0x1384] sm:$0xf]  ;;  %v16980_v34 = vor.u32 %v18478_v41, %v16977_v46  ;;  %v9564_v2 = vpop.f32.mrf.mxu0  ;;  %v17180_v39 = vor.u32 %v18529_v59, %v17177_v45 }
 0x57e   : > { %10639 = vmatpush.bf16.msrb.mxu0 %v16804_v9  ;;  %v16993_v9 = vld [vmem:[%s27772_s3 + $0x11d8] sm:$0xf0]  ;;  %v17212_v29 = vor.u32 %v18537_v63, %v17209_v21  ;;  %v18496_v63 = vld [vmem:[%s27772_s3 + $0x1234] sm:$0xf0]  ;;  %v18462_v21 = vld [vmem:[%s27772_s3 + $0x112c] sm:$0xf] }
 0x57f   : > { %v16996_v47 = vor.u32 %v18482_v56, %v16993_v9  ;;  %v17055_v56 = vld [vmem:[%s27772_s3 + $0x1248] sm:$0xf]  ;;  %v18500_v9 = vld [vmem:[%s27772_s3 + $0x1254] sm:$0xf0] }
 0x580   : > { %10515 = vmatpush.bf16.msra.mxu3 %v17144_v52  ;;  %10557 = vmatpush.bf16.msrb.mxu2 %v17020_v40  ;;  %v16964_v52 = vor.u32 %v18474_v16, %v16961_v58  ;;  %v17193_v40 = vld [vmem:[%s27772_s3 + $0x1370] sm:$0xf0]  ;;  %v17056_v41 = vor.u32 %v18500_v9, %v17055_v56  ;;  %v18521_v58 = vld [vmem:[%s27772_s3 + $0x1304] sm:$0xf]  ;;  %v17247_v9 = vld [vmem:[%s27772_s3 + $0x13c8] sm:$0xf] }
 0x581   : > { %10599 = vmatpush.bf16.msra.mxu1 %v16896_v23  ;;  %v18470_v23 = vld [vmem:[%s27772_s3 + $0x116c] sm:$0xf] }
 0x582   : > { %10640 = vmatpush.bf16.msrb.mxu0 %v16788_v44  ;;  %v9480_v44 = vpop.f32.mrf.mxu2 }
 0x583   : > { %10516 = vmatmul.bf16.vlgmr.msra.gmra.mxu3 %v23933_v19  ;;  %10558 = vmatmul.bf16.vlgmr.msrb.gmra.mxu2 %v23771_v61  ;;  %v9576_v54 = vpop.f32.mrf.mxu1 }
 0x584   : > { %10564 = vmatpush.bf16.msrb.mxu3 %v17260_v31  ;;  %10606 = vmatpush.bf16.msra.mxu2 %v17136_v35  ;;  %v27233_v17 = vadd.f32 %v9576_v54, %v9562_v15  ;;  %v17196_v31 = vor.u32 %v18533_v3, %v17193_v40  ;;  %v17072_v35 = vor.u32 %v18504_v27, %v17071_v55  ;;  %v18458_v3 = vld [vmem:[%s27772_s3 + $0x110c] sm:$0xf]  ;;  %v16897_v55 = vld [vmem:[%s27772_s3 + $0x1118] sm:$0xf0]  ;;  %v17263_v27 = vld [vmem:[%s27772_s3 + $0x13e8] sm:$0xf] }
 0x585   : > { %10648 = vmatpush.bf16.msrb.mxu1 %v17012_v57 }
 0x586   : > { %10641 = vmatpush.bf16.msrb.mxu0 %v16772_v10  ;;  %10600 = vmatmul.bf16.vlgmr.msra.gmra.mxu1 %v23607_v33  ;;  %v16945_v10 = vld [vmem:[%s27772_s3 + $0x1178] sm:$0xf0]  ;;  %v9492_v62 = vpop.f32.mrf.mxu3 }
 0x587   : > { %v16948_v57 = vor.u32 %v18470_v23, %v16945_v10  ;;  %v18552_v23 = vld [vmem:[%s27772_s3 + $0x13f4] sm:$0xf0]  ;;  %v18518_v10 = vld [vmem:[%s27772_s3 + $0x12ec] sm:$0xf] }
 0x588   : > { %10565 = vmatpush.bf16.msrb.mxu3 %v17244_v28  ;;  %10607 = vmatpush.bf16.msra.mxu2 %v17120_v43  ;;  %v9493_v28 = vadd.f32 %v9492_v62, %v27086_v11  ;;  %v18525_v11 = vld [vmem:[%s27772_s3 + $0x1324] sm:$0xf]  ;;  %v16900_v62 = vor.u32 %v18458_v3, %v16897_v55  ;;  %v17183_v55 = vld [vmem:[%s27772_s3 + $0x1348] sm:$0xf] }
 0x589   : > { %10642 = vmatmul.bf16.vlgmr.msrb.gmra.mxu0 %v23441_v50  ;;  %10649 = vmatpush.bf16.msrb.mxu1 %v16996_v47  ;;  %v18508_v50 = vld [vmem:[%s27772_s3 + $0x1294] sm:$0xf0]  ;;  %v16929_v47 = vld [vmem:[%s27772_s3 + $0x1158] sm:$0xf0] }
 0x58a   : > { %v17088_v49 = vor.u32 %v18508_v50, %v17087_v38  ;;  %v9534_v36 = vpop.f32.mrf.mxu2  ;;  %v16932_v46 = vor.u32 %v18466_v12, %v16929_v47  ;;  %v16913_v38 = vld [vmem:[%s27772_s3 + $0x1138] sm:$0xf0]  ;;  %v18514_v47 = vld [vmem:[%s27772_s3 + $0x12cc] sm:$0xf] }
 0x58b   : > { %v27264_v43 = vadd.f32 %v9534_v36, %v27049_v13  ;;  %v9578_v51 = vpop.f32.mrf.mxu1  ;;  %v17264_v36 = vor.u32 %v18552_v23, %v17263_v27  ;;  %v18532_v27 = vld [vmem:[%s27772_s3 + $0x1354] sm:$0xf0] }
 0x58c   : > { %10566 = vmatpush.bf16.msrb.mxu3 %v17228_v48  ;;  %10608 = vmatpush.bf16.msra.mxu2 %v17104_v53  ;;  %v27275_v13 = vadd.f32 %v9578_v51, %v9564_v2  ;;  %v17161_v48 = vld [vmem:[%s27772_s3 + $0x1330] sm:$0xf0]  ;;  %v17039_v53 = vld [vmem:[%s27772_s3 + $0x1228] sm:$0xf]  ;;  %v17121_v2 = vld [vmem:[%s27772_s3 + $0x12d8] sm:$0xf0] }
 0x58d   : > { %10650 = vmatpush.bf16.msrb.mxu1 %v16980_v34  ;;  %v9467_v34 = vadd.f32 %v26989_v18, %v26978_v6  ;;  %v17164_v15 = vor.u32 %v18525_v11, %v17161_v48  ;;  %v17040_v16 = vor.u32 %v18496_v63, %v17039_v53  ;;  %v17145_v6 = vld [vmem:[%s27772_s3 + $0x1310] sm:$0xf0]  ;;  %v16916_v18 = vor.u32 %v18462_v21, %v16913_v38  ;;  %v17231_v48 = vld [vmem:[%s27772_s3 + $0x13a8] sm:$0xf]  ;;  %v17105_v53 = vld [vmem:[%s27772_s3 + $0x12b8] sm:$0xf0] }
 0x58e   : > { %v9494_v54 = vpop.f32.mrf.mxu3  ;;  %v17148_v59 = vor.u32 %v18521_v58, %v17145_v6  ;;  %v17215_v21 = vld [vmem:[%s27772_s3 + $0x1388] sm:$0xf]  ;;  %v18540_v38 = vld [vmem:[%s27772_s3 + $0x1394] sm:$0xf0] }
 0x58f   : > { %v9481_v50 = vadd.f32 %v9480_v44, %v9467_v34  ;;  %v17023_v44 = vld [vmem:[%s27772_s3 + $0x1208] sm:$0xf] }
 0x590   : > { %10567 = vmatpush.bf16.msrb.mxu3 %v17212_v29  ;;  %10609 = vmatpush.bf16.msra.mxu2 %v17088_v49  ;;  %v18492_v49 = vld [vmem:[%s27772_s3 + $0x1214] sm:$0xf0] }
 0x591   : > { %10651 = vmatpush.bf16.msrb.mxu1 %v16964_v52  ;;  %v9495_v52 = vadd.f32 %v9494_v54, %v9481_v50  ;;  %v18506_v50 = vld [vmem:[%s27772_s3 + $0x128c] sm:$0xf]  ;;  %v18536_v54 = vld [vmem:[%s27772_s3 + $0x1374] sm:$0xf0] }
 0x592   : > { %v9536_v29 = vpop.f32.mrf.mxu2 }
 0x593   : > { %v27310_v40 = vadd.f32 %v9536_v29, %v27106_v25  ;;  %v17137_v25 = vld [vmem:[%s27772_s3 + $0x12f8] sm:$0xf0] }
 0x594   : > { %10568 = vmatpush.bf16.msrb.mxu3 %v17196_v31  ;;  %10610 = vmatpush.bf16.msra.mxu2 %v17072_v35  ;;  %v9665_v31 = vrot.slane %v9493_v28, 1  ;;  %v9669_v35 = vrot.slane %v9495_v52, 1  ;;  %v17140_v56 = vor.u32 %v18518_v10, %v17137_v25  ;;  %v18548_v28 = vld [vmem:[%s27772_s3 + $0x13d4] sm:$0xf0]  ;;  %v18498_v25 = vld [vmem:[%s27772_s3 + $0x124c] sm:$0xf] }
 0x595   : > { %10652 = vmatpush.bf16.msrb.mxu1 %v16948_v57  ;;  %v17024_v57 = vor.u32 %v18492_v49, %v17023_v44  ;;  %v17248_v11 = vor.u32 %v18548_v28, %v17247_v9  ;;  %v18502_v44 = vld [vmem:[%s27772_s3 + $0x126c] sm:$0xf]  ;;  %v17073_v49 = vld [vmem:[%s27772_s3 + $0x1278] sm:$0xf0]  ;;  %v18528_v9 = vld [vmem:[%s27772_s3 + $0x1334] sm:$0xf0] }
 0x596   : > { %v9677_v45 = vsel %vm4541_vm4, %v9669_v35, %v9665_v31  ;;  %v9673_v12 = vsel %vm4541_vm4, %v9665_v31, %v9669_v35  ;;  %v17076_v52 = vor.u32 %v18502_v44, %v17073_v49  ;;  %v17057_v31 = vld [vmem:[%s27772_s3 + $0x1258] sm:$0xf0]  ;;  %v18542_v49 = vld [vmem:[%s27772_s3 + $0x13ac] sm:$0xf] }
 0x597   : > { %v27344_v51 = vadd.f32 %v9673_v12, %v26454_v22  ;;  %v18544_v22 = vld [vmem:[%s27772_s3 + $0x13b4] sm:$0xf0] }
 0x598   : > { %10569 = vmatpush.bf16.msrb.mxu3 %v17180_v39  ;;  %10611 = vmatpush.bf16.msra.mxu2 %v17056_v41  ;;  %v9685_v39 = vsel %vm465_vm5, %v9677_v45, 0.0  ;;  %v17232_v63 = vor.u32 %v18544_v22, %v17231_v48  ;;  %v17060_v45 = vor.u32 %v18498_v25, %v17057_v31  ;;  %v17025_v22 = vld [vmem:[%s27772_s3 + $0x1218] sm:$0xf0] }
 0x599   : > { %10653 = vmatpush.bf16.msrb.mxu1 %v16932_v46  ;;  %v27349_v41 = vadd.f32 %v9685_v39, %v26526_v24  ;;  %v17124_v46 = vor.u32 %v18514_v47, %v17121_v2  ;;  %v18510_v24 = vld [vmem:[%s27772_s3 + $0x12ac] sm:$0xf]  ;;  %v17151_v2 = vld [vmem:[%s27772_s3 + $0x1308] sm:$0xf]  ;;  %v18524_v39 = vld [vmem:[%s27772_s3 + $0x1314] sm:$0xf0] }
 0x59a   : > { %v17108_v34 = vor.u32 %v18510_v24, %v17105_v53  ;;  %v18550_v24 = vld [vmem:[%s27772_s3 + $0x13ec] sm:$0xf]  ;;  %v17265_v53 = vld [vmem:[%s27772_s3 + $0x13f8] sm:$0xf0] }
 0x59b   : > { %v17185_v25 = vld [vmem:[%s27772_s3 + $0x1358] sm:$0xf0] }
 0x59c   : > { %10570 = vmatpush.bf16.msrb.mxu3 %v17164_v15  ;;  %10612 = vmatpush.bf16.msra.mxu2 %v17040_v16  ;;  %v9618_v15 = vpop.f32.mrf.mxu0  ;;  %v17216_v16 = vor.u32 %v18540_v38, %v17215_v21  ;;  %v17152_v21 = vor.u32 %v18524_v39, %v17151_v2 }
 0x59d   : > { %10654 = vmatpush.bf16.msrb.mxu1 %v16916_v18  ;;  %v17199_v18 = vld [vmem:[%s27772_s3 + $0x1368] sm:$0xf] }
 0x59e   : > { %v17200_v3 = vor.u32 %v18536_v54, %v17199_v18 }
 0x5a0   : > { %10571 = vmatpush.bf16.msrb.mxu3 %v17148_v59  ;;  %10613 = vmatpush.bf16.msra.mxu2 %v17024_v57  ;;  %v17184_v57 = vor.u32 %v18532_v27, %v17183_v55  ;;  %v18534_v27 = vld [vmem:[%s27772_s3 + $0x136c] sm:$0xf] }
 0x5a1   : > { %10655 = vmatpush.bf16.msrb.mxu1 %v16900_v62 }
 0x5a3   : > { %10572 = vmatmul.bf16.vlgmr.msrb.gmra.mxu3 %v23933_v19  ;;  %10614 = vmatmul.bf16.vlgmr.msra.gmra.mxu2 %v23771_v61  ;;  %v9632_v58 = vpop.f32.mrf.mxu1 }
 0x5a4   : > { %10620 = vmatpush.bf16.msra.mxu3 %v17264_v36  ;;  %10662 = vmatpush.bf16.msrb.mxu2 %v17140_v56  ;;  %v27384_v29 = vadd.f32 %v9632_v58, %v9618_v15  ;;  %v9620_v62 = vpop.f32.mrf.mxu0  ;;  %v17167_v56 = vld [vmem:[%s27772_s3 + $0x1328] sm:$0xf]  ;;  %v17268_v15 = vor.u32 %v18550_v24, %v17265_v53  ;;  %v17249_v58 = vld [vmem:[%s27772_s3 + $0x13d8] sm:$0xf0] }
 0x5a5   : > { %10656 = vmatmul.bf16.vlgmr.msrb.gmra.mxu1 %v23607_v33  ;;  %v17089_v33 = vld [vmem:[%s27772_s3 + $0x1298] sm:$0xf0]  ;;  %v17168_v12 = vor.u32 %v18528_v9, %v17167_v56 }
 0x5a6   : > { %v17092_v6 = vor.u32 %v18506_v50, %v17089_v33  ;;  %v9548_v23 = vpop.f32.mrf.mxu3  ;;  %v9590_v10 = vpop.f32.mrf.mxu2  ;;  %v17169_v56 = vld [vmem:[%s27772_s3 + $0x1338] sm:$0xf0] }
 0x5a7   : > { %v9549_v35 = vadd.f32 %v9548_v23, %v27264_v43  ;;  %v27406_v59 = vadd.f32 %v9590_v10, %v27233_v17  ;;  %v18494_v17 = vld [vmem:[%s27772_s3 + $0x122c] sm:$0xf]  ;;  %v17041_v43 = vld [vmem:[%s27772_s3 + $0x1238] sm:$0xf0] }
 0x5a8   : > { %10621 = vmatpush.bf16.msra.mxu3 %v17248_v11  ;;  %10663 = vmatpush.bf16.msrb.mxu2 %v17124_v46  ;;  %v17044_v47 = vor.u32 %v18494_v17, %v17041_v43  ;;  %v18490_v11 = vld [vmem:[%s27772_s3 + $0x120c] sm:$0xf] }
 0x5a9   : > { %v9666_v38 = vrot.slane %v9549_v35, 1  ;;  %v17028_v33 = vor.u32 %v18490_v11, %v17025_v22  ;;  %v18530_v10 = vld [vmem:[%s27772_s3 + $0x134c] sm:$0xf] }
 0x5aa   : > { %v18522_v43 = vld [vmem:[%s27772_s3 + $0x130c] sm:$0xf] }
 0x5ab   : > { %v9634_v36 = vpop.f32.mrf.mxu1 }
 0x5ac   : > { %10622 = vmatpush.bf16.msra.mxu3 %v17232_v63  ;;  %10664 = vmatpush.bf16.msrb.mxu2 %v17108_v34  ;;  %v27414_v28 = vadd.f32 %v9634_v36, %v9620_v62  ;;  %v17188_v36 = vor.u32 %v18530_v10, %v17185_v25  ;;  %v10475_v9 = vpop.f32.mrf.mxu0 }
 0x5ae   : > { %v9550_v46 = vpop.f32.mrf.mxu3  ;;  %v9592_v48 = vpop.f32.mrf.mxu2 }
 0x5af   : > { %v9551_v63 = vadd.f32 %v9550_v46, %v27310_v40  ;;  %v9593_v34 = vadd.f32 %v9592_v48, %v27275_v13 }
 0x5b0   : > { %10623 = vmatpush.bf16.msra.mxu3 %v17216_v16  ;;  %10665 = vmatpush.bf16.msrb.mxu2 %v17092_v6  ;;  %v18546_v16 = vld [vmem:[%s27772_s3 + $0x13cc] sm:$0xf] }
 0x5b1   : > { %v9670_v50 = vrot.slane %v9551_v63, 1  ;;  %v17252_v44 = vor.u32 %v18546_v16, %v17249_v58 }
 0x5b3   : > { %v9674_v40 = vsel %vm4541_vm4, %v9666_v38, %v9670_v50  ;;  %v9678_v13 = vsel %vm4541_vm4, %v9670_v50, %v9666_v38 }
 0x5b4   : > { %10624 = vmatpush.bf16.msra.mxu3 %v17200_v3  ;;  %10666 = vmatpush.bf16.msrb.mxu2 %v17076_v52  ;;  %v9686_v6 = vsel %vm465_vm5, %v9678_v13, 0.0  ;;  %v27455_v18 = vadd.f32 %v9674_v40, %v26668_v1  ;;  %v17233_v3 = vld [vmem:[%s27772_s3 + $0x13b8] sm:$0xf0] }
 0x5b5   : > { %v27458_v54 = vadd.f32 %v9686_v6, %v26740_v37  ;;  %v17236_v1 = vor.u32 %v18542_v49, %v17233_v3  ;;  %v18538_v37 = vld [vmem:[%s27772_s3 + $0x138c] sm:$0xf]  ;;  %v17217_v52 = vld [vmem:[%s27772_s3 + $0x1398] sm:$0xf0] }
 0x5b6   : > { %v17220_v55 = vor.u32 %v18538_v37, %v17217_v52 }
 0x5b8   : > { %10625 = vmatpush.bf16.msra.mxu3 %v17184_v57  ;;  %10667 = vmatpush.bf16.msrb.mxu2 %v17060_v45  ;;  %v18526_v45 = vld [vmem:[%s27772_s3 + $0x132c] sm:$0xf] }
 0x5b9   : > { %v17172_v17 = vor.u32 %v18526_v45, %v17169_v56 }
 0x5bc   : > { %10626 = vmatpush.bf16.msra.mxu3 %v17168_v12  ;;  %10668 = vmatpush.bf16.msrb.mxu2 %v17044_v47 }
 0x5c0   : > { %10627 = vmatpush.bf16.msra.mxu3 %v17152_v21  ;;  %10669 = vmatpush.bf16.msrb.mxu2 %v17028_v33  ;;  %v10477_v21 = vpop.f32.mrf.mxu0 }
 0x5c3   : > { %10628 = vmatmul.bf16.vlgmr.msra.gmra.mxu3 %v23933_v19  ;;  %10670 = vmatmul.bf16.vlgmr.msrb.gmra.mxu2 %v23771_v61  ;;  %v17201_v61 = vld [vmem:[%s27772_s3 + $0x1378] sm:$0xf0] }
 0x5c4   : > { %10676 = vmatpush.bf16.msrb.mxu3 %v17268_v15  ;;  %v17204_v23 = vor.u32 %v18534_v27, %v17201_v61 }
 0x5c6   : > { %v9604_v31 = vpop.f32.mrf.mxu3  ;;  %v9646_v35 = vpop.f32.mrf.mxu2 }
 0x5c7   : > { %v9605_v57 = vadd.f32 %v9604_v31, %v27406_v59  ;;  %v9647_v62 = vadd.f32 %v9646_v35, %v27384_v29  ;;  %v17153_v29 = vld [vmem:[%s27772_s3 + $0x1318] sm:$0xf0]  ;;  %v10489_v59 = vpop.f32.mrf.mxu1 }
 0x5c8   : > { %10677 = vmatpush.bf16.msrb.mxu3 %v17252_v44  ;;  %v17156_v11 = vor.u32 %v18522_v43, %v17153_v29  ;;  %v10531_v38 = vpop.f32.mrf.mxu0  ;;  %v10490_v10 = vadd.f32 %v10489_v59, %v10475_v9 }
 0x5c9   : > { %v9667_v46 = vrot.slane %v9605_v57, 1 }
 0x5cc   : > { %10678 = vmatpush.bf16.msrb.mxu3 %v17236_v1 }
 0x5ce   : > { %v9606_v12 = vpop.f32.mrf.mxu3  ;;  %v9648_v47 = vpop.f32.mrf.mxu2 }
 0x5cf   : > { %v9607_v2 = vadd.f32 %v9606_v12, %v9593_v34  ;;  %v9649_v39 = vadd.f32 %v9648_v47, %v27414_v28  ;;  %v10491_v28 = vpop.f32.mrf.mxu1 }
 0x5d0   : > { %10679 = vmatpush.bf16.msrb.mxu3 %v17220_v55  ;;  %v10533_v58 = vpop.f32.mrf.mxu0  ;;  %v10492_v25 = vadd.f32 %v10491_v28, %v10477_v21 }
 0x5d1   : > { %v9671_v48 = vrot.slane %v9607_v2, 1 }
 0x5d3   : > { %v9675_v22 = vsel %vm4541_vm4, %v9667_v46, %v9671_v48  ;;  %v9679_v24 = vsel %vm4541_vm4, %v9671_v48, %v9667_v46 }
 0x5d4   : > { %10680 = vmatpush.bf16.msrb.mxu3 %v17204_v23  ;;  %v9687_v53 = vsel %vm465_vm5, %v9679_v24, 0.0  ;;  %v27508_v63 = vadd.f32 %v9675_v22, %v26882_v4 }
 0x5d5   : > { %v27511_v34 = vadd.f32 %v9687_v53, %v26952_v42 }
 0x5d8   : > { %10681 = vmatpush.bf16.msrb.mxu3 %v17188_v36 }
 0x5dc   : > { %10682 = vmatpush.bf16.msrb.mxu3 %v17172_v17  ;;  %v10724_v17 = vperm.slane %v27529_v0, 0 }
 0x5e0   : > { %10683 = vmatpush.bf16.msrb.mxu3 %v17156_v11 }
 0x5e3   : > { %10684 = vmatmul.bf16.vlgmr.msrb.gmra.mxu3 %v23933_v19  ;;  %v10545_v50 = vpop.f32.mrf.mxu1 }
 0x5e4   : > { %v10546_v33 = vadd.f32 %v10545_v50, %v10531_v38 }
 0x5e6   : > { %v9660_v15 = vpop.f32.mrf.mxu3  ;;  %v10503_v3 = vpop.f32.mrf.mxu2 }
 0x5e7   : > { %v9661_v16 = vadd.f32 %v9660_v15, %v9647_v62  ;;  %v10504_v31 = vadd.f32 %v10503_v3, %v10490_v10  ;;  %v10587_v50 = vpop.f32.mrf.mxu0 }
 0x5e9   : > { %v9668_v49 = vrot.slane %v9661_v16, 1 }
 0x5eb   : > { %v10547_v40 = vpop.f32.mrf.mxu1 }
 0x5ec   : > { %v10548_v13 = vadd.f32 %v10547_v40, %v10533_v58 }
 0x5ee   : > { %v9662_v6 = vpop.f32.mrf.mxu3  ;;  %v10505_v55 = vpop.f32.mrf.mxu2 }
 0x5ef   : > { %v9663_v44 = vadd.f32 %v9662_v6, %v9649_v39  ;;  %v10506_v35 = vadd.f32 %v10505_v55, %v10492_v25  ;;  %v10589_v40 = vpop.f32.mrf.mxu0 }
 0x5f1   : > { %v9672_v4 = vrot.slane %v9663_v44, 1 }
 0x5f3   : > { %v9676_v42 = vsel %vm4541_vm4, %v9668_v49, %v9672_v4  ;;  %v9680_v19 = vsel %vm4541_vm4, %v9672_v4, %v9668_v49 }
 0x5f4   : > { %v9688_v1 = vsel %vm465_vm5, %v9680_v19, 0.0  ;;  %v27521_v37 = vadd.f32 %v9676_v42, %v27098_v5 }
 0x5f5   : > { %v27524_v52 = vadd.f32 %v9688_v1, %v27164_v7 }
 0x603   : > { %v10601_v38 = vpop.f32.mrf.mxu1 }
 0x604   : > { %v10602_v58 = vadd.f32 %v10601_v38, %v10587_v50 }
 0x606   : > { %v10517_v27 = vpop.f32.mrf.mxu3  ;;  %v10559_v61 = vpop.f32.mrf.mxu2 }
 0x607   : > { %v10560_v23 = vadd.f32 %v10559_v61, %v10546_v33  ;;  %v10518_v57 = vadd.f32 %v10517_v27, %v10504_v31  ;;  %v10643_v31 = vpop.f32.mrf.mxu0 }
 0x609   : > { %v10690_v7 = vrot.slane %v10518_v57, 2 }
 0x60b   : > { %v10603_v16 = vpop.f32.mrf.mxu1 }
 0x60c   : > { %v10604_v6 = vadd.f32 %v10603_v16, %v10589_v40 }
 0x60e   : > { %v10519_v62 = vpop.f32.mrf.mxu3  ;;  %v10561_v45 = vpop.f32.mrf.mxu2 }
 0x60f   : > { %v10520_v36 = vadd.f32 %v10519_v62, %v10506_v35  ;;  %v10562_v5 = vadd.f32 %v10561_v45, %v10548_v13 }
 0x611   : > { %v10694_v56 = vrot.slane %v10520_v36, 2 }
 0x613   : > { %v10698_v9 = vsel %vm5571_vm6, %v10690_v7, %v10694_v56  ;;  %v10702_v29 = vsel %vm5571_vm6, %v10694_v56, %v10690_v7 }
 0x614   : > { %v10714_v43 = vadd.f32 %v10698_v9, %v27344_v51  ;;  %v10710_v12 = vsel %vm473_vm7, %v10702_v29, 0.0 }
 0x615   : > { %v10718_v47 = vadd.f32 %v10710_v12, %v27349_v41 }
 0x616   : > { %v10732_v59 = vadd.f32 %v10724_v17, %v10714_v43 }
 0x617   : > { %v10736_v2 = vadd.f32 %v10724_v17, %v10718_v47 }
 0x618   : > { %10740 = vxpose.xlu2.b32.start [1/2] (short) %v10732_v59, 128 }
 0x620   : > { %10741 = vxpose.xlu2.b32.end [2/2] (short) %v10736_v2, 128 }
 0x622   : > { %v10657_v25 = vpop.f32.mrf.mxu1 }
 0x623   : > { %v10658_v45 = vadd.f32 %v10657_v25, %v10643_v31  ;;  %v27901_v31 = vld [vmem:[#allocation38_spill] sm:$0xff] }
 0x626   : > { %v10573_v39 = vpop.f32.mrf.mxu3  ;;  %v10615_v33 = vpop.f32.mrf.mxu2 }
 0x627   : > { %v10574_v11 = vadd.f32 %v10573_v39, %v10560_v23  ;;  %v10616_v44 = vadd.f32 %v10615_v33, %v10602_v58 }
 0x629   : > { %v10691_v22 = vrot.slane %v10574_v11, 2 }
 0x62a   : > { %v10659_v36 = vpop.f32.mrf.mxu1 }
 0x62e   : > { %v10575_v46 = vpop.f32.mrf.mxu3  ;;  %v10617_v13 = vpop.f32.mrf.mxu2 }
 0x62f   : > { %v10576_v48 = vadd.f32 %v10575_v46, %v10562_v5  ;;  %v10618_v49 = vadd.f32 %v10617_v13, %v10604_v6  ;;  %v10645_v5 = vpop.f32.mrf.mxu0 }
 0x630   : > { %v10660_v56 = vadd.f32 %v10659_v36, %v10645_v5  ;;  %v27902_v36 = vld [vmem:[#allocation42_spill] sm:$0xff] }
 0x631   : > { %v10695_v24 = vrot.slane %v10576_v48, 2 }
 0x633   : > { %v10703_v51 = vsel %vm5571_vm6, %v10695_v24, %v10691_v22  ;;  %v10699_v53 = vsel %vm5571_vm6, %v10691_v22, %v10695_v24  ;;  %v10725_v24 = vperm.slane %v27529_v0, 1 }
 0x634   : > { %v10711_v21 = vsel %vm473_vm7, %v10703_v51, 0.0  ;;  %v10715_v28 = vadd.f32 %v10699_v53, %v27455_v18  ;;  %v10726_v18 = vperm.slane %v27529_v0, 2 }
 0x635   : > { %v10719_v41 = vadd.f32 %v10711_v21, %v27458_v54 }
 0x636   : > { %v10733_v51 = vadd.f32 %v10725_v24, %v10715_v28 }
 0x637   : > { %v10737_v53 = vadd.f32 %v10725_v24, %v10719_v41  ;;  %v27907_v24 = vld [vmem:[#allocation50_spill] sm:$0xff] }
 0x646   : > { %v10629_v15 = vpop.f32.mrf.mxu3  ;;  %v10671_v35 = vpop.f32.mrf.mxu2 }
 0x647   : > { %v10630_v4 = vadd.f32 %v10629_v15, %v10616_v44  ;;  %v10672_v17 = vadd.f32 %v10671_v35, %v10658_v45 }
 0x649   : > { %v10692_v19 = vrot.slane %v10630_v4, 2 }
 0x64e   : > { %v10631_v3 = vpop.f32.mrf.mxu3  ;;  %v10673_v7 = vpop.f32.mrf.mxu2 }
 0x64f   : > { %v10632_v42 = vadd.f32 %v10631_v3, %v10618_v49 }
 0x651   : > { %v10696_v1 = vrot.slane %v10632_v42, 2 }
 0x653   : > { %v10700_v54 = vsel %vm5571_vm6, %v10692_v19, %v10696_v1  ;;  %v10704_v55 = vsel %vm5571_vm6, %v10696_v1, %v10692_v19 }
 0x654   : > { %v10716_v27 = vadd.f32 %v10700_v54, %v27508_v63  ;;  %v10712_v23 = vsel %vm473_vm7, %v10704_v55, 0.0  ;;  %v10674_v63 = vadd.f32 %v10673_v7, %v10660_v56 }
 0x655   : > { %v10720_v10 = vadd.f32 %v10712_v23, %v27511_v34  ;;  %v10727_v34 = vperm.slane %v27529_v0, 3 }
 0x656   : > { %v10734_v61 = vadd.f32 %v10726_v18, %v10716_v27 }
 0x657   : > { %v10738_v57 = vadd.f32 %v10726_v18, %v10720_v10 }
 0x658   : > { %10804 = vxpose.xlu0.b32.start [1/2] (short) %v10734_v61, 128  ;;  %v27900_v61 = vld [vmem:[#allocation34_spill] sm:$0xff] }
 0x660   : > { %10805 = vxpose.xlu0.b32.end [2/2] (short) %v10738_v57, 128 }
 0x666   : > { %v10685_v62 = vpop.f32.mrf.mxu3 }
 0x667   : > { %v10686_v9 = vadd.f32 %v10685_v62, %v10672_v17  ;;  %v27903_v17 = vld [vmem:[#allocation2_spill] sm:$0xff] }
 0x669   : > { %v10693_v59 = vrot.slane %v10686_v9, 2 }
 0x66e   : > { %v10687_v43 = vpop.f32.mrf.mxu3 }
 0x66f   : > { %v10688_v29 = vadd.f32 %v10687_v43, %v10674_v63  ;;  %v27904_v43 = vld [vmem:[#allocation46_spill] sm:$0xff] }
 0x671   : > { %v10697_v12 = vrot.slane %v10688_v29, 2 }
 0x673   : > { %v10701_v47 = vsel %vm5571_vm6, %v10693_v59, %v10697_v12  ;;  %v10705_v2 = vsel %vm5571_vm6, %v10697_v12, %v10693_v59 }
 0x674   : > { %v10717_v39 = vadd.f32 %v10701_v47, %v27521_v37  ;;  %v10713_v46 = vsel %vm473_vm7, %v10705_v2, 0.0  ;;  %v27905_v47 = vld [vmem:[#allocation3_spill] sm:$0xff] }
 0x675   : > { %v10721_v48 = vadd.f32 %v10713_v46, %v27524_v52  ;;  %v27906_v46 = vld [vmem:[#allocation5_spill] sm:$0xff] }
 0x676   : > { %v10735_v11 = vadd.f32 %v10727_v34, %v10717_v39 }
 0x677   : > { %v10739_v22 = vadd.f32 %v10727_v34, %v10721_v48 }
 0x678   : > { %10836 = vxpose.xlu1.b32.start [1/2] (short) %v10735_v11, 128 }
 0x680   : > { %10837 = vxpose.xlu1.b32.end [2/2] (short) %v10739_v22, 128 }
 0x698   : > { %10772 = vxpose.xlu2.b32.start [1/2] (short) %v10733_v51, 128 }
 0x6a0   : > { %10773 = vxpose.xlu2.b32.end [2/2] (short) %v10737_v53, 128 }
 0x6b1   : > { %v10756_v30 = vpop.trf.xlu2 }
 0x6b2   : > { %v10868_v21 = vmul.f32 0.3, %v10756_v30 }
 0x6b4   : > { %v10932_v37 = vadd.f32 %v18646_v60, %v10868_v21  ;;  %v27908_v60 = vld [vmem:[#allocation6_spill] sm:$0xff] }
 0x6b6   : > { %10997 = vst.msk [vmem:[%s27572_s26] sm:$0xff] %vm10996_vm8, %v10932_v37 }
 0x6b9   : > { %v10757_v52 = vpop.trf.xlu2 }
 0x6ba   : > { %v10869_v0 = vmul.f32 0.3, %v10757_v52 }
 0x6bc   : > { %v10933_v28 = vadd.f32 %v10869_v0, %v18723_v8 }
 0x6be   : > { %10998 = vst.msk [vmem:[%s27572_s26 + $0x8] sm:$0xff] %vm10996_vm8, %v10933_v28  ;;  %v27909_v28 = vld [vmem:[#allocation8_spill] sm:$0xff] }
 0x6c1   : > { %v10758_v41 = vpop.trf.xlu2 }
 0x6c2   : > { %v10870_v38 = vmul.f32 0.3, %v10758_v41 }
 0x6c4   : > { %v10934_v50 = vadd.f32 %v10870_v38, %v18739_v14 }
 0x6c6   : > { %10999 = vst.msk [vmem:[%s27572_s26 + $0x10] sm:$0xff] %vm10996_vm8, %v10934_v50  ;;  %v27910_v50 = vld [vmem:[#allocation54_spill] sm:$0xff] }
 0x6c9   : > { %v10759_v33 = vpop.trf.xlu2 }
 0x6ca   : > { %v10871_v15 = vmul.f32 0.3, %v10759_v33 }
 0x6cc   : > { %v10935_v16 = vadd.f32 %v10871_v15, %v18755_v20  ;;  %v27897_v20 = vld [vmem:[#allocation22_spill] sm:$0xff] }
 0x6ce   : > { %11000 = vst.msk [vmem:[%s27572_s26 + $0x18] sm:$0xff] %vm10996_vm8, %v10935_v16 }
 0x6d1   : > { %v10760_v58 = vpop.trf.xlu2 }
 0x6d2   : > { %v10872_v40 = vmul.f32 0.3, %v10760_v58 }
 0x6d4   : > { %v10936_v8 = vadd.f32 %v10872_v40, %v18771_v26  ;;  %v27898_v26 = vld [vmem:[#allocation26_spill] sm:$0xff]  ;;  %v27911_v40 = vld [vmem:[#allocation9_spill] sm:$0xff] }
 0x6d6   : > { %11001 = vst.msk [vmem:[%s27572_s26 + $0x20] sm:$0xff] %vm10996_vm8, %v10936_v8 }
 0x6d9   : > { %v10761_v13 = vpop.trf.xlu2 }
 0x6da   : > { %v10873_v6 = vmul.f32 0.3, %v10761_v13 }
 0x6dc   : > { %v10937_v14 = vadd.f32 %v10873_v6, %v18787_v32  ;;  %v27899_v32 = vld [vmem:[#allocation30_spill] sm:$0xff] }
 0x6de   : > { %11002 = vst.msk [vmem:[%s27572_s26 + $0x28] sm:$0xff] %vm10996_vm8, %v10937_v14  ;;  %v27912_v14 = vld [vmem:[#allocation11_spill] sm:$0xff] }
 0x6e1   : > { %v10762_v44 = vpop.trf.xlu2 }
 0x6e2   : > { %v10874_v49 = vmul.f32 0.3, %v10762_v44 }
 0x6e4   : > { %v10938_v4 = vadd.f32 %v10874_v49, %v27897_v20  ;;  %v27913_v20 = vld [vmem:[#allocation58_spill] sm:$0xff] }
 0x6e6   : > { %11003 = vst.msk [vmem:[%s27572_s26 + $0x30] sm:$0xff] %vm10996_vm8, %v10938_v4 }
 0x6e9   : > { %v10763_v3 = vpop.trf.xlu2 }
 0x6ea   : > { %v10875_v42 = vmul.f32 0.3, %v10763_v3 }
 0x6ec   : > { %v10939_v19 = vadd.f32 %v10875_v42, %v27898_v26 }
 0x6ee   : > { %11004 = vst.msk [vmem:[%s27572_s26 + $0x38] sm:$0xff] %vm10996_vm8, %v10939_v19  ;;  %v27914_v19 = vld [vmem:[#allocation12_spill] sm:$0xff] }
 0x6f1   : > { %v10764_v1 = vpop.trf.xlu2 }
 0x6f2   : > { %v10876_v18 = vmul.f32 0.3, %v10764_v1 }
 0x6f4   : > { %v10940_v54 = vadd.f32 %v10876_v18, %v27899_v32 }
 0x6f6   : > { %11005 = vst.msk [vmem:[%s27572_s26 + $0x40] sm:$0xff] %vm10996_vm8, %v10940_v54  ;;  %v27915_v54 = vld [vmem:[#allocation14_spill] sm:$0xff] }
 0x6f9   : > { %v10765_v55 = vpop.trf.xlu2 }
 0x6fa   : > { %v10877_v27 = vmul.f32 0.3, %v10765_v55 }
 0x6fc   : > { %v10941_v23 = vadd.f32 %v10877_v27, %v27900_v61  ;;  %v10820_v5 = vpop.trf.xlu0  ;;  %v27916_v61 = vld [vmem:[#allocation4_spill] sm:$0xff] }
 0x6fd   : > { %v10900_v7 = vmul.f32 0.3, %v10820_v5 }
 0x6fe   : > { %11006 = vst.msk [vmem:[%s27572_s26 + $0x48] sm:$0xff] %vm10996_vm8, %v10941_v23 }
 0x6ff   : > { %v10964_v63 = vadd.f32 %v10900_v7, %v27903_v17 }
 0x701   : > { %v10766_v10 = vpop.trf.xlu2  ;;  %11029 = vst.msk [vmem:[%s27572_s26 + $0x100] sm:$0xff] %vm10996_vm8, %v10964_v63 }
 0x702   : > { %v10878_v25 = vmul.f32 0.3, %v10766_v10 }
 0x704   : > { %v10942_v35 = vadd.f32 %v10878_v25, %v27901_v31  ;;  %v10821_v34 = vpop.trf.xlu0 }
 0x705   : > { %v10901_v39 = vmul.f32 0.3, %v10821_v34 }
 0x706   : > { %11007 = vst.msk [vmem:[%s27572_s26 + $0x50] sm:$0xff] %vm10996_vm8, %v10942_v35  ;;  %v27917_v35 = vld [vmem:[#allocation15_spill] sm:$0xff] }
 0x707   : > { %v10965_v48 = vadd.f32 %v10901_v39, %v27906_v46 }
 0x709   : > { %v10767_v57 = vpop.trf.xlu2  ;;  %11030 = vst.msk [vmem:[%s27572_s26 + $0x108] sm:$0xff] %vm10996_vm8, %v10965_v48 }
 0x70a   : > { %v10879_v62 = vmul.f32 0.3, %v10767_v57 }
 0x70c   : > { %v10943_v45 = vadd.f32 %v10879_v62, %v27902_v36  ;;  %v10822_v21 = vpop.trf.xlu0 }
 0x70d   : > { %v10902_v52 = vmul.f32 0.3, %v10822_v21 }
 0x70e   : > { %11008 = vst.msk [vmem:[%s27572_s26 + $0x58] sm:$0xff] %vm10996_vm8, %v10943_v45  ;;  %v27918_v45 = vld [vmem:[#allocation17_spill] sm:$0xff] }
 0x70f   : > { %v10966_v41 = vadd.f32 %v10902_v52, %v27909_v28 }
 0x711   : > { %v10768_v56 = vpop.trf.xlu2  ;;  %11031 = vst.msk [vmem:[%s27572_s26 + $0x110] sm:$0xff] %vm10996_vm8, %v10966_v41 }
 0x712   : > { %v10880_v9 = vmul.f32 0.3, %v10768_v56  ;;  %v27919_v56 = vld [vmem:[#allocation7_spill] sm:$0xff] }
 0x714   : > { %v10944_v29 = vadd.f32 %v10880_v9, %v27904_v43  ;;  %v10823_v58 = vpop.trf.xlu0 }
 0x715   : > { %v10903_v13 = vmul.f32 0.3, %v10823_v58 }
 0x716   : > { %11009 = vst.msk [vmem:[%s27572_s26 + $0x60] sm:$0xff] %vm10996_vm8, %v10944_v29  ;;  %v27920_v29 = vld [vmem:[#allocation18_spill] sm:$0xff] }
 0x717   : > { %v10967_v44 = vadd.f32 %v10903_v13, %v27912_v14 }
 0x719   : > { %v10769_v11 = vpop.trf.xlu2  ;;  %11032 = vst.msk [vmem:[%s27572_s26 + $0x118] sm:$0xff] %vm10996_vm8, %v10967_v44 }
 0x71a   : > { %v10881_v22 = vmul.f32 0.3, %v10769_v11  ;;  %v27922_v11 = vld [vmem:[#allocation10_spill] sm:$0xff] }
 0x71c   : > { %v10852_v59 = vpop.trf.xlu1  ;;  %v10945_v51 = vadd.f32 %v10881_v22, %v27907_v24  ;;  %v10824_v26 = vpop.trf.xlu0 }
 0x71d   : > { %v10916_v12 = vmul.f32 0.3, %v10852_v59  ;;  %v10904_v18 = vmul.f32 0.3, %v10824_v26 }
 0x71e   : > { %11010 = vst.msk [vmem:[%s27572_s26 + $0x68] sm:$0xff] %vm10996_vm8, %v10945_v51  ;;  %v27923_v51 = vld [vmem:[#allocation21_spill] sm:$0xff] }
 0x71f   : > { %v10980_v2 = vadd.f32 %v10916_v12, %v27905_v47  ;;  %v10968_v55 = vadd.f32 %v10904_v18, %v27915_v54  ;;  %v27921_v47 = vld [vmem:[#allocation20_spill] sm:$0xff] }
 0x721   : > { %11045 = vst.msk [vmem:[%s27572_s26 + $0x180] sm:$0xff] %vm10996_vm8, %v10980_v2  ;;  %v10770_v0 = vpop.trf.xlu2 }
 0x722   : > { %v10882_v38 = vmul.f32 0.3, %v10770_v0  ;;  %11033 = vst.msk [vmem:[%s27572_s26 + $0x120] sm:$0xff] %vm10996_vm8, %v10968_v55  ;;  %v27925_v0 = vld [vmem:[#allocation13_spill] sm:$0xff] }
 0x724   : > { %v10853_v53 = vpop.trf.xlu1  ;;  %v10946_v33 = vadd.f32 %v10882_v38, %v27910_v50  ;;  %v10825_v31 = vpop.trf.xlu0 }
 0x725   : > { %v10917_v30 = vmul.f32 0.3, %v10853_v53  ;;  %v10905_v62 = vmul.f32 0.3, %v10825_v31 }
 0x726   : > { %11011 = vst.msk [vmem:[%s27572_s26 + $0x70] sm:$0xff] %vm10996_vm8, %v10946_v33  ;;  %v27926_v33 = vld [vmem:[#allocation25_spill] sm:$0xff] }
 0x727   : > { %v10981_v37 = vadd.f32 %v10917_v30, %v27908_v60  ;;  %v10969_v5 = vadd.f32 %v10905_v62, %v27918_v45  ;;  %v27924_v60 = vld [vmem:[#allocation24_spill] sm:$0xff] }
 0x729   : > { %11046 = vst.msk [vmem:[%s27572_s26 + $0x188] sm:$0xff] %vm10996_vm8, %v10981_v37  ;;  %v10771_v6 = vpop.trf.xlu2 }
 0x72a   : > { %v10883_v49 = vmul.f32 0.3, %v10771_v6  ;;  %11034 = vst.msk [vmem:[%s27572_s26 + $0x128] sm:$0xff] %vm10996_vm8, %v10969_v5  ;;  %v27928_v6 = vld [vmem:[#allocation16_spill] sm:$0xff] }
 0x72c   : > { %v10854_v15 = vpop.trf.xlu1  ;;  %v10947_v4 = vadd.f32 %v10883_v49, %v27913_v20  ;;  %v10826_v43 = vpop.trf.xlu0 }
 0x72d   : > { %v10918_v16 = vmul.f32 0.3, %v10854_v15  ;;  %v10906_v12 = vmul.f32 0.3, %v10826_v43 }
 0x72e   : > { %11012 = vst.msk [vmem:[%s27572_s26 + $0x78] sm:$0xff] %vm10996_vm8, %v10947_v4  ;;  %v27929_v4 = vld [vmem:[#allocation29_spill] sm:$0xff] }
 0x72f   : > { %v10982_v8 = vadd.f32 %v10918_v16, %v27911_v40  ;;  %v10970_v2 = vadd.f32 %v10906_v12, %v27921_v47  ;;  %v27927_v40 = vld [vmem:[#allocation28_spill] sm:$0xff] }
 0x731   : > { %11047 = vst.msk [vmem:[%s27572_s26 + $0x190] sm:$0xff] %vm10996_vm8, %v10982_v8  ;;  %v10788_v32 = vpop.trf.xlu2 }
 0x732   : > { %v10884_v27 = vmul.f32 0.3, %v10788_v32  ;;  %11035 = vst.msk [vmem:[%s27572_s26 + $0x130] sm:$0xff] %vm10996_vm8, %v10970_v2  ;;  %v27931_v32 = vld [vmem:[#allocation19_spill] sm:$0xff] }
 0x734   : > { %v10855_v3 = vpop.trf.xlu1  ;;  %v10948_v23 = vadd.f32 %v10884_v27, %v27916_v61  ;;  %v10827_v24 = vpop.trf.xlu0 }
 0x735   : > { %v10919_v42 = vmul.f32 0.3, %v10855_v3  ;;  %v10907_v30 = vmul.f32 0.3, %v10827_v24 }
 0x736   : > { %11013 = vst.msk [vmem:[%s27572_s26 + $0x80] sm:$0xff] %vm10996_vm8, %v10948_v23  ;;  %v27932_v23 = vld [vmem:[#allocation33_spill] sm:$0xff] }
 0x737   : > { %v10983_v1 = vadd.f32 %v10919_v42, %v27914_v19  ;;  %v10971_v37 = vadd.f32 %v10907_v30, %v27924_v60  ;;  %v27930_v19 = vld [vmem:[#allocation32_spill] sm:$0xff] }
 0x739   : > { %11048 = vst.msk [vmem:[%s27572_s26 + $0x198] sm:$0xff] %vm10996_vm8, %v10983_v1  ;;  %v10789_v36 = vpop.trf.xlu2 }
 0x73a   : > { %v10885_v7 = vmul.f32 0.3, %v10789_v36  ;;  %11036 = vst.msk [vmem:[%s27572_s26 + $0x138] sm:$0xff] %vm10996_vm8, %v10971_v37  ;;  %v27934_v36 = vld [vmem:[#allocation23_spill] sm:$0xff] }
 0x73c   : > { %v10856_v10 = vpop.trf.xlu1  ;;  %v10949_v17 = vadd.f32 %v10885_v7, %v27919_v56  ;;  %v10828_v50 = vpop.trf.xlu0 }
 0x73d   : > { %v10920_v25 = vmul.f32 0.3, %v10856_v10  ;;  %v10908_v16 = vmul.f32 0.3, %v10828_v50 }
 0x73e   : > { %11014 = vst.msk [vmem:[%s27572_s26 + $0x88] sm:$0xff] %vm10996_vm8, %v10949_v17  ;;  %v27935_v17 = vld [vmem:[#allocation37_spill] sm:$0xff] }
 0x73f   : > { %v10984_v57 = vadd.f32 %v10920_v25, %v27917_v35  ;;  %v10972_v8 = vadd.f32 %v10908_v16, %v27927_v40  ;;  %v27933_v35 = vld [vmem:[#allocation36_spill] sm:$0xff] }
 0x741   : > { %11049 = vst.msk [vmem:[%s27572_s26 + $0x1a0] sm:$0xff] %vm10996_vm8, %v10984_v57  ;;  %v10790_v34 = vpop.trf.xlu2 }
 0x742   : > { %v10886_v39 = vmul.f32 0.3, %v10790_v34  ;;  %11037 = vst.msk [vmem:[%s27572_s26 + $0x140] sm:$0xff] %vm10996_vm8, %v10972_v8  ;;  %v27937_v34 = vld [vmem:[#allocation27_spill] sm:$0xff] }
 0x744   : > { %v10857_v63 = vpop.trf.xlu1  ;;  %v10950_v46 = vadd.f32 %v10886_v39, %v27922_v11  ;;  %v10829_v20 = vpop.trf.xlu0 }
 0x745   : > { %v10921_v9 = vmul.f32 0.3, %v10857_v63  ;;  %v10909_v42 = vmul.f32 0.3, %v10829_v20 }
 0x746   : > { %11015 = vst.msk [vmem:[%s27572_s26 + $0x90] sm:$0xff] %vm10996_vm8, %v10950_v46  ;;  %v27938_v46 = vld [vmem:[#allocation41_spill] sm:$0xff] }
 0x747   : > { %v10985_v59 = vadd.f32 %v10921_v9, %v27920_v29  ;;  %v10973_v1 = vadd.f32 %v10909_v42, %v27930_v19  ;;  %v27936_v29 = vld [vmem:[#allocation40_spill] sm:$0xff] }
 0x749   : > { %11050 = vst.msk [vmem:[%s27572_s26 + $0x1a8] sm:$0xff] %vm10996_vm8, %v10985_v59  ;;  %v10791_v21 = vpop.trf.xlu2 }
 0x74a   : > { %v10887_v52 = vmul.f32 0.3, %v10791_v21  ;;  %11038 = vst.msk [vmem:[%s27572_s26 + $0x148] sm:$0xff] %vm10996_vm8, %v10973_v1  ;;  %v27940_v21 = vld [vmem:[#allocation31_spill] sm:$0xff] }
 0x74c   : > { %v10858_v48 = vpop.trf.xlu1  ;;  %v10951_v28 = vadd.f32 %v10887_v52, %v27925_v0  ;;  %v10830_v61 = vpop.trf.xlu0 }
 0x74d   : > { %v10922_v22 = vmul.f32 0.3, %v10858_v48  ;;  %v10910_v25 = vmul.f32 0.3, %v10830_v61 }
 0x74e   : > { %11016 = vst.msk [vmem:[%s27572_s26 + $0x98] sm:$0xff] %vm10996_vm8, %v10951_v28  ;;  %v27941_v28 = vld [vmem:[#allocation45_spill] sm:$0xff] }
 0x74f   : > { %v10986_v53 = vadd.f32 %v10922_v22, %v27923_v51  ;;  %v10974_v57 = vadd.f32 %v10910_v25, %v27933_v35  ;;  %v27939_v51 = vld [vmem:[#allocation44_spill] sm:$0xff] }
 0x751   : > { %11051 = vst.msk [vmem:[%s27572_s26 + $0x1b0] sm:$0xff] %vm10996_vm8, %v10986_v53  ;;  %v10792_v58 = vpop.trf.xlu2 }
 0x752   : > { %v10888_v13 = vmul.f32 0.3, %v10792_v58  ;;  %11039 = vst.msk [vmem:[%s27572_s26 + $0x150] sm:$0xff] %vm10996_vm8, %v10974_v57  ;;  %v27943_v58 = vld [vmem:[#allocation35_spill] sm:$0xff] }
 0x754   : > { %v10859_v41 = vpop.trf.xlu1  ;;  %v10952_v14 = vadd.f32 %v10888_v13, %v27928_v6  ;;  %v10831_v56 = vpop.trf.xlu0 }
 0x755   : > { %v10923_v38 = vmul.f32 0.3, %v10859_v41  ;;  %v10911_v9 = vmul.f32 0.3, %v10831_v56  ;;  %v27951_v56 = vld [vmem:[#allocation47_spill] sm:$0xff] }
 0x756   : > { %11017 = vst.msk [vmem:[%s27572_s26 + $0xa0] sm:$0xff] %vm10996_vm8, %v10952_v14  ;;  %v27944_v14 = vld [vmem:[#allocation49_spill] sm:$0xff] }
 0x757   : > { %v10987_v15 = vadd.f32 %v10923_v38, %v27926_v33  ;;  %v10975_v59 = vadd.f32 %v10911_v9, %v27936_v29  ;;  %v27942_v33 = vld [vmem:[#allocation48_spill] sm:$0xff] }
 0x759   : > { %11052 = vst.msk [vmem:[%s27572_s26 + $0x1b8] sm:$0xff] %vm10996_vm8, %v10987_v15  ;;  %v10793_v26 = vpop.trf.xlu2 }
 0x75a   : > { %v10889_v18 = vmul.f32 0.3, %v10793_v26  ;;  %11040 = vst.msk [vmem:[%s27572_s26 + $0x158] sm:$0xff] %vm10996_vm8, %v10975_v59  ;;  %v27946_v26 = vld [vmem:[#allocation39_spill] sm:$0xff] }
 0x75c   : > { %v10860_v44 = vpop.trf.xlu1  ;;  %v10953_v54 = vadd.f32 %v10889_v18, %v27931_v32  ;;  %v10832_v11 = vpop.trf.xlu0 }
 0x75d   : > { %v10924_v49 = vmul.f32 0.3, %v10860_v44  ;;  %v10912_v22 = vmul.f32 0.3, %v10832_v11  ;;  %v27954_v11 = vld [vmem:[#allocation59_spill] sm:$0xff] }
 0x75e   : > { %11018 = vst.msk [vmem:[%s27572_s26 + $0xa8] sm:$0xff] %vm10996_vm8, %v10953_v54  ;;  %v27947_v54 = vld [vmem:[#allocation53_spill] sm:$0xff] }
 0x75f   : > { %v10988_v3 = vadd.f32 %v10924_v49, %v27929_v4  ;;  %v10976_v53 = vadd.f32 %v10912_v22, %v27939_v51  ;;  %v27945_v4 = vld [vmem:[#allocation52_spill] sm:$0xff] }
 0x761   : > { %11053 = vst.msk [vmem:[%s27572_s26 + $0x1c0] sm:$0xff] %vm10996_vm8, %v10988_v3  ;;  %v10794_v31 = vpop.trf.xlu2 }
 0x762   : > { %v10890_v62 = vmul.f32 0.3, %v10794_v31  ;;  %11041 = vst.msk [vmem:[%s27572_s26 + $0x160] sm:$0xff] %vm10996_vm8, %v10976_v53  ;;  %v27949_v31 = vld [vmem:[#allocation43_spill] sm:$0xff] }
 0x764   : > { %v10861_v55 = vpop.trf.xlu1  ;;  %v10954_v45 = vadd.f32 %v10890_v62, %v27934_v36  ;;  %v10833_v0 = vpop.trf.xlu0  ;;  %v27950_v36 = vld [vmem:[#allocation57_spill] sm:$0xff] }
 0x765   : > { %v10925_v27 = vmul.f32 0.3, %v10861_v55  ;;  %v10913_v38 = vmul.f32 0.3, %v10833_v0 }
 0x766   : > { %11019 = vst.msk [vmem:[%s27572_s26 + $0xb0] sm:$0xff] %vm10996_vm8, %v10954_v45 }
 0x767   : > { %v10989_v10 = vadd.f32 %v10925_v27, %v27932_v23  ;;  %v10977_v15 = vadd.f32 %v10913_v38, %v27942_v33  ;;  %v27948_v23 = vld [vmem:[#allocation56_spill] sm:$0xff] }
 0x769   : > { %11054 = vst.msk [vmem:[%s27572_s26 + $0x1c8] sm:$0xff] %vm10996_vm8, %v10989_v10  ;;  %v10795_v43 = vpop.trf.xlu2 }
 0x76a   : > { %v10891_v12 = vmul.f32 0.3, %v10795_v43  ;;  %11042 = vst.msk [vmem:[%s27572_s26 + $0x168] sm:$0xff] %vm10996_vm8, %v10977_v15  ;;  %v27952_v43 = vld [vmem:[#allocation51_spill] sm:$0xff] }
 0x76c   : > { %v10862_v5 = vpop.trf.xlu1  ;;  %v10955_v47 = vadd.f32 %v10891_v12, %v27937_v34  ;;  %v10834_v6 = vpop.trf.xlu0  ;;  %v27953_v34 = vld [vmem:[#allocation55_spill] sm:$0xff] }
 0x76d   : > { %v10926_v7 = vmul.f32 0.3, %v10862_v5  ;;  %v10914_v49 = vmul.f32 0.3, %v10834_v6 }
 0x76e   : > { %11020 = vst.msk [vmem:[%s27572_s26 + $0xb8] sm:$0xff] %vm10996_vm8, %v10955_v47 }
 0x76f   : > { %v10990_v63 = vadd.f32 %v10926_v7, %v27935_v17  ;;  %v10978_v3 = vadd.f32 %v10914_v49, %v27945_v4 }
 0x771   : > { %11055 = vst.msk [vmem:[%s27572_s26 + $0x1d0] sm:$0xff] %vm10996_vm8, %v10990_v63  ;;  %v10796_v24 = vpop.trf.xlu2 }
 0x772   : > { %v10892_v30 = vmul.f32 0.3, %v10796_v24  ;;  %11043 = vst.msk [vmem:[%s27572_s26 + $0x170] sm:$0xff] %vm10996_vm8, %v10978_v3 }
 0x774   : > { %v10863_v2 = vpop.trf.xlu1  ;;  %v10956_v60 = vadd.f32 %v10892_v30, %v27940_v21  ;;  %v10835_v32 = vpop.trf.xlu0 }
 0x775   : > { %v10927_v39 = vmul.f32 0.3, %v10863_v2  ;;  %v10915_v27 = vmul.f32 0.3, %v10835_v32 }
 0x776   : > { %11021 = vst.msk [vmem:[%s27572_s26 + $0xc0] sm:$0xff] %vm10996_vm8, %v10956_v60 }
 0x777   : > { %v10991_v48 = vadd.f32 %v10927_v39, %v27938_v46  ;;  %v10979_v10 = vadd.f32 %v10915_v27, %v27948_v23 }
 0x779   : > { %11056 = vst.msk [vmem:[%s27572_s26 + $0x1d8] sm:$0xff] %vm10996_vm8, %v10991_v48  ;;  %v10797_v50 = vpop.trf.xlu2 }
 0x77a   : > { %v10893_v16 = vmul.f32 0.3, %v10797_v50  ;;  %11044 = vst.msk [vmem:[%s27572_s26 + $0x178] sm:$0xff] %vm10996_vm8, %v10979_v10 }
 0x77c   : > { %v10864_v37 = vpop.trf.xlu1  ;;  %v10957_v40 = vadd.f32 %v10893_v16, %v27943_v58 }
 0x77d   : > { %v10928_v52 = vmul.f32 0.3, %v10864_v37 }
 0x77e   : > { %11022 = vst.msk [vmem:[%s27572_s26 + $0xc8] sm:$0xff] %vm10996_vm8, %v10957_v40 }
 0x77f   : > { %v10992_v41 = vadd.f32 %v10928_v52, %v27941_v28 }
 0x781   : > { %11057 = vst.msk [vmem:[%s27572_s26 + $0x1e0] sm:$0xff] %vm10996_vm8, %v10992_v41  ;;  %v10798_v20 = vpop.trf.xlu2 }
 0x782   : > { %v10894_v42 = vmul.f32 0.3, %v10798_v20 }
 0x784   : > { %v10865_v8 = vpop.trf.xlu1  ;;  %v10958_v19 = vadd.f32 %v10894_v42, %v27946_v26 }
 0x785   : > { %v10929_v13 = vmul.f32 0.3, %v10865_v8 }
 0x786   : > { %11023 = vst.msk [vmem:[%s27572_s26 + $0xd0] sm:$0xff] %vm10996_vm8, %v10958_v19 }
 0x787   : > { %v10993_v44 = vadd.f32 %v10929_v13, %v27944_v14 }
 0x789   : > { %11058 = vst.msk [vmem:[%s27572_s26 + $0x1e8] sm:$0xff] %vm10996_vm8, %v10993_v44  ;;  %v10799_v61 = vpop.trf.xlu2 }
 0x78a   : > { %v10895_v25 = vmul.f32 0.3, %v10799_v61 }
 0x78c   : > { %v10866_v1 = vpop.trf.xlu1  ;;  %v10959_v35 = vadd.f32 %v10895_v25, %v27949_v31 }
 0x78d   : > { %v10930_v18 = vmul.f32 0.3, %v10866_v1 }
 0x78e   : > { %11024 = vst.msk [vmem:[%s27572_s26 + $0xd8] sm:$0xff] %vm10996_vm8, %v10959_v35 }
 0x78f   : > { %v10994_v55 = vadd.f32 %v10930_v18, %v27947_v54 }
 0x791   : > { %11059 = vst.msk [vmem:[%s27572_s26 + $0x1f0] sm:$0xff] %vm10996_vm8, %v10994_v55  ;;  %v10800_v5 = vpop.trf.xlu2 }
 0x792   : > { %v10896_v7 = vmul.f32 0.3, %v10800_v5 }
 0x794   : > { %v10867_v57 = vpop.trf.xlu1  ;;  %v10960_v17 = vadd.f32 %v10896_v7, %v27951_v56 }
 0x795   : > { %v10931_v62 = vmul.f32 0.3, %v10867_v57 }
 0x796   : > { %11025 = vst.msk [vmem:[%s27572_s26 + $0xe0] sm:$0xff] %vm10996_vm8, %v10960_v17 }
 0x797   : > { %v10995_v45 = vadd.f32 %v10931_v62, %v27950_v36 }
 0x799   : > { %11060 = vst.msk [vmem:[%s27572_s26 + $0x1f8] sm:$0xff] %vm10996_vm8, %v10995_v45  ;;  %v10801_v63 = vpop.trf.xlu2 }
 0x79a   : > { %v10897_v9 = vmul.f32 0.3, %v10801_v63 }
 0x79c   : > { %v10961_v29 = vadd.f32 %v10897_v9, %v27952_v43 }
 0x79e   : > { %11026 = vst.msk [vmem:[%s27572_s26 + $0xe8] sm:$0xff] %vm10996_vm8, %v10961_v29 }
 0x7a1   : > { %v10802_v59 = vpop.trf.xlu2 }
 0x7a2   : > { %v10898_v12 = vmul.f32 0.3, %v10802_v59 }
 0x7a4   : > { %v10962_v47 = vadd.f32 %v10898_v12, %v27953_v34 }
 0x7a6   : > { %11027 = vst.msk [vmem:[%s27572_s26 + $0xf0] sm:$0xff] %vm10996_vm8, %v10962_v47 }
 0x7a9   : > { %v10803_v2 = vpop.trf.xlu2 }
 0x7aa   : > { %v10899_v39 = vmul.f32 0.3, %v10803_v2 }
 0x7ac   : > { %v10963_v46 = vadd.f32 %v10899_v39, %v27954_v11 }
 0x7ae   : > { %11028 = vst.msk [vmem:[%s27572_s26 + $0xf8] sm:$0xff] %vm10996_vm8, %v10963_v46 }
 0x7af PF: > { %s15_s18 = sadd.s32 1, %s18653_s18  }
 0x7b0   : > { %p12_p4 = scmp.ge.s32.totalorder %s15_s18, 4  }
 0x7b2   :  { %14 = sbr.rel (!%p12_p4) target bundleno = 1 (0x1), region = 78 }

</bundles_post_ra>
